<compile_context>
chip_gen: v5e
topology: v5e:2x2
jax: 0.10.0
libtpu: 0.0.40
codegen_flags: <defaults>
</compile_context>

<pallas_src>
import functools

import jax
import jax.numpy as jnp
from jax.experimental import pallas as pl
from jax.experimental.pallas import tpu as pltpu

EPS = 1e-5  # nn.BatchNorm2d default eps

# scaled-down configuration (original: ASPP in=2048, out=256, full-res input)
BACKBONE_CHANNELS = (3, 16, 32, 64, 96, 128)  # true stand-in layer0..layer4 channels
BACKBONE_STRIDES = (2, 2, 2, 1, 1)            # /8 overall (dilated-backbone style)
C_PAD = 128                                    # lane-dense padded channel width
ASPP_IN = BACKBONE_CHANNELS[-1]                # 128 (== C_PAD, no extra padding)
ASPP_OUT = 64                                  # scaled down from 256
ASPP_DILATIONS = (12, 24, 36)


def _vmem_specs(n):
    return [pl.BlockSpec(memory_space=pltpu.MemorySpace.VMEM) for _ in range(n)]


# ----------------------------------------------------------------------------
# 3x3 im2col with the stride folded into the gather (XLA side, stride-2 layers only).
# ----------------------------------------------------------------------------
def _im2col(x_nhwc, stride):
    N, H, W, C = x_nhwc.shape
    Ho = (H - 1) // stride + 1   # PyTorch conv output size with pad=1, k=3
    Wo = (W - 1) // stride + 1
    xpad = jnp.pad(x_nhwc, ((0, 0), (1, 1), (1, 1), (0, 0)))
    cols = [xpad[:, ky:ky + stride * (Ho - 1) + 1:stride,
                 kx:kx + stride * (Wo - 1) + 1:stride, :]
            for ky in range(3) for kx in range(3)]
    a = jnp.concatenate(cols, axis=-1).reshape(N * Ho * Wo, 9 * C)
    return a, (N, Ho, Wo)


# ----------------------------------------------------------------------------
# GEMM + ReLU kernel for the large-map backbone layers (layer0, layer1).
# ----------------------------------------------------------------------------
def _gemm_relu_kernel(a_ref, w_ref, out_ref):
    out_ref[...] = jnp.maximum(
        jnp.dot(a_ref[...], w_ref[...], preferred_element_type=jnp.float32), 0.0)


def _gemm_relu(a, w):
    M, K = a.shape
    Cout = w.shape[-1]
    # 2 blocks when M splits cleanly (both v7x TensorCores), else 1 block (1-TC chips /
    # ragged M).  No whole-matrix fallback that could blow VMEM at larger sizes.
    nb = 2 if (M % 2 == 0 and (M // 2) % 8 == 0) else 1
    bm = M // nb
    return pl.pallas_call(
        _gemm_relu_kernel,
        out_shape=jax.ShapeDtypeStruct((M, Cout), jnp.float32),
        grid=(nb,),
        in_specs=[pl.BlockSpec((bm, K), lambda i: (i, 0)),
                  pl.BlockSpec((K, Cout), lambda i: (0, 0))],
        out_specs=pl.BlockSpec((bm, Cout), lambda i: (i, 0)),
        compiler_params=pltpu.CompilerParams(dimension_semantics=("parallel",)),
    )(a, w)


# ----------------------------------------------------------------------------
# Fused tail kernel: layer2 (GEMM+ReLU), layer3/layer4 (in-kernel 3x3 taps on padded
# VMEM scratch) and the full ASPP head, all in one VMEM-resident pallas_call.
# TODO(synk): at production ASPP sizes this must be blocked over M (two-pass BN); at
# 8x8 the whole problem fits in VMEM and a single invocation is fastest.
# ----------------------------------------------------------------------------
def _fused_tail_kernel(a2_ref, w2_ref, w3_ref, w4_ref, wcat_ref, wp_ref,
                       wpt_ref, wpp_ref, fea_ref, pad3_ref, pad4_ref, *, n, hw):
    H, W = hw
    M = n * H * W
    C = w2_ref.shape[-1]            # 128 (lane-dense channel width)
    Cout = fea_ref.shape[-1]        # ASPP output channels

    def bn_relu(y):
        # training-mode BatchNorm2d (weight=1, bias=0): one-pass batch statistics.
        m = y.shape[0]
        s = jnp.sum(y, axis=0, keepdims=True)
        ss = jnp.sum(y * y, axis=0, keepdims=True)
        mean = s / m
        # TODO(synk): E[x^2]-mean^2 is slightly less stable than the two-pass form.
        var = jnp.maximum(ss / m - mean * mean, 0.0)
        return jnp.maximum((y - mean) * jax.lax.rsqrt(var + EPS), 0.0)

    def conv3x3_relu_from(pad_ref, w_ref):
        # stride-1 3x3 conv, pad=1: 9 shifted-slice matmuls on the padded VMEM scratch.
        acc = None
        for t in range(9):
            ky, kx = t // 3, t % 3
            patch = pad_ref[:, ky:ky + H, kx:kx + W, :].reshape(M, C)
            d = jnp.dot(patch, w_ref[t], preferred_element_type=jnp.float32)
            acc = d if acc is None else acc + d
        return jnp.maximum(acc, 0.0)

    # ---- backbone layer2 (im2col matrix prepared in the wrapper, stride folded) ----
    y2 = jnp.maximum(jnp.dot(a2_ref[...], w2_ref[...],
                             preferred_element_type=jnp.float32), 0.0)     # (M, C)

    # ---- backbone layer3 / layer4: in-kernel im2col on zero-padded scratch ----
    pad3_ref[...] = jnp.zeros_like(pad3_ref)
    pad3_ref[:, 1:1 + H, 1:1 + W, :] = y2.astype(jnp.bfloat16).reshape(n, H, W, C)
    y3 = conv3x3_relu_from(pad3_ref, w3_ref)                               # (M, C)

    pad4_ref[...] = jnp.zeros_like(pad4_ref)
    pad4_ref[:, 1:1 + H, 1:1 + W, :] = y3.astype(jnp.bfloat16).reshape(n, H, W, C)
    x4 = conv3x3_relu_from(pad4_ref, w4_ref)                               # (M, C)

    # ---- ASPP ----
    # Branches 0..3: after static tap pruning (H,W <= min dilation) all four are 1x1
    # convs on x4 -> one lane-dense (M, 4*Cout) matmul + one BN/ReLU pass, projected
    # by a single stacked (4*Cout, Cout) matmul.
    x4b = x4.astype(jnp.bfloat16)
    ybr = bn_relu(jnp.dot(x4b, wcat_ref[...], preferred_element_type=jnp.float32))
    proj = jnp.dot(ybr.astype(jnp.bfloat16), wpt_ref[...],
                   preferred_element_type=jnp.float32)                     # (M, Cout)

    # Global-average-pool branch: pool -> 1x1 conv -> BN -> ReLU, projected at
    # (N, Cout) BEFORE broadcasting (bilinear upsample of a 1x1 map == broadcast).
    pooled = jnp.mean(x4.reshape(n, H * W, C), axis=1)                     # (N, C)
    p = bn_relu(jnp.dot(pooled.astype(jnp.bfloat16), wp_ref[...],
                        preferred_element_type=jnp.float32))               # (N, Cout)
    p_proj = jnp.dot(p.astype(jnp.bfloat16), wpp_ref[...],
                     preferred_element_type=jnp.float32)                   # (N, Cout)
    proj = (proj.reshape(n, H * W, Cout) + p_proj[:, None, :]).reshape(M, Cout)

    # TODO(synk): nn.Dropout(0.1) in training mode is stochastic; applied as identity.
    fea_ref[...] = bn_relu(proj)


def _fused_tail(a2, params, N, H, W):
    if not (H <= min(ASPP_DILATIONS) and W <= min(ASPP_DILATIONS)):
        # TODO(synk): general (unpruned) dilated-tap path + M-blocked ASPP for larger
        # feature maps; at 8x8 every off-center dilated tap falls fully in the padding.
        raise NotImplementedError("ASPP tap pruning assumes H,W <= min(dilations)")
    M = N * H * W
    kernel = functools.partial(_fused_tail_kernel, n=N, hw=(H, W))
    return pl.pallas_call(
        kernel,
        out_shape=jax.ShapeDtypeStruct((M, ASPP_OUT), jnp.float32),
        in_specs=_vmem_specs(8),
        out_specs=pl.BlockSpec(memory_space=pltpu.MemorySpace.VMEM),
        scratch_shapes=[pltpu.VMEM((N, H + 2, W + 2, C_PAD), jnp.bfloat16),
                        pltpu.VMEM((N, H + 2, W + 2, C_PAD), jnp.bfloat16)],
    )(a2, params["w_l2"], params["w_l3"], params["w_l4"],
      params["wcat"], params["wp"], params["wproj_top"], params["wproj_pool"])


# ----------------------------------------------------------------------------
# Deterministic parameter init (kaiming_normal_, fan_in, relu gain), staged into the
# lane-dense / fused forms the kernels consume.  Padded rows/cols are zero, so the
# true-channel numerics equal the unpadded model.
# ----------------------------------------------------------------------------
def _kaiming(key, shape_hwio):
    kh, kw, cin, cout = shape_hwio
    std = (2.0 / (cin * kh * kw)) ** 0.5
    return std * jax.random.normal(key, shape_hwio, jnp.float32)


def init_params(key):
    n_bb = len(BACKBONE_STRIDES)
    keys = jax.random.split(key, n_bb + 6)
    params = {}
    for i in range(n_bb):
        cin_t, cout_t = BACKBONE_CHANNELS[i], BACKBONE_CHANNELS[i + 1]
        cin_p = 3 if i == 0 else C_PAD
        w_true = _kaiming(keys[i], (3, 3, cin_t, cout_t))
        w = jnp.zeros((3, 3, cin_p, C_PAD), jnp.float32)
        w = w.at[:, :, :cin_t, :cout_t].set(w_true)
        if i in (3, 4):  # consumed as per-tap (9, Cin, Cout) inside the fused kernel
            params[f"w_l{i}"] = w.reshape(9, cin_p, C_PAD).astype(jnp.bfloat16)
        else:            # consumed as an im2col GEMM weight (9*Cin, Cout)
            params[f"w_l{i}"] = w.reshape(9 * cin_p, C_PAD).astype(jnp.bfloat16)
    k = n_bb
    w0 = _kaiming(keys[k + 0], (1, 1, ASPP_IN, ASPP_OUT)).reshape(ASPP_IN, ASPP_OUT)
    w1 = _kaiming(keys[k + 1], (3, 3, ASPP_IN, ASPP_OUT))
    w2 = _kaiming(keys[k + 2], (3, 3, ASPP_IN, ASPP_OUT))
    w3 = _kaiming(keys[k + 3], (3, 3, ASPP_IN, ASPP_OUT))
    wp = _kaiming(keys[k + 4], (1, 1, ASPP_IN, ASPP_OUT)).reshape(ASPP_IN, ASPP_OUT)
    proj_std = (2.0 / (5 * ASPP_OUT)) ** 0.5  # torch weight (Cout, 5*Cout, 1, 1)
    wproj = proj_std * jax.random.normal(keys[k + 5], (5 * ASPP_OUT, ASPP_OUT),
                                         jnp.float32)
    # Branches 0..3 reduce to their centre taps at 8x8 -> one (Cin, 4*Cout) matrix;
    # fold their projection slices into one (4*Cout, Cout) block.
    params["wcat"] = jnp.concatenate(
        [w0, w1[1, 1], w2[1, 1], w3[1, 1]], axis=-1).astype(jnp.bfloat16)
    params["wp"] = wp.astype(jnp.bfloat16)
    params["wproj_top"] = wproj[:4 * ASPP_OUT].astype(jnp.bfloat16)
    params["wproj_pool"] = wproj[4 * ASPP_OUT:].astype(jnp.bfloat16)
    return params


# ----------------------------------------------------------------------------
# DeepLabV3.forward: (x1, fea)
# ----------------------------------------------------------------------------
def deeplabv3_forward(x_nchw, params):
    x = jnp.transpose(x_nchw, (0, 2, 3, 1)).astype(jnp.float32)  # NCHW -> NHWC
    # layer0 / layer1 (stride 2, larger maps): XLA im2col (stride folded) + Pallas GEMM
    a0, (N, H0, W0) = _im2col(x, BACKBONE_STRIDES[0])
    y0 = _gemm_relu(a0.astype(jnp.bfloat16), params["w_l0"]).reshape(N, H0, W0, C_PAD)
    a1, (_, H1, W1) = _im2col(y0, BACKBONE_STRIDES[1])
    y1 = _gemm_relu(a1.astype(jnp.bfloat16), params["w_l1"]).reshape(N, H1, W1, C_PAD)
    # layer2 + layer3 + layer4 + ASPP: one fused Pallas kernel (VMEM-resident)
    a2, (_, H2, W2) = _im2col(y1, BACKBONE_STRIDES[2])
    fea_flat = _fused_tail(a2.astype(jnp.bfloat16), params, N, H2, W2)
    fea = fea_flat.reshape(N, H2, W2, ASPP_OUT)
    x1 = y1[..., :BACKBONE_CHANNELS[2]]   # drop lane-padding channels (all zero)
    # back to PyTorch NCHW
    return (jnp.transpose(x1, (0, 3, 1, 2)), jnp.transpose(fea, (0, 3, 1, 2)))


if __name__ == "__main__":
    key = jax.random.PRNGKey(0)
    k_x, k_p = jax.random.split(key)
    x = jax.random.normal(k_x, (2, 3, 64, 64), jnp.float32)  # NCHW, like PyTorch
    params = init_params(k_p)

    fwd = jax.jit(deeplabv3_forward)
    x1, fea = fwd(x, params)
    jax.block_until_ready((x1, fea))

    assert x1.shape == (2, 32, 16, 16), x1.shape
    assert fea.shape == (2, ASPP_OUT, 8, 8), fea.shape
    assert bool(jnp.all(jnp.isfinite(x1))) and bool(jnp.all(jnp.isfinite(fea)))
    print("KERNEL_OK")
</pallas_src>

<mosaic_0001>
module attributes {stable_mosaic.version = 11 : i64} {
  func.func @_gemm_relu_kernel(%arg0: i32, %arg1: memref<1024x27xbf16, #tpu.memory_space<vmem>>, %arg2: memref<27x128xbf16, #tpu.memory_space<vmem>>, %arg3: memref<1024x128xf32, #tpu.memory_space<vmem>>) attributes {dimension_semantics = [#tpu.dimension_semantics<parallel>], iteration_bounds = array<i64: 2>, scalar_prefetch = 0 : i64, scratch_operands = 0 : i64, tpu.core_type = #tpu.core_type<tc>, window_params = [{transform_indices = @transform_0, window_bounds = array<i64: 1024, 27>}, {pipeline_mode = #tpu.pipeline_mode<synchronous>, transform_indices = @transform_1, window_bounds = array<i64: 27, 128>}, {transform_indices = @transform_2, window_bounds = array<i64: 1024, 128>}]} {
    %c0 = arith.constant 0 : index
    %c0_0 = arith.constant 0 : index
    %0 = vector.load %arg1[%c0, %c0_0] : memref<1024x27xbf16, #tpu.memory_space<vmem>>, vector<1024x27xbf16>
    %c0_1 = arith.constant 0 : index
    %c0_2 = arith.constant 0 : index
    %1 = vector.load %arg2[%c0_1, %c0_2] : memref<27x128xbf16, #tpu.memory_space<vmem>>, vector<27x128xbf16>
    %cst = arith.constant dense<0.000000e+00> : vector<1024x128xf32>
    %2 = tpu.matmul %0, %1, %cst {dimension_numbers = #tpu.dot_dimension_numbers<[1], [0], [0], [1], [0, 0, 1, 1], [], []>} : vector<1024x27xbf16>, vector<27x128xbf16>, vector<1024x128xf32> -> vector<1024x128xf32>
    %cst_3 = arith.constant 0.000000e+00 : f32
    %3 = vector.broadcast %cst_3 : f32 to vector<1024x128xf32>
    %4 = arith.maximumf %2, %3 : vector<1024x128xf32>
    %c0_4 = arith.constant 0 : index
    %c0_5 = arith.constant 0 : index
    %5 = vector.load %arg3[%c0_4, %c0_5] : memref<1024x128xf32, #tpu.memory_space<vmem>>, vector<1024x128xf32>
    tpu.vector_store %arg3[%c0_4, %c0_5], %4 {strides = array<i32>} : memref<1024x128xf32, #tpu.memory_space<vmem>>, vector<1024x128xf32>,
    return
  }
  func.func @transform_0(%arg0: i32) -> (i32, i32) {
    %c0_i32 = arith.constant 0 : i32
    %c0_i32_0 = arith.constant 0 : i32
    return %arg0, %c0_i32 : i32, i32
  }
  func.func @transform_1(%arg0: i32) -> (i32, i32) {
    %c0_i32 = arith.constant 0 : i32
    %c0_i32_0 = arith.constant 0 : i32
    %c0_i32_1 = arith.constant 0 : i32
    return %c0_i32, %c0_i32_0 : i32, i32
  }
  func.func @transform_2(%arg0: i32) -> (i32, i32) {
    %c0_i32 = arith.constant 0 : i32
    %c0_i32_0 = arith.constant 0 : i32
    return %arg0, %c0_i32 : i32, i32
  }
}

module attributes {stable_mosaic.version = 11 : i64} {
  func.func @_gemm_relu_kernel(%arg0: i32, %arg1: memref<256x1152xbf16, #tpu.memory_space<vmem>>, %arg2: memref<1152x128xbf16, #tpu.memory_space<vmem>>, %arg3: memref<256x128xf32, #tpu.memory_space<vmem>>) attributes {dimension_semantics = [#tpu.dimension_semantics<parallel>], iteration_bounds = array<i64: 2>, scalar_prefetch = 0 : i64, scratch_operands = 0 : i64, tpu.core_type = #tpu.core_type<tc>, window_params = [{transform_indices = @transform_0, window_bounds = array<i64: 256, 1152>}, {pipeline_mode = #tpu.pipeline_mode<synchronous>, transform_indices = @transform_1, window_bounds = array<i64: 1152, 128>}, {transform_indices = @transform_2, window_bounds = array<i64: 256, 128>}]} {
    %c0 = arith.constant 0 : index
    %c0_0 = arith.constant 0 : index
    %0 = vector.load %arg1[%c0, %c0_0] : memref<256x1152xbf16, #tpu.memory_space<vmem>>, vector<256x1152xbf16>
    %c0_1 = arith.constant 0 : index
    %c0_2 = arith.constant 0 : index
    %1 = vector.load %arg2[%c0_1, %c0_2] : memref<1152x128xbf16, #tpu.memory_space<vmem>>, vector<1152x128xbf16>
    %cst = arith.constant dense<0.000000e+00> : vector<256x128xf32>
    %2 = tpu.matmul %0, %1, %cst {dimension_numbers = #tpu.dot_dimension_numbers<[1], [0], [0], [1], [0, 0, 1, 1], [], []>} : vector<256x1152xbf16>, vector<1152x128xbf16>, vector<256x128xf32> -> vector<256x128xf32>
    %cst_3 = arith.constant 0.000000e+00 : f32
    %3 = vector.broadcast %cst_3 : f32 to vector<256x128xf32>
    %4 = arith.maximumf %2, %3 : vector<256x128xf32>
    %c0_4 = arith.constant 0 : index
    %c0_5 = arith.constant 0 : index
    %5 = vector.load %arg3[%c0_4, %c0_5] : memref<256x128xf32, #tpu.memory_space<vmem>>, vector<256x128xf32>
    tpu.vector_store %arg3[%c0_4, %c0_5], %4 {strides = array<i32>} : memref<256x128xf32, #tpu.memory_space<vmem>>, vector<256x128xf32>,
    return
  }
  func.func @transform_0(%arg0: i32) -> (i32, i32) {
    %c0_i32 = arith.constant 0 : i32
    %c0_i32_0 = arith.constant 0 : i32
    return %arg0, %c0_i32 : i32, i32
  }
  func.func @transform_1(%arg0: i32) -> (i32, i32) {
    %c0_i32 = arith.constant 0 : i32
    %c0_i32_0 = arith.constant 0 : i32
    %c0_i32_1 = arith.constant 0 : i32
    return %c0_i32, %c0_i32_0 : i32, i32
  }
  func.func @transform_2(%arg0: i32) -> (i32, i32) {
    %c0_i32 = arith.constant 0 : i32
    %c0_i32_0 = arith.constant 0 : i32
    return %arg0, %c0_i32 : i32, i32
  }
}

module attributes {stable_mosaic.version = 11 : i64} {
  func.func @_fused_tail_kernel(%arg0: memref<128x1152xbf16, #tpu.memory_space<vmem>>, %arg1: memref<1152x128xbf16, #tpu.memory_space<vmem>>, %arg2: memref<9x128x128xbf16, #tpu.memory_space<vmem>>, %arg3: memref<9x128x128xbf16, #tpu.memory_space<vmem>>, %arg4: memref<128x256xbf16, #tpu.memory_space<vmem>>, %arg5: memref<128x64xbf16, #tpu.memory_space<vmem>>, %arg6: memref<256x64xbf16, #tpu.memory_space<vmem>>, %arg7: memref<64x64xbf16, #tpu.memory_space<vmem>>, %arg8: memref<128x64xf32, #tpu.memory_space<vmem>>, %arg9: memref<2x10x10x128xbf16, #tpu.memory_space<vmem>>, %arg10: memref<2x10x10x128xbf16, #tpu.memory_space<vmem>>) attributes {dimension_semantics = [], scalar_prefetch = 0 : i64, scratch_operands = 2 : i64, tpu.core_type = #tpu.core_type<tc>} {
    %c0 = arith.constant 0 : index
    %c0_0 = arith.constant 0 : index
    %0 = vector.load %arg0[%c0, %c0_0] : memref<128x1152xbf16, #tpu.memory_space<vmem>>, vector<128x1152xbf16>
    %c0_1 = arith.constant 0 : index
    %c0_2 = arith.constant 0 : index
    %1 = vector.load %arg1[%c0_1, %c0_2] : memref<1152x128xbf16, #tpu.memory_space<vmem>>, vector<1152x128xbf16>
    %cst = arith.constant dense<0.000000e+00> : vector<128x128xf32>
    %2 = tpu.matmul %0, %1, %cst {dimension_numbers = #tpu.dot_dimension_numbers<[1], [0], [0], [1], [0, 0, 1, 1], [], []>} : vector<128x1152xbf16>, vector<1152x128xbf16>, vector<128x128xf32> -> vector<128x128xf32>
    %cst_3 = arith.constant 0.000000e+00 : f32
    %3 = vector.broadcast %cst_3 : f32 to vector<128x128xf32>
    %4 = arith.maximumf %2, %3 : vector<128x128xf32>
    %cst_4 = arith.constant 0.000000e+00 : bf16
    %5 = vector.broadcast %cst_4 : bf16 to vector<2x10x10x128xbf16>
    %c0_5 = arith.constant 0 : index
    %c0_6 = arith.constant 0 : index
    %c0_7 = arith.constant 0 : index
    %c0_8 = arith.constant 0 : index
    %6 = vector.load %arg9[%c0_5, %c0_6, %c0_7, %c0_8] : memref<2x10x10x128xbf16, #tpu.memory_space<vmem>>, vector<2x10x10x128xbf16>
    tpu.vector_store %arg9[%c0_5, %c0_6, %c0_7, %c0_8], %5 {strides = array<i32>} : memref<2x10x10x128xbf16, #tpu.memory_space<vmem>>, vector<2x10x10x128xbf16>,
    %7 = arith.truncf %4 : vector<128x128xf32> to vector<128x128xbf16>
    %8 = vector.shape_cast %7 : vector<128x128xbf16> to vector<2x8x8x128xbf16>
    %c0_9 = arith.constant 0 : index
    %c1 = arith.constant 1 : index
    %c1_10 = arith.constant 1 : index
    %c0_11 = arith.constant 0 : index
    %9 = vector.load %arg9[%c0_9, %c1, %c1_10, %c0_11] : memref<2x10x10x128xbf16, #tpu.memory_space<vmem>>, vector<2x8x8x128xbf16>
    tpu.vector_store %arg9[%c0_9, %c1, %c1_10, %c0_11], %8 {strides = array<i32>} : memref<2x10x10x128xbf16, #tpu.memory_space<vmem>>, vector<2x8x8x128xbf16>,
    %c0_12 = arith.constant 0 : index
    %c0_13 = arith.constant 0 : index
    %c0_14 = arith.constant 0 : index
    %c0_15 = arith.constant 0 : index
    %10 = vector.load %arg9[%c0_12, %c0_13, %c0_14, %c0_15] : memref<2x10x10x128xbf16, #tpu.memory_space<vmem>>, vector<2x8x8x128xbf16>
    %11 = vector.shape_cast %10 : vector<2x8x8x128xbf16> to vector<128x128xbf16>
    %c0_16 = arith.constant 0 : index
    %c0_17 = arith.constant 0 : index
    %c0_18 = arith.constant 0 : index
    %12 = vector.load %arg2[%c0_16, %c0_17, %c0_18] : memref<9x128x128xbf16, #tpu.memory_space<vmem>>, vector<1x128x128xbf16>
    %13 = vector.shape_cast %12 : vector<1x128x128xbf16> to vector<128x128xbf16>
    %cst_19 = arith.constant dense<0.000000e+00> : vector<128x128xf32>
    %14 = tpu.matmul %11, %13, %cst_19 {dimension_numbers = #tpu.dot_dimension_numbers<[1], [0], [0], [1], [0, 0, 1, 1], [], []>} : vector<128x128xbf16>, vector<128x128xbf16>, vector<128x128xf32> -> vector<128x128xf32>
    %c0_20 = arith.constant 0 : index
    %c0_21 = arith.constant 0 : index
    %c1_22 = arith.constant 1 : index
    %c0_23 = arith.constant 0 : index
    %15 = vector.load %arg9[%c0_20, %c0_21, %c1_22, %c0_23] : memref<2x10x10x128xbf16, #tpu.memory_space<vmem>>, vector<2x8x8x128xbf16>
    %16 = vector.shape_cast %15 : vector<2x8x8x128xbf16> to vector<128x128xbf16>
    %c1_24 = arith.constant 1 : index
    %c0_25 = arith.constant 0 : index
    %c0_26 = arith.constant 0 : index
    %17 = vector.load %arg2[%c1_24, %c0_25, %c0_26] : memref<9x128x128xbf16, #tpu.memory_space<vmem>>, vector<1x128x128xbf16>
    %18 = vector.shape_cast %17 : vector<1x128x128xbf16> to vector<128x128xbf16>
    %cst_27 = arith.constant dense<0.000000e+00> : vector<128x128xf32>
    %19 = tpu.matmul %16, %18, %cst_27 {dimension_numbers = #tpu.dot_dimension_numbers<[1], [0], [0], [1], [0, 0, 1, 1], [], []>} : vector<128x128xbf16>, vector<128x128xbf16>, vector<128x128xf32> -> vector<128x128xf32>
    %20 = arith.addf %14, %19 : vector<128x128xf32>
    %c0_28 = arith.constant 0 : index
    %c0_29 = arith.constant 0 : index
    %c2 = arith.constant 2 : index
    %c0_30 = arith.constant 0 : index
    %21 = vector.load %arg9[%c0_28, %c0_29, %c2, %c0_30] : memref<2x10x10x128xbf16, #tpu.memory_space<vmem>>, vector<2x8x8x128xbf16>
    %22 = vector.shape_cast %21 : vector<2x8x8x128xbf16> to vector<128x128xbf16>
    %c2_31 = arith.constant 2 : index
    %c0_32 = arith.constant 0 : index
    %c0_33 = arith.constant 0 : index
    %23 = vector.load %arg2[%c2_31, %c0_32, %c0_33] : memref<9x128x128xbf16, #tpu.memory_space<vmem>>, vector<1x128x128xbf16>
    %24 = vector.shape_cast %23 : vector<1x128x128xbf16> to vector<128x128xbf16>
    %cst_34 = arith.constant dense<0.000000e+00> : vector<128x128xf32>
    %25 = tpu.matmul %22, %24, %cst_34 {dimension_numbers = #tpu.dot_dimension_numbers<[1], [0], [0], [1], [0, 0, 1, 1], [], []>} : vector<128x128xbf16>, vector<128x128xbf16>, vector<128x128xf32> -> vector<128x128xf32>
    %26 = arith.addf %20, %25 : vector<128x128xf32>
    %c0_35 = arith.constant 0 : index
    %c1_36 = arith.constant 1 : index
    %c0_37 = arith.constant 0 : index
    %c0_38 = arith.constant 0 : index
    %27 = vector.load %arg9[%c0_35, %c1_36, %c0_37, %c0_38] : memref<2x10x10x128xbf16, #tpu.memory_space<vmem>>, vector<2x8x8x128xbf16>
    %28 = vector.shape_cast %27 : vector<2x8x8x128xbf16> to vector<128x128xbf16>
    %c3 = arith.constant 3 : index
    %c0_39 = arith.constant 0 : index
    %c0_40 = arith.constant 0 : index
    %29 = vector.load %arg2[%c3, %c0_39, %c0_40] : memref<9x128x128xbf16, #tpu.memory_space<vmem>>, vector<1x128x128xbf16>
    %30 = vector.shape_cast %29 : vector<1x128x128xbf16> to vector<128x128xbf16>
    %cst_41 = arith.constant dense<0.000000e+00> : vector<128x128xf32>
    %31 = tpu.matmul %28, %30, %cst_41 {dimension_numbers = #tpu.dot_dimension_numbers<[1], [0], [0], [1], [0, 0, 1, 1], [], []>} : vector<128x128xbf16>, vector<128x128xbf16>, vector<128x128xf32> -> vector<128x128xf32>
    %32 = arith.addf %26, %31 : vector<128x128xf32>
    %c0_42 = arith.constant 0 : index
    %c1_43 = arith.constant 1 : index
    %c1_44 = arith.constant 1 : index
    %c0_45 = arith.constant 0 : index
    %33 = vector.load %arg9[%c0_42, %c1_43, %c1_44, %c0_45] : memref<2x10x10x128xbf16, #tpu.memory_space<vmem>>, vector<2x8x8x128xbf16>
    %34 = vector.shape_cast %33 : vector<2x8x8x128xbf16> to vector<128x128xbf16>
    %c4 = arith.constant 4 : index
    %c0_46 = arith.constant 0 : index
    %c0_47 = arith.constant 0 : index
    %35 = vector.load %arg2[%c4, %c0_46, %c0_47] : memref<9x128x128xbf16, #tpu.memory_space<vmem>>, vector<1x128x128xbf16>
    %36 = vector.shape_cast %35 : vector<1x128x128xbf16> to vector<128x128xbf16>
    %cst_48 = arith.constant dense<0.000000e+00> : vector<128x128xf32>
    %37 = tpu.matmul %34, %36, %cst_48 {dimension_numbers = #tpu.dot_dimension_numbers<[1], [0], [0], [1], [0, 0, 1, 1], [], []>} : vector<128x128xbf16>, vector<128x128xbf16>, vector<128x128xf32> -> vector<128x128xf32>
    %38 = arith.addf %32, %37 : vector<128x128xf32>
    %c0_49 = arith.constant 0 : index
    %c1_50 = arith.constant 1 : index
    %c2_51 = arith.constant 2 : index
    %c0_52 = arith.constant 0 : index
    %39 = vector.load %arg9[%c0_49, %c1_50, %c2_51, %c0_52] : memref<2x10x10x128xbf16, #tpu.memory_space<vmem>>, vector<2x8x8x128xbf16>
    %40 = vector.shape_cast %39 : vector<2x8x8x128xbf16> to vector<128x128xbf16>
    %c5 = arith.constant 5 : index
    %c0_53 = arith.constant 0 : index
    %c0_54 = arith.constant 0 : index
    %41 = vector.load %arg2[%c5, %c0_53, %c0_54] : memref<9x128x128xbf16, #tpu.memory_space<vmem>>, vector<1x128x128xbf16>
    %42 = vector.shape_cast %41 : vector<1x128x128xbf16> to vector<128x128xbf16>
    %cst_55 = arith.constant dense<0.000000e+00> : vector<128x128xf32>
    %43 = tpu.matmul %40, %42, %cst_55 {dimension_numbers = #tpu.dot_dimension_numbers<[1], [0], [0], [1], [0, 0, 1, 1], [], []>} : vector<128x128xbf16>, vector<128x128xbf16>, vector<128x128xf32> -> vector<128x128xf32>
    %44 = arith.addf %38, %43 : vector<128x128xf32>
    %c0_56 = arith.constant 0 : index
    %c2_57 = arith.constant 2 : index
    %c0_58 = arith.constant 0 : index
    %c0_59 = arith.constant 0 : index
    %45 = vector.load %arg9[%c0_56, %c2_57, %c0_58, %c0_59] : memref<2x10x10x128xbf16, #tpu.memory_space<vmem>>, vector<2x8x8x128xbf16>
    %46 = vector.shape_cast %45 : vector<2x8x8x128xbf16> to vector<128x128xbf16>
    %c6 = arith.constant 6 : index
    %c0_60 = arith.constant 0 : index
    %c0_61 = arith.constant 0 : index
    %47 = vector.load %arg2[%c6, %c0_60, %c0_61] : memref<9x128x128xbf16, #tpu.memory_space<vmem>>, vector<1x128x128xbf16>
    %48 = vector.shape_cast %47 : vector<1x128x128xbf16> to vector<128x128xbf16>
    %cst_62 = arith.constant dense<0.000000e+00> : vector<128x128xf32>
    %49 = tpu.matmul %46, %48, %cst_62 {dimension_numbers = #tpu.dot_dimension_numbers<[1], [0], [0], [1], [0, 0, 1, 1], [], []>} : vector<128x128xbf16>, vector<128x128xbf16>, vector<128x128xf32> -> vector<128x128xf32>
    %50 = arith.addf %44, %49 : vector<128x128xf32>
    %c0_63 = arith.constant 0 : index
    %c2_64 = arith.constant 2 : index
    %c1_65 = arith.constant 1 : index
    %c0_66 = arith.constant 0 : index
    %51 = vector.load %arg9[%c0_63, %c2_64, %c1_65, %c0_66] : memref<2x10x10x128xbf16, #tpu.memory_space<vmem>>, vector<2x8x8x128xbf16>
    %52 = vector.shape_cast %51 : vector<2x8x8x128xbf16> to vector<128x128xbf16>
    %c7 = arith.constant 7 : index
    %c0_67 = arith.constant 0 : index
    %c0_68 = arith.constant 0 : index
    %53 = vector.load %arg2[%c7, %c0_67, %c0_68] : memref<9x128x128xbf16, #tpu.memory_space<vmem>>, vector<1x128x128xbf16>
    %54 = vector.shape_cast %53 : vector<1x128x128xbf16> to vector<128x128xbf16>
    %cst_69 = arith.constant dense<0.000000e+00> : vector<128x128xf32>
    %55 = tpu.matmul %52, %54, %cst_69 {dimension_numbers = #tpu.dot_dimension_numbers<[1], [0], [0], [1], [0, 0, 1, 1], [], []>} : vector<128x128xbf16>, vector<128x128xbf16>, vector<128x128xf32> -> vector<128x128xf32>
    %56 = arith.addf %50, %55 : vector<128x128xf32>
    %c0_70 = arith.constant 0 : index
    %c2_71 = arith.constant 2 : index
    %c2_72 = arith.constant 2 : index
    %c0_73 = arith.constant 0 : index
    %57 = vector.load %arg9[%c0_70, %c2_71, %c2_72, %c0_73] : memref<2x10x10x128xbf16, #tpu.memory_space<vmem>>, vector<2x8x8x128xbf16>
    %58 = vector.shape_cast %57 : vector<2x8x8x128xbf16> to vector<128x128xbf16>
    %c8 = arith.constant 8 : index
    %c0_74 = arith.constant 0 : index
    %c0_75 = arith.constant 0 : index
    %59 = vector.load %arg2[%c8, %c0_74, %c0_75] : memref<9x128x128xbf16, #tpu.memory_space<vmem>>, vector<1x128x128xbf16>
    %60 = vector.shape_cast %59 : vector<1x128x128xbf16> to vector<128x128xbf16>
    %cst_76 = arith.constant dense<0.000000e+00> : vector<128x128xf32>
    %61 = tpu.matmul %58, %60, %cst_76 {dimension_numbers = #tpu.dot_dimension_numbers<[1], [0], [0], [1], [0, 0, 1, 1], [], []>} : vector<128x128xbf16>, vector<128x128xbf16>, vector<128x128xf32> -> vector<128x128xf32>
    %62 = arith.addf %56, %61 : vector<128x128xf32>
    %cst_77 = arith.constant 0.000000e+00 : f32
    %63 = vector.broadcast %cst_77 : f32 to vector<128x128xf32>
    %64 = arith.maximumf %62, %63 : vector<128x128xf32>
    %cst_78 = arith.constant 0.000000e+00 : bf16
    %65 = vector.broadcast %cst_78 : bf16 to vector<2x10x10x128xbf16>
    %c0_79 = arith.constant 0 : index
    %c0_80 = arith.constant 0 : index
    %c0_81 = arith.constant 0 : index
    %c0_82 = arith.constant 0 : index
    %66 = vector.load %arg10[%c0_79, %c0_80, %c0_81, %c0_82] : memref<2x10x10x128xbf16, #tpu.memory_space<vmem>>, vector<2x10x10x128xbf16>
    tpu.vector_store %arg10[%c0_79, %c0_80, %c0_81, %c0_82], %65 {strides = array<i32>} : memref<2x10x10x128xbf16, #tpu.memory_space<vmem>>, vector<2x10x10x128xbf16>,
    %67 = arith.truncf %64 : vector<128x128xf32> to vector<128x128xbf16>
    %68 = vector.shape_cast %67 : vector<128x128xbf16> to vector<2x8x8x128xbf16>
    %c0_83 = arith.constant 0 : index
    %c1_84 = arith.constant 1 : index
    %c1_85 = arith.constant 1 : index
    %c0_86 = arith.constant 0 : index
    %69 = vector.load %arg10[%c0_83, %c1_84, %c1_85, %c0_86] : memref<2x10x10x128xbf16, #tpu.memory_space<vmem>>, vector<2x8x8x128xbf16>
    tpu.vector_store %arg10[%c0_83, %c1_84, %c1_85, %c0_86], %68 {strides = array<i32>} : memref<2x10x10x128xbf16, #tpu.memory_space<vmem>>, vector<2x8x8x128xbf16>,
    %c0_87 = arith.constant 0 : index
    %c0_88 = arith.constant 0 : index
    %c0_89 = arith.constant 0 : index
    %c0_90 = arith.constant 0 : index
    %70 = vector.load %arg10[%c0_87, %c0_88, %c0_89, %c0_90] : memref<2x10x10x128xbf16, #tpu.memory_space<vmem>>, vector<2x8x8x128xbf16>
    %71 = vector.shape_cast %70 : vector<2x8x8x128xbf16> to vector<128x128xbf16>
    %c0_91 = arith.constant 0 : index
    %c0_92 = arith.constant 0 : index
    %c0_93 = arith.constant 0 : index
    %72 = vector.load %arg3[%c0_91, %c0_92, %c0_93] : memref<9x128x128xbf16, #tpu.memory_space<vmem>>, vector<1x128x128xbf16>
    %73 = vector.shape_cast %72 : vector<1x128x128xbf16> to vector<128x128xbf16>
    %cst_94 = arith.constant dense<0.000000e+00> : vector<128x128xf32>
    %74 = tpu.matmul %71, %73, %cst_94 {dimension_numbers = #tpu.dot_dimension_numbers<[1], [0], [0], [1], [0, 0, 1, 1], [], []>} : vector<128x128xbf16>, vector<128x128xbf16>, vector<128x128xf32> -> vector<128x128xf32>
    %c0_95 = arith.constant 0 : index
    %c0_96 = arith.constant 0 : index
    %c1_97 = arith.constant 1 : index
    %c0_98 = arith.constant 0 : index
    %75 = vector.load %arg10[%c0_95, %c0_96, %c1_97, %c0_98] : memref<2x10x10x128xbf16, #tpu.memory_space<vmem>>, vector<2x8x8x128xbf16>
    %76 = vector.shape_cast %75 : vector<2x8x8x128xbf16> to vector<128x128xbf16>
    %c1_99 = arith.constant 1 : index
    %c0_100 = arith.constant 0 : index
    %c0_101 = arith.constant 0 : index
    %77 = vector.load %arg3[%c1_99, %c0_100, %c0_101] : memref<9x128x128xbf16, #tpu.memory_space<vmem>>, vector<1x128x128xbf16>
    %78 = vector.shape_cast %77 : vector<1x128x128xbf16> to vector<128x128xbf16>
    %cst_102 = arith.constant dense<0.000000e+00> : vector<128x128xf32>
    %79 = tpu.matmul %76, %78, %cst_102 {dimension_numbers = #tpu.dot_dimension_numbers<[1], [0], [0], [1], [0, 0, 1, 1], [], []>} : vector<128x128xbf16>, vector<128x128xbf16>, vector<128x128xf32> -> vector<128x128xf32>
    %80 = arith.addf %74, %79 : vector<128x128xf32>
    %c0_103 = arith.constant 0 : index
    %c0_104 = arith.constant 0 : index
    %c2_105 = arith.constant 2 : index
    %c0_106 = arith.constant 0 : index
    %81 = vector.load %arg10[%c0_103, %c0_104, %c2_105, %c0_106] : memref<2x10x10x128xbf16, #tpu.memory_space<vmem>>, vector<2x8x8x128xbf16>
    %82 = vector.shape_cast %81 : vector<2x8x8x128xbf16> to vector<128x128xbf16>
    %c2_107 = arith.constant 2 : index
    %c0_108 = arith.constant 0 : index
    %c0_109 = arith.constant 0 : index
    %83 = vector.load %arg3[%c2_107, %c0_108, %c0_109] : memref<9x128x128xbf16, #tpu.memory_space<vmem>>, vector<1x128x128xbf16>
    %84 = vector.shape_cast %83 : vector<1x128x128xbf16> to vector<128x128xbf16>
    %cst_110 = arith.constant dense<0.000000e+00> : vector<128x128xf32>
    %85 = tpu.matmul %82, %84, %cst_110 {dimension_numbers = #tpu.dot_dimension_numbers<[1], [0], [0], [1], [0, 0, 1, 1], [], []>} : vector<128x128xbf16>, vector<128x128xbf16>, vector<128x128xf32> -> vector<128x128xf32>
    %86 = arith.addf %80, %85 : vector<128x128xf32>
    %c0_111 = arith.constant 0 : index
    %c1_112 = arith.constant 1 : index
    %c0_113 = arith.constant 0 : index
    %c0_114 = arith.constant 0 : index
    %87 = vector.load %arg10[%c0_111, %c1_112, %c0_113, %c0_114] : memref<2x10x10x128xbf16, #tpu.memory_space<vmem>>, vector<2x8x8x128xbf16>
    %88 = vector.shape_cast %87 : vector<2x8x8x128xbf16> to vector<128x128xbf16>
    %c3_115 = arith.constant 3 : index
    %c0_116 = arith.constant 0 : index
    %c0_117 = arith.constant 0 : index
    %89 = vector.load %arg3[%c3_115, %c0_116, %c0_117] : memref<9x128x128xbf16, #tpu.memory_space<vmem>>, vector<1x128x128xbf16>
    %90 = vector.shape_cast %89 : vector<1x128x128xbf16> to vector<128x128xbf16>
    %cst_118 = arith.constant dense<0.000000e+00> : vector<128x128xf32>
    %91 = tpu.matmul %88, %90, %cst_118 {dimension_numbers = #tpu.dot_dimension_numbers<[1], [0], [0], [1], [0, 0, 1, 1], [], []>} : vector<128x128xbf16>, vector<128x128xbf16>, vector<128x128xf32> -> vector<128x128xf32>
    %92 = arith.addf %86, %91 : vector<128x128xf32>
    %c0_119 = arith.constant 0 : index
    %c1_120 = arith.constant 1 : index
    %c1_121 = arith.constant 1 : index
    %c0_122 = arith.constant 0 : index
    %93 = vector.load %arg10[%c0_119, %c1_120, %c1_121, %c0_122] : memref<2x10x10x128xbf16, #tpu.memory_space<vmem>>, vector<2x8x8x128xbf16>
    %94 = vector.shape_cast %93 : vector<2x8x8x128xbf16> to vector<128x128xbf16>
    %c4_123 = arith.constant 4 : index
    %c0_124 = arith.constant 0 : index
    %c0_125 = arith.constant 0 : index
    %95 = vector.load %arg3[%c4_123, %c0_124, %c0_125] : memref<9x128x128xbf16, #tpu.memory_space<vmem>>, vector<1x128x128xbf16>
    %96 = vector.shape_cast %95 : vector<1x128x128xbf16> to vector<128x128xbf16>
    %cst_126 = arith.constant dense<0.000000e+00> : vector<128x128xf32>
    %97 = tpu.matmul %94, %96, %cst_126 {dimension_numbers = #tpu.dot_dimension_numbers<[1], [0], [0], [1], [0, 0, 1, 1], [], []>} : vector<128x128xbf16>, vector<128x128xbf16>, vector<128x128xf32> -> vector<128x128xf32>
    %98 = arith.addf %92, %97 : vector<128x128xf32>
    %c0_127 = arith.constant 0 : index
    %c1_128 = arith.constant 1 : index
    %c2_129 = arith.constant 2 : index
    %c0_130 = arith.constant 0 : index
    %99 = vector.load %arg10[%c0_127, %c1_128, %c2_129, %c0_130] : memref<2x10x10x128xbf16, #tpu.memory_space<vmem>>, vector<2x8x8x128xbf16>
    %100 = vector.shape_cast %99 : vector<2x8x8x128xbf16> to vector<128x128xbf16>
    %c5_131 = arith.constant 5 : index
    %c0_132 = arith.constant 0 : index
    %c0_133 = arith.constant 0 : index
    %101 = vector.load %arg3[%c5_131, %c0_132, %c0_133] : memref<9x128x128xbf16, #tpu.memory_space<vmem>>, vector<1x128x128xbf16>
    %102 = vector.shape_cast %101 : vector<1x128x128xbf16> to vector<128x128xbf16>
    %cst_134 = arith.constant dense<0.000000e+00> : vector<128x128xf32>
    %103 = tpu.matmul %100, %102, %cst_134 {dimension_numbers = #tpu.dot_dimension_numbers<[1], [0], [0], [1], [0, 0, 1, 1], [], []>} : vector<128x128xbf16>, vector<128x128xbf16>, vector<128x128xf32> -> vector<128x128xf32>
    %104 = arith.addf %98, %103 : vector<128x128xf32>
    %c0_135 = arith.constant 0 : index
    %c2_136 = arith.constant 2 : index
    %c0_137 = arith.constant 0 : index
    %c0_138 = arith.constant 0 : index
    %105 = vector.load %arg10[%c0_135, %c2_136, %c0_137, %c0_138] : memref<2x10x10x128xbf16, #tpu.memory_space<vmem>>, vector<2x8x8x128xbf16>
    %106 = vector.shape_cast %105 : vector<2x8x8x128xbf16> to vector<128x128xbf16>
    %c6_139 = arith.constant 6 : index
    %c0_140 = arith.constant 0 : index
    %c0_141 = arith.constant 0 : index
    %107 = vector.load %arg3[%c6_139, %c0_140, %c0_141] : memref<9x128x128xbf16, #tpu.memory_space<vmem>>, vector<1x128x128xbf16>
    %108 = vector.shape_cast %107 : vector<1x128x128xbf16> to vector<128x128xbf16>
    %cst_142 = arith.constant dense<0.000000e+00> : vector<128x128xf32>
    %109 = tpu.matmul %106, %108, %cst_142 {dimension_numbers = #tpu.dot_dimension_numbers<[1], [0], [0], [1], [0, 0, 1, 1], [], []>} : vector<128x128xbf16>, vector<128x128xbf16>, vector<128x128xf32> -> vector<128x128xf32>
    %110 = arith.addf %104, %109 : vector<128x128xf32>
    %c0_143 = arith.constant 0 : index
    %c2_144 = arith.constant 2 : index
    %c1_145 = arith.constant 1 : index
    %c0_146 = arith.constant 0 : index
    %111 = vector.load %arg10[%c0_143, %c2_144, %c1_145, %c0_146] : memref<2x10x10x128xbf16, #tpu.memory_space<vmem>>, vector<2x8x8x128xbf16>
    %112 = vector.shape_cast %111 : vector<2x8x8x128xbf16> to vector<128x128xbf16>
    %c7_147 = arith.constant 7 : index
    %c0_148 = arith.constant 0 : index
    %c0_149 = arith.constant 0 : index
    %113 = vector.load %arg3[%c7_147, %c0_148, %c0_149] : memref<9x128x128xbf16, #tpu.memory_space<vmem>>, vector<1x128x128xbf16>
    %114 = vector.shape_cast %113 : vector<1x128x128xbf16> to vector<128x128xbf16>
    %cst_150 = arith.constant dense<0.000000e+00> : vector<128x128xf32>
    %115 = tpu.matmul %112, %114, %cst_150 {dimension_numbers = #tpu.dot_dimension_numbers<[1], [0], [0], [1], [0, 0, 1, 1], [], []>} : vector<128x128xbf16>, vector<128x128xbf16>, vector<128x128xf32> -> vector<128x128xf32>
    %116 = arith.addf %110, %115 : vector<128x128xf32>
    %c0_151 = arith.constant 0 : index
    %c2_152 = arith.constant 2 : index
    %c2_153 = arith.constant 2 : index
    %c0_154 = arith.constant 0 : index
    %117 = vector.load %arg10[%c0_151, %c2_152, %c2_153, %c0_154] : memref<2x10x10x128xbf16, #tpu.memory_space<vmem>>, vector<2x8x8x128xbf16>
    %118 = vector.shape_cast %117 : vector<2x8x8x128xbf16> to vector<128x128xbf16>
    %c8_155 = arith.constant 8 : index
    %c0_156 = arith.constant 0 : index
    %c0_157 = arith.constant 0 : index
    %119 = vector.load %arg3[%c8_155, %c0_156, %c0_157] : memref<9x128x128xbf16, #tpu.memory_space<vmem>>, vector<1x128x128xbf16>
    %120 = vector.shape_cast %119 : vector<1x128x128xbf16> to vector<128x128xbf16>
    %cst_158 = arith.constant dense<0.000000e+00> : vector<128x128xf32>
    %121 = tpu.matmul %118, %120, %cst_158 {dimension_numbers = #tpu.dot_dimension_numbers<[1], [0], [0], [1], [0, 0, 1, 1], [], []>} : vector<128x128xbf16>, vector<128x128xbf16>, vector<128x128xf32> -> vector<128x128xf32>
    %122 = arith.addf %116, %121 : vector<128x128xf32>
    %cst_159 = arith.constant 0.000000e+00 : f32
    %123 = vector.broadcast %cst_159 : f32 to vector<128x128xf32>
    %124 = arith.maximumf %122, %123 : vector<128x128xf32>
    %125 = arith.truncf %124 : vector<128x128xf32> to vector<128x128xbf16>
    %c0_160 = arith.constant 0 : index
    %c0_161 = arith.constant 0 : index
    %126 = vector.load %arg4[%c0_160, %c0_161] : memref<128x256xbf16, #tpu.memory_space<vmem>>, vector<128x256xbf16>
    %cst_162 = arith.constant dense<0.000000e+00> : vector<128x256xf32>
    %127 = tpu.matmul %125, %126, %cst_162 {dimension_numbers = #tpu.dot_dimension_numbers<[1], [0], [0], [1], [0, 0, 1, 1], [], []>} : vector<128x128xbf16>, vector<128x256xbf16>, vector<128x256xf32> -> vector<128x256xf32>
    %cst_163 = arith.constant dense<0.000000e+00> : vector<256xf32>
    %128 = vector.multi_reduction <add>, %127, %cst_163 [0] : vector<128x256xf32> to vector<256xf32>
    %129 = vector.shape_cast %128 : vector<256xf32> to vector<1x256xf32>
    %130 = arith.mulf %127, %127 : vector<128x256xf32>
    %cst_164 = arith.constant dense<0.000000e+00> : vector<256xf32>
    %131 = vector.multi_reduction <add>, %130, %cst_164 [0] : vector<128x256xf32> to vector<256xf32>
    %132 = vector.shape_cast %131 : vector<256xf32> to vector<1x256xf32>
    %cst_165 = arith.constant 1.280000e+02 : f32
    %133 = vector.broadcast %cst_165 : f32 to vector<1x256xf32>
    %134 = arith.divf %129, %133 : vector<1x256xf32>
    %cst_166 = arith.constant 1.280000e+02 : f32
    %135 = vector.broadcast %cst_166 : f32 to vector<1x256xf32>
    %136 = arith.divf %132, %135 : vector<1x256xf32>
    %137 = arith.mulf %134, %134 : vector<1x256xf32>
    %138 = arith.subf %136, %137 : vector<1x256xf32>
    %cst_167 = arith.constant 0.000000e+00 : f32
    %139 = vector.broadcast %cst_167 : f32 to vector<1x256xf32>
    %140 = arith.maximumf %138, %139 : vector<1x256xf32>
    %141 = vector.broadcast %134 : vector<1x256xf32> to vector<128x256xf32>
    %142 = arith.subf %127, %141 : vector<128x256xf32>
    %cst_168 = arith.constant 9.99999974E-6 : f32
    %143 = vector.broadcast %cst_168 : f32 to vector<1x256xf32>
    %144 = arith.addf %140, %143 : vector<1x256xf32>
    %145 = math.rsqrt %144 : vector<1x256xf32>
    %146 = vector.broadcast %145 : vector<1x256xf32> to vector<128x256xf32>
    %147 = arith.mulf %142, %146 : vector<128x256xf32>
    %cst_169 = arith.constant 0.000000e+00 : f32
    %148 = vector.broadcast %cst_169 : f32 to vector<128x256xf32>
    %149 = arith.maximumf %147, %148 : vector<128x256xf32>
    %150 = arith.truncf %149 : vector<128x256xf32> to vector<128x256xbf16>
    %c0_170 = arith.constant 0 : index
    %c0_171 = arith.constant 0 : index
    %151 = vector.load %arg6[%c0_170, %c0_171] : memref<256x64xbf16, #tpu.memory_space<vmem>>, vector<256x64xbf16>
    %cst_172 = arith.constant dense<0.000000e+00> : vector<128x64xf32>
    %152 = tpu.matmul %150, %151, %cst_172 {dimension_numbers = #tpu.dot_dimension_numbers<[1], [0], [0], [1], [0, 0, 1, 1], [], []>} : vector<128x256xbf16>, vector<256x64xbf16>, vector<128x64xf32> -> vector<128x64xf32>
    %153 = vector.shape_cast %124 : vector<128x128xf32> to vector<2x64x128xf32>
    %cst_173 = arith.constant dense<0.000000e+00> : vector<2x128xf32>
    %154 = vector.multi_reduction <add>, %153, %cst_173 [1] : vector<2x64x128xf32> to vector<2x128xf32>
    %cst_174 = arith.constant 6.400000e+01 : f32
    %155 = vector.broadcast %cst_174 : f32 to vector<2x128xf32>
    %156 = arith.divf %154, %155 : vector<2x128xf32>
    %157 = arith.truncf %156 : vector<2x128xf32> to vector<2x128xbf16>
    %c0_175 = arith.constant 0 : index
    %c0_176 = arith.constant 0 : index
    %158 = vector.load %arg5[%c0_175, %c0_176] : memref<128x64xbf16, #tpu.memory_space<vmem>>, vector<128x64xbf16>
    %cst_177 = arith.constant dense<0.000000e+00> : vector<2x64xf32>
    %159 = tpu.matmul %157, %158, %cst_177 {dimension_numbers = #tpu.dot_dimension_numbers<[1], [0], [0], [1], [0, 0, 1, 1], [], []>} : vector<2x128xbf16>, vector<128x64xbf16>, vector<2x64xf32> -> vector<2x64xf32>
    %cst_178 = arith.constant dense<0.000000e+00> : vector<64xf32>
    %160 = vector.multi_reduction <add>, %159, %cst_178 [0] : vector<2x64xf32> to vector<64xf32>
    %161 = vector.shape_cast %160 : vector<64xf32> to vector<1x64xf32>
    %162 = arith.mulf %159, %159 : vector<2x64xf32>
    %cst_179 = arith.constant dense<0.000000e+00> : vector<64xf32>
    %163 = vector.multi_reduction <add>, %162, %cst_179 [0] : vector<2x64xf32> to vector<64xf32>
    %164 = vector.shape_cast %163 : vector<64xf32> to vector<1x64xf32>
    %cst_180 = arith.constant 2.000000e+00 : f32
    %165 = vector.broadcast %cst_180 : f32 to vector<1x64xf32>
    %166 = arith.divf %161, %165 : vector<1x64xf32>
    %cst_181 = arith.constant 2.000000e+00 : f32
    %167 = vector.broadcast %cst_181 : f32 to vector<1x64xf32>
    %168 = arith.divf %164, %167 : vector<1x64xf32>
    %169 = arith.mulf %166, %166 : vector<1x64xf32>
    %170 = arith.subf %168, %169 : vector<1x64xf32>
    %cst_182 = arith.constant 0.000000e+00 : f32
    %171 = vector.broadcast %cst_182 : f32 to vector<1x64xf32>
    %172 = arith.maximumf %170, %171 : vector<1x64xf32>
    %173 = vector.broadcast %166 : vector<1x64xf32> to vector<2x64xf32>
    %174 = arith.subf %159, %173 : vector<2x64xf32>
    %cst_183 = arith.constant 9.99999974E-6 : f32
    %175 = vector.broadcast %cst_183 : f32 to vector<1x64xf32>
    %176 = arith.addf %172, %175 : vector<1x64xf32>
    %177 = math.rsqrt %176 : vector<1x64xf32>
    %178 = vector.broadcast %177 : vector<1x64xf32> to vector<2x64xf32>
    %179 = arith.mulf %174, %178 : vector<2x64xf32>
    %cst_184 = arith.constant 0.000000e+00 : f32
    %180 = vector.broadcast %cst_184 : f32 to vector<2x64xf32>
    %181 = arith.maximumf %179, %180 : vector<2x64xf32>
    %182 = arith.truncf %181 : vector<2x64xf32> to vector<2x64xbf16>
    %c0_185 = arith.constant 0 : index
    %c0_186 = arith.constant 0 : index
    %183 = vector.load %arg7[%c0_185, %c0_186] : memref<64x64xbf16, #tpu.memory_space<vmem>>, vector<64x64xbf16>
    %cst_187 = arith.constant dense<0.000000e+00> : vector<2x64xf32>
    %184 = tpu.matmul %182, %183, %cst_187 {dimension_numbers = #tpu.dot_dimension_numbers<[1], [0], [0], [1], [0, 0, 1, 1], [], []>} : vector<2x64xbf16>, vector<64x64xbf16>, vector<2x64xf32> -> vector<2x64xf32>
    %185 = vector.shape_cast %152 : vector<128x64xf32> to vector<2x64x64xf32>
    %186 = vector.shape_cast %184 : vector<2x64xf32> to vector<2x1x64xf32>
    %187 = vector.broadcast %186 : vector<2x1x64xf32> to vector<2x64x64xf32>
    %188 = arith.addf %185, %187 : vector<2x64x64xf32>
    %189 = vector.shape_cast %188 : vector<2x64x64xf32> to vector<128x64xf32>
    %cst_188 = arith.constant dense<0.000000e+00> : vector<64xf32>
    %190 = vector.multi_reduction <add>, %189, %cst_188 [0] : vector<128x64xf32> to vector<64xf32>
    %191 = vector.shape_cast %190 : vector<64xf32> to vector<1x64xf32>
    %192 = arith.mulf %189, %189 : vector<128x64xf32>
    %cst_189 = arith.constant dense<0.000000e+00> : vector<64xf32>
    %193 = vector.multi_reduction <add>, %192, %cst_189 [0] : vector<128x64xf32> to vector<64xf32>
    %194 = vector.shape_cast %193 : vector<64xf32> to vector<1x64xf32>
    %cst_190 = arith.constant 1.280000e+02 : f32
    %195 = vector.broadcast %cst_190 : f32 to vector<1x64xf32>
    %196 = arith.divf %191, %195 : vector<1x64xf32>
    %cst_191 = arith.constant 1.280000e+02 : f32
    %197 = vector.broadcast %cst_191 : f32 to vector<1x64xf32>
    %198 = arith.divf %194, %197 : vector<1x64xf32>
    %199 = arith.mulf %196, %196 : vector<1x64xf32>
    %200 = arith.subf %198, %199 : vector<1x64xf32>
    %cst_192 = arith.constant 0.000000e+00 : f32
    %201 = vector.broadcast %cst_192 : f32 to vector<1x64xf32>
    %202 = arith.maximumf %200, %201 : vector<1x64xf32>
    %203 = vector.broadcast %196 : vector<1x64xf32> to vector<128x64xf32>
    %204 = arith.subf %189, %203 : vector<128x64xf32>
    %cst_193 = arith.constant 9.99999974E-6 : f32
    %205 = vector.broadcast %cst_193 : f32 to vector<1x64xf32>
    %206 = arith.addf %202, %205 : vector<1x64xf32>
    %207 = math.rsqrt %206 : vector<1x64xf32>
    %208 = vector.broadcast %207 : vector<1x64xf32> to vector<128x64xf32>
    %209 = arith.mulf %204, %208 : vector<128x64xf32>
    %cst_194 = arith.constant 0.000000e+00 : f32
    %210 = vector.broadcast %cst_194 : f32 to vector<128x64xf32>
    %211 = arith.maximumf %209, %210 : vector<128x64xf32>
    %c0_195 = arith.constant 0 : index
    %c0_196 = arith.constant 0 : index
    %212 = vector.load %arg8[%c0_195, %c0_196] : memref<128x64xf32, #tpu.memory_space<vmem>>, vector<128x64xf32>
    tpu.vector_store %arg8[%c0_195, %c0_196], %211 {strides = array<i32>} : memref<128x64xf32, #tpu.memory_space<vmem>>, vector<128x64xf32>,
    return
  }
}

</mosaic_0001>

<bundles_post_ra>
// kernel: deeplabv3_forward.3
= control target key start
LH: loop header
LB: loop body
LE: loop exit
PB: predicated region body
PF: predicated region fallthrough
CT: control target
= control target key end

     0   :  { %s1896_s9 = smov 0   ;;  %s2186_s0 = inlined_call_operand.vmem [shape: bf16[2048,27], index: 0, kind: input, shape index: {}]   ;;  %s2187_s1 = inlined_call_operand.vmem [shape: bf16[27,128], index: 1, kind: input, shape index: {}]   ;;  %s2188_s2 = inlined_call_operand.vmem [shape: f32[2048,128], index: 2, kind: output, shape index: {}]  }
   0x1 LB: > { %s1452_s10 = sadd.s32 4294967295, %s1878_s9   ;;  %p1456_p0 = scmp.ge.s32.totalorder %s1878_s9, 1  ;;  %s1878_s9 = sphi %s1896_s9, %s12_s9  }
   0x2   : > { %p113_p1 = scmp.lt.s32.totalorder %s1878_s9, 3 }
   0x4   : > { %p114_p2 = pnand %p1456_p0, %p113_p1 }
   0x5   : > { %s1457_s15 = sshll.u32 (!%p114_p2), %s1452_s10, 7 }
   0x6   : > { %117 = sbr.rel (%p114_p2) target bundleno = 409 (0x199), region = 28  ;;  %p136_p3 = scmp.lt.s32.totalorder (!%p114_p2), %s1457_s15, 255 }
   0xb   : > { %v1723_v0 = vld [vmem:[%s2187_s1 + $0x8] sm:$0xf]  ;;  %v1856_v1 = vld [vmem:[%s2187_s1 + $0x8] sm:$0x30]  ;;  %vm804_vm0 = vcmask 1044480   ;;  %vm805_vm1 = vcmask 1045504  }
   0xc   : > { %v1724_v2 = vor.u32 %v1856_v1, %v1723_v0  ;;  %v1880_v3 = vmov 65535   ;;  %s2190_s15 = smov (!%p136_p3, %s1457_s15), 255  ;;  %v1855_v7 = vld [vmem:[%s2187_s1] sm:$0xff]  ;;  %vm611_vm2 = vcmask 220160  }
   0xd   : > { %v806_v4 = vsel %vm804_vm0, 4294967295, %v1880_v3  ;;  %s1458_s18 = sshll.u32 %s2190_s15, 2  ;;  %s1460_s22 = sshll.u32 %s2190_s15, 3 }
   0xe   : > { %v807_v5 = vsel %vm805_vm1, %v806_v4, 0  ;;  %s1919_s21 = scalar_lea.vmem %s2186_s0, %s1458_s18  ;;  %s1991_s25 = scalar_lea.vmem %s2188_s2, %s1460_s22 }
   0xf   : > { %v809_v6 = vand.u32 %v1724_v2, %v807_v5  ;;  %v1791_v8 = vld [vmem:[%s1919_s21] sm:$0xff]  ;;  %v1792_v12 = vld [vmem:[%s1919_s21 + $0x8] sm:$0xff]  ;;  %v1793_v16 = vld [vmem:[%s1919_s21 + $0x10] sm:$0xff] }
  0x10   : > { %v1807_v9 = vld [vmem:[%s1919_s21 + $0x80] sm:$0xff]  ;;  %v1808_v13 = vld [vmem:[%s1919_s21 + $0x88] sm:$0xff]  ;;  %v1809_v17 = vld [vmem:[%s1919_s21 + $0x90] sm:$0xff] }
  0x11   : > { %817 = vmatpush.bf16.msra.mxu0 %v809_v6  ;;  %1857 = vmatpush.bf16.msra.mxu1 %v809_v6  ;;  %v1823_v10 = vld [vmem:[%s1919_s21 + $0x100] sm:$0xff]  ;;  %v1824_v14 = vld [vmem:[%s1919_s21 + $0x108] sm:$0xff]  ;;  %v1825_v18 = vld [vmem:[%s1919_s21 + $0x110] sm:$0xff] }
  0x12   : > { %1858 = vmatpush.bf16.msra.mxu2 %v809_v6  ;;  %1859 = vmatpush.bf16.msra.mxu3 %v809_v6  ;;  %v1839_v11 = vld [vmem:[%s1919_s21 + $0x180] sm:$0xff]  ;;  %v1840_v15 = vld [vmem:[%s1919_s21 + $0x188] sm:$0xff]  ;;  %v1841_v19 = vld [vmem:[%s1919_s21 + $0x190] sm:$0xff] }
  0x13   : > { %v1794_v20 = vld [vmem:[%s1919_s21 + $0x18] sm:$0xff]  ;;  %v1795_v24 = vld [vmem:[%s1919_s21 + $0x20] sm:$0xff]  ;;  %v1796_v28 = vld [vmem:[%s1919_s21 + $0x28] sm:$0xff] }
  0x14   : > { %v1810_v21 = vld [vmem:[%s1919_s21 + $0x98] sm:$0xff]  ;;  %v1811_v25 = vld [vmem:[%s1919_s21 + $0xa0] sm:$0xff]  ;;  %v1812_v29 = vld [vmem:[%s1919_s21 + $0xa8] sm:$0xff] }
  0x15   : > { %818 = vmatpush.bf16.msra.mxu0 %v1855_v7  ;;  %1860 = vmatpush.bf16.msra.mxu1 %v1855_v7  ;;  %v1826_v22 = vld [vmem:[%s1919_s21 + $0x118] sm:$0xff]  ;;  %v1827_v26 = vld [vmem:[%s1919_s21 + $0x120] sm:$0xff]  ;;  %v1828_v30 = vld [vmem:[%s1919_s21 + $0x128] sm:$0xff] }
  0x16   : > { %1861 = vmatpush.bf16.msra.mxu2 %v1855_v7  ;;  %1862 = vmatpush.bf16.msra.mxu3 %v1855_v7  ;;  %v1842_v23 = vld [vmem:[%s1919_s21 + $0x198] sm:$0xff]  ;;  %v1843_v27 = vld [vmem:[%s1919_s21 + $0x1a0] sm:$0xff]  ;;  %v1844_v31 = vld [vmem:[%s1919_s21 + $0x1a8] sm:$0xff] }
  0x17   : > { %v1797_v32 = vld [vmem:[%s1919_s21 + $0x30] sm:$0xff]  ;;  %v1798_v36 = vld [vmem:[%s1919_s21 + $0x38] sm:$0xff]  ;;  %v1799_v40 = vld [vmem:[%s1919_s21 + $0x40] sm:$0xff] }
  0x18   : > { %1725 = vmatmul.msk.bf16.vlgmr.msra.gmra.mxu0 %vm611_vm2, %v1791_v8  ;;  %1741 = vmatmul.msk.bf16.vlgmr.msra.gmra.mxu1 %vm611_vm2, %v1807_v9  ;;  %v1813_v33 = vld [vmem:[%s1919_s21 + $0xb0] sm:$0xff]  ;;  %v1814_v37 = vld [vmem:[%s1919_s21 + $0xb8] sm:$0xff]  ;;  %v1815_v41 = vld [vmem:[%s1919_s21 + $0xc0] sm:$0xff] }
  0x19   : > { %1757 = vmatmul.msk.bf16.vlgmr.msra.gmra.mxu2 %vm611_vm2, %v1823_v10  ;;  %1773 = vmatmul.msk.bf16.vlgmr.msra.gmra.mxu3 %vm611_vm2, %v1839_v11  ;;  %v1829_v34 = vld [vmem:[%s1919_s21 + $0x130] sm:$0xff]  ;;  %v1830_v38 = vld [vmem:[%s1919_s21 + $0x138] sm:$0xff]  ;;  %v1831_v44 = vld [vmem:[%s1919_s21 + $0x140] sm:$0xff] }
  0x1a   : > { %v1845_v35 = vld [vmem:[%s1919_s21 + $0x1b0] sm:$0xff]  ;;  %v1846_v39 = vld [vmem:[%s1919_s21 + $0x1b8] sm:$0xff]  ;;  %v1847_v45 = vld [vmem:[%s1919_s21 + $0x1c0] sm:$0xff] }
  0x1b   : > { %v1800_v58 = vld [vmem:[%s1919_s21 + $0x48] sm:$0xff] }
  0x1c   : > { %v1816_v59 = vld [vmem:[%s1919_s21 + $0xc8] sm:$0xff] }
  0x1d   : > { %v1832_v0 = vld [vmem:[%s1919_s21 + $0x148] sm:$0xff] }
  0x1e   : > { %v1848_v1 = vld [vmem:[%s1919_s21 + $0x1c8] sm:$0xff] }
  0x28   : > { %1726 = vmatmul.msk.bf16.gmra.mxu0 %vm611_vm2, %v1792_v12  ;;  %1742 = vmatmul.msk.bf16.gmra.mxu1 %vm611_vm2, %v1808_v13 }
  0x29   : > { %1758 = vmatmul.msk.bf16.gmra.mxu2 %vm611_vm2, %v1824_v14  ;;  %1774 = vmatmul.msk.bf16.gmra.mxu3 %vm611_vm2, %v1840_v15  ;;  %v1801_v14 = vld [vmem:[%s1919_s21 + $0x50] sm:$0xff] }
  0x2a   : > { %v1817_v15 = vld [vmem:[%s1919_s21 + $0xd0] sm:$0xff] }
  0x38   : > { %1727 = vmatmul.msk.bf16.gmra.mxu0 %vm611_vm2, %v1793_v16  ;;  %1743 = vmatmul.msk.bf16.gmra.mxu1 %vm611_vm2, %v1809_v17 }
  0x39   : > { %1759 = vmatmul.msk.bf16.gmra.mxu2 %vm611_vm2, %v1825_v18  ;;  %1775 = vmatmul.msk.bf16.gmra.mxu3 %vm611_vm2, %v1841_v19 }
  0x48   : > { %1728 = vmatmul.msk.bf16.gmra.mxu0 %vm611_vm2, %v1794_v20  ;;  %1744 = vmatmul.msk.bf16.gmra.mxu1 %vm611_vm2, %v1810_v21  ;;  %v1833_v20 = vld [vmem:[%s1919_s21 + $0x150] sm:$0xff] }
  0x49   : > { %1760 = vmatmul.msk.bf16.gmra.mxu2 %vm611_vm2, %v1826_v22  ;;  %1776 = vmatmul.msk.bf16.gmra.mxu3 %vm611_vm2, %v1842_v23  ;;  %v1849_v21 = vld [vmem:[%s1919_s21 + $0x1d0] sm:$0xff] }
  0x58   : > { %1729 = vmatmul.msk.bf16.gmra.mxu0 %vm611_vm2, %v1795_v24  ;;  %1745 = vmatmul.msk.bf16.gmra.mxu1 %vm611_vm2, %v1811_v25 }
  0x59   : > { %1761 = vmatmul.msk.bf16.gmra.mxu2 %vm611_vm2, %v1827_v26  ;;  %1777 = vmatmul.msk.bf16.gmra.mxu3 %vm611_vm2, %v1843_v27 }
  0x68   : > { %1730 = vmatmul.msk.bf16.gmra.mxu0 %vm611_vm2, %v1796_v28  ;;  %1746 = vmatmul.msk.bf16.gmra.mxu1 %vm611_vm2, %v1812_v29 }
  0x69   : > { %1762 = vmatmul.msk.bf16.gmra.mxu2 %vm611_vm2, %v1828_v30  ;;  %1778 = vmatmul.msk.bf16.gmra.mxu3 %vm611_vm2, %v1844_v31 }
  0x78   : > { %1731 = vmatmul.msk.bf16.gmra.mxu0 %vm611_vm2, %v1797_v32  ;;  %1747 = vmatmul.msk.bf16.gmra.mxu1 %vm611_vm2, %v1813_v33 }
  0x79   : > { %1763 = vmatmul.msk.bf16.gmra.mxu2 %vm611_vm2, %v1829_v34  ;;  %1779 = vmatmul.msk.bf16.gmra.mxu3 %vm611_vm2, %v1845_v35  ;;  %v1802_v34 = vld [vmem:[%s1919_s21 + $0x58] sm:$0xff] }
  0x7a   : > { %v1818_v35 = vld [vmem:[%s1919_s21 + $0xd8] sm:$0xff] }
  0x88   : > { %1732 = vmatmul.msk.bf16.gmra.mxu0 %vm611_vm2, %v1798_v36  ;;  %1748 = vmatmul.msk.bf16.gmra.mxu1 %vm611_vm2, %v1814_v37 }
  0x89   : > { %1764 = vmatmul.msk.bf16.gmra.mxu2 %vm611_vm2, %v1830_v38  ;;  %1780 = vmatmul.msk.bf16.gmra.mxu3 %vm611_vm2, %v1846_v39 }
  0x95   : > { %v820_v42 = vpop.f32.mrf.mxu0  ;;  %v900_v43 = vpop.f32.mrf.mxu1 }
  0x96   : > { %v1140_v46 = vmax.f32 %v820_v42, 0.0  ;;  %v1172_v47 = vmax.f32 %v900_v43, 0.0 }
  0x98   : > { %1268 = vst [vmem:[%s1991_s25] sm:$0xff] %v1140_v46  ;;  %1733 = vmatmul.msk.bf16.gmra.mxu0 %vm611_vm2, %v1799_v40  ;;  %1749 = vmatmul.msk.bf16.gmra.mxu1 %vm611_vm2, %v1815_v41  ;;  %v1834_v40 = vld [vmem:[%s1919_s21 + $0x158] sm:$0xff] }
  0x99   : > { %1300 = vst [vmem:[%s1991_s25 + $0x100] sm:$0xff] %v1172_v47  ;;  %1765 = vmatmul.msk.bf16.gmra.mxu2 %vm611_vm2, %v1831_v44  ;;  %1781 = vmatmul.msk.bf16.gmra.mxu3 %vm611_vm2, %v1847_v45  ;;  %v1850_v41 = vld [vmem:[%s1919_s21 + $0x1d8] sm:$0xff] }
  0x9c   : > { %v980_v48 = vpop.f32.mrf.mxu2  ;;  %v1060_v49 = vpop.f32.mrf.mxu3 }
  0x9d   : > { %v1204_v50 = vmax.f32 %v980_v48, 0.0  ;;  %v1236_v51 = vmax.f32 %v1060_v49, 0.0  ;;  %v822_v52 = vpop.f32.mrf.mxu0  ;;  %v902_v53 = vpop.f32.mrf.mxu1 }
  0x9e   : > { %v1141_v54 = vmax.f32 %v822_v52, 0.0  ;;  %v1173_v55 = vmax.f32 %v902_v53, 0.0 }
  0x9f   : > { %1332 = vst [vmem:[%s1991_s25 + $0x200] sm:$0xff] %v1204_v50 }
  0xa0   : > { %1364 = vst [vmem:[%s1991_s25 + $0x300] sm:$0xff] %v1236_v51 }
  0xa1   : > { %1269 = vst [vmem:[%s1991_s25 + $0x8] sm:$0xff] %v1141_v54  ;;  %v1803_v54 = vld [vmem:[%s1919_s21 + $0x60] sm:$0xff] }
  0xa2   : > { %1301 = vst [vmem:[%s1991_s25 + $0x108] sm:$0xff] %v1173_v55  ;;  %v1819_v55 = vld [vmem:[%s1919_s21 + $0xe0] sm:$0xff] }
  0xa4   : > { %v982_v56 = vpop.f32.mrf.mxu2  ;;  %v1062_v57 = vpop.f32.mrf.mxu3 }
  0xa5   : > { %v1205_v60 = vmax.f32 %v982_v56, 0.0  ;;  %v1237_v61 = vmax.f32 %v1062_v57, 0.0  ;;  %v825_v62 = vpop.f32.mrf.mxu0  ;;  %v905_v63 = vpop.f32.mrf.mxu1 }
  0xa6   : > { %v1142_v2 = vmax.f32 %v825_v62, 0.0  ;;  %v1174_v3 = vmax.f32 %v905_v63, 0.0 }
  0xa7   : > { %1333 = vst [vmem:[%s1991_s25 + $0x208] sm:$0xff] %v1205_v60  ;;  %v1835_v60 = vld [vmem:[%s1919_s21 + $0x160] sm:$0xff] }
  0xa8   : > { %1365 = vst [vmem:[%s1991_s25 + $0x308] sm:$0xff] %v1237_v61  ;;  %1734 = vmatmul.msk.bf16.gmra.mxu0 %vm611_vm2, %v1800_v58  ;;  %1750 = vmatmul.msk.bf16.gmra.mxu1 %vm611_vm2, %v1816_v59  ;;  %v1851_v61 = vld [vmem:[%s1919_s21 + $0x1e0] sm:$0xff] }
  0xa9   : > { %1270 = vst [vmem:[%s1991_s25 + $0x10] sm:$0xff] %v1142_v2  ;;  %1766 = vmatmul.msk.bf16.gmra.mxu2 %vm611_vm2, %v1832_v0  ;;  %1782 = vmatmul.msk.bf16.gmra.mxu3 %vm611_vm2, %v1848_v1 }
  0xaa   : > { %1302 = vst [vmem:[%s1991_s25 + $0x110] sm:$0xff] %v1174_v3 }
  0xac   : > { %v985_v4 = vpop.f32.mrf.mxu2  ;;  %v1065_v5 = vpop.f32.mrf.mxu3 }
  0xad   : > { %v1206_v6 = vmax.f32 %v985_v4, 0.0  ;;  %v1238_v7 = vmax.f32 %v1065_v5, 0.0  ;;  %v827_v8 = vpop.f32.mrf.mxu0  ;;  %v907_v9 = vpop.f32.mrf.mxu1 }
  0xae   : > { %v1143_v10 = vmax.f32 %v827_v8, 0.0  ;;  %v1175_v11 = vmax.f32 %v907_v9, 0.0 }
  0xaf   : > { %1334 = vst [vmem:[%s1991_s25 + $0x210] sm:$0xff] %v1206_v6 }
  0xb0   : > { %1366 = vst [vmem:[%s1991_s25 + $0x310] sm:$0xff] %v1238_v7 }
  0xb1   : > { %1271 = vst [vmem:[%s1991_s25 + $0x18] sm:$0xff] %v1143_v10  ;;  %v1804_v10 = vld [vmem:[%s1919_s21 + $0x68] sm:$0xff] }
  0xb2   : > { %1303 = vst [vmem:[%s1991_s25 + $0x118] sm:$0xff] %v1175_v11  ;;  %v1820_v11 = vld [vmem:[%s1919_s21 + $0xe8] sm:$0xff] }
  0xb4   : > { %v987_v12 = vpop.f32.mrf.mxu2  ;;  %v1067_v13 = vpop.f32.mrf.mxu3 }
  0xb5   : > { %v1207_v16 = vmax.f32 %v987_v12, 0.0  ;;  %v1239_v17 = vmax.f32 %v1067_v13, 0.0  ;;  %v830_v18 = vpop.f32.mrf.mxu0  ;;  %v910_v19 = vpop.f32.mrf.mxu1 }
  0xb6   : > { %v1144_v22 = vmax.f32 %v830_v18, 0.0  ;;  %v1176_v23 = vmax.f32 %v910_v19, 0.0 }
  0xb7   : > { %1335 = vst [vmem:[%s1991_s25 + $0x218] sm:$0xff] %v1207_v16  ;;  %v1836_v16 = vld [vmem:[%s1919_s21 + $0x168] sm:$0xff] }
  0xb8   : > { %1367 = vst [vmem:[%s1991_s25 + $0x318] sm:$0xff] %v1239_v17  ;;  %1735 = vmatmul.msk.bf16.gmra.mxu0 %vm611_vm2, %v1801_v14  ;;  %1751 = vmatmul.msk.bf16.gmra.mxu1 %vm611_vm2, %v1817_v15  ;;  %v1852_v17 = vld [vmem:[%s1919_s21 + $0x1e8] sm:$0xff] }
  0xb9   : > { %1272 = vst [vmem:[%s1991_s25 + $0x20] sm:$0xff] %v1144_v22  ;;  %1767 = vmatmul.msk.bf16.gmra.mxu2 %vm611_vm2, %v1833_v20  ;;  %1783 = vmatmul.msk.bf16.gmra.mxu3 %vm611_vm2, %v1849_v21 }
  0xba   : > { %1304 = vst [vmem:[%s1991_s25 + $0x120] sm:$0xff] %v1176_v23 }
  0xbc   : > { %v990_v24 = vpop.f32.mrf.mxu2  ;;  %v1070_v25 = vpop.f32.mrf.mxu3 }
  0xbd   : > { %v1208_v26 = vmax.f32 %v990_v24, 0.0  ;;  %v1240_v27 = vmax.f32 %v1070_v25, 0.0  ;;  %v832_v28 = vpop.f32.mrf.mxu0  ;;  %v912_v29 = vpop.f32.mrf.mxu1 }
  0xbe   : > { %v1145_v30 = vmax.f32 %v832_v28, 0.0  ;;  %v1177_v31 = vmax.f32 %v912_v29, 0.0 }
  0xbf   : > { %1336 = vst [vmem:[%s1991_s25 + $0x220] sm:$0xff] %v1208_v26 }
  0xc0   : > { %1368 = vst [vmem:[%s1991_s25 + $0x320] sm:$0xff] %v1240_v27 }
  0xc1   : > { %1273 = vst [vmem:[%s1991_s25 + $0x28] sm:$0xff] %v1145_v30  ;;  %v1805_v30 = vld [vmem:[%s1919_s21 + $0x70] sm:$0xff] }
  0xc2   : > { %1305 = vst [vmem:[%s1991_s25 + $0x128] sm:$0xff] %v1177_v31  ;;  %v1821_v31 = vld [vmem:[%s1919_s21 + $0xf0] sm:$0xff] }
  0xc4   : > { %v992_v32 = vpop.f32.mrf.mxu2  ;;  %v1072_v33 = vpop.f32.mrf.mxu3 }
  0xc5   : > { %v1209_v36 = vmax.f32 %v992_v32, 0.0  ;;  %v1241_v37 = vmax.f32 %v1072_v33, 0.0  ;;  %v835_v38 = vpop.f32.mrf.mxu0  ;;  %v915_v39 = vpop.f32.mrf.mxu1 }
  0xc6   : > { %v1146_v42 = vmax.f32 %v835_v38, 0.0  ;;  %v1178_v43 = vmax.f32 %v915_v39, 0.0 }
  0xc7   : > { %1337 = vst [vmem:[%s1991_s25 + $0x228] sm:$0xff] %v1209_v36  ;;  %v1837_v36 = vld [vmem:[%s1919_s21 + $0x170] sm:$0xff] }
  0xc8   : > { %1369 = vst [vmem:[%s1991_s25 + $0x328] sm:$0xff] %v1241_v37  ;;  %1736 = vmatmul.msk.bf16.gmra.mxu0 %vm611_vm2, %v1802_v34  ;;  %1752 = vmatmul.msk.bf16.gmra.mxu1 %vm611_vm2, %v1818_v35  ;;  %v1853_v37 = vld [vmem:[%s1919_s21 + $0x1f0] sm:$0xff] }
  0xc9   : > { %1274 = vst [vmem:[%s1991_s25 + $0x30] sm:$0xff] %v1146_v42  ;;  %1768 = vmatmul.msk.bf16.gmra.mxu2 %vm611_vm2, %v1834_v40  ;;  %1784 = vmatmul.msk.bf16.gmra.mxu3 %vm611_vm2, %v1850_v41 }
  0xca   : > { %1306 = vst [vmem:[%s1991_s25 + $0x130] sm:$0xff] %v1178_v43 }
  0xcc   : > { %v995_v44 = vpop.f32.mrf.mxu2  ;;  %v1075_v45 = vpop.f32.mrf.mxu3 }
  0xcd   : > { %v1210_v46 = vmax.f32 %v995_v44, 0.0  ;;  %v1242_v47 = vmax.f32 %v1075_v45, 0.0  ;;  %v837_v48 = vpop.f32.mrf.mxu0  ;;  %v917_v49 = vpop.f32.mrf.mxu1 }
  0xce   : > { %v1147_v50 = vmax.f32 %v837_v48, 0.0  ;;  %v1179_v51 = vmax.f32 %v917_v49, 0.0 }
  0xcf   : > { %1338 = vst [vmem:[%s1991_s25 + $0x230] sm:$0xff] %v1210_v46 }
  0xd0   : > { %1370 = vst [vmem:[%s1991_s25 + $0x330] sm:$0xff] %v1242_v47 }
  0xd1   : > { %1275 = vst [vmem:[%s1991_s25 + $0x38] sm:$0xff] %v1147_v50  ;;  %v1806_v50 = vld [vmem:[%s1919_s21 + $0x78] sm:$0xff] }
  0xd2   : > { %1307 = vst [vmem:[%s1991_s25 + $0x138] sm:$0xff] %v1179_v51  ;;  %v1822_v51 = vld [vmem:[%s1919_s21 + $0xf8] sm:$0xff] }
  0xd4   : > { %v997_v52 = vpop.f32.mrf.mxu2  ;;  %v1077_v53 = vpop.f32.mrf.mxu3 }
  0xd5   : > { %v1211_v56 = vmax.f32 %v997_v52, 0.0  ;;  %v1243_v57 = vmax.f32 %v1077_v53, 0.0  ;;  %v840_v58 = vpop.f32.mrf.mxu0  ;;  %v920_v59 = vpop.f32.mrf.mxu1 }
  0xd6   : > { %v1148_v62 = vmax.f32 %v840_v58, 0.0  ;;  %v1180_v63 = vmax.f32 %v920_v59, 0.0 }
  0xd7   : > { %1339 = vst [vmem:[%s1991_s25 + $0x238] sm:$0xff] %v1211_v56  ;;  %v1838_v56 = vld [vmem:[%s1919_s21 + $0x178] sm:$0xff] }
  0xd8   : > { %1371 = vst [vmem:[%s1991_s25 + $0x338] sm:$0xff] %v1243_v57  ;;  %1737 = vmatmul.msk.bf16.gmra.mxu0 %vm611_vm2, %v1803_v54  ;;  %1753 = vmatmul.msk.bf16.gmra.mxu1 %vm611_vm2, %v1819_v55  ;;  %v1854_v57 = vld [vmem:[%s1919_s21 + $0x1f8] sm:$0xff] }
  0xd9   : > { %1276 = vst [vmem:[%s1991_s25 + $0x40] sm:$0xff] %v1148_v62  ;;  %1769 = vmatmul.msk.bf16.gmra.mxu2 %vm611_vm2, %v1835_v60  ;;  %1785 = vmatmul.msk.bf16.gmra.mxu3 %vm611_vm2, %v1851_v61 }
  0xda   : > { %1308 = vst [vmem:[%s1991_s25 + $0x140] sm:$0xff] %v1180_v63 }
  0xdc   : > { %v1000_v0 = vpop.f32.mrf.mxu2  ;;  %v1080_v1 = vpop.f32.mrf.mxu3 }
  0xdd   : > { %v1212_v2 = vmax.f32 %v1000_v0, 0.0  ;;  %v1244_v3 = vmax.f32 %v1080_v1, 0.0  ;;  %v842_v4 = vpop.f32.mrf.mxu0  ;;  %v922_v5 = vpop.f32.mrf.mxu1 }
  0xde   : > { %v1149_v6 = vmax.f32 %v842_v4, 0.0  ;;  %v1181_v7 = vmax.f32 %v922_v5, 0.0 }
  0xdf   : > { %1340 = vst [vmem:[%s1991_s25 + $0x240] sm:$0xff] %v1212_v2 }
  0xe0   : > { %1372 = vst [vmem:[%s1991_s25 + $0x340] sm:$0xff] %v1244_v3 }
  0xe1   : > { %1277 = vst [vmem:[%s1991_s25 + $0x48] sm:$0xff] %v1149_v6 }
  0xe2   : > { %1309 = vst [vmem:[%s1991_s25 + $0x148] sm:$0xff] %v1181_v7 }
  0xe4   : > { %v1002_v8 = vpop.f32.mrf.mxu2  ;;  %v1082_v9 = vpop.f32.mrf.mxu3 }
  0xe5   : > { %v1213_v12 = vmax.f32 %v1002_v8, 0.0  ;;  %v1245_v13 = vmax.f32 %v1082_v9, 0.0  ;;  %v845_v14 = vpop.f32.mrf.mxu0  ;;  %v925_v15 = vpop.f32.mrf.mxu1 }
  0xe6   : > { %v1150_v18 = vmax.f32 %v845_v14, 0.0  ;;  %v1182_v19 = vmax.f32 %v925_v15, 0.0 }
  0xe7   : > { %1341 = vst [vmem:[%s1991_s25 + $0x248] sm:$0xff] %v1213_v12 }
  0xe8   : > { %1373 = vst [vmem:[%s1991_s25 + $0x348] sm:$0xff] %v1245_v13  ;;  %1738 = vmatmul.msk.bf16.gmra.mxu0 %vm611_vm2, %v1804_v10  ;;  %1754 = vmatmul.msk.bf16.gmra.mxu1 %vm611_vm2, %v1820_v11 }
  0xe9   : > { %1278 = vst [vmem:[%s1991_s25 + $0x50] sm:$0xff] %v1150_v18  ;;  %1770 = vmatmul.msk.bf16.gmra.mxu2 %vm611_vm2, %v1836_v16  ;;  %1786 = vmatmul.msk.bf16.gmra.mxu3 %vm611_vm2, %v1852_v17 }
  0xea   : > { %1310 = vst [vmem:[%s1991_s25 + $0x150] sm:$0xff] %v1182_v19 }
  0xec   : > { %v1005_v20 = vpop.f32.mrf.mxu2  ;;  %v1085_v21 = vpop.f32.mrf.mxu3 }
  0xed   : > { %v1214_v22 = vmax.f32 %v1005_v20, 0.0  ;;  %v1246_v23 = vmax.f32 %v1085_v21, 0.0  ;;  %v847_v24 = vpop.f32.mrf.mxu0  ;;  %v927_v25 = vpop.f32.mrf.mxu1 }
  0xee   : > { %v1151_v26 = vmax.f32 %v847_v24, 0.0  ;;  %v1183_v27 = vmax.f32 %v927_v25, 0.0 }
  0xef   : > { %1342 = vst [vmem:[%s1991_s25 + $0x250] sm:$0xff] %v1214_v22 }
  0xf0   : > { %1374 = vst [vmem:[%s1991_s25 + $0x350] sm:$0xff] %v1246_v23 }
  0xf1   : > { %1279 = vst [vmem:[%s1991_s25 + $0x58] sm:$0xff] %v1151_v26 }
  0xf2   : > { %1311 = vst [vmem:[%s1991_s25 + $0x158] sm:$0xff] %v1183_v27 }
  0xf4   : > { %v1007_v28 = vpop.f32.mrf.mxu2  ;;  %v1087_v29 = vpop.f32.mrf.mxu3 }
  0xf5   : > { %v1215_v32 = vmax.f32 %v1007_v28, 0.0  ;;  %v1247_v33 = vmax.f32 %v1087_v29, 0.0  ;;  %v850_v34 = vpop.f32.mrf.mxu0  ;;  %v930_v35 = vpop.f32.mrf.mxu1 }
  0xf6   : > { %v1152_v38 = vmax.f32 %v850_v34, 0.0  ;;  %v1184_v39 = vmax.f32 %v930_v35, 0.0 }
  0xf7   : > { %1343 = vst [vmem:[%s1991_s25 + $0x258] sm:$0xff] %v1215_v32 }
  0xf8   : > { %1375 = vst [vmem:[%s1991_s25 + $0x358] sm:$0xff] %v1247_v33  ;;  %1739 = vmatmul.msk.bf16.gmra.mxu0 %vm611_vm2, %v1805_v30  ;;  %1755 = vmatmul.msk.bf16.gmra.mxu1 %vm611_vm2, %v1821_v31 }
  0xf9   : > { %1280 = vst [vmem:[%s1991_s25 + $0x60] sm:$0xff] %v1152_v38  ;;  %1771 = vmatmul.msk.bf16.gmra.mxu2 %vm611_vm2, %v1837_v36  ;;  %1787 = vmatmul.msk.bf16.gmra.mxu3 %vm611_vm2, %v1853_v37 }
  0xfa   : > { %1312 = vst [vmem:[%s1991_s25 + $0x160] sm:$0xff] %v1184_v39 }
  0xfc   : > { %v1010_v40 = vpop.f32.mrf.mxu2  ;;  %v1090_v41 = vpop.f32.mrf.mxu3 }
  0xfd   : > { %v1216_v42 = vmax.f32 %v1010_v40, 0.0  ;;  %v1248_v43 = vmax.f32 %v1090_v41, 0.0  ;;  %v852_v44 = vpop.f32.mrf.mxu0  ;;  %v932_v45 = vpop.f32.mrf.mxu1 }
  0xfe   : > { %v1153_v46 = vmax.f32 %v852_v44, 0.0  ;;  %v1185_v47 = vmax.f32 %v932_v45, 0.0 }
  0xff   : > { %1344 = vst [vmem:[%s1991_s25 + $0x260] sm:$0xff] %v1216_v42 }
 0x100   : > { %1376 = vst [vmem:[%s1991_s25 + $0x360] sm:$0xff] %v1248_v43 }
 0x101   : > { %1281 = vst [vmem:[%s1991_s25 + $0x68] sm:$0xff] %v1153_v46 }
 0x102   : > { %1313 = vst [vmem:[%s1991_s25 + $0x168] sm:$0xff] %v1185_v47 }
 0x104   : > { %v1012_v48 = vpop.f32.mrf.mxu2  ;;  %v1092_v49 = vpop.f32.mrf.mxu3 }
 0x105   : > { %v1217_v52 = vmax.f32 %v1012_v48, 0.0  ;;  %v1249_v53 = vmax.f32 %v1092_v49, 0.0  ;;  %v855_v54 = vpop.f32.mrf.mxu0  ;;  %v935_v55 = vpop.f32.mrf.mxu1 }
 0x106   : > { %v1154_v58 = vmax.f32 %v855_v54, 0.0  ;;  %v1186_v59 = vmax.f32 %v935_v55, 0.0 }
 0x107   : > { %1345 = vst [vmem:[%s1991_s25 + $0x268] sm:$0xff] %v1217_v52 }
 0x108   : > { %1377 = vst [vmem:[%s1991_s25 + $0x368] sm:$0xff] %v1249_v53  ;;  %1740 = vmatmul.msk.bf16.gmra.mxu0 %vm611_vm2, %v1806_v50  ;;  %1756 = vmatmul.msk.bf16.gmra.mxu1 %vm611_vm2, %v1822_v51 }
 0x109   : > { %1282 = vst [vmem:[%s1991_s25 + $0x70] sm:$0xff] %v1154_v58  ;;  %1772 = vmatmul.msk.bf16.gmra.mxu2 %vm611_vm2, %v1838_v56  ;;  %1788 = vmatmul.msk.bf16.gmra.mxu3 %vm611_vm2, %v1854_v57 }
 0x10a   : > { %1314 = vst [vmem:[%s1991_s25 + $0x170] sm:$0xff] %v1186_v59 }
 0x10c   : > { %v1015_v60 = vpop.f32.mrf.mxu2  ;;  %v1095_v61 = vpop.f32.mrf.mxu3 }
 0x10d   : > { %v1218_v62 = vmax.f32 %v1015_v60, 0.0  ;;  %v1250_v63 = vmax.f32 %v1095_v61, 0.0  ;;  %v857_v0 = vpop.f32.mrf.mxu0  ;;  %v937_v1 = vpop.f32.mrf.mxu1 }
 0x10e   : > { %v1155_v2 = vmax.f32 %v857_v0, 0.0  ;;  %v1187_v3 = vmax.f32 %v937_v1, 0.0 }
 0x10f   : > { %1346 = vst [vmem:[%s1991_s25 + $0x270] sm:$0xff] %v1218_v62 }
 0x110   : > { %1378 = vst [vmem:[%s1991_s25 + $0x370] sm:$0xff] %v1250_v63 }
 0x111   : > { %1283 = vst [vmem:[%s1991_s25 + $0x78] sm:$0xff] %v1155_v2 }
 0x112   : > { %1315 = vst [vmem:[%s1991_s25 + $0x178] sm:$0xff] %v1187_v3 }
 0x114   : > { %v1017_v4 = vpop.f32.mrf.mxu2  ;;  %v1097_v5 = vpop.f32.mrf.mxu3 }
 0x115   : > { %v1219_v6 = vmax.f32 %v1017_v4, 0.0  ;;  %v1251_v7 = vmax.f32 %v1097_v5, 0.0  ;;  %v860_v8 = vpop.f32.mrf.mxu0  ;;  %v940_v9 = vpop.f32.mrf.mxu1 }
 0x116   : > { %v1156_v10 = vmax.f32 %v860_v8, 0.0  ;;  %v1188_v11 = vmax.f32 %v940_v9, 0.0 }
 0x117   : > { %1347 = vst [vmem:[%s1991_s25 + $0x278] sm:$0xff] %v1219_v6 }
 0x118   : > { %1379 = vst [vmem:[%s1991_s25 + $0x378] sm:$0xff] %v1251_v7 }
 0x119   : > { %1284 = vst [vmem:[%s1991_s25 + $0x80] sm:$0xff] %v1156_v10 }
 0x11a   : > { %1316 = vst [vmem:[%s1991_s25 + $0x180] sm:$0xff] %v1188_v11 }
 0x11c   : > { %v1020_v12 = vpop.f32.mrf.mxu2  ;;  %v1100_v13 = vpop.f32.mrf.mxu3 }
 0x11d   : > { %v1220_v14 = vmax.f32 %v1020_v12, 0.0  ;;  %v1252_v15 = vmax.f32 %v1100_v13, 0.0  ;;  %v862_v16 = vpop.f32.mrf.mxu0  ;;  %v942_v17 = vpop.f32.mrf.mxu1 }
 0x11e   : > { %v1157_v18 = vmax.f32 %v862_v16, 0.0  ;;  %v1189_v19 = vmax.f32 %v942_v17, 0.0 }
 0x11f   : > { %1348 = vst [vmem:[%s1991_s25 + $0x280] sm:$0xff] %v1220_v14 }
 0x120   : > { %1380 = vst [vmem:[%s1991_s25 + $0x380] sm:$0xff] %v1252_v15 }
 0x121   : > { %1285 = vst [vmem:[%s1991_s25 + $0x88] sm:$0xff] %v1157_v18 }
 0x122   : > { %1317 = vst [vmem:[%s1991_s25 + $0x188] sm:$0xff] %v1189_v19 }
 0x124   : > { %v1022_v20 = vpop.f32.mrf.mxu2  ;;  %v1102_v21 = vpop.f32.mrf.mxu3 }
 0x125   : > { %v1221_v22 = vmax.f32 %v1022_v20, 0.0  ;;  %v1253_v23 = vmax.f32 %v1102_v21, 0.0  ;;  %v865_v24 = vpop.f32.mrf.mxu0  ;;  %v945_v25 = vpop.f32.mrf.mxu1 }
 0x126   : > { %v1158_v26 = vmax.f32 %v865_v24, 0.0  ;;  %v1190_v27 = vmax.f32 %v945_v25, 0.0 }
 0x127   : > { %1349 = vst [vmem:[%s1991_s25 + $0x288] sm:$0xff] %v1221_v22 }
 0x128   : > { %1381 = vst [vmem:[%s1991_s25 + $0x388] sm:$0xff] %v1253_v23 }
 0x129   : > { %1286 = vst [vmem:[%s1991_s25 + $0x90] sm:$0xff] %v1158_v26 }
 0x12a   : > { %1318 = vst [vmem:[%s1991_s25 + $0x190] sm:$0xff] %v1190_v27 }
 0x12c   : > { %v1025_v28 = vpop.f32.mrf.mxu2  ;;  %v1105_v29 = vpop.f32.mrf.mxu3 }
 0x12d   : > { %v1222_v30 = vmax.f32 %v1025_v28, 0.0  ;;  %v1254_v31 = vmax.f32 %v1105_v29, 0.0  ;;  %v867_v32 = vpop.f32.mrf.mxu0  ;;  %v947_v33 = vpop.f32.mrf.mxu1 }
 0x12e   : > { %v1159_v34 = vmax.f32 %v867_v32, 0.0  ;;  %v1191_v35 = vmax.f32 %v947_v33, 0.0 }
 0x12f   : > { %1350 = vst [vmem:[%s1991_s25 + $0x290] sm:$0xff] %v1222_v30 }
 0x130   : > { %1382 = vst [vmem:[%s1991_s25 + $0x390] sm:$0xff] %v1254_v31 }
 0x131   : > { %1287 = vst [vmem:[%s1991_s25 + $0x98] sm:$0xff] %v1159_v34 }
 0x132   : > { %1319 = vst [vmem:[%s1991_s25 + $0x198] sm:$0xff] %v1191_v35 }
 0x134   : > { %v1027_v36 = vpop.f32.mrf.mxu2  ;;  %v1107_v37 = vpop.f32.mrf.mxu3 }
 0x135   : > { %v1223_v38 = vmax.f32 %v1027_v36, 0.0  ;;  %v1255_v39 = vmax.f32 %v1107_v37, 0.0  ;;  %v870_v40 = vpop.f32.mrf.mxu0  ;;  %v950_v41 = vpop.f32.mrf.mxu1 }
 0x136   : > { %v1160_v42 = vmax.f32 %v870_v40, 0.0  ;;  %v1192_v43 = vmax.f32 %v950_v41, 0.0 }
 0x137   : > { %1351 = vst [vmem:[%s1991_s25 + $0x298] sm:$0xff] %v1223_v38 }
 0x138   : > { %1383 = vst [vmem:[%s1991_s25 + $0x398] sm:$0xff] %v1255_v39 }
 0x139   : > { %1288 = vst [vmem:[%s1991_s25 + $0xa0] sm:$0xff] %v1160_v42 }
 0x13a   : > { %1320 = vst [vmem:[%s1991_s25 + $0x1a0] sm:$0xff] %v1192_v43 }
 0x13c   : > { %v1030_v44 = vpop.f32.mrf.mxu2  ;;  %v1110_v45 = vpop.f32.mrf.mxu3 }
 0x13d   : > { %v1224_v46 = vmax.f32 %v1030_v44, 0.0  ;;  %v1256_v47 = vmax.f32 %v1110_v45, 0.0  ;;  %v872_v48 = vpop.f32.mrf.mxu0  ;;  %v952_v49 = vpop.f32.mrf.mxu1 }
 0x13e   : > { %v1161_v50 = vmax.f32 %v872_v48, 0.0  ;;  %v1193_v51 = vmax.f32 %v952_v49, 0.0 }
 0x13f   : > { %1352 = vst [vmem:[%s1991_s25 + $0x2a0] sm:$0xff] %v1224_v46 }
 0x140   : > { %1384 = vst [vmem:[%s1991_s25 + $0x3a0] sm:$0xff] %v1256_v47 }
 0x141   : > { %1289 = vst [vmem:[%s1991_s25 + $0xa8] sm:$0xff] %v1161_v50 }
 0x142   : > { %1321 = vst [vmem:[%s1991_s25 + $0x1a8] sm:$0xff] %v1193_v51 }
 0x144   : > { %v1032_v52 = vpop.f32.mrf.mxu2  ;;  %v1112_v53 = vpop.f32.mrf.mxu3 }
 0x145   : > { %v1225_v54 = vmax.f32 %v1032_v52, 0.0  ;;  %v1257_v55 = vmax.f32 %v1112_v53, 0.0  ;;  %v875_v56 = vpop.f32.mrf.mxu0  ;;  %v955_v57 = vpop.f32.mrf.mxu1 }
 0x146   : > { %v1162_v58 = vmax.f32 %v875_v56, 0.0  ;;  %v1194_v59 = vmax.f32 %v955_v57, 0.0 }
 0x147   : > { %1353 = vst [vmem:[%s1991_s25 + $0x2a8] sm:$0xff] %v1225_v54 }
 0x148   : > { %1385 = vst [vmem:[%s1991_s25 + $0x3a8] sm:$0xff] %v1257_v55 }
 0x149   : > { %1290 = vst [vmem:[%s1991_s25 + $0xb0] sm:$0xff] %v1162_v58 }
 0x14a   : > { %1322 = vst [vmem:[%s1991_s25 + $0x1b0] sm:$0xff] %v1194_v59 }
 0x14c   : > { %v1035_v60 = vpop.f32.mrf.mxu2  ;;  %v1115_v61 = vpop.f32.mrf.mxu3 }
 0x14d   : > { %v1226_v62 = vmax.f32 %v1035_v60, 0.0  ;;  %v1258_v63 = vmax.f32 %v1115_v61, 0.0  ;;  %v877_v0 = vpop.f32.mrf.mxu0  ;;  %v957_v1 = vpop.f32.mrf.mxu1 }
 0x14e   : > { %v1163_v2 = vmax.f32 %v877_v0, 0.0  ;;  %v1195_v3 = vmax.f32 %v957_v1, 0.0 }
 0x14f   : > { %1354 = vst [vmem:[%s1991_s25 + $0x2b0] sm:$0xff] %v1226_v62 }
 0x150   : > { %1386 = vst [vmem:[%s1991_s25 + $0x3b0] sm:$0xff] %v1258_v63 }
 0x151   : > { %1291 = vst [vmem:[%s1991_s25 + $0xb8] sm:$0xff] %v1163_v2 }
 0x152   : > { %1323 = vst [vmem:[%s1991_s25 + $0x1b8] sm:$0xff] %v1195_v3 }
 0x154   : > { %v1037_v4 = vpop.f32.mrf.mxu2  ;;  %v1117_v5 = vpop.f32.mrf.mxu3 }
 0x155   : > { %v1227_v6 = vmax.f32 %v1037_v4, 0.0  ;;  %v1259_v7 = vmax.f32 %v1117_v5, 0.0  ;;  %v880_v8 = vpop.f32.mrf.mxu0  ;;  %v960_v9 = vpop.f32.mrf.mxu1 }
 0x156   : > { %v1164_v10 = vmax.f32 %v880_v8, 0.0  ;;  %v1196_v11 = vmax.f32 %v960_v9, 0.0 }
 0x157   : > { %1355 = vst [vmem:[%s1991_s25 + $0x2b8] sm:$0xff] %v1227_v6 }
 0x158   : > { %1387 = vst [vmem:[%s1991_s25 + $0x3b8] sm:$0xff] %v1259_v7 }
 0x159   : > { %1292 = vst [vmem:[%s1991_s25 + $0xc0] sm:$0xff] %v1164_v10 }
 0x15a   : > { %1324 = vst [vmem:[%s1991_s25 + $0x1c0] sm:$0xff] %v1196_v11 }
 0x15c   : > { %v1040_v12 = vpop.f32.mrf.mxu2  ;;  %v1120_v13 = vpop.f32.mrf.mxu3 }
 0x15d   : > { %v1228_v14 = vmax.f32 %v1040_v12, 0.0  ;;  %v1260_v15 = vmax.f32 %v1120_v13, 0.0  ;;  %v882_v16 = vpop.f32.mrf.mxu0  ;;  %v962_v17 = vpop.f32.mrf.mxu1 }
 0x15e   : > { %v1165_v18 = vmax.f32 %v882_v16, 0.0  ;;  %v1197_v19 = vmax.f32 %v962_v17, 0.0 }
 0x15f   : > { %1356 = vst [vmem:[%s1991_s25 + $0x2c0] sm:$0xff] %v1228_v14 }
 0x160   : > { %1388 = vst [vmem:[%s1991_s25 + $0x3c0] sm:$0xff] %v1260_v15 }
 0x161   : > { %1293 = vst [vmem:[%s1991_s25 + $0xc8] sm:$0xff] %v1165_v18 }
 0x162   : > { %1325 = vst [vmem:[%s1991_s25 + $0x1c8] sm:$0xff] %v1197_v19 }
 0x164   : > { %v1042_v20 = vpop.f32.mrf.mxu2  ;;  %v1122_v21 = vpop.f32.mrf.mxu3 }
 0x165   : > { %v1229_v22 = vmax.f32 %v1042_v20, 0.0  ;;  %v1261_v23 = vmax.f32 %v1122_v21, 0.0  ;;  %v885_v24 = vpop.f32.mrf.mxu0  ;;  %v965_v25 = vpop.f32.mrf.mxu1 }
 0x166   : > { %v1166_v26 = vmax.f32 %v885_v24, 0.0  ;;  %v1198_v27 = vmax.f32 %v965_v25, 0.0 }
 0x167   : > { %1357 = vst [vmem:[%s1991_s25 + $0x2c8] sm:$0xff] %v1229_v22 }
 0x168   : > { %1389 = vst [vmem:[%s1991_s25 + $0x3c8] sm:$0xff] %v1261_v23 }
 0x169   : > { %1294 = vst [vmem:[%s1991_s25 + $0xd0] sm:$0xff] %v1166_v26 }
 0x16a   : > { %1326 = vst [vmem:[%s1991_s25 + $0x1d0] sm:$0xff] %v1198_v27 }
 0x16c   : > { %v1045_v28 = vpop.f32.mrf.mxu2  ;;  %v1125_v29 = vpop.f32.mrf.mxu3 }
 0x16d   : > { %v1230_v30 = vmax.f32 %v1045_v28, 0.0  ;;  %v1262_v31 = vmax.f32 %v1125_v29, 0.0  ;;  %v887_v32 = vpop.f32.mrf.mxu0  ;;  %v967_v33 = vpop.f32.mrf.mxu1 }
 0x16e   : > { %v1167_v34 = vmax.f32 %v887_v32, 0.0  ;;  %v1199_v35 = vmax.f32 %v967_v33, 0.0 }
 0x16f   : > { %1358 = vst [vmem:[%s1991_s25 + $0x2d0] sm:$0xff] %v1230_v30 }
 0x170   : > { %1390 = vst [vmem:[%s1991_s25 + $0x3d0] sm:$0xff] %v1262_v31 }
 0x171   : > { %1295 = vst [vmem:[%s1991_s25 + $0xd8] sm:$0xff] %v1167_v34 }
 0x172   : > { %1327 = vst [vmem:[%s1991_s25 + $0x1d8] sm:$0xff] %v1199_v35 }
 0x174   : > { %v1047_v36 = vpop.f32.mrf.mxu2  ;;  %v1127_v37 = vpop.f32.mrf.mxu3 }
 0x175   : > { %v1231_v38 = vmax.f32 %v1047_v36, 0.0  ;;  %v1263_v39 = vmax.f32 %v1127_v37, 0.0  ;;  %v890_v40 = vpop.f32.mrf.mxu0  ;;  %v970_v41 = vpop.f32.mrf.mxu1 }
 0x176   : > { %v1168_v42 = vmax.f32 %v890_v40, 0.0  ;;  %v1200_v43 = vmax.f32 %v970_v41, 0.0 }
 0x177   : > { %1359 = vst [vmem:[%s1991_s25 + $0x2d8] sm:$0xff] %v1231_v38 }
 0x178   : > { %1391 = vst [vmem:[%s1991_s25 + $0x3d8] sm:$0xff] %v1263_v39 }
 0x179   : > { %1296 = vst [vmem:[%s1991_s25 + $0xe0] sm:$0xff] %v1168_v42 }
 0x17a   : > { %1328 = vst [vmem:[%s1991_s25 + $0x1e0] sm:$0xff] %v1200_v43 }
 0x17c   : > { %v1050_v44 = vpop.f32.mrf.mxu2  ;;  %v1130_v45 = vpop.f32.mrf.mxu3 }
 0x17d   : > { %v1232_v46 = vmax.f32 %v1050_v44, 0.0  ;;  %v1264_v47 = vmax.f32 %v1130_v45, 0.0  ;;  %v892_v48 = vpop.f32.mrf.mxu0  ;;  %v972_v49 = vpop.f32.mrf.mxu1 }
 0x17e   : > { %v1169_v50 = vmax.f32 %v892_v48, 0.0  ;;  %v1201_v51 = vmax.f32 %v972_v49, 0.0 }
 0x17f   : > { %1360 = vst [vmem:[%s1991_s25 + $0x2e0] sm:$0xff] %v1232_v46 }
 0x180   : > { %1392 = vst [vmem:[%s1991_s25 + $0x3e0] sm:$0xff] %v1264_v47 }
 0x181   : > { %1297 = vst [vmem:[%s1991_s25 + $0xe8] sm:$0xff] %v1169_v50 }
 0x182   : > { %1329 = vst [vmem:[%s1991_s25 + $0x1e8] sm:$0xff] %v1201_v51 }
 0x184   : > { %v1052_v52 = vpop.f32.mrf.mxu2  ;;  %v1132_v53 = vpop.f32.mrf.mxu3 }
 0x185   : > { %v1233_v54 = vmax.f32 %v1052_v52, 0.0  ;;  %v1265_v55 = vmax.f32 %v1132_v53, 0.0  ;;  %v895_v56 = vpop.f32.mrf.mxu0  ;;  %v975_v57 = vpop.f32.mrf.mxu1 }
 0x186   : > { %v1170_v58 = vmax.f32 %v895_v56, 0.0  ;;  %v1202_v59 = vmax.f32 %v975_v57, 0.0 }
 0x187   : > { %1361 = vst [vmem:[%s1991_s25 + $0x2e8] sm:$0xff] %v1233_v54 }
 0x188   : > { %1393 = vst [vmem:[%s1991_s25 + $0x3e8] sm:$0xff] %v1265_v55 }
 0x189   : > { %1298 = vst [vmem:[%s1991_s25 + $0xf0] sm:$0xff] %v1170_v58 }
 0x18a   : > { %1330 = vst [vmem:[%s1991_s25 + $0x1f0] sm:$0xff] %v1202_v59 }
 0x18c   : > { %v1055_v60 = vpop.f32.mrf.mxu2  ;;  %v1135_v61 = vpop.f32.mrf.mxu3 }
 0x18d   : > { %v1234_v62 = vmax.f32 %v1055_v60, 0.0  ;;  %v1266_v63 = vmax.f32 %v1135_v61, 0.0  ;;  %v897_v0 = vpop.f32.mrf.mxu0  ;;  %v977_v1 = vpop.f32.mrf.mxu1 }
 0x18e   : > { %v1171_v2 = vmax.f32 %v897_v0, 0.0  ;;  %v1203_v3 = vmax.f32 %v977_v1, 0.0 }
 0x18f   : > { %1362 = vst [vmem:[%s1991_s25 + $0x2f0] sm:$0xff] %v1234_v62 }
 0x190   : > { %1394 = vst [vmem:[%s1991_s25 + $0x3f0] sm:$0xff] %v1266_v63 }
 0x191   : > { %1299 = vst [vmem:[%s1991_s25 + $0xf8] sm:$0xff] %v1171_v2 }
 0x192   : > { %1331 = vst [vmem:[%s1991_s25 + $0x1f8] sm:$0xff] %v1203_v3 }
 0x194   : > { %v1057_v4 = vpop.f32.mrf.mxu2  ;;  %v1137_v5 = vpop.f32.mrf.mxu3 }
 0x195   : > { %v1235_v6 = vmax.f32 %v1057_v4, 0.0  ;;  %v1267_v7 = vmax.f32 %v1137_v5, 0.0 }
 0x197   : > { %1363 = vst [vmem:[%s1991_s25 + $0x2f8] sm:$0xff] %v1235_v6 }
 0x198   : > { %1395 = vst [vmem:[%s1991_s25 + $0x3f8] sm:$0xff] %v1267_v7 }
 0x199 PF: > { %s12_s9 = sadd.s32 1, %s1878_s9  }
 0x19a   : > { %p9_p4 = scmp.ge.s32.totalorder %s12_s9, 4  }
 0x19c   :  { %11 = sbr.rel (!%p9_p4) target bundleno = 1 (0x1), region = 58 }

// kernel: deeplabv3_forward.4
= control target key start
LH: loop header
LB: loop body
LE: loop exit
PB: predicated region body
PF: predicated region fallthrough
CT: control target
= control target key end

     0   :  { %s3690_s9 = smov 0   ;;  %s4443_s0 = inlined_call_operand.vmem [shape: bf16[512,1152], index: 0, kind: input, shape index: {}]   ;;  %s4444_s1 = inlined_call_operand.vmem [shape: bf16[1152,128], index: 1, kind: input, shape index: {}]   ;;  %s4445_s2 = inlined_call_operand.vmem [shape: f32[512,128], index: 2, kind: output, shape index: {}]  }
   0x1 LB: > { %s2543_s10 = sadd.s32 4294967295, %s3673_s9   ;;  %p2547_p0 = scmp.ge.s32.totalorder %s3673_s9, 1  ;;  %s3673_s9 = sphi %s3690_s9, %s12_s9  }
   0x2   : > { %p114_p1 = scmp.lt.s32.totalorder %s3673_s9, 3 }
   0x4   : > { %p115_p2 = pnand %p2547_p0, %p114_p1 }
   0x5   : > { %s2548_s17 = sshll.u32 (!%p115_p2), %s2543_s10, 5 }
   0x6   : > { %118 = sbr.rel (%p115_p2) target bundleno = 752 (0x2f0), region = 28  ;;  %p138_p3 = scmp.lt.s32.totalorder (!%p115_p2), %s2548_s17, 63 }
   0xb   : > { %v3569_v0 = vld [vmem:[%s4444_s1 + $0x38] sm:$0xff]  ;;  %v3568_v1 = vld [vmem:[%s4444_s1 + $0x30] sm:$0xff]  ;;  %v3567_v2 = vld [vmem:[%s4444_s1 + $0x28] sm:$0xff]  ;;  %s4447_s17 = smov (!%p138_p3, %s2548_s17), 63 }
   0xc   : > { %3634 = vmatpush.bf16.msra.mxu1 %v3569_v0  ;;  %3635 = vmatpush.bf16.msra.mxu2 %v3569_v0  ;;  %v3566_v3 = vld [vmem:[%s4444_s1 + $0x20] sm:$0xff]  ;;  %v3565_v4 = vld [vmem:[%s4444_s1 + $0x18] sm:$0xff]  ;;  %v3564_v5 = vld [vmem:[%s4444_s1 + $0x10] sm:$0xff]  ;;  %s3658_s24 = smul.u32 36, %s4447_s17  ;;  %s2551_s7 = sshll.u32 %s4447_s17, 3 }
   0xd   : > { %3636 = vmatpush.bf16.msra.mxu3 %v3569_v0  ;;  %1622 = vmatpush.bf16.msra.mxu0 %v3569_v0  ;;  %v3563_v6 = vld [vmem:[%s4444_s1 + $0x8] sm:$0xff]  ;;  %v3562_v7 = vld [vmem:[%s4444_s1] sm:$0xff]  ;;  %v3585_v16 = vld [vmem:[%s4444_s1 + $0xb8] sm:$0xff]  ;;  %s4322_s11 = scalar_lea.vmem %s4445_s2, %s2551_s7 }
   0xe   : > { %s3725_s29 = scalar_lea.vmem %s4443_s0, %s3658_s24  ;;  %v3593_v17 = vld [vmem:[%s4444_s1 + $0xf8] sm:$0xff]  ;;  %v3584_v24 = vld [vmem:[%s4444_s1 + $0xb0] sm:$0xff]  ;;  %v3583_v28 = vld [vmem:[%s4444_s1 + $0xa8] sm:$0xff] }
   0xf   : > { %v2698_v8 = vld [vmem:[%s3725_s29 + $0x120] sm:$0xf]  ;;  %v3458_v9 = vld [vmem:[%s3725_s29 + $0x140] sm:$0xf0]  ;;  %v3577_v22 = vld [vmem:[%s4444_s1 + $0x78] sm:$0xff] }
  0x10   : > { %3637 = vmatpush.bf16.msra.mxu1 %v3568_v1  ;;  %3638 = vmatpush.bf16.msra.mxu2 %v3568_v1  ;;  %v2842_v10 = vld [vmem:[%s3725_s29 + $0x240] sm:$0xf]  ;;  %v3494_v11 = vld [vmem:[%s3725_s29 + $0x260] sm:$0xf0]  ;;  %v2699_v18 = vor.u32 %v3458_v9, %v2698_v8  ;;  %v3601_v23 = vld [vmem:[%s4444_s1 + $0x138] sm:$0xff] }
  0x11   : > { %3639 = vmatpush.bf16.msra.mxu3 %v3568_v1  ;;  %1623 = vmatpush.bf16.msra.mxu0 %v3568_v1  ;;  %v2986_v12 = vld [vmem:[%s3725_s29 + $0x360] sm:$0xf]  ;;  %v3530_v13 = vld [vmem:[%s3725_s29 + $0x380] sm:$0xf0]  ;;  %v2843_v19 = vor.u32 %v3494_v11, %v2842_v10  ;;  %v3592_v25 = vld [vmem:[%s4444_s1 + $0xf0] sm:$0xff] }
  0x12   : > { %v2554_v14 = vld [vmem:[%s3725_s29] sm:$0xf]  ;;  %v3422_v15 = vld [vmem:[%s3725_s29 + $0x20] sm:$0xf0]  ;;  %v2987_v20 = vor.u32 %v3530_v13, %v2986_v12  ;;  %v3576_v26 = vld [vmem:[%s4444_s1 + $0x70] sm:$0xff] }
  0x13   : > { %v2555_v21 = vor.u32 %v3422_v15, %v2554_v14  ;;  %v3600_v27 = vld [vmem:[%s4444_s1 + $0x130] sm:$0xff]  ;;  %v3591_v29 = vld [vmem:[%s4444_s1 + $0xe8] sm:$0xff]  ;;  %v3582_v33 = vld [vmem:[%s4444_s1 + $0xa0] sm:$0xff] }
  0x14   : > { %3640 = vmatpush.bf16.msra.mxu1 %v3567_v2  ;;  %3641 = vmatpush.bf16.msra.mxu2 %v3567_v2  ;;  %v3575_v30 = vld [vmem:[%s4444_s1 + $0x68] sm:$0xff]  ;;  %v3590_v34 = vld [vmem:[%s4444_s1 + $0xe0] sm:$0xff]  ;;  %v3581_v44 = vld [vmem:[%s4444_s1 + $0x98] sm:$0xff] }
  0x15   : > { %3642 = vmatpush.bf16.msra.mxu3 %v3567_v2  ;;  %1624 = vmatpush.bf16.msra.mxu0 %v3567_v2  ;;  %v3599_v31 = vld [vmem:[%s4444_s1 + $0x128] sm:$0xff]  ;;  %v3574_v42 = vld [vmem:[%s4444_s1 + $0x60] sm:$0xff]  ;;  %v3589_v45 = vld [vmem:[%s4444_s1 + $0xd8] sm:$0xff] }
  0x16   : > { %v2734_v32 = vld [vmem:[%s3725_s29 + $0x168] sm:$0xf]  ;;  %v3467_v35 = vld [vmem:[%s3725_s29 + $0x188] sm:$0xf0]  ;;  %v3598_v43 = vld [vmem:[%s4444_s1 + $0x120] sm:$0xff] }
  0x17   : > { %v2878_v36 = vld [vmem:[%s3725_s29 + $0x288] sm:$0xf]  ;;  %v3503_v37 = vld [vmem:[%s3725_s29 + $0x2a8] sm:$0xf0]  ;;  %v2735_v46 = vor.u32 %v3467_v35, %v2734_v32  ;;  %v3573_v50 = vld [vmem:[%s4444_s1 + $0x58] sm:$0xff] }
  0x18   : > { %3643 = vmatpush.bf16.msra.mxu1 %v3566_v3  ;;  %3644 = vmatpush.bf16.msra.mxu2 %v3566_v3  ;;  %v3022_v38 = vld [vmem:[%s3725_s29 + $0x3a8] sm:$0xf]  ;;  %v3539_v39 = vld [vmem:[%s3725_s29 + $0x3c8] sm:$0xf0]  ;;  %v2879_v47 = vor.u32 %v3503_v37, %v2878_v36  ;;  %v3597_v51 = vld [vmem:[%s4444_s1 + $0x118] sm:$0xff] }
  0x19   : > { %3645 = vmatpush.bf16.msra.mxu3 %v3566_v3  ;;  %1625 = vmatpush.bf16.msra.mxu0 %v3566_v3  ;;  %v2590_v40 = vld [vmem:[%s3725_s29 + $0x48] sm:$0xf]  ;;  %v3431_v41 = vld [vmem:[%s3725_s29 + $0x68] sm:$0xf0]  ;;  %v3023_v48 = vor.u32 %v3539_v39, %v3022_v38  ;;  %v3580_v52 = vld [vmem:[%s4444_s1 + $0x90] sm:$0xff] }
  0x1a   : > { %v2591_v49 = vor.u32 %v3431_v41, %v2590_v40  ;;  %v3588_v53 = vld [vmem:[%s4444_s1 + $0xd0] sm:$0xff]  ;;  %v3579_v56 = vld [vmem:[%s4444_s1 + $0x88] sm:$0xff]  ;;  %v3578_v61 = vld [vmem:[%s4444_s1 + $0x80] sm:$0xff] }
  0x1b   : > { %v3572_v54 = vld [vmem:[%s4444_s1 + $0x50] sm:$0xff]  ;;  %v3587_v57 = vld [vmem:[%s4444_s1 + $0xc8] sm:$0xff]  ;;  %v3586_v62 = vld [vmem:[%s4444_s1 + $0xc0] sm:$0xff] }
  0x1c   : > { %3646 = vmatpush.bf16.msra.mxu1 %v3565_v4  ;;  %3647 = vmatpush.bf16.msra.mxu2 %v3565_v4  ;;  %v3596_v55 = vld [vmem:[%s4444_s1 + $0x110] sm:$0xff]  ;;  %v3571_v58 = vld [vmem:[%s4444_s1 + $0x48] sm:$0xff]  ;;  %v3617_v12 = vld [vmem:[%s4444_s1 + $0x1b8] sm:$0xff] }
  0x1d   : > { %3648 = vmatpush.bf16.msra.mxu3 %v3565_v4  ;;  %1626 = vmatpush.bf16.msra.mxu0 %v3565_v4  ;;  %v3595_v59 = vld [vmem:[%s4444_s1 + $0x108] sm:$0xff]  ;;  %v2770_v60 = vld [vmem:[%s3725_s29 + $0x1b0] sm:$0xf]  ;;  %v3476_v63 = vld [vmem:[%s3725_s29 + $0x1d0] sm:$0xf0] }
  0x1e   : > { %v2914_v0 = vld [vmem:[%s3725_s29 + $0x2d0] sm:$0xf]  ;;  %v3512_v1 = vld [vmem:[%s3725_s29 + $0x2f0] sm:$0xf0]  ;;  %v2771_v8 = vor.u32 %v3476_v63, %v2770_v60  ;;  %v3625_v13 = vld [vmem:[%s4444_s1 + $0x1f8] sm:$0xff] }
  0x1f   : > { %v3058_v2 = vld [vmem:[%s3725_s29 + $0x3f0] sm:$0xf]  ;;  %v3548_v3 = vld [vmem:[%s3725_s29 + $0x410] sm:$0xf0]  ;;  %v2915_v9 = vor.u32 %v3512_v1, %v2914_v0  ;;  %v3609_v14 = vld [vmem:[%s4444_s1 + $0x178] sm:$0xff] }
  0x20   : > { %3649 = vmatpush.bf16.msra.mxu1 %v3564_v5  ;;  %3650 = vmatpush.bf16.msra.mxu2 %v3564_v5  ;;  %v2626_v4 = vld [vmem:[%s3725_s29 + $0x90] sm:$0xf]  ;;  %v3059_v10 = vor.u32 %v3548_v3, %v3058_v2  ;;  %v3633_v15 = vld [vmem:[%s4444_s1 + $0x238] sm:$0xff]  ;;  %v3419_v32 = vld [vmem:[%s3725_s29 + $0xc] sm:$0xf] }
  0x21   : > { %3651 = vmatpush.bf16.msra.mxu3 %v3564_v5  ;;  %1627 = vmatpush.bf16.msra.mxu0 %v3564_v5  ;;  %v3440_v5 = vld [vmem:[%s3725_s29 + $0xb0] sm:$0xf0]  ;;  %v3437_v60 = vld [vmem:[%s3725_s29 + $0x9c] sm:$0xf]  ;;  %v3442_v63 = vld [vmem:[%s3725_s29 + $0xc0] sm:$0xf0] }
  0x22   : > { %v2627_v11 = vor.u32 %v3440_v5, %v2626_v4  ;;  %v3424_v35 = vld [vmem:[%s3725_s29 + $0x30] sm:$0xf0]  ;;  %v3615_v4 = vld [vmem:[%s4444_s1 + $0x1a8] sm:$0xff] }
  0x23   : > { %v3616_v40 = vld [vmem:[%s4444_s1 + $0x1b0] sm:$0xff]  ;;  %v3623_v5 = vld [vmem:[%s4444_s1 + $0x1e8] sm:$0xff] }
  0x24   : > { %3652 = vmatpush.bf16.msra.mxu1 %v3563_v6  ;;  %3653 = vmatpush.bf16.msra.mxu2 %v3563_v6  ;;  %v3624_v41 = vld [vmem:[%s4444_s1 + $0x1f0] sm:$0xff] }
  0x25   : > { %3654 = vmatpush.bf16.msra.mxu3 %v3563_v6  ;;  %1628 = vmatpush.bf16.msra.mxu0 %v3563_v6  ;;  %v3570_v6 = vld [vmem:[%s4444_s1 + $0x40] sm:$0xff] }
  0x28   : > { %3655 = vmatpush.bf16.msra.mxu1 %v3562_v7  ;;  %3656 = vmatpush.bf16.msra.mxu2 %v3562_v7 }
  0x29   : > { %3657 = vmatpush.bf16.msra.mxu3 %v3562_v7  ;;  %1629 = vmatpush.bf16.msra.mxu0 %v3562_v7  ;;  %v3594_v7 = vld [vmem:[%s4444_s1 + $0x100] sm:$0xff] }
  0x2b   : > { %1650 = vmatmul.bf16.vlgmr.msra.gmra.mxu1 %v2699_v18  ;;  %1670 = vmatmul.bf16.vlgmr.msra.gmra.mxu2 %v2843_v19  ;;  %v2950_v18 = vld [vmem:[%s3725_s29 + $0x318] sm:$0xf]  ;;  %v3521_v19 = vld [vmem:[%s3725_s29 + $0x338] sm:$0xf0] }
  0x2c   : > { %1800 = vmatpush.bf16.msrb.mxu2 %v3585_v16  ;;  %1690 = vmatmul.bf16.vlgmr.msra.gmra.mxu3 %v2987_v20  ;;  %v2806_v16 = vld [vmem:[%s3725_s29 + $0x1f8] sm:$0xf] }
  0x2d   : > { %1889 = vmatpush.bf16.msrb.mxu3 %v3593_v17  ;;  %1630 = vmatmul.bf16.vlgmr.msra.gmra.mxu0 %v2555_v21  ;;  %v3485_v17 = vld [vmem:[%s3725_s29 + $0x218] sm:$0xf0]  ;;  %v3094_v20 = vld [vmem:[%s3725_s29 + $0x438] sm:$0xf] }
  0x2e   : > { %1711 = vmatpush.bf16.msrb.mxu1 %v3577_v22  ;;  %1978 = vmatpush.bf16.msrb.mxu0 %v3601_v23  ;;  %v3557_v21 = vld [vmem:[%s3725_s29 + $0x458] sm:$0xf0]  ;;  %v2662_v22 = vld [vmem:[%s3725_s29 + $0xd8] sm:$0xf] }
  0x2f   : > { %v3449_v23 = vld [vmem:[%s3725_s29 + $0xf8] sm:$0xf0] }
  0x30   : > { %1801 = vmatpush.bf16.msrb.mxu2 %v3584_v24  ;;  %v2807_v24 = vor.u32 %v3485_v17, %v2806_v16 }
  0x31   : > { %1890 = vmatpush.bf16.msrb.mxu3 %v3592_v25  ;;  %v2951_v25 = vor.u32 %v3521_v19, %v2950_v18 }
  0x32   : > { %1712 = vmatpush.bf16.msrb.mxu1 %v3576_v26  ;;  %1979 = vmatpush.bf16.msrb.mxu0 %v3600_v27  ;;  %v3095_v26 = vor.u32 %v3557_v21, %v3094_v20  ;;  %v2663_v27 = vor.u32 %v3449_v23, %v2662_v22  ;;  %v3454_v20 = vld [vmem:[%s3725_s29 + $0x124] sm:$0xf]  ;;  %v2700_v21 = vld [vmem:[%s3725_s29 + $0x144] sm:$0xf0]  ;;  %v3459_v23 = vld [vmem:[%s3725_s29 + $0x148] sm:$0xf0] }
  0x33   : > { %v2706_v22 = vld [vmem:[%s3725_s29 + $0x128] sm:$0xf] }
  0x34   : > { %1802 = vmatpush.bf16.msrb.mxu2 %v3583_v28  ;;  %v3418_v28 = vld [vmem:[%s3725_s29 + $0x4] sm:$0xf] }
  0x35   : > { %1891 = vmatpush.bf16.msrb.mxu3 %v3591_v29  ;;  %v2556_v29 = vld [vmem:[%s3725_s29 + $0x24] sm:$0xf0] }
  0x36   : > { %1713 = vmatpush.bf16.msrb.mxu1 %v3575_v30  ;;  %1980 = vmatpush.bf16.msrb.mxu0 %v3599_v31  ;;  %v2562_v30 = vld [vmem:[%s3725_s29 + $0x8] sm:$0xf]  ;;  %v3423_v31 = vld [vmem:[%s3725_s29 + $0x28] sm:$0xf0]  ;;  %v2559_v36 = vor.u32 %v3418_v28, %v2556_v29  ;;  %v2703_v28 = vor.u32 %v3454_v20, %v2700_v21  ;;  %v2707_v29 = vor.u32 %v3459_v23, %v2706_v22  ;;  %v3605_v20 = vld [vmem:[%s4444_s1 + $0x158] sm:$0xff] }
  0x37   : > { %v2563_v37 = vor.u32 %v3423_v31, %v2562_v30  ;;  %v3629_v21 = vld [vmem:[%s4444_s1 + $0x218] sm:$0xff]  ;;  %v2808_v23 = vld [vmem:[%s3725_s29 + $0x21c] sm:$0xf0] }
  0x38   : > { %1803 = vmatpush.bf16.msrb.mxu2 %v3582_v33  ;;  %v2564_v33 = vld [vmem:[%s3725_s29 + $0x2c] sm:$0xf0]  ;;  %v3481_v22 = vld [vmem:[%s3725_s29 + $0x1fc] sm:$0xf] }
  0x39   : > { %1892 = vmatpush.bf16.msrb.mxu3 %v3590_v34  ;;  %v2570_v34 = vld [vmem:[%s3725_s29 + $0x10] sm:$0xf]  ;;  %v2567_v38 = vor.u32 %v3419_v32, %v2564_v33 }
  0x3a   : > { %1714 = vmatpush.bf16.msrb.mxu1 %v3574_v42  ;;  %1981 = vmatpush.bf16.msrb.mxu0 %v3598_v43  ;;  %v2571_v39 = vor.u32 %v3424_v35, %v2570_v34  ;;  %v3608_v42 = vld [vmem:[%s4444_s1 + $0x170] sm:$0xff]  ;;  %v3614_v34 = vld [vmem:[%s4444_s1 + $0x1a0] sm:$0xff] }
  0x3b   : > { %1655 = vmatmul.bf16.gmra.mxu1 %v2735_v46  ;;  %1675 = vmatmul.bf16.gmra.mxu2 %v2879_v47  ;;  %v3632_v43 = vld [vmem:[%s4444_s1 + $0x230] sm:$0xff]  ;;  %v3622_v35 = vld [vmem:[%s4444_s1 + $0x1e0] sm:$0xff] }
  0x3c   : > { %1804 = vmatpush.bf16.msrb.mxu2 %v3581_v44  ;;  %1695 = vmatmul.bf16.gmra.mxu3 %v3023_v48  ;;  %v3427_v44 = vld [vmem:[%s3725_s29 + $0x4c] sm:$0xf]  ;;  %v2598_v46 = vld [vmem:[%s3725_s29 + $0x50] sm:$0xf]  ;;  %v3432_v47 = vld [vmem:[%s3725_s29 + $0x70] sm:$0xf0] }
  0x3d   : > { %1893 = vmatpush.bf16.msrb.mxu3 %v3589_v45  ;;  %1635 = vmatmul.bf16.gmra.mxu0 %v2591_v49  ;;  %v2592_v45 = vld [vmem:[%s3725_s29 + $0x6c] sm:$0xf0]  ;;  %v3428_v48 = vld [vmem:[%s3725_s29 + $0x54] sm:$0xf]  ;;  %v2600_v49 = vld [vmem:[%s3725_s29 + $0x74] sm:$0xf0] }
  0x3e   : > { %1715 = vmatpush.bf16.msrb.mxu1 %v3573_v50  ;;  %1982 = vmatpush.bf16.msrb.mxu0 %v3597_v51  ;;  %v2606_v50 = vld [vmem:[%s3725_s29 + $0x58] sm:$0xf]  ;;  %v3433_v51 = vld [vmem:[%s3725_s29 + $0x78] sm:$0xf0] }
  0x40   : > { %1805 = vmatpush.bf16.msrb.mxu2 %v3580_v52  ;;  %v2595_v52 = vor.u32 %v3427_v44, %v2592_v45  ;;  %v2742_v44 = vld [vmem:[%s3725_s29 + $0x170] sm:$0xf]  ;;  %v3468_v45 = vld [vmem:[%s3725_s29 + $0x190] sm:$0xf0] }
  0x41   : > { %1894 = vmatpush.bf16.msrb.mxu3 %v3588_v53  ;;  %v2599_v53 = vor.u32 %v3432_v47, %v2598_v46  ;;  %v3464_v46 = vld [vmem:[%s3725_s29 + $0x174] sm:$0xf]  ;;  %v2744_v47 = vld [vmem:[%s3725_s29 + $0x194] sm:$0xf0] }
  0x42   : > { %1716 = vmatpush.bf16.msrb.mxu1 %v3572_v54  ;;  %1983 = vmatpush.bf16.msrb.mxu0 %v3596_v55  ;;  %v2603_v54 = vor.u32 %v3428_v48, %v2600_v49  ;;  %v2607_v55 = vor.u32 %v3433_v51, %v2606_v50  ;;  %v2750_v48 = vld [vmem:[%s3725_s29 + $0x178] sm:$0xf]  ;;  %v3469_v49 = vld [vmem:[%s3725_s29 + $0x198] sm:$0xf0] }
  0x44   : > { %1806 = vmatpush.bf16.msrb.mxu2 %v3579_v56  ;;  %v3436_v56 = vld [vmem:[%s3725_s29 + $0x94] sm:$0xf] }
  0x45   : > { %1895 = vmatpush.bf16.msrb.mxu3 %v3587_v57  ;;  %v2628_v57 = vld [vmem:[%s3725_s29 + $0xb4] sm:$0xf0] }
  0x46   : > { %1717 = vmatpush.bf16.msrb.mxu1 %v3571_v58  ;;  %1984 = vmatpush.bf16.msrb.mxu0 %v3595_v59  ;;  %v2634_v58 = vld [vmem:[%s3725_s29 + $0x98] sm:$0xf]  ;;  %v3441_v59 = vld [vmem:[%s3725_s29 + $0xb8] sm:$0xf0]  ;;  %v2631_v0 = vor.u32 %v3436_v56, %v2628_v57  ;;  %v2751_v56 = vor.u32 %v3469_v49, %v2750_v48  ;;  %v3490_v48 = vld [vmem:[%s3725_s29 + $0x244] sm:$0xf] }
  0x47   : > { %v2635_v1 = vor.u32 %v3441_v59, %v2634_v58  ;;  %v2844_v49 = vld [vmem:[%s3725_s29 + $0x264] sm:$0xf0] }
  0x48   : > { %1807 = vmatpush.bf16.msrb.mxu2 %v3578_v61  ;;  %v2636_v61 = vld [vmem:[%s3725_s29 + $0xbc] sm:$0xf0] }
  0x49   : > { %1896 = vmatpush.bf16.msrb.mxu3 %v3586_v62  ;;  %v2642_v62 = vld [vmem:[%s3725_s29 + $0xa0] sm:$0xf]  ;;  %v2639_v2 = vor.u32 %v3437_v60, %v2636_v61 }
  0x4a   : > { %1718 = vmatpush.bf16.msrb.mxu1 %v3570_v6  ;;  %1985 = vmatpush.bf16.msrb.mxu0 %v3594_v7  ;;  %v2643_v3 = vor.u32 %v3442_v63, %v2642_v62  ;;  %v3607_v6 = vld [vmem:[%s4444_s1 + $0x168] sm:$0xff]  ;;  %v3472_v62 = vld [vmem:[%s3725_s29 + $0x1b4] sm:$0xf]  ;;  %v2772_v63 = vld [vmem:[%s3725_s29 + $0x1d4] sm:$0xf0] }
  0x4b   : > { %1660 = vmatmul.bf16.gmra.mxu1 %v2771_v8  ;;  %1680 = vmatmul.bf16.gmra.mxu2 %v2915_v9  ;;  %v3631_v7 = vld [vmem:[%s4444_s1 + $0x228] sm:$0xff]  ;;  %v3445_v8 = vld [vmem:[%s3725_s29 + $0xdc] sm:$0xf]  ;;  %v2664_v9 = vld [vmem:[%s3725_s29 + $0xfc] sm:$0xf0] }
  0x4c   : > { %1700 = vmatmul.bf16.gmra.mxu3 %v3059_v10  ;;  %2156 = vmatpush.bf16.msra.mxu2 %v3617_v12  ;;  %v2670_v10 = vld [vmem:[%s3725_s29 + $0xe0] sm:$0xf]  ;;  %v3446_v12 = vld [vmem:[%s3725_s29 + $0xe4] sm:$0xf]  ;;  %v2667_v16 = vor.u32 %v3445_v8, %v2664_v9  ;;  %v2775_v8 = vor.u32 %v3472_v62, %v2772_v63  ;;  %v2858_v62 = vld [vmem:[%s3725_s29 + $0x250] sm:$0xf] }
  0x4d   : > { %1640 = vmatmul.bf16.gmra.mxu0 %v2627_v11  ;;  %2245 = vmatpush.bf16.msra.mxu3 %v3625_v13  ;;  %v3450_v11 = vld [vmem:[%s3725_s29 + $0x100] sm:$0xf0]  ;;  %v2672_v13 = vld [vmem:[%s3725_s29 + $0x104] sm:$0xf0]  ;;  %v3496_v63 = vld [vmem:[%s3725_s29 + $0x270] sm:$0xf0] }
  0x4e   : > { %2067 = vmatpush.bf16.msra.mxu1 %v3609_v14  ;;  %2334 = vmatpush.bf16.msra.mxu0 %v3633_v15  ;;  %v2678_v14 = vld [vmem:[%s3725_s29 + $0xe8] sm:$0xf]  ;;  %v3451_v15 = vld [vmem:[%s3725_s29 + $0x108] sm:$0xf0]  ;;  %v2671_v17 = vor.u32 %v3450_v11, %v2670_v10  ;;  %v2675_v18 = vor.u32 %v3446_v12, %v2672_v13 }
  0x4f   : > { %v2679_v19 = vor.u32 %v3451_v15, %v2678_v14  ;;  %v3613_v14 = vld [vmem:[%s4444_s1 + $0x198] sm:$0xff] }
  0x50   : > { %2157 = vmatpush.bf16.msra.mxu2 %v3616_v40  ;;  %v3621_v15 = vld [vmem:[%s4444_s1 + $0x1d8] sm:$0xff] }
  0x51   : > { %2246 = vmatpush.bf16.msra.mxu3 %v3624_v41  ;;  %v3630_v41 = vld [vmem:[%s4444_s1 + $0x220] sm:$0xff] }
  0x52   : > { %2068 = vmatpush.bf16.msra.mxu1 %v3608_v42  ;;  %2335 = vmatpush.bf16.msra.mxu0 %v3632_v43  ;;  %v3463_v42 = vld [vmem:[%s3725_s29 + $0x16c] sm:$0xf]  ;;  %v2736_v43 = vld [vmem:[%s3725_s29 + $0x18c] sm:$0xf0] }
  0x54   : > { %2158 = vmatpush.bf16.msra.mxu2 %v3615_v4  ;;  %v2786_v4 = vld [vmem:[%s3725_s29 + $0x1c0] sm:$0xf] }
  0x55   : > { %2247 = vmatpush.bf16.msra.mxu3 %v3623_v5  ;;  %v3478_v5 = vld [vmem:[%s3725_s29 + $0x1e0] sm:$0xf0] }
  0x56   : > { %2069 = vmatpush.bf16.msra.mxu1 %v3607_v6  ;;  %2336 = vmatpush.bf16.msra.mxu0 %v3631_v7  ;;  %v2787_v12 = vor.u32 %v3478_v5, %v2786_v4 }
  0x58   : > { %2159 = vmatpush.bf16.msra.mxu2 %v3614_v34  ;;  %v2811_v34 = vor.u32 %v3481_v22, %v2808_v23 }
  0x59   : > { %2248 = vmatpush.bf16.msra.mxu3 %v3622_v35 }
  0x5a   : > { %2337 = vmatpush.bf16.msra.mxu0 %v3630_v41 }
  0x5b   : > { %1665 = vmatmul.bf16.gmra.mxu1 %v2807_v24  ;;  %1685 = vmatmul.bf16.gmra.mxu2 %v2951_v25  ;;  %v3455_v24 = vld [vmem:[%s3725_s29 + $0x12c] sm:$0xf]  ;;  %v2708_v25 = vld [vmem:[%s3725_s29 + $0x14c] sm:$0xf0] }
  0x5c   : > { %1705 = vmatmul.bf16.gmra.mxu3 %v3095_v26  ;;  %v2714_v26 = vld [vmem:[%s3725_s29 + $0x130] sm:$0xf]  ;;  %v2711_v31 = vor.u32 %v3455_v24, %v2708_v25  ;;  %2160 = vmatpush.bf16.msra.mxu2 %v3613_v14  ;;  %v2814_v24 = vld [vmem:[%s3725_s29 + $0x200] sm:$0xf]  ;;  %v3486_v25 = vld [vmem:[%s3725_s29 + $0x220] sm:$0xf0] }
  0x5d   : > { %1645 = vmatmul.bf16.gmra.mxu0 %v2663_v27  ;;  %v3460_v27 = vld [vmem:[%s3725_s29 + $0x150] sm:$0xf0]  ;;  %2249 = vmatpush.bf16.msra.mxu3 %v3621_v15  ;;  %v2815_v35 = vor.u32 %v3486_v25, %v2814_v24 }
  0x5e   : > { %v2715_v32 = vor.u32 %v3460_v27, %v2714_v26  ;;  %2338 = vmatpush.bf16.msra.mxu0 %v3629_v21  ;;  %v3482_v26 = vld [vmem:[%s3725_s29 + $0x204] sm:$0xf]  ;;  %v2816_v27 = vld [vmem:[%s3725_s29 + $0x224] sm:$0xf0]  ;;  %v3620_v14 = vld [vmem:[%s4444_s1 + $0x1d0] sm:$0xff] }
  0x5f   : > { %v2819_v41 = vor.u32 %v3482_v26, %v2816_v27  ;;  %v3604_v25 = vld [vmem:[%s4444_s1 + $0x150] sm:$0xff]  ;;  %v3499_v27 = vld [vmem:[%s3725_s29 + $0x28c] sm:$0xf] }
  0x60   : > { %v3628_v26 = vld [vmem:[%s4444_s1 + $0x210] sm:$0xff] }
  0x61   : > { %2250 = vmatpush.bf16.msra.mxu3 %v3620_v14 }
  0x62   : > { %2339 = vmatpush.bf16.msra.mxu0 %v3628_v26  ;;  %v2924_v26 = vld [vmem:[%s3725_s29 + $0x2fc] sm:$0xf0] }
  0x6b   : > { %1719 = vmatmul.bf16.vlgmr.msrb.gmra.mxu1 %v2559_v36  ;;  %1808 = vmatmul.bf16.vlgmr.msrb.gmra.mxu2 %v2563_v37 }
  0x6c   : > { %1897 = vmatmul.bf16.vlgmr.msrb.gmra.mxu3 %v2567_v38  ;;  %v3606_v38 = vld [vmem:[%s4444_s1 + $0x160] sm:$0xff] }
  0x6d   : > { %1986 = vmatmul.bf16.vlgmr.msrb.gmra.mxu0 %v2571_v39  ;;  %2070 = vmatpush.bf16.msra.mxu1 %v3606_v38 }
  0x71   : > { %2071 = vmatpush.bf16.msra.mxu1 %v3605_v20 }
  0x75   : > { %2072 = vmatpush.bf16.msra.mxu1 %v3604_v25  ;;  %v3509_v25 = vld [vmem:[%s3725_s29 + $0x2dc] sm:$0xf] }
  0x7b   : > { %1724 = vmatmul.bf16.gmra.mxu1 %v2595_v52  ;;  %1813 = vmatmul.bf16.gmra.mxu2 %v2599_v53  ;;  %v2739_v52 = vor.u32 %v3463_v42, %v2736_v43  ;;  %v2743_v53 = vor.u32 %v3468_v45, %v2742_v44 }
  0x7c   : > { %1902 = vmatmul.bf16.gmra.mxu3 %v2603_v54 }
  0x7d   : > { %1991 = vmatmul.bf16.gmra.mxu0 %v2607_v55  ;;  %v2747_v55 = vor.u32 %v3464_v46, %v2744_v47 }
  0x8b   : > { %1729 = vmatmul.bf16.gmra.mxu1 %v2631_v0  ;;  %1818 = vmatmul.bf16.gmra.mxu2 %v2635_v1  ;;  %v2778_v0 = vld [vmem:[%s3725_s29 + $0x1b8] sm:$0xf]  ;;  %v3477_v1 = vld [vmem:[%s3725_s29 + $0x1d8] sm:$0xf0] }
  0x8c   : > { %1907 = vmatmul.bf16.gmra.mxu3 %v2639_v2  ;;  %v3473_v2 = vld [vmem:[%s3725_s29 + $0x1bc] sm:$0xf]  ;;  %v2779_v9 = vor.u32 %v3477_v1, %v2778_v0 }
  0x8d   : > { %1996 = vmatmul.bf16.gmra.mxu0 %v2643_v3  ;;  %v2780_v3 = vld [vmem:[%s3725_s29 + $0x1dc] sm:$0xf0] }
  0x8e   : > { %v2783_v11 = vor.u32 %v3473_v2, %v2780_v3  ;;  %v2847_v2 = vor.u32 %v3490_v48, %v2844_v49  ;;  %v3505_v48 = vld [vmem:[%s3725_s29 + $0x2b8] sm:$0xf0] }
  0x9b   : > { %1734 = vmatmul.bf16.gmra.mxu1 %v2667_v16  ;;  %1823 = vmatmul.bf16.gmra.mxu2 %v2671_v17 }
  0x9c   : > { %1912 = vmatmul.bf16.gmra.mxu3 %v2675_v18 }
  0x9d   : > { %2001 = vmatmul.bf16.gmra.mxu0 %v2679_v19 }
  0xa8   : > { %v3934_v30 = vpop.f32.mrf.mxu1 }
  0xaa   : > { %v3936_v33 = vpop.f32.mrf.mxu0 }
  0xab   : > { %1739 = vmatmul.bf16.gmra.mxu1 %v2703_v28  ;;  %1828 = vmatmul.bf16.gmra.mxu2 %v2707_v29  ;;  %v2822_v28 = vld [vmem:[%s3725_s29 + $0x208] sm:$0xf]  ;;  %v3487_v29 = vld [vmem:[%s3725_s29 + $0x228] sm:$0xf0] }
  0xac   : > { %1917 = vmatmul.bf16.gmra.mxu3 %v2711_v31  ;;  %v2823_v42 = vor.u32 %v3487_v29, %v2822_v28  ;;  %v2880_v28 = vld [vmem:[%s3725_s29 + $0x2ac] sm:$0xf0] }
  0xad   : > { %2006 = vmatmul.bf16.gmra.mxu0 %v2715_v32 }
  0xae   : > { %v3944_v36 = vpop.f32.mrf.mxu2 }
  0xaf   : > { %v3946_v37 = vpop.f32.mrf.mxu3 }
  0xb0   : > { %v3951_v39 = vpop.f32.mrf.mxu1 }
  0xb2   : > { %v3953_v40 = vpop.f32.mrf.mxu0 }
  0xb6   : > { %v3966_v50 = vpop.f32.mrf.mxu2 }
  0xb7   : > { %v3968_v51 = vpop.f32.mrf.mxu3 }
  0xb8   : > { %v3970_v54 = vpop.f32.mrf.mxu1 }
  0xba   : > { %v3972_v57 = vpop.f32.mrf.mxu0 }
  0xbb   : > { %1744 = vmatmul.bf16.gmra.mxu1 %v2739_v52  ;;  %1833 = vmatmul.bf16.gmra.mxu2 %v2743_v53  ;;  %v2850_v52 = vld [vmem:[%s3725_s29 + $0x248] sm:$0xf]  ;;  %v3495_v53 = vld [vmem:[%s3725_s29 + $0x268] sm:$0xf0] }
  0xbc   : > { %1922 = vmatmul.bf16.gmra.mxu3 %v2747_v55  ;;  %v3491_v55 = vld [vmem:[%s3725_s29 + $0x24c] sm:$0xf]  ;;  %v2851_v3 = vor.u32 %v3495_v53, %v2850_v52 }
  0xbd   : > { %2011 = vmatmul.bf16.gmra.mxu0 %v2751_v56  ;;  %v2852_v56 = vld [vmem:[%s3725_s29 + $0x26c] sm:$0xf0] }
  0xbe   : > { %v3974_v58 = vpop.f32.mrf.mxu2  ;;  %v2855_v5 = vor.u32 %v3491_v55, %v2852_v56  ;;  %v2883_v55 = vor.u32 %v3499_v27, %v2880_v28  ;;  %v2930_v27 = vld [vmem:[%s3725_s29 + $0x2e0] sm:$0xf]  ;;  %v3514_v28 = vld [vmem:[%s3725_s29 + $0x300] sm:$0xf0] }
  0xbf   : > { %v3976_v59 = vpop.f32.mrf.mxu3 }
  0xc0   : > { %v3978_v60 = vpop.f32.mrf.mxu1 }
  0xc2   : > { %v3980_v61 = vpop.f32.mrf.mxu0 }
  0xc6   : > { %v3990_v6 = vpop.f32.mrf.mxu2 }
  0xc7   : > { %v3992_v7 = vpop.f32.mrf.mxu3 }
  0xc8   : > { %v3994_v10 = vpop.f32.mrf.mxu1 }
  0xca   : > { %v3996_v13 = vpop.f32.mrf.mxu0 }
  0xcb   : > { %1749 = vmatmul.bf16.gmra.mxu1 %v2775_v8  ;;  %1838 = vmatmul.bf16.gmra.mxu2 %v2779_v9  ;;  %v2859_v8 = vor.u32 %v3496_v63, %v2858_v62 }
  0xcc   : > { %1927 = vmatmul.bf16.gmra.mxu3 %v2783_v11 }
  0xcd   : > { %2016 = vmatmul.bf16.gmra.mxu0 %v2787_v12  ;;  %v3612_v12 = vld [vmem:[%s4444_s1 + $0x190] sm:$0xff] }
  0xce   : > { %v4004_v16 = vpop.f32.mrf.mxu2  ;;  %2161 = vmatpush.bf16.msra.mxu2 %v3612_v12 }
  0xcf   : > { %v4006_v17 = vpop.f32.mrf.mxu3 }
  0xd0   : > { %v4008_v18 = vpop.f32.mrf.mxu1 }
  0xd2   : > { %v4010_v19 = vpop.f32.mrf.mxu0 }
  0xd6   : > { %v4026_v31 = vpop.f32.mrf.mxu2 }
  0xd7   : > { %v4028_v32 = vpop.f32.mrf.mxu3 }
  0xd8   : > { %v4030_v38 = vpop.f32.mrf.mxu1 }
  0xda   : > { %v4032_v43 = vpop.f32.mrf.mxu0 }
  0xdb   : > { %1754 = vmatmul.bf16.gmra.mxu1 %v2811_v34  ;;  %1843 = vmatmul.bf16.gmra.mxu2 %v2815_v35  ;;  %v2886_v34 = vld [vmem:[%s3725_s29 + $0x290] sm:$0xf]  ;;  %v3504_v35 = vld [vmem:[%s3725_s29 + $0x2b0] sm:$0xf0] }
  0xdc   : > { %1932 = vmatmul.bf16.gmra.mxu3 %v2819_v41  ;;  %v3500_v41 = vld [vmem:[%s3725_s29 + $0x294] sm:$0xf]  ;;  %v2887_v56 = vor.u32 %v3504_v35, %v2886_v34 }
  0xdd   : > { %2021 = vmatmul.bf16.gmra.mxu0 %v2823_v42  ;;  %v2888_v42 = vld [vmem:[%s3725_s29 + $0x2b4] sm:$0xf0] }
  0xde   : > { %v4034_v44 = vpop.f32.mrf.mxu2  ;;  %v2891_v63 = vor.u32 %v3500_v41, %v2888_v42 }
  0xdf   : > { %v4036_v45 = vpop.f32.mrf.mxu3 }
  0xe0   : > { %v4038_v46 = vpop.f32.mrf.mxu1 }
  0xe2   : > { %v4040_v47 = vpop.f32.mrf.mxu0 }
  0xe6   : > { %v4050_v0 = vpop.f32.mrf.mxu2 }
  0xe7   : > { %v4052_v1 = vpop.f32.mrf.mxu3 }
  0xe8   : > { %v1720_v4 = vpop.f32.mrf.mxu1 }
  0xe9   : > { %v1721_v9 = vadd.f32 %v1720_v4, %v3936_v33 }
  0xea   : > { %v1987_v11 = vpop.f32.mrf.mxu0 }
  0xeb   : > { %1759 = vmatmul.bf16.gmra.mxu1 %v2847_v2  ;;  %1848 = vmatmul.bf16.gmra.mxu2 %v2851_v3 }
  0xec   : > { %1937 = vmatmul.bf16.gmra.mxu3 %v2855_v5 }
  0xed   : > { %2026 = vmatmul.bf16.gmra.mxu0 %v2859_v8 }
  0xee   : > { %v1809_v15 = vpop.f32.mrf.mxu2 }
  0xef   : > { %v1810_v33 = vadd.f32 %v1809_v15, %v1721_v9  ;;  %v1898_v20 = vpop.f32.mrf.mxu3 }
  0xf0   : > { %v1722_v21 = vpop.f32.mrf.mxu1 }
  0xf1   : > { %v1899_v22 = vadd.f32 %v1898_v20, %v1810_v33  ;;  %v1723_v23 = vadd.f32 %v1722_v21, %v3953_v40  ;;  %v2894_v40 = vld [vmem:[%s3725_s29 + $0x298] sm:$0xf]  ;;  %v3508_v20 = vld [vmem:[%s3725_s29 + $0x2d4] sm:$0xf] }
  0xf2   : > { %v1989_v24 = vpop.f32.mrf.mxu0  ;;  %v2895_v2 = vor.u32 %v3505_v48, %v2894_v40  ;;  %v2916_v21 = vld [vmem:[%s3725_s29 + $0x2f4] sm:$0xf0] }
  0xf3   : > { %v4070_v29 = vadd.f32 %v1987_v11, %v1899_v22  ;;  %v2919_v42 = vor.u32 %v3508_v20, %v2916_v21  ;;  %v2958_v20 = vld [vmem:[%s3725_s29 + $0x320] sm:$0xf]  ;;  %v3522_v21 = vld [vmem:[%s3725_s29 + $0x340] sm:$0xf0] }
  0xf6   : > { %v1811_v49 = vpop.f32.mrf.mxu2 }
  0xf7   : > { %v1812_v52 = vadd.f32 %v1811_v49, %v1723_v23  ;;  %v1900_v53 = vpop.f32.mrf.mxu3  ;;  %v2922_v23 = vld [vmem:[%s3725_s29 + $0x2d8] sm:$0xf]  ;;  %v2927_v49 = vor.u32 %v3509_v25, %v2924_v26  ;;  %v3523_v25 = vld [vmem:[%s3725_s29 + $0x348] sm:$0xf0] }
  0xf8   : > { %v1725_v62 = vpop.f32.mrf.mxu1 }
  0xf9   : > { %v1901_v3 = vadd.f32 %v1900_v53, %v1812_v52  ;;  %v1726_v4 = vadd.f32 %v1725_v62, %v3972_v57  ;;  %v2931_v52 = vor.u32 %v3514_v28, %v2930_v27  ;;  %v3611_v62 = vld [vmem:[%s4444_s1 + $0x188] sm:$0xff] }
  0xfa   : > { %v1992_v5 = vpop.f32.mrf.mxu0  ;;  %2162 = vmatpush.bf16.msra.mxu2 %v3611_v62 }
  0xfb   : > { %1764 = vmatmul.bf16.gmra.mxu1 %v2883_v55  ;;  %1853 = vmatmul.bf16.gmra.mxu2 %v2887_v56  ;;  %v4079_v8 = vadd.f32 %v1989_v24, %v1901_v3  ;;  %v3513_v24 = vld [vmem:[%s3725_s29 + $0x2f8] sm:$0xf0] }
  0xfc   : > { %1942 = vmatmul.bf16.gmra.mxu3 %v2891_v63  ;;  %v2923_v40 = vor.u32 %v3513_v24, %v2922_v23  ;;  %v3619_v63 = vld [vmem:[%s4444_s1 + $0x1c8] sm:$0xff]  ;;  %v3518_v23 = vld [vmem:[%s3725_s29 + $0x324] sm:$0xf] }
  0xfd   : > { %2031 = vmatmul.bf16.gmra.mxu0 %v2895_v2  ;;  %2251 = vmatpush.bf16.msra.mxu3 %v3619_v63  ;;  %v2960_v24 = vld [vmem:[%s3725_s29 + $0x344] sm:$0xf0] }
  0xfe   : > { %v1814_v9 = vpop.f32.mrf.mxu2 }
  0xff   : > { %v1815_v11 = vadd.f32 %v1814_v9, %v1726_v4  ;;  %v1903_v12 = vpop.f32.mrf.mxu3 }
 0x100   : > { %v1727_v14 = vpop.f32.mrf.mxu1 }
 0x101   : > { %v1904_v15 = vadd.f32 %v1903_v12, %v1815_v11  ;;  %v1728_v57 = vadd.f32 %v1727_v14, %v3980_v61  ;;  %v3603_v12 = vld [vmem:[%s4444_s1 + $0x148] sm:$0xff] }
 0x102   : > { %v1994_v33 = vpop.f32.mrf.mxu0  ;;  %v3627_v14 = vld [vmem:[%s4444_s1 + $0x208] sm:$0xff]  ;;  %2073 = vmatpush.bf16.msra.mxu1 %v3603_v12 }
 0x103   : > { %v4084_v22 = vadd.f32 %v1992_v5, %v1904_v15  ;;  %v3517_v15 = vld [vmem:[%s3725_s29 + $0x31c] sm:$0xf]  ;;  %2340 = vmatpush.bf16.msra.mxu0 %v3627_v14  ;;  %v3527_v12 = vld [vmem:[%s3725_s29 + $0x36c] sm:$0xf]  ;;  %v2996_v14 = vld [vmem:[%s3725_s29 + $0x38c] sm:$0xf0] }
 0x106   : > { %v1816_v34 = vpop.f32.mrf.mxu2 }
 0x107   : > { %v1817_v35 = vadd.f32 %v1816_v34, %v1728_v57  ;;  %v1905_v41 = vpop.f32.mrf.mxu3  ;;  %v2952_v57 = vld [vmem:[%s3725_s29 + $0x33c] sm:$0xf0] }
 0x108   : > { %v1730_v48 = vpop.f32.mrf.mxu1  ;;  %v2955_v34 = vor.u32 %v3517_v15, %v2952_v57  ;;  %v3002_v15 = vld [vmem:[%s3725_s29 + $0x370] sm:$0xf]  ;;  %v3532_v57 = vld [vmem:[%s3725_s29 + $0x390] sm:$0xf0] }
 0x109   : > { %v1906_v61 = vadd.f32 %v1905_v41, %v1817_v35  ;;  %v1731_v53 = vadd.f32 %v1730_v48, %v3996_v13  ;;  %v2959_v35 = vor.u32 %v3522_v21, %v2958_v20 }
 0x10a   : > { %v1997_v55 = vpop.f32.mrf.mxu0 }
 0x10b   : > { %1769 = vmatmul.bf16.gmra.mxu1 %v2919_v42  ;;  %1858 = vmatmul.bf16.gmra.mxu2 %v2923_v40  ;;  %v4093_v56 = vadd.f32 %v1994_v33, %v1906_v61  ;;  %v2963_v42 = vor.u32 %v3518_v23, %v2960_v24 }
 0x10c   : > { %1947 = vmatmul.bf16.gmra.mxu3 %v2927_v49 }
 0x10d   : > { %2036 = vmatmul.bf16.gmra.mxu0 %v2931_v52 }
 0x10e   : > { %v1819_v2 = vpop.f32.mrf.mxu2 }
 0x10f   : > { %v1820_v13 = vadd.f32 %v1819_v2, %v1731_v53  ;;  %v1908_v3 = vpop.f32.mrf.mxu3 }
 0x110   : > { %v1732_v4 = vpop.f32.mrf.mxu1 }
 0x111   : > { %v1909_v5 = vadd.f32 %v1908_v3, %v1820_v13  ;;  %v1733_v9 = vadd.f32 %v1732_v4, %v4010_v19  ;;  %v2966_v19 = vld [vmem:[%s3725_s29 + $0x328] sm:$0xf]  ;;  %v3526_v3 = vld [vmem:[%s3725_s29 + $0x364] sm:$0xf] }
 0x112   : > { %v1999_v11 = vpop.f32.mrf.mxu0  ;;  %v2967_v40 = vor.u32 %v3523_v25, %v2966_v19  ;;  %v2988_v4 = vld [vmem:[%s3725_s29 + $0x384] sm:$0xf0] }
 0x113   : > { %v4110_v33 = vadd.f32 %v1997_v55, %v1909_v5  ;;  %v2991_v24 = vor.u32 %v3526_v3, %v2988_v4  ;;  %v3540_v3 = vld [vmem:[%s3725_s29 + $0x3d0] sm:$0xf0] }
 0x114   : > { %v3536_v4 = vld [vmem:[%s3725_s29 + $0x3b4] sm:$0xf] }
 0x116   : > { %v1821_v26 = vpop.f32.mrf.mxu2 }
 0x117   : > { %v1822_v27 = vadd.f32 %v1821_v26, %v1733_v9  ;;  %v1910_v28 = vpop.f32.mrf.mxu3  ;;  %v2994_v9 = vld [vmem:[%s3725_s29 + $0x368] sm:$0xf]  ;;  %v2999_v26 = vor.u32 %v3527_v12, %v2996_v14  ;;  %v3038_v12 = vld [vmem:[%s3725_s29 + $0x3b8] sm:$0xf]  ;;  %v3541_v14 = vld [vmem:[%s3725_s29 + $0x3d8] sm:$0xf0] }
 0x118   : > { %v1735_v41 = vpop.f32.mrf.mxu1 }
 0x119   : > { %v1911_v48 = vadd.f32 %v1910_v28, %v1822_v27  ;;  %v1736_v49 = vadd.f32 %v1735_v41, %v4032_v43  ;;  %v3003_v27 = vor.u32 %v3532_v57, %v3002_v15  ;;  %v3618_v41 = vld [vmem:[%s4444_s1 + $0x1c0] sm:$0xff] }
 0x11a   : > { %v2002_v52 = vpop.f32.mrf.mxu0  ;;  %2252 = vmatpush.bf16.msra.mxu3 %v3618_v41 }
 0x11b   : > { %1774 = vmatmul.bf16.gmra.mxu1 %v2955_v34  ;;  %1863 = vmatmul.bf16.gmra.mxu2 %v2959_v35  ;;  %v4119_v61 = vadd.f32 %v1999_v11, %v1911_v48  ;;  %v3531_v11 = vld [vmem:[%s3725_s29 + $0x388] sm:$0xf0]  ;;  %v3610_v35 = vld [vmem:[%s4444_s1 + $0x180] sm:$0xff] }
 0x11c   : > { %1952 = vmatmul.bf16.gmra.mxu3 %v2963_v42  ;;  %v2995_v19 = vor.u32 %v3531_v11, %v2994_v9  ;;  %2163 = vmatpush.bf16.msra.mxu2 %v3610_v35  ;;  %v3032_v11 = vld [vmem:[%s3725_s29 + $0x3d4] sm:$0xf0] }
 0x11d   : > { %2041 = vmatmul.bf16.gmra.mxu0 %v2967_v40 }
 0x11e   : > { %v1824_v53 = vpop.f32.mrf.mxu2 }
 0x11f   : > { %v1825_v55 = vadd.f32 %v1824_v53, %v1736_v49  ;;  %v1913_v62 = vpop.f32.mrf.mxu3 }
 0x120   : > { %v1737_v63 = vpop.f32.mrf.mxu1 }
 0x121   : > { %v1914_v2 = vadd.f32 %v1913_v62, %v1825_v55  ;;  %v1738_v43 = vadd.f32 %v1737_v63, %v4040_v47  ;;  %v3602_v62 = vld [vmem:[%s4444_s1 + $0x140] sm:$0xff]  ;;  %v3535_v63 = vld [vmem:[%s3725_s29 + $0x3ac] sm:$0xf] }
 0x122   : > { %v2004_v13 = vpop.f32.mrf.mxu0  ;;  %2074 = vmatpush.bf16.msra.mxu1 %v3602_v62  ;;  %v3066_v62 = vld [vmem:[%s3725_s29 + $0x3f8] sm:$0xf] }
 0x123   : > { %v4124_v5 = vadd.f32 %v2002_v52, %v1914_v2  ;;  %v3024_v2 = vld [vmem:[%s3725_s29 + $0x3cc] sm:$0xf0] }
 0x126   : > { %v1826_v20 = vpop.f32.mrf.mxu2 }
 0x127   : > { %v1827_v21 = vadd.f32 %v1826_v20, %v1738_v43  ;;  %v1915_v23 = vpop.f32.mrf.mxu3 }
 0x128   : > { %v1740_v25 = vpop.f32.mrf.mxu1 }
 0x129   : > { %v1916_v47 = vadd.f32 %v1915_v23, %v1827_v21  ;;  %v1741_v42 = vadd.f32 %v1740_v25, %v3934_v30  ;;  %v3626_v30 = vld [vmem:[%s4444_s1 + $0x200] sm:$0xff]  ;;  %v3027_v21 = vor.u32 %v3535_v63, %v3024_v2  ;;  %v3039_v25 = vor.u32 %v3541_v14, %v3038_v12 }
 0x12a   : > { %v2007_v28 = vpop.f32.mrf.mxu0  ;;  %2341 = vmatpush.bf16.msra.mxu0 %v3626_v30  ;;  %v3545_v30 = vld [vmem:[%s3725_s29 + $0x3fc] sm:$0xf]  ;;  %v3068_v2 = vld [vmem:[%s3725_s29 + $0x41c] sm:$0xf0] }
 0x12b   : > { %1779 = vmatmul.bf16.gmra.mxu1 %v2991_v24  ;;  %1868 = vmatmul.bf16.gmra.mxu2 %v2995_v19  ;;  %v4132_v34 = vadd.f32 %v2004_v13, %v1916_v47  ;;  %v3030_v13 = vld [vmem:[%s3725_s29 + $0x3b0] sm:$0xf]  ;;  %v3035_v19 = vor.u32 %v3536_v4, %v3032_v11 }
 0x12c   : > { %1957 = vmatmul.bf16.gmra.mxu3 %v2999_v26  ;;  %v3031_v23 = vor.u32 %v3540_v3, %v3030_v13  ;;  %v3074_v13 = vld [vmem:[%s3725_s29 + $0x400] sm:$0xf]  ;;  %v3550_v3 = vld [vmem:[%s3725_s29 + $0x420] sm:$0xf0] }
 0x12d   : > { %2046 = vmatmul.bf16.gmra.mxu0 %v3003_v27 }
 0x12e   : > { %v1829_v40 = vpop.f32.mrf.mxu2 }
 0x12f   : > { %v1830_v48 = vadd.f32 %v1829_v40, %v1741_v42  ;;  %v1918_v49 = vpop.f32.mrf.mxu3 }
 0x130   : > { %v1742_v52 = vpop.f32.mrf.mxu1 }
 0x131   : > { %v1919_v53 = vadd.f32 %v1918_v49, %v1830_v48  ;;  %v1743_v9 = vadd.f32 %v1742_v52, %v3951_v39  ;;  %v3544_v49 = vld [vmem:[%s3725_s29 + $0x3f4] sm:$0xf]  ;;  %v3060_v52 = vld [vmem:[%s3725_s29 + $0x414] sm:$0xf0] }
 0x132   : > { %v2009_v55 = vpop.f32.mrf.mxu0  ;;  %v3063_v11 = vor.u32 %v3544_v49, %v3060_v52  ;;  %v3104_v52 = vld [vmem:[%s3725_s29 + $0x464] sm:$0xf0] }
 0x133   : > { %v4149_v43 = vadd.f32 %v2007_v28, %v1919_v53 }
 0x136   : > { %v1831_v15 = vpop.f32.mrf.mxu2 }
 0x137   : > { %v1832_v57 = vadd.f32 %v1831_v15, %v1743_v9  ;;  %v1920_v20 = vpop.f32.mrf.mxu3  ;;  %v3071_v15 = vor.u32 %v3545_v30, %v3068_v2 }
 0x138   : > { %v1745_v24 = vpop.f32.mrf.mxu1 }
 0x139   : > { %v1921_v26 = vadd.f32 %v1920_v20, %v1832_v57  ;;  %v1746_v47 = vadd.f32 %v1745_v24, %v3970_v54  ;;  %v3075_v57 = vor.u32 %v3550_v3, %v3074_v13 }
 0x13a   : > { %v2012_v27 = vpop.f32.mrf.mxu0 }
 0x13b   : > { %1784 = vmatmul.bf16.gmra.mxu1 %v3027_v21  ;;  %1873 = vmatmul.bf16.gmra.mxu2 %v3031_v23  ;;  %v4158_v39 = vadd.f32 %v2009_v55, %v1921_v26  ;;  %v3549_v55 = vld [vmem:[%s3725_s29 + $0x418] sm:$0xf0] }
 0x13c   : > { %1962 = vmatmul.bf16.gmra.mxu3 %v3035_v19  ;;  %v3067_v12 = vor.u32 %v3549_v55, %v3066_v62  ;;  %v3110_v62 = vld [vmem:[%s3725_s29 + $0x448] sm:$0xf]  ;;  %v3559_v55 = vld [vmem:[%s3725_s29 + $0x468] sm:$0xf0] }
 0x13d   : > { %2051 = vmatmul.bf16.gmra.mxu0 %v3039_v25 }
 0x13e   : > { %v1834_v28 = vpop.f32.mrf.mxu2 }
 0x13f   : > { %v1835_v35 = vadd.f32 %v1834_v28, %v1746_v47  ;;  %v1923_v41 = vpop.f32.mrf.mxu3  ;;  %v3553_v28 = vld [vmem:[%s3725_s29 + $0x43c] sm:$0xf] }
 0x140   : > { %v1747_v42 = vpop.f32.mrf.mxu1 }
 0x141   : > { %v1924_v40 = vadd.f32 %v1923_v41, %v1835_v35  ;;  %v1748_v63 = vadd.f32 %v1747_v42, %v3978_v60  ;;  %v3096_v35 = vld [vmem:[%s3725_s29 + $0x45c] sm:$0xf0] }
 0x142   : > { %v2014_v48 = vpop.f32.mrf.mxu0  ;;  %v3102_v42 = vld [vmem:[%s3725_s29 + $0x440] sm:$0xf]  ;;  %v3099_v2 = vor.u32 %v3553_v28, %v3096_v35 }
 0x143   : > { %v4163_v53 = vadd.f32 %v2012_v27, %v1924_v40  ;;  %v3558_v40 = vld [vmem:[%s3725_s29 + $0x460] sm:$0xf0]  ;;  %v2580_v35 = vld [vmem:[%s3725_s29 + $0x3c] sm:$0xf0] }
 0x144   : > { %v3103_v13 = vor.u32 %v3558_v40, %v3102_v42  ;;  %v2586_v42 = vld [vmem:[%s3725_s29 + $0x20] sm:$0xf]  ;;  %v3426_v40 = vld [vmem:[%s3725_s29 + $0x40] sm:$0xf0] }
 0x146   : > { %v1836_v54 = vpop.f32.mrf.mxu2 }
 0x147   : > { %v1837_v4 = vadd.f32 %v1836_v54, %v1748_v63  ;;  %v1925_v9 = vpop.f32.mrf.mxu3 }
 0x148   : > { %v1750_v14 = vpop.f32.mrf.mxu1 }
 0x149   : > { %v1926_v20 = vadd.f32 %v1925_v9, %v1837_v4  ;;  %v1751_v23 = vadd.f32 %v1750_v14, %v3994_v10  ;;  %v3111_v4 = vor.u32 %v3559_v55, %v3110_v62 }
 0x14a   : > { %v2017_v21 = vpop.f32.mrf.mxu0 }
 0x14b   : > { %1789 = vmatmul.bf16.gmra.mxu1 %v3063_v11  ;;  %1878 = vmatmul.bf16.gmra.mxu2 %v3067_v12  ;;  %v4172_v60 = vadd.f32 %v2014_v48, %v1926_v20  ;;  %v3554_v48 = vld [vmem:[%s3725_s29 + $0x444] sm:$0xf] }
 0x14c   : > { %1967 = vmatmul.bf16.gmra.mxu3 %v3071_v15  ;;  %v3107_v54 = vor.u32 %v3554_v48, %v3104_v52 }
 0x14d   : > { %2056 = vmatmul.bf16.gmra.mxu0 %v3075_v57 }
 0x14e   : > { %v1839_v24 = vpop.f32.mrf.mxu2 }
 0x14f   : > { %v1840_v19 = vadd.f32 %v1839_v24, %v1751_v23  ;;  %v1928_v25 = vpop.f32.mrf.mxu3  ;;  %v3420_v24 = vld [vmem:[%s3725_s29 + $0x14] sm:$0xf] }
 0x150   : > { %v1752_v26 = vpop.f32.mrf.mxu1 }
 0x151   : > { %v1929_v27 = vadd.f32 %v1928_v25, %v1840_v19  ;;  %v1753_v49 = vadd.f32 %v1752_v26, %v4008_v18  ;;  %v2572_v19 = vld [vmem:[%s3725_s29 + $0x34] sm:$0xf0] }
 0x152   : > { %v2019_v47 = vpop.f32.mrf.mxu0  ;;  %v2578_v26 = vld [vmem:[%s3725_s29 + $0x18] sm:$0xf]  ;;  %v2575_v52 = vor.u32 %v3420_v24, %v2572_v19  ;;  %v2616_v19 = vld [vmem:[%s3725_s29 + $0x84] sm:$0xf0] }
 0x153   : > { %v4177_v41 = vadd.f32 %v2017_v21, %v1929_v27  ;;  %v3425_v27 = vld [vmem:[%s3725_s29 + $0x38] sm:$0xf0] }
 0x154   : > { %v2579_v62 = vor.u32 %v3425_v27, %v2578_v26  ;;  %v2622_v26 = vld [vmem:[%s3725_s29 + $0x68] sm:$0xf]  ;;  %v3435_v27 = vld [vmem:[%s3725_s29 + $0x88] sm:$0xf0] }
 0x156   : > { %v1841_v10 = vpop.f32.mrf.mxu2 }
 0x157   : > { %v1842_v30 = vadd.f32 %v1841_v10, %v1753_v49  ;;  %v1930_v63 = vpop.f32.mrf.mxu3 }
 0x158   : > { %v1755_v3 = vpop.f32.mrf.mxu1 }
 0x159   : > { %v1931_v9 = vadd.f32 %v1930_v63, %v1842_v30  ;;  %v1756_v12 = vadd.f32 %v1755_v3, %v4030_v38  ;;  %v2587_v30 = vor.u32 %v3426_v40, %v2586_v42 }
 0x15a   : > { %v2022_v11 = vpop.f32.mrf.mxu0 }
 0x15b   : > { %1794 = vmatmul.bf16.gmra.mxu1 %v3099_v2  ;;  %1883 = vmatmul.bf16.gmra.mxu2 %v3103_v13  ;;  %v4186_v18 = vadd.f32 %v2019_v47, %v1931_v9  ;;  %v3421_v47 = vld [vmem:[%s3725_s29 + $0x1c] sm:$0xf] }
 0x15c   : > { %1972 = vmatmul.bf16.gmra.mxu3 %v3107_v54  ;;  %v2583_v10 = vor.u32 %v3421_v47, %v2580_v35 }
 0x15d   : > { %2061 = vmatmul.bf16.gmra.mxu0 %v3111_v4 }
 0x15e   : > { %v1844_v14 = vpop.f32.mrf.mxu2 }
 0x15f   : > { %v1845_v15 = vadd.f32 %v1844_v14, %v1756_v12  ;;  %v1933_v57 = vpop.f32.mrf.mxu3  ;;  %v3429_v14 = vld [vmem:[%s3725_s29 + $0x5c] sm:$0xf] }
 0x160   : > { %v1757_v20 = vpop.f32.mrf.mxu1 }
 0x161   : > { %v1934_v21 = vadd.f32 %v1933_v57, %v1845_v15  ;;  %v1758_v28 = vadd.f32 %v1757_v20, %v4038_v46  ;;  %v2608_v15 = vld [vmem:[%s3725_s29 + $0x7c] sm:$0xf0] }
 0x162   : > { %v2024_v23 = vpop.f32.mrf.mxu0  ;;  %v2614_v20 = vld [vmem:[%s3725_s29 + $0x60] sm:$0xf]  ;;  %v2611_v35 = vor.u32 %v3429_v14, %v2608_v15  ;;  %v2652_v15 = vld [vmem:[%s3725_s29 + $0xcc] sm:$0xf0] }
 0x163   : > { %v4191_v25 = vadd.f32 %v2022_v11, %v1934_v21  ;;  %v3434_v21 = vld [vmem:[%s3725_s29 + $0x80] sm:$0xf0] }
 0x164   : > { %v2615_v42 = vor.u32 %v3434_v21, %v2614_v20  ;;  %v2658_v20 = vld [vmem:[%s3725_s29 + $0xb0] sm:$0xf]  ;;  %v3444_v21 = vld [vmem:[%s3725_s29 + $0xd0] sm:$0xf0] }
 0x166   : > { %v1846_v38 = vpop.f32.mrf.mxu2 }
 0x167   : > { %v1847_v48 = vadd.f32 %v1846_v38, %v1758_v28  ;;  %v1935_v49 = vpop.f32.mrf.mxu3 }
 0x168   : > { %v1760_v55 = vpop.f32.mrf.mxu1 }
 0x169   : > { %v1936_v63 = vadd.f32 %v1935_v49, %v1847_v48  ;;  %v1761_v13 = vadd.f32 %v1760_v55, %v3944_v36  ;;  %v2623_v48 = vor.u32 %v3435_v27, %v2622_v26 }
 0x16a   : > { %v2027_v2 = vpop.f32.mrf.mxu0 }
 0x16b   : > { %2075 = vmatmul.bf16.vlgmr.msra.gmra.mxu1 %v2575_v52  ;;  %2164 = vmatmul.bf16.vlgmr.msra.gmra.mxu2 %v2579_v62  ;;  %v4200_v46 = vadd.f32 %v2024_v23, %v1936_v63  ;;  %v3430_v23 = vld [vmem:[%s3725_s29 + $0x64] sm:$0xf] }
 0x16c   : > { %2253 = vmatmul.bf16.vlgmr.msra.gmra.mxu3 %v2583_v10  ;;  %v2619_v38 = vor.u32 %v3430_v23, %v2616_v19 }
 0x16d   : > { %2342 = vmatmul.bf16.vlgmr.msra.gmra.mxu0 %v2587_v30 }
 0x16e   : > { %v1849_v3 = vpop.f32.mrf.mxu2 }
 0x16f   : > { %v1850_v54 = vadd.f32 %v1849_v3, %v1761_v13  ;;  %v1938_v4 = vpop.f32.mrf.mxu3  ;;  %v3438_v3 = vld [vmem:[%s3725_s29 + $0xa4] sm:$0xf] }
 0x170   : > { %v1762_v9 = vpop.f32.mrf.mxu1 }
 0x171   : > { %v1939_v11 = vadd.f32 %v1938_v4, %v1850_v54  ;;  %v1763_v24 = vadd.f32 %v1762_v9, %v3966_v50  ;;  %v2644_v54 = vld [vmem:[%s3725_s29 + $0xc4] sm:$0xf0] }
 0x172   : > { %v2029_v12 = vpop.f32.mrf.mxu0  ;;  %v2650_v9 = vld [vmem:[%s3725_s29 + $0xa8] sm:$0xf]  ;;  %v2647_v19 = vor.u32 %v3438_v3, %v2644_v54  ;;  %v2688_v54 = vld [vmem:[%s3725_s29 + $0x114] sm:$0xf0] }
 0x173   : > { %v4205_v57 = vadd.f32 %v2027_v2, %v1939_v11  ;;  %v3443_v11 = vld [vmem:[%s3725_s29 + $0xc8] sm:$0xf0] }
 0x174   : > { %v2651_v26 = vor.u32 %v3443_v11, %v2650_v9  ;;  %v2694_v9 = vld [vmem:[%s3725_s29 + $0xf8] sm:$0xf]  ;;  %v3453_v11 = vld [vmem:[%s3725_s29 + $0x118] sm:$0xf0] }
 0x176   : > { %v1851_v36 = vpop.f32.mrf.mxu2 }
 0x177   : > { %v1852_v47 = vadd.f32 %v1851_v36, %v1763_v24  ;;  %v1940_v28 = vpop.f32.mrf.mxu3 }
 0x178   : > { %v1765_v40 = vpop.f32.mrf.mxu1 }
 0x179   : > { %v1941_v49 = vadd.f32 %v1940_v28, %v1852_v47  ;;  %v1766_v62 = vadd.f32 %v1765_v40, %v3974_v58  ;;  %v2659_v47 = vor.u32 %v3444_v21, %v2658_v20 }
 0x17a   : > { %v2032_v52 = vpop.f32.mrf.mxu0 }
 0x17b   : > { %2080 = vmatmul.bf16.gmra.mxu1 %v2611_v35  ;;  %2169 = vmatmul.bf16.gmra.mxu2 %v2615_v42  ;;  %v4214_v50 = vadd.f32 %v2029_v12, %v1941_v49  ;;  %v3439_v12 = vld [vmem:[%s3725_s29 + $0xac] sm:$0xf] }
 0x17c   : > { %2258 = vmatmul.bf16.gmra.mxu3 %v2619_v38  ;;  %v2655_v36 = vor.u32 %v3439_v12, %v2652_v15 }
 0x17d   : > { %2347 = vmatmul.bf16.gmra.mxu0 %v2623_v48 }
 0x17e   : > { %v1854_v55 = vpop.f32.mrf.mxu2 }
 0x17f   : > { %v1855_v10 = vadd.f32 %v1854_v55, %v1766_v62  ;;  %v1943_v30 = vpop.f32.mrf.mxu3  ;;  %v3447_v55 = vld [vmem:[%s3725_s29 + $0xec] sm:$0xf] }
 0x180   : > { %v1767_v63 = vpop.f32.mrf.mxu1 }
 0x181   : > { %v1944_v2 = vadd.f32 %v1943_v30, %v1855_v10  ;;  %v1768_v14 = vadd.f32 %v1767_v63, %v3990_v6  ;;  %v2680_v10 = vld [vmem:[%s3725_s29 + $0x10c] sm:$0xf0] }
 0x182   : > { %v2034_v13 = vpop.f32.mrf.mxu0  ;;  %v2686_v63 = vld [vmem:[%s3725_s29 + $0xf0] sm:$0xf]  ;;  %v2683_v15 = vor.u32 %v3447_v55, %v2680_v10  ;;  %v2724_v10 = vld [vmem:[%s3725_s29 + $0x15c] sm:$0xf0] }
 0x183   : > { %v4219_v4 = vadd.f32 %v2032_v52, %v1944_v2  ;;  %v3452_v2 = vld [vmem:[%s3725_s29 + $0x110] sm:$0xf0] }
 0x184   : > { %v2687_v20 = vor.u32 %v3452_v2, %v2686_v63  ;;  %v2730_v63 = vld [vmem:[%s3725_s29 + $0x140] sm:$0xf]  ;;  %v3462_v2 = vld [vmem:[%s3725_s29 + $0x160] sm:$0xf0] }
 0x186   : > { %v1856_v58 = vpop.f32.mrf.mxu2 }
 0x187   : > { %v1857_v23 = vadd.f32 %v1856_v58, %v1768_v14  ;;  %v1945_v24 = vpop.f32.mrf.mxu3 }
 0x188   : > { %v1770_v27 = vpop.f32.mrf.mxu1 }
 0x189   : > { %v1946_v28 = vadd.f32 %v1945_v24, %v1857_v23  ;;  %v1771_v42 = vadd.f32 %v1770_v27, %v4004_v16  ;;  %v2695_v23 = vor.u32 %v3453_v11, %v2694_v9 }
 0x18a   : > { %v2037_v35 = vpop.f32.mrf.mxu0 }
 0x18b   : > { %2085 = vmatmul.bf16.gmra.mxu1 %v2647_v19  ;;  %2174 = vmatmul.bf16.gmra.mxu2 %v2651_v26  ;;  %v4228_v6 = vadd.f32 %v2034_v13, %v1946_v28  ;;  %v3448_v13 = vld [vmem:[%s3725_s29 + $0xf4] sm:$0xf] }
 0x18c   : > { %2263 = vmatmul.bf16.gmra.mxu3 %v2655_v36  ;;  %v2691_v58 = vor.u32 %v3448_v13, %v2688_v54 }
 0x18d   : > { %2352 = vmatmul.bf16.gmra.mxu0 %v2659_v47 }
 0x18e   : > { %v1859_v40 = vpop.f32.mrf.mxu2 }
 0x18f   : > { %v1860_v38 = vadd.f32 %v1859_v40, %v1771_v42  ;;  %v1948_v48 = vpop.f32.mrf.mxu3  ;;  %v3456_v40 = vld [vmem:[%s3725_s29 + $0x134] sm:$0xf] }
 0x190   : > { %v1772_v49 = vpop.f32.mrf.mxu1 }
 0x191   : > { %v1949_v52 = vadd.f32 %v1948_v48, %v1860_v38  ;;  %v1773_v3 = vadd.f32 %v1772_v49, %v4026_v31  ;;  %v2716_v38 = vld [vmem:[%s3725_s29 + $0x154] sm:$0xf0] }
 0x192   : > { %v2039_v62 = vpop.f32.mrf.mxu0  ;;  %v2722_v49 = vld [vmem:[%s3725_s29 + $0x138] sm:$0xf]  ;;  %v2719_v54 = vor.u32 %v3456_v40, %v2716_v38  ;;  %v2760_v38 = vld [vmem:[%s3725_s29 + $0x1a4] sm:$0xf0] }
 0x193   : > { %v4233_v30 = vadd.f32 %v2037_v35, %v1949_v52  ;;  %v3461_v52 = vld [vmem:[%s3725_s29 + $0x158] sm:$0xf0] }
 0x194   : > { %v2723_v9 = vor.u32 %v3461_v52, %v2722_v49  ;;  %v2766_v49 = vld [vmem:[%s3725_s29 + $0x188] sm:$0xf]  ;;  %v3471_v52 = vld [vmem:[%s3725_s29 + $0x1a8] sm:$0xf0] }
 0x196   : > { %v1861_v16 = vpop.f32.mrf.mxu2 }
 0x197   : > { %v1862_v12 = vadd.f32 %v1861_v16, %v1773_v3  ;;  %v1950_v14 = vpop.f32.mrf.mxu3 }
 0x198   : > { %v1775_v21 = vpop.f32.mrf.mxu1 }
 0x199   : > { %v1951_v24 = vadd.f32 %v1950_v14, %v1862_v12  ;;  %v1776_v26 = vadd.f32 %v1775_v21, %v4034_v44  ;;  %v2731_v12 = vor.u32 %v3462_v2, %v2730_v63 }
 0x19a   : > { %v2042_v19 = vpop.f32.mrf.mxu0 }
 0x19b   : > { %2090 = vmatmul.bf16.gmra.mxu1 %v2683_v15  ;;  %2179 = vmatmul.bf16.gmra.mxu2 %v2687_v20  ;;  %v4242_v31 = vadd.f32 %v2039_v62, %v1951_v24  ;;  %v3457_v62 = vld [vmem:[%s3725_s29 + $0x13c] sm:$0xf] }
 0x19c   : > { %2268 = vmatmul.bf16.gmra.mxu3 %v2691_v58  ;;  %v2727_v16 = vor.u32 %v3457_v62, %v2724_v10 }
 0x19d   : > { %2357 = vmatmul.bf16.gmra.mxu0 %v2695_v23 }
 0x19e   : > { %v1864_v27 = vpop.f32.mrf.mxu2 }
 0x19f   : > { %v1865_v36 = vadd.f32 %v1864_v27, %v1776_v26  ;;  %v1953_v47 = vpop.f32.mrf.mxu3  ;;  %v3465_v27 = vld [vmem:[%s3725_s29 + $0x17c] sm:$0xf] }
 0x1a0   : > { %v1777_v28 = vpop.f32.mrf.mxu1 }
 0x1a1   : > { %v1954_v35 = vadd.f32 %v1953_v47, %v1865_v36  ;;  %v1778_v55 = vadd.f32 %v1777_v28, %v4050_v0  ;;  %v2752_v36 = vld [vmem:[%s3725_s29 + $0x19c] sm:$0xf0] }
 0x1a2   : > { %v2044_v42 = vpop.f32.mrf.mxu0  ;;  %v2758_v28 = vld [vmem:[%s3725_s29 + $0x180] sm:$0xf]  ;;  %v2755_v10 = vor.u32 %v3465_v27, %v2752_v36  ;;  %v2796_v36 = vld [vmem:[%s3725_s29 + $0x1ec] sm:$0xf0] }
 0x1a3   : > { %v4247_v48 = vadd.f32 %v2042_v19, %v1954_v35  ;;  %v3470_v35 = vld [vmem:[%s3725_s29 + $0x1a0] sm:$0xf0] }
 0x1a4   : > { %v2759_v63 = vor.u32 %v3470_v35, %v2758_v28  ;;  %v2802_v28 = vld [vmem:[%s3725_s29 + $0x1d0] sm:$0xf]  ;;  %v3480_v35 = vld [vmem:[%s3725_s29 + $0x1f0] sm:$0xf0] }
 0x1a6   : > { %v1866_v44 = vpop.f32.mrf.mxu2 }
 0x1a7   : > { %v1867_v13 = vadd.f32 %v1866_v44, %v1778_v55  ;;  %v1955_v3 = vpop.f32.mrf.mxu3 }
 0x1a8   : > { %v1780_v11 = vpop.f32.mrf.mxu1 }
 0x1a9   : > { %v1956_v14 = vadd.f32 %v1955_v3, %v1867_v13  ;;  %v1781_v20 = vadd.f32 %v1780_v11, %v3946_v37  ;;  %v2767_v13 = vor.u32 %v3471_v52, %v2766_v49 }
 0x1aa   : > { %v2047_v15 = vpop.f32.mrf.mxu0 }
 0x1ab   : > { %2095 = vmatmul.bf16.gmra.mxu1 %v2719_v54  ;;  %2184 = vmatmul.bf16.gmra.mxu2 %v2723_v9  ;;  %v4256_v0 = vadd.f32 %v2044_v42, %v1956_v14  ;;  %v3466_v42 = vld [vmem:[%s3725_s29 + $0x184] sm:$0xf] }
 0x1ac   : > { %2273 = vmatmul.bf16.gmra.mxu3 %v2727_v16  ;;  %v2763_v44 = vor.u32 %v3466_v42, %v2760_v38 }
 0x1ad   : > { %2362 = vmatmul.bf16.gmra.mxu0 %v2731_v12 }
 0x1ae   : > { %v1869_v21 = vpop.f32.mrf.mxu2 }
 0x1af   : > { %v1870_v58 = vadd.f32 %v1869_v21, %v1781_v20  ;;  %v1958_v23 = vpop.f32.mrf.mxu3  ;;  %v3474_v21 = vld [vmem:[%s3725_s29 + $0x1c4] sm:$0xf] }
 0x1b0   : > { %v1782_v24 = vpop.f32.mrf.mxu1 }
 0x1b1   : > { %v1959_v19 = vadd.f32 %v1958_v23, %v1870_v58  ;;  %v1783_v40 = vadd.f32 %v1782_v24, %v3968_v51  ;;  %v2788_v58 = vld [vmem:[%s3725_s29 + $0x1e4] sm:$0xf0] }
 0x1b2   : > { %v2049_v26 = vpop.f32.mrf.mxu0  ;;  %v2794_v24 = vld [vmem:[%s3725_s29 + $0x1c8] sm:$0xf]  ;;  %v2791_v38 = vor.u32 %v3474_v21, %v2788_v58  ;;  %v2832_v58 = vld [vmem:[%s3725_s29 + $0x234] sm:$0xf0] }
 0x1b3   : > { %v4261_v47 = vadd.f32 %v2047_v15, %v1959_v19  ;;  %v3479_v19 = vld [vmem:[%s3725_s29 + $0x1e8] sm:$0xf0] }
 0x1b4   : > { %v2795_v49 = vor.u32 %v3479_v19, %v2794_v24  ;;  %v2838_v24 = vld [vmem:[%s3725_s29 + $0x218] sm:$0xf]  ;;  %v3489_v19 = vld [vmem:[%s3725_s29 + $0x238] sm:$0xf0] }
 0x1b6   : > { %v1871_v37 = vpop.f32.mrf.mxu2 }
 0x1b7   : > { %v1872_v62 = vadd.f32 %v1871_v37, %v1783_v40  ;;  %v1960_v55 = vpop.f32.mrf.mxu3 }
 0x1b8   : > { %v1785_v2 = vpop.f32.mrf.mxu1 }
 0x1b9   : > { %v1961_v3 = vadd.f32 %v1960_v55, %v1872_v62  ;;  %v1786_v9 = vadd.f32 %v1785_v2, %v3976_v59  ;;  %v2803_v62 = vor.u32 %v3480_v35, %v2802_v28 }
 0x1ba   : > { %v2052_v54 = vpop.f32.mrf.mxu0 }
 0x1bb   : > { %2100 = vmatmul.bf16.gmra.mxu1 %v2755_v10  ;;  %2189 = vmatmul.bf16.gmra.mxu2 %v2759_v63  ;;  %v4270_v51 = vadd.f32 %v2049_v26, %v1961_v3  ;;  %v3475_v26 = vld [vmem:[%s3725_s29 + $0x1cc] sm:$0xf] }
 0x1bc   : > { %2278 = vmatmul.bf16.gmra.mxu3 %v2763_v44  ;;  %v2799_v37 = vor.u32 %v3475_v26, %v2796_v36 }
 0x1bd   : > { %2367 = vmatmul.bf16.gmra.mxu0 %v2767_v13 }
 0x1be   : > { %v1874_v11 = vpop.f32.mrf.mxu2 }
 0x1bf   : > { %v1875_v16 = vadd.f32 %v1874_v11, %v1786_v9  ;;  %v1963_v12 = vpop.f32.mrf.mxu3  ;;  %v3483_v11 = vld [vmem:[%s3725_s29 + $0x20c] sm:$0xf] }
 0x1c0   : > { %v1787_v14 = vpop.f32.mrf.mxu1 }
 0x1c1   : > { %v1964_v15 = vadd.f32 %v1963_v12, %v1875_v16  ;;  %v1788_v27 = vadd.f32 %v1787_v14, %v3992_v7  ;;  %v2824_v16 = vld [vmem:[%s3725_s29 + $0x22c] sm:$0xf0] }
 0x1c2   : > { %v2054_v20 = vpop.f32.mrf.mxu0  ;;  %v2830_v14 = vld [vmem:[%s3725_s29 + $0x210] sm:$0xf]  ;;  %v2827_v36 = vor.u32 %v3483_v11, %v2824_v16  ;;  %v2868_v16 = vld [vmem:[%s3725_s29 + $0x27c] sm:$0xf0] }
 0x1c3   : > { %v4275_v23 = vadd.f32 %v2052_v54, %v1964_v15  ;;  %v3488_v15 = vld [vmem:[%s3725_s29 + $0x230] sm:$0xf0] }
 0x1c4   : > { %v2831_v28 = vor.u32 %v3488_v15, %v2830_v14  ;;  %v2874_v14 = vld [vmem:[%s3725_s29 + $0x260] sm:$0xf]  ;;  %v3498_v15 = vld [vmem:[%s3725_s29 + $0x280] sm:$0xf0] }
 0x1c6   : > { %v1876_v59 = vpop.f32.mrf.mxu2 }
 0x1c7   : > { %v1877_v42 = vadd.f32 %v1876_v59, %v1788_v27  ;;  %v1965_v40 = vpop.f32.mrf.mxu3 }
 0x1c8   : > { %v1790_v52 = vpop.f32.mrf.mxu1 }
 0x1c9   : > { %v1966_v55 = vadd.f32 %v1965_v40, %v1877_v42  ;;  %v1791_v63 = vadd.f32 %v1790_v52, %v4006_v17  ;;  %v2839_v42 = vor.u32 %v3489_v19, %v2838_v24 }
 0x1ca   : > { %v2057_v10 = vpop.f32.mrf.mxu0 }
 0x1cb   : > { %2105 = vmatmul.bf16.gmra.mxu1 %v2791_v38  ;;  %2194 = vmatmul.bf16.gmra.mxu2 %v2795_v49  ;;  %v4284_v7 = vadd.f32 %v2054_v20, %v1966_v55  ;;  %v3484_v20 = vld [vmem:[%s3725_s29 + $0x214] sm:$0xf] }
 0x1cc   : > { %2283 = vmatmul.bf16.gmra.mxu3 %v2799_v37  ;;  %v2835_v59 = vor.u32 %v3484_v20, %v2832_v58 }
 0x1cd   : > { %2372 = vmatmul.bf16.gmra.mxu0 %v2803_v62 }
 0x1ce   : > { %v1879_v2 = vpop.f32.mrf.mxu2 }
 0x1cf   : > { %v1880_v44 = vadd.f32 %v1879_v2, %v1791_v63  ;;  %v1968_v13 = vpop.f32.mrf.mxu3  ;;  %v3492_v2 = vld [vmem:[%s3725_s29 + $0x254] sm:$0xf] }
 0x1d0   : > { %v1792_v3 = vpop.f32.mrf.mxu1 }
 0x1d1   : > { %v1969_v54 = vadd.f32 %v1968_v13, %v1880_v44  ;;  %v1793_v21 = vadd.f32 %v1792_v3, %v4028_v32  ;;  %v2860_v44 = vld [vmem:[%s3725_s29 + $0x274] sm:$0xf0] }
 0x1d2   : > { %v2059_v9 = vpop.f32.mrf.mxu0  ;;  %v2866_v3 = vld [vmem:[%s3725_s29 + $0x258] sm:$0xf]  ;;  %v2863_v58 = vor.u32 %v3492_v2, %v2860_v44 }
 0x1d3   : > { %v4289_v12 = vadd.f32 %v2057_v10, %v1969_v54  ;;  %v3497_v54 = vld [vmem:[%s3725_s29 + $0x278] sm:$0xf0] }
 0x1d4   : > { %v2867_v24 = vor.u32 %v3497_v54, %v2866_v3  ;;  %v2910_v3 = vld [vmem:[%s3725_s29 + $0x2a8] sm:$0xf]  ;;  %v3507_v54 = vld [vmem:[%s3725_s29 + $0x2c8] sm:$0xf0] }
 0x1d6   : > { %v1881_v17 = vpop.f32.mrf.mxu2 }
 0x1d7   : > { %v1882_v26 = vadd.f32 %v1881_v17, %v1793_v21  ;;  %v1970_v27 = vpop.f32.mrf.mxu3 }
 0x1d8   : > { %v1795_v35 = vpop.f32.mrf.mxu1 }
 0x1d9   : > { %v1971_v40 = vadd.f32 %v1970_v27, %v1882_v26  ;;  %v1796_v49 = vadd.f32 %v1795_v35, %v4036_v45  ;;  %v2875_v26 = vor.u32 %v3498_v15, %v2874_v14 }
 0x1da   : > { %v2062_v38 = vpop.f32.mrf.mxu0 }
 0x1db   : > { %2110 = vmatmul.bf16.gmra.mxu1 %v2827_v36  ;;  %2199 = vmatmul.bf16.gmra.mxu2 %v2831_v28  ;;  %v4298_v32 = vadd.f32 %v2059_v9, %v1971_v40  ;;  %v3493_v9 = vld [vmem:[%s3725_s29 + $0x25c] sm:$0xf] }
 0x1dc   : > { %2288 = vmatmul.bf16.gmra.mxu3 %v2835_v59  ;;  %v2871_v17 = vor.u32 %v3493_v9, %v2868_v16 }
 0x1dd   : > { %2377 = vmatmul.bf16.gmra.mxu0 %v2839_v42 }
 0x1de   : > { %v1884_v52 = vpop.f32.mrf.mxu2 }
 0x1df   : > { %v1885_v37 = vadd.f32 %v1884_v52, %v1796_v49  ;;  %v1973_v62 = vpop.f32.mrf.mxu3 }
 0x1e0   : > { %v1797_v55 = vpop.f32.mrf.mxu1 }
 0x1e1   : > { %v1974_v10 = vadd.f32 %v1973_v62, %v1885_v37  ;;  %v1798_v11 = vadd.f32 %v1797_v55, %v4052_v1  ;;  %v3501_v37 = vld [vmem:[%s3725_s29 + $0x29c] sm:$0xf]  ;;  %v2896_v62 = vld [vmem:[%s3725_s29 + $0x2bc] sm:$0xf0] }
 0x1e2   : > { %v2064_v63 = vpop.f32.mrf.mxu0  ;;  %v2902_v55 = vld [vmem:[%s3725_s29 + $0x2a0] sm:$0xf]  ;;  %v2899_v14 = vor.u32 %v3501_v37, %v2896_v62  ;;  %v3511_v37 = vld [vmem:[%s3725_s29 + $0x2ec] sm:$0xf]  ;;  %v2940_v62 = vld [vmem:[%s3725_s29 + $0x30c] sm:$0xf0] }
 0x1e3   : > { %v4303_v13 = vadd.f32 %v2062_v38, %v1974_v10  ;;  %v3502_v10 = vld [vmem:[%s3725_s29 + $0x2a4] sm:$0xf] }
 0x1e6   : > { %v1886_v45 = vpop.f32.mrf.mxu2 }
 0x1e7   : > { %v1887_v20 = vadd.f32 %v1886_v45, %v1798_v11  ;;  %v1975_v21 = vpop.f32.mrf.mxu3 }
 0x1e8   : > { %v2076_v19 = vpop.f32.mrf.mxu1 }
 0x1e9   : > { %v1976_v27 = vadd.f32 %v1975_v21, %v1887_v20  ;;  %v2077_v28 = vadd.f32 %v2076_v19, %v4070_v29  ;;  %v3506_v29 = vld [vmem:[%s3725_s29 + $0x2c0] sm:$0xf0]  ;;  %v2911_v21 = vor.u32 %v3507_v54, %v2910_v3 }
 0x1ea   : > { %v2343_v36 = vpop.f32.mrf.mxu0  ;;  %v2903_v15 = vor.u32 %v3506_v29, %v2902_v55  ;;  %v2946_v29 = vld [vmem:[%s3725_s29 + $0x2f0] sm:$0xf] }
 0x1eb   : > { %2115 = vmatmul.bf16.gmra.mxu1 %v2863_v58  ;;  %2204 = vmatmul.bf16.gmra.mxu2 %v2867_v24  ;;  %v4312_v1 = vadd.f32 %v2064_v63, %v1976_v27  ;;  %v2904_v63 = vld [vmem:[%s3725_s29 + $0x2c4] sm:$0xf0] }
 0x1ec   : > { %2293 = vmatmul.bf16.gmra.mxu3 %v2871_v17  ;;  %v2907_v20 = vor.u32 %v3502_v10, %v2904_v63  ;;  %v3516_v10 = vld [vmem:[%s3725_s29 + $0x310] sm:$0xf0] }
 0x1ed   : > { %2382 = vmatmul.bf16.gmra.mxu0 %v2875_v26 }
 0x1ee   : > { %v2165_v35 = vpop.f32.mrf.mxu2 }
 0x1ef   : > { %v2166_v59 = vadd.f32 %v2165_v35, %v2077_v28  ;;  %v2254_v42 = vpop.f32.mrf.mxu3 }
 0x1f0   : > { %v2078_v40 = vpop.f32.mrf.mxu1 }
 0x1f1   : > { %v2255_v38 = vadd.f32 %v2254_v42, %v2166_v59  ;;  %v2079_v44 = vadd.f32 %v2078_v40, %v4079_v8  ;;  %v3510_v40 = vld [vmem:[%s3725_s29 + $0x2e4] sm:$0xf] }
 0x1f2   : > { %v2345_v49 = vpop.f32.mrf.mxu0 }
 0x1f3   : > { %v2344_v52 = vadd.f32 %v2343_v36, %v2255_v38  ;;  %v2932_v38 = vld [vmem:[%s3725_s29 + $0x304] sm:$0xf0] }
 0x1f4   : > { %v2935_v3 = vor.u32 %v3510_v40, %v2932_v38  ;;  %v2982_v38 = vld [vmem:[%s3725_s29 + $0x338] sm:$0xf] }
 0x1f5   : > { %v2423_v2 = vmax.f32 %v2344_v52, 0.0  ;;  %v3515_v52 = vld [vmem:[%s3725_s29 + $0x308] sm:$0xf0] }
 0x1f6   : > { %v2167_v9 = vpop.f32.mrf.mxu2 }
 0x1f7   : > { %2455 = vst [vmem:[%s4322_s11] sm:$0xff] %v2423_v2  ;;  %v2168_v11 = vadd.f32 %v2167_v9, %v2079_v44  ;;  %v2256_v16 = vpop.f32.mrf.mxu3 }
 0x1f8   : > { %v2081_v45 = vpop.f32.mrf.mxu1 }
 0x1f9   : > { %v2257_v58 = vadd.f32 %v2256_v16, %v2168_v11  ;;  %v2082_v17 = vadd.f32 %v2081_v45, %v4084_v22  ;;  %v2943_v11 = vor.u32 %v3511_v37, %v2940_v62  ;;  %v2947_v16 = vor.u32 %v3516_v10, %v2946_v29 }
 0x1fa   : > { %v2348_v24 = vpop.f32.mrf.mxu0 }
 0x1fb   : > { %v2346_v19 = vadd.f32 %v2345_v49, %v2257_v58  ;;  %2120 = vmatmul.bf16.gmra.mxu1 %v2899_v14  ;;  %2209 = vmatmul.bf16.gmra.mxu2 %v2903_v15  ;;  %v2938_v49 = vld [vmem:[%s3725_s29 + $0x2e8] sm:$0xf] }
 0x1fc   : > { %2298 = vmatmul.bf16.gmra.mxu3 %v2907_v20  ;;  %v2939_v54 = vor.u32 %v3515_v52, %v2938_v49  ;;  %v3525_v49 = vld [vmem:[%s3725_s29 + $0x358] sm:$0xf0] }
 0x1fd   : > { %2387 = vmatmul.bf16.gmra.mxu0 %v2911_v21  ;;  %v2424_v8 = vmax.f32 %v2346_v19, 0.0 }
 0x1fe   : > { %v2170_v26 = vpop.f32.mrf.mxu2 }
 0x1ff   : > { %2456 = vst [vmem:[%s4322_s11 + $0x8] sm:$0xff] %v2424_v8  ;;  %v2171_v27 = vadd.f32 %v2170_v26, %v2082_v17  ;;  %v2259_v36 = vpop.f32.mrf.mxu3 }
 0x200   : > { %v2083_v28 = vpop.f32.mrf.mxu1 }
 0x201   : > { %v2260_v35 = vadd.f32 %v2259_v36, %v2171_v27  ;;  %v2084_v22 = vadd.f32 %v2083_v28, %v4093_v56  ;;  %v3519_v27 = vld [vmem:[%s3725_s29 + $0x32c] sm:$0xf]  ;;  %v2968_v36 = vld [vmem:[%s3725_s29 + $0x34c] sm:$0xf0] }
 0x202   : > { %v2350_v59 = vpop.f32.mrf.mxu0  ;;  %v2974_v28 = vld [vmem:[%s3725_s29 + $0x330] sm:$0xf] }
 0x203   : > { %v2349_v42 = vadd.f32 %v2348_v24, %v2260_v35  ;;  %v3524_v35 = vld [vmem:[%s3725_s29 + $0x350] sm:$0xf0] }
 0x205   : > { %v2425_v55 = vmax.f32 %v2349_v42, 0.0  ;;  %v2976_v42 = vld [vmem:[%s3725_s29 + $0x354] sm:$0xf0] }
 0x206   : > { %v2172_v63 = vpop.f32.mrf.mxu2 }
 0x207   : > { %2457 = vst [vmem:[%s4322_s11 + $0x10] sm:$0xff] %v2425_v55  ;;  %v2173_v2 = vadd.f32 %v2172_v63, %v2084_v22  ;;  %v2261_v44 = vpop.f32.mrf.mxu3  ;;  %v2971_v55 = vor.u32 %v3519_v27, %v2968_v36  ;;  %v2975_v22 = vor.u32 %v3524_v35, %v2974_v28  ;;  %v2983_v63 = vor.u32 %v3525_v49, %v2982_v38  ;;  %v3534_v27 = vld [vmem:[%s3725_s29 + $0x3a0] sm:$0xf0] }
 0x208   : > { %v2086_v9 = vpop.f32.mrf.mxu1 }
 0x209   : > { %v2262_v14 = vadd.f32 %v2261_v44, %v2173_v2  ;;  %v2087_v20 = vadd.f32 %v2086_v9, %v4110_v33 }
 0x20a   : > { %v2353_v15 = vpop.f32.mrf.mxu0 }
 0x20b   : > { %v2351_v45 = vadd.f32 %v2350_v59, %v2262_v14  ;;  %2125 = vmatmul.bf16.gmra.mxu1 %v2935_v3  ;;  %2214 = vmatmul.bf16.gmra.mxu2 %v2939_v54  ;;  %v3520_v59 = vld [vmem:[%s3725_s29 + $0x334] sm:$0xf] }
 0x20c   : > { %2303 = vmatmul.bf16.gmra.mxu3 %v2943_v11  ;;  %v2979_v10 = vor.u32 %v3520_v59, %v2976_v42 }
 0x20d   : > { %2392 = vmatmul.bf16.gmra.mxu0 %v2947_v16  ;;  %v2426_v56 = vmax.f32 %v2351_v45, 0.0 }
 0x20e   : > { %v2175_v21 = vpop.f32.mrf.mxu2 }
 0x20f   : > { %2458 = vst [vmem:[%s4322_s11 + $0x18] sm:$0xff] %v2426_v56  ;;  %v2176_v58 = vadd.f32 %v2175_v21, %v2087_v20  ;;  %v2264_v24 = vpop.f32.mrf.mxu3  ;;  %v3528_v20 = vld [vmem:[%s3725_s29 + $0x374] sm:$0xf]  ;;  %v3004_v21 = vld [vmem:[%s3725_s29 + $0x394] sm:$0xf0] }
 0x210   : > { %v2088_v19 = vpop.f32.mrf.mxu1  ;;  %v3007_v59 = vor.u32 %v3528_v20, %v3004_v21 }
 0x211   : > { %v2265_v8 = vadd.f32 %v2264_v24, %v2176_v58  ;;  %v2089_v33 = vadd.f32 %v2088_v19, %v4119_v61  ;;  %v3010_v58 = vld [vmem:[%s3725_s29 + $0x378] sm:$0xf]  ;;  %v3533_v24 = vld [vmem:[%s3725_s29 + $0x398] sm:$0xf0] }
 0x212   : > { %v2355_v17 = vpop.f32.mrf.mxu0  ;;  %v3529_v19 = vld [vmem:[%s3725_s29 + $0x37c] sm:$0xf]  ;;  %v3011_v42 = vor.u32 %v3533_v24, %v3010_v58 }
 0x213   : > { %v2354_v26 = vadd.f32 %v2353_v15, %v2265_v8  ;;  %v3012_v8 = vld [vmem:[%s3725_s29 + $0x39c] sm:$0xf0] }
 0x215   : > { %v2427_v40 = vmax.f32 %v2354_v26, 0.0  ;;  %v3018_v26 = vld [vmem:[%s3725_s29 + $0x380] sm:$0xf] }
 0x216   : > { %v2177_v52 = vpop.f32.mrf.mxu2  ;;  %v3019_v38 = vor.u32 %v3534_v27, %v3018_v26 }
 0x217   : > { %2459 = vst [vmem:[%s4322_s11 + $0x20] sm:$0xff] %v2427_v40  ;;  %v2178_v37 = vadd.f32 %v2177_v52, %v2089_v33  ;;  %v2266_v62 = vpop.f32.mrf.mxu3  ;;  %v3015_v33 = vor.u32 %v3529_v19, %v3012_v8 }
 0x218   : > { %v2091_v29 = vpop.f32.mrf.mxu1 }
 0x219   : > { %v2267_v2 = vadd.f32 %v2266_v62, %v2178_v37  ;;  %v2092_v54 = vadd.f32 %v2091_v29, %v4124_v5 }
 0x21a   : > { %v2358_v44 = vpop.f32.mrf.mxu0 }
 0x21b   : > { %v2356_v3 = vadd.f32 %v2355_v17, %v2267_v2  ;;  %2130 = vmatmul.bf16.gmra.mxu1 %v2971_v55  ;;  %2219 = vmatmul.bf16.gmra.mxu2 %v2975_v22 }
 0x21c   : > { %2308 = vmatmul.bf16.gmra.mxu3 %v2979_v10 }
 0x21d   : > { %2397 = vmatmul.bf16.gmra.mxu0 %v2983_v63  ;;  %v2428_v61 = vmax.f32 %v2356_v3, 0.0  ;;  %v3537_v3 = vld [vmem:[%s3725_s29 + $0x3bc] sm:$0xf] }
 0x21e   : > { %v2180_v9 = vpop.f32.mrf.mxu2 }
 0x21f   : > { %2460 = vst [vmem:[%s4322_s11 + $0x28] sm:$0xff] %v2428_v61  ;;  %v2181_v11 = vadd.f32 %v2180_v9, %v2092_v54  ;;  %v2269_v16 = vpop.f32.mrf.mxu3  ;;  %v3040_v61 = vld [vmem:[%s3725_s29 + $0x3dc] sm:$0xf0]  ;;  %v3542_v9 = vld [vmem:[%s3725_s29 + $0x3e0] sm:$0xf0] }
 0x220   : > { %v2093_v14 = vpop.f32.mrf.mxu1  ;;  %v3046_v54 = vld [vmem:[%s3725_s29 + $0x3c0] sm:$0xf]  ;;  %v3043_v58 = vor.u32 %v3537_v3, %v3040_v61 }
 0x221   : > { %v2270_v15 = vadd.f32 %v2269_v16, %v2181_v11  ;;  %v2094_v5 = vadd.f32 %v2093_v14, %v4132_v34  ;;  %v3538_v11 = vld [vmem:[%s3725_s29 + $0x3c4] sm:$0xf]  ;;  %v3048_v16 = vld [vmem:[%s3725_s29 + $0x3e4] sm:$0xf0]  ;;  %v3047_v24 = vor.u32 %v3542_v9, %v3046_v54 }
 0x222   : > { %v2360_v45 = vpop.f32.mrf.mxu0  ;;  %v3051_v8 = vor.u32 %v3538_v11, %v3048_v16 }
 0x223   : > { %v2359_v56 = vadd.f32 %v2358_v44, %v2270_v15  ;;  %v3054_v15 = vld [vmem:[%s3725_s29 + $0x3c8] sm:$0xf] }
 0x225   : > { %v2429_v17 = vmax.f32 %v2359_v56, 0.0 }
 0x226   : > { %v2182_v36 = vpop.f32.mrf.mxu2 }
 0x227   : > { %2461 = vst [vmem:[%s4322_s11 + $0x30] sm:$0xff] %v2429_v17  ;;  %v2183_v28 = vadd.f32 %v2182_v36, %v2094_v5  ;;  %v2271_v35 = vpop.f32.mrf.mxu3 }
 0x228   : > { %v2096_v40 = vpop.f32.mrf.mxu1 }
 0x229   : > { %v2272_v49 = vadd.f32 %v2271_v35, %v2183_v28  ;;  %v2097_v62 = vadd.f32 %v2096_v40, %v4149_v43 }
 0x22a   : > { %v2363_v52 = vpop.f32.mrf.mxu0 }
 0x22b   : > { %v2361_v37 = vadd.f32 %v2360_v45, %v2272_v49  ;;  %2135 = vmatmul.bf16.gmra.mxu1 %v3007_v59  ;;  %2224 = vmatmul.bf16.gmra.mxu2 %v3011_v42  ;;  %v3543_v45 = vld [vmem:[%s3725_s29 + $0x3e8] sm:$0xf0]  ;;  %v3546_v49 = vld [vmem:[%s3725_s29 + $0x404] sm:$0xf] }
 0x22c   : > { %2313 = vmatmul.bf16.gmra.mxu3 %v3015_v33  ;;  %v3055_v17 = vor.u32 %v3543_v45, %v3054_v15 }
 0x22d   : > { %2402 = vmatmul.bf16.gmra.mxu0 %v3019_v38  ;;  %v2430_v34 = vmax.f32 %v2361_v37, 0.0  ;;  %v3082_v37 = vld [vmem:[%s3725_s29 + $0x408] sm:$0xf] }
 0x22e   : > { %v2185_v55 = vpop.f32.mrf.mxu2 }
 0x22f   : > { %2462 = vst [vmem:[%s4322_s11 + $0x38] sm:$0xff] %v2430_v34  ;;  %v2186_v22 = vadd.f32 %v2185_v55, %v2097_v62  ;;  %v2274_v29 = vpop.f32.mrf.mxu3  ;;  %v3551_v34 = vld [vmem:[%s3725_s29 + $0x428] sm:$0xf0]  ;;  %v3084_v55 = vld [vmem:[%s3725_s29 + $0x42c] sm:$0xf0] }
 0x230   : > { %v2098_v10 = vpop.f32.mrf.mxu1  ;;  %v3547_v62 = vld [vmem:[%s3725_s29 + $0x40c] sm:$0xf]  ;;  %v3083_v61 = vor.u32 %v3551_v34, %v3082_v37 }
 0x231   : > { %v2275_v63 = vadd.f32 %v2274_v29, %v2186_v22  ;;  %v2099_v43 = vadd.f32 %v2098_v10, %v4158_v39  ;;  %v3090_v29 = vld [vmem:[%s3725_s29 + $0x410] sm:$0xf]  ;;  %v3552_v10 = vld [vmem:[%s3725_s29 + $0x430] sm:$0xf0]  ;;  %v3087_v9 = vor.u32 %v3547_v62, %v3084_v55 }
 0x232   : > { %v2365_v2 = vpop.f32.mrf.mxu0  ;;  %v3091_v11 = vor.u32 %v3552_v10, %v3090_v29 }
 0x233   : > { %v2364_v44 = vadd.f32 %v2363_v52, %v2275_v63  ;;  %v3076_v52 = vld [vmem:[%s3725_s29 + $0x424] sm:$0xf0] }
 0x234   : > { %v3079_v3 = vor.u32 %v3546_v49, %v3076_v52 }
 0x235   : > { %v2431_v14 = vmax.f32 %v2364_v44, 0.0 }
 0x236   : > { %v2187_v56 = vpop.f32.mrf.mxu2 }
 0x237   : > { %2463 = vst [vmem:[%s4322_s11 + $0x40] sm:$0xff] %v2431_v14  ;;  %v2188_v20 = vadd.f32 %v2187_v56, %v2099_v43  ;;  %v2276_v21 = vpop.f32.mrf.mxu3 }
 0x238   : > { %v2101_v19 = vpop.f32.mrf.mxu1 }
 0x239   : > { %v2277_v5 = vadd.f32 %v2276_v21, %v2188_v20  ;;  %v2102_v36 = vadd.f32 %v2101_v19, %v4163_v53 }
 0x23a   : > { %v2368_v26 = vpop.f32.mrf.mxu0 }
 0x23b   : > { %v2366_v27 = vadd.f32 %v2365_v2, %v2277_v5  ;;  %2140 = vmatmul.bf16.gmra.mxu1 %v3043_v58  ;;  %2229 = vmatmul.bf16.gmra.mxu2 %v3047_v24  ;;  %v3118_v5 = vld [vmem:[%s3725_s29 + $0x450] sm:$0xf] }
 0x23c   : > { %2318 = vmatmul.bf16.gmra.mxu3 %v3051_v8  ;;  %v3555_v8 = vld [vmem:[%s3725_s29 + $0x44c] sm:$0xf] }
 0x23d   : > { %2407 = vmatmul.bf16.gmra.mxu0 %v3055_v17  ;;  %v2432_v39 = vmax.f32 %v2366_v27, 0.0  ;;  %v3112_v17 = vld [vmem:[%s3725_s29 + $0x46c] sm:$0xf0]  ;;  %v3556_v27 = vld [vmem:[%s3725_s29 + $0x454] sm:$0xf] }
 0x23e   : > { %v2190_v28 = vpop.f32.mrf.mxu2 }
 0x23f   : > { %2464 = vst [vmem:[%s4322_s11 + $0x48] sm:$0xff] %v2432_v39  ;;  %v2191_v35 = vadd.f32 %v2190_v28, %v2102_v36  ;;  %v2279_v59 = vpop.f32.mrf.mxu3  ;;  %v3120_v39 = vld [vmem:[%s3725_s29 + $0x474] sm:$0xf0] }
 0x240   : > { %v2103_v42 = vpop.f32.mrf.mxu1  ;;  %v3126_v28 = vld [vmem:[%s3725_s29 + $0x458] sm:$0xf]  ;;  %v3123_v52 = vor.u32 %v3556_v27, %v3120_v39 }
 0x241   : > { %v2280_v40 = vadd.f32 %v2279_v59, %v2191_v35  ;;  %v2104_v53 = vadd.f32 %v2103_v42, %v4172_v60  ;;  %v3561_v35 = vld [vmem:[%s3725_s29 + $0x478] sm:$0xf0] }
 0x242   : > { %v2370_v33 = vpop.f32.mrf.mxu0  ;;  %v3127_v37 = vor.u32 %v3561_v35, %v3126_v28 }
 0x243   : > { %v2369_v38 = vadd.f32 %v2368_v26, %v2280_v40  ;;  %v3560_v26 = vld [vmem:[%s3725_s29 + $0x470] sm:$0xf0] }
 0x245   : > { %v2433_v22 = vmax.f32 %v2369_v38, 0.0  ;;  %v3119_v38 = vor.u32 %v3560_v26, %v3118_v5 }
 0x246   : > { %v2192_v63 = vpop.f32.mrf.mxu2 }
 0x247   : > { %2465 = vst [vmem:[%s4322_s11 + $0x50] sm:$0xff] %v2433_v22  ;;  %v2193_v2 = vadd.f32 %v2192_v63, %v2104_v53  ;;  %v2281_v44 = vpop.f32.mrf.mxu3 }
 0x248   : > { %v2106_v54 = vpop.f32.mrf.mxu1 }
 0x249   : > { %v2282_v16 = vadd.f32 %v2281_v44, %v2193_v2  ;;  %v2107_v15 = vadd.f32 %v2106_v54, %v4177_v41 }
 0x24a   : > { %v2373_v14 = vpop.f32.mrf.mxu0 }
 0x24b   : > { %v2371_v43 = vadd.f32 %v2370_v33, %v2282_v16  ;;  %2145 = vmatmul.bf16.gmra.mxu1 %v3079_v3  ;;  %2234 = vmatmul.bf16.gmra.mxu2 %v3083_v61  ;;  %v3115_v33 = vor.u32 %v3555_v8, %v3112_v17 }
 0x24c   : > { %2323 = vmatmul.bf16.gmra.mxu3 %v3087_v9 }
 0x24d   : > { %2412 = vmatmul.bf16.gmra.mxu0 %v3091_v11  ;;  %v2434_v60 = vmax.f32 %v2371_v43, 0.0 }
 0x24e   : > { %v2195_v45 = vpop.f32.mrf.mxu2 }
 0x24f   : > { %2466 = vst [vmem:[%s4322_s11 + $0x58] sm:$0xff] %v2434_v60  ;;  %v2196_v56 = vadd.f32 %v2195_v45, %v2107_v15  ;;  %v2284_v20 = vpop.f32.mrf.mxu3 }
 0x250   : > { %v2108_v21 = vpop.f32.mrf.mxu1 }
 0x251   : > { %v2285_v58 = vadd.f32 %v2284_v20, %v2196_v56  ;;  %v2109_v41 = vadd.f32 %v2108_v21, %v4186_v18 }
 0x252   : > { %v2375_v24 = vpop.f32.mrf.mxu0 }
 0x253   : > { %v2374_v19 = vadd.f32 %v2373_v14, %v2285_v58 }
 0x255   : > { %v2435_v36 = vmax.f32 %v2374_v19, 0.0 }
 0x256   : > { %v2197_v59 = vpop.f32.mrf.mxu2 }
 0x257   : > { %2467 = vst [vmem:[%s4322_s11 + $0x60] sm:$0xff] %v2435_v36  ;;  %v2198_v42 = vadd.f32 %v2197_v59, %v2109_v41  ;;  %v2286_v40 = vpop.f32.mrf.mxu3 }
 0x258   : > { %v2111_v49 = vpop.f32.mrf.mxu1 }
 0x259   : > { %v2287_v34 = vadd.f32 %v2286_v40, %v2198_v42  ;;  %v2112_v22 = vadd.f32 %v2111_v49, %v4191_v25 }
 0x25a   : > { %v2378_v62 = vpop.f32.mrf.mxu0 }
 0x25b   : > { %v2376_v55 = vadd.f32 %v2375_v24, %v2287_v34  ;;  %2150 = vmatmul.bf16.gmra.mxu1 %v3115_v33  ;;  %2239 = vmatmul.bf16.gmra.mxu2 %v3119_v38 }
 0x25c   : > { %2328 = vmatmul.bf16.gmra.mxu3 %v3123_v52 }
 0x25d   : > { %2417 = vmatmul.bf16.gmra.mxu0 %v3127_v37  ;;  %v2436_v18 = vmax.f32 %v2376_v55, 0.0 }
 0x25e   : > { %v2200_v53 = vpop.f32.mrf.mxu2 }
 0x25f   : > { %2468 = vst [vmem:[%s4322_s11 + $0x68] sm:$0xff] %v2436_v18  ;;  %v2201_v29 = vadd.f32 %v2200_v53, %v2112_v22  ;;  %v2289_v10 = vpop.f32.mrf.mxu3 }
 0x260   : > { %v2113_v63 = vpop.f32.mrf.mxu1 }
 0x261   : > { %v2290_v2 = vadd.f32 %v2289_v10, %v2201_v29  ;;  %v2114_v54 = vadd.f32 %v2113_v63, %v4200_v46 }
 0x262   : > { %v2380_v44 = vpop.f32.mrf.mxu0 }
 0x263   : > { %v2379_v3 = vadd.f32 %v2378_v62, %v2290_v2 }
 0x265   : > { %v2437_v61 = vmax.f32 %v2379_v3, 0.0 }
 0x266   : > { %v2202_v9 = vpop.f32.mrf.mxu2 }
 0x267   : > { %2469 = vst [vmem:[%s4322_s11 + $0x70] sm:$0xff] %v2437_v61  ;;  %v2203_v11 = vadd.f32 %v2202_v9, %v2114_v54  ;;  %v2291_v16 = vpop.f32.mrf.mxu3 }
 0x268   : > { %v2116_v14 = vpop.f32.mrf.mxu1 }
 0x269   : > { %v2292_v43 = vadd.f32 %v2291_v16, %v2203_v11  ;;  %v2117_v45 = vadd.f32 %v2116_v14, %v4205_v57 }
 0x26a   : > { %v2383_v25 = vpop.f32.mrf.mxu0 }
 0x26b   : > { %v2381_v60 = vadd.f32 %v2380_v44, %v2292_v43 }
 0x26d   : > { %v2438_v15 = vmax.f32 %v2381_v60, 0.0 }
 0x26e   : > { %v2205_v56 = vpop.f32.mrf.mxu2 }
 0x26f   : > { %2470 = vst [vmem:[%s4322_s11 + $0x78] sm:$0xff] %v2438_v15  ;;  %v2206_v20 = vadd.f32 %v2205_v56, %v2117_v45  ;;  %v2294_v21 = vpop.f32.mrf.mxu3 }
 0x270   : > { %v2118_v58 = vpop.f32.mrf.mxu1 }
 0x271   : > { %v2295_v24 = vadd.f32 %v2294_v21, %v2206_v20  ;;  %v2119_v17 = vadd.f32 %v2118_v58, %v4214_v50 }
 0x272   : > { %v2385_v46 = vpop.f32.mrf.mxu0 }
 0x273   : > { %v2384_v19 = vadd.f32 %v2383_v25, %v2295_v24 }
 0x275   : > { %v2439_v8 = vmax.f32 %v2384_v19, 0.0 }
 0x276   : > { %v2207_v5 = vpop.f32.mrf.mxu2 }
 0x277   : > { %2471 = vst [vmem:[%s4322_s11 + $0x80] sm:$0xff] %v2439_v8  ;;  %v2208_v26 = vadd.f32 %v2207_v5, %v2119_v17  ;;  %v2296_v27 = vpop.f32.mrf.mxu3 }
 0x278   : > { %v2121_v39 = vpop.f32.mrf.mxu1 }
 0x279   : > { %v2297_v36 = vadd.f32 %v2296_v27, %v2208_v26  ;;  %v2122_v35 = vadd.f32 %v2121_v39, %v4219_v4 }
 0x27a   : > { %v2388_v57 = vpop.f32.mrf.mxu0 }
 0x27b   : > { %v2386_v41 = vadd.f32 %v2385_v46, %v2297_v36 }
 0x27d   : > { %v2440_v28 = vmax.f32 %v2386_v41, 0.0 }
 0x27e   : > { %v2210_v59 = vpop.f32.mrf.mxu2 }
 0x27f   : > { %2472 = vst [vmem:[%s4322_s11 + $0x88] sm:$0xff] %v2440_v28  ;;  %v2211_v42 = vadd.f32 %v2210_v59, %v2122_v35  ;;  %v2299_v40 = vpop.f32.mrf.mxu3 }
 0x280   : > { %v2123_v33 = vpop.f32.mrf.mxu1 }
 0x281   : > { %v2300_v38 = vadd.f32 %v2299_v40, %v2211_v42  ;;  %v2124_v37 = vadd.f32 %v2123_v33, %v4228_v6 }
 0x282   : > { %v2390_v50 = vpop.f32.mrf.mxu0 }
 0x283   : > { %v2389_v49 = vadd.f32 %v2388_v57, %v2300_v38 }
 0x285   : > { %v2441_v52 = vmax.f32 %v2389_v49, 0.0 }
 0x286   : > { %v2212_v34 = vpop.f32.mrf.mxu2 }
 0x287   : > { %2473 = vst [vmem:[%s4322_s11 + $0x90] sm:$0xff] %v2441_v52  ;;  %v2213_v62 = vadd.f32 %v2212_v34, %v2124_v37  ;;  %v2301_v55 = vpop.f32.mrf.mxu3 }
 0x288   : > { %v2126_v18 = vpop.f32.mrf.mxu1 }
 0x289   : > { %v2302_v22 = vadd.f32 %v2301_v55, %v2213_v62  ;;  %v2127_v10 = vadd.f32 %v2126_v18, %v4233_v30 }
 0x28a   : > { %v2393_v4 = vpop.f32.mrf.mxu0 }
 0x28b   : > { %v2391_v53 = vadd.f32 %v2390_v50, %v2302_v22 }
 0x28d   : > { %v2442_v29 = vmax.f32 %v2391_v53, 0.0 }
 0x28e   : > { %v2215_v63 = vpop.f32.mrf.mxu2 }
 0x28f   : > { %2474 = vst [vmem:[%s4322_s11 + $0x98] sm:$0xff] %v2442_v29  ;;  %v2216_v2 = vadd.f32 %v2215_v63, %v2127_v10  ;;  %v2304_v44 = vpop.f32.mrf.mxu3 }
 0x290   : > { %v2128_v3 = vpop.f32.mrf.mxu1 }
 0x291   : > { %v2305_v61 = vadd.f32 %v2304_v44, %v2216_v2  ;;  %v2129_v11 = vadd.f32 %v2128_v3, %v4242_v31 }
 0x292   : > { %v2395_v6 = vpop.f32.mrf.mxu0 }
 0x293   : > { %v2394_v54 = vadd.f32 %v2393_v4, %v2305_v61 }
 0x295   : > { %v2443_v9 = vmax.f32 %v2394_v54, 0.0 }
 0x296   : > { %v2217_v16 = vpop.f32.mrf.mxu2 }
 0x297   : > { %2475 = vst [vmem:[%s4322_s11 + $0xa0] sm:$0xff] %v2443_v9  ;;  %v2218_v14 = vadd.f32 %v2217_v16, %v2129_v11  ;;  %v2306_v43 = vpop.f32.mrf.mxu3 }
 0x298   : > { %v2131_v25 = vpop.f32.mrf.mxu1 }
 0x299   : > { %v2307_v60 = vadd.f32 %v2306_v43, %v2218_v14  ;;  %v2132_v56 = vadd.f32 %v2131_v25, %v4247_v48 }
 0x29a   : > { %v2398_v30 = vpop.f32.mrf.mxu0 }
 0x29b   : > { %v2396_v15 = vadd.f32 %v2395_v6, %v2307_v60 }
 0x29d   : > { %v2444_v45 = vmax.f32 %v2396_v15, 0.0 }
 0x29e   : > { %v2220_v20 = vpop.f32.mrf.mxu2 }
 0x29f   : > { %2476 = vst [vmem:[%s4322_s11 + $0xa8] sm:$0xff] %v2444_v45  ;;  %v2221_v21 = vadd.f32 %v2220_v20, %v2132_v56  ;;  %v2309_v58 = vpop.f32.mrf.mxu3 }
 0x2a0   : > { %v2133_v24 = vpop.f32.mrf.mxu1 }
 0x2a1   : > { %v2310_v46 = vadd.f32 %v2309_v58, %v2221_v21  ;;  %v2134_v17 = vadd.f32 %v2133_v24, %v4256_v0 }
 0x2a2   : > { %v2400_v31 = vpop.f32.mrf.mxu0 }
 0x2a3   : > { %v2399_v19 = vadd.f32 %v2398_v30, %v2310_v46 }
 0x2a5   : > { %v2445_v8 = vmax.f32 %v2399_v19, 0.0 }
 0x2a6   : > { %v2222_v5 = vpop.f32.mrf.mxu2 }
 0x2a7   : > { %2477 = vst [vmem:[%s4322_s11 + $0xb0] sm:$0xff] %v2445_v8  ;;  %v2223_v26 = vadd.f32 %v2222_v5, %v2134_v17  ;;  %v2311_v27 = vpop.f32.mrf.mxu3 }
 0x2a8   : > { %v2136_v39 = vpop.f32.mrf.mxu1 }
 0x2a9   : > { %v2312_v36 = vadd.f32 %v2311_v27, %v2223_v26  ;;  %v2137_v28 = vadd.f32 %v2136_v39, %v4261_v47 }
 0x2aa   : > { %v2403_v48 = vpop.f32.mrf.mxu0 }
 0x2ab   : > { %v2401_v57 = vadd.f32 %v2400_v31, %v2312_v36 }
 0x2ad   : > { %v2446_v41 = vmax.f32 %v2401_v57, 0.0 }
 0x2ae   : > { %v2225_v35 = vpop.f32.mrf.mxu2 }
 0x2af   : > { %2478 = vst [vmem:[%s4322_s11 + $0xb8] sm:$0xff] %v2446_v41  ;;  %v2226_v59 = vadd.f32 %v2225_v35, %v2137_v28  ;;  %v2314_v42 = vpop.f32.mrf.mxu3 }
 0x2b0   : > { %v2138_v40 = vpop.f32.mrf.mxu1 }
 0x2b1   : > { %v2315_v33 = vadd.f32 %v2314_v42, %v2226_v59  ;;  %v2139_v49 = vadd.f32 %v2138_v40, %v4270_v51 }
 0x2b2   : > { %v2405_v0 = vpop.f32.mrf.mxu0 }
 0x2b3   : > { %v2404_v38 = vadd.f32 %v2403_v48, %v2315_v33 }
 0x2b5   : > { %v2447_v50 = vmax.f32 %v2404_v38, 0.0 }
 0x2b6   : > { %v2227_v52 = vpop.f32.mrf.mxu2 }
 0x2b7   : > { %2479 = vst [vmem:[%s4322_s11 + $0xc0] sm:$0xff] %v2447_v50  ;;  %v2228_v37 = vadd.f32 %v2227_v52, %v2139_v49  ;;  %v2316_v34 = vpop.f32.mrf.mxu3 }
 0x2b8   : > { %v2141_v62 = vpop.f32.mrf.mxu1 }
 0x2b9   : > { %v2317_v55 = vadd.f32 %v2316_v34, %v2228_v37  ;;  %v2142_v4 = vadd.f32 %v2141_v62, %v4275_v23 }
 0x2ba   : > { %v2408_v47 = vpop.f32.mrf.mxu0 }
 0x2bb   : > { %v2406_v18 = vadd.f32 %v2405_v0, %v2317_v55 }
 0x2bd   : > { %v2448_v22 = vmax.f32 %v2406_v18, 0.0 }
 0x2be   : > { %v2230_v53 = vpop.f32.mrf.mxu2 }
 0x2bf   : > { %2480 = vst [vmem:[%s4322_s11 + $0xc8] sm:$0xff] %v2448_v22  ;;  %v2231_v29 = vadd.f32 %v2230_v53, %v2142_v4  ;;  %v2319_v10 = vpop.f32.mrf.mxu3 }
 0x2c0   : > { %v2143_v63 = vpop.f32.mrf.mxu1 }
 0x2c1   : > { %v2320_v2 = vadd.f32 %v2319_v10, %v2231_v29  ;;  %v2144_v61 = vadd.f32 %v2143_v63, %v4284_v7 }
 0x2c2   : > { %v2410_v51 = vpop.f32.mrf.mxu0 }
 0x2c3   : > { %v2409_v44 = vadd.f32 %v2408_v47, %v2320_v2 }
 0x2c5   : > { %v2449_v3 = vmax.f32 %v2409_v44, 0.0 }
 0x2c6   : > { %v2232_v6 = vpop.f32.mrf.mxu2 }
 0x2c7   : > { %2481 = vst [vmem:[%s4322_s11 + $0xd0] sm:$0xff] %v2449_v3  ;;  %v2233_v54 = vadd.f32 %v2232_v6, %v2144_v61  ;;  %v2321_v9 = vpop.f32.mrf.mxu3 }
 0x2c8   : > { %v2146_v11 = vpop.f32.mrf.mxu1 }
 0x2c9   : > { %v2322_v16 = vadd.f32 %v2321_v9, %v2233_v54  ;;  %v2147_v25 = vadd.f32 %v2146_v11, %v4289_v12 }
 0x2ca   : > { %v2413_v14 = vpop.f32.mrf.mxu0 }
 0x2cb   : > { %v2411_v23 = vadd.f32 %v2410_v51, %v2322_v16 }
 0x2cd   : > { %v2450_v43 = vmax.f32 %v2411_v23, 0.0 }
 0x2ce   : > { %v2235_v60 = vpop.f32.mrf.mxu2 }
 0x2cf   : > { %2482 = vst [vmem:[%s4322_s11 + $0xd8] sm:$0xff] %v2450_v43  ;;  %v2236_v30 = vadd.f32 %v2235_v60, %v2147_v25  ;;  %v2324_v15 = vpop.f32.mrf.mxu3 }
 0x2d0   : > { %v2148_v45 = vpop.f32.mrf.mxu1 }
 0x2d1   : > { %v2325_v56 = vadd.f32 %v2324_v15, %v2236_v30  ;;  %v2149_v21 = vadd.f32 %v2148_v45, %v4298_v32 }
 0x2d2   : > { %v2415_v58 = vpop.f32.mrf.mxu0 }
 0x2d3   : > { %v2414_v7 = vadd.f32 %v2413_v14, %v2325_v56 }
 0x2d5   : > { %v2451_v20 = vmax.f32 %v2414_v7, 0.0 }
 0x2d6   : > { %v2237_v24 = vpop.f32.mrf.mxu2 }
 0x2d7   : > { %2483 = vst [vmem:[%s4322_s11 + $0xe0] sm:$0xff] %v2451_v20  ;;  %v2238_v46 = vadd.f32 %v2237_v24, %v2149_v21  ;;  %v2326_v31 = vpop.f32.mrf.mxu3 }
 0x2d8   : > { %v2151_v19 = vpop.f32.mrf.mxu1 }
 0x2d9   : > { %v2327_v8 = vadd.f32 %v2326_v31, %v2238_v46  ;;  %v2152_v5 = vadd.f32 %v2151_v19, %v4303_v13 }
 0x2da   : > { %v2418_v36 = vpop.f32.mrf.mxu0 }
 0x2db   : > { %v2416_v12 = vadd.f32 %v2415_v58, %v2327_v8 }
 0x2dd   : > { %v2452_v17 = vmax.f32 %v2416_v12, 0.0 }
 0x2de   : > { %v2240_v26 = vpop.f32.mrf.mxu2 }
 0x2df   : > { %2484 = vst [vmem:[%s4322_s11 + $0xe8] sm:$0xff] %v2452_v17  ;;  %v2241_v27 = vadd.f32 %v2240_v26, %v2152_v5  ;;  %v2329_v39 = vpop.f32.mrf.mxu3 }
 0x2e0   : > { %v2153_v32 = vpop.f32.mrf.mxu1 }
 0x2e1   : > { %v2330_v48 = vadd.f32 %v2329_v39, %v2241_v27  ;;  %v2154_v28 = vadd.f32 %v2153_v32, %v4312_v1 }
 0x2e2   : > { %v2420_v33 = vpop.f32.mrf.mxu0 }
 0x2e3   : > { %v2419_v57 = vadd.f32 %v2418_v36, %v2330_v48 }
 0x2e5   : > { %v2453_v41 = vmax.f32 %v2419_v57, 0.0 }
 0x2e6   : > { %v2242_v35 = vpop.f32.mrf.mxu2 }
 0x2e7   : > { %2485 = vst [vmem:[%s4322_s11 + $0xf0] sm:$0xff] %v2453_v41  ;;  %v2243_v59 = vadd.f32 %v2242_v35, %v2154_v28  ;;  %v2331_v42 = vpop.f32.mrf.mxu3 }
 0x2e9   : > { %v2332_v40 = vadd.f32 %v2331_v42, %v2243_v59 }
 0x2eb   : > { %v2421_v0 = vadd.f32 %v2420_v33, %v2332_v40 }
 0x2ed   : > { %v2454_v13 = vmax.f32 %v2421_v0, 0.0 }
 0x2ef   : > { %2486 = vst [vmem:[%s4322_s11 + $0xf8] sm:$0xff] %v2454_v13 }
 0x2f0 PF: > { %s12_s9 = sadd.s32 1, %s3673_s9  }
 0x2f1   : > { %p9_p4 = scmp.ge.s32.totalorder %s12_s9, 4  }
 0x2f3   :  { %11 = sbr.rel (!%p9_p4) target bundleno = 1 (0x1), region = 58 }

// kernel: deeplabv3_forward.5
= control target key start
LH: loop header
LB: loop body
LE: loop exit
PB: predicated region body
PF: predicated region fallthrough
CT: control target
= control target key end

     0   :  { %s14316_s0 = inlined_call_operand.vmem [shape: bf16[128,1152], index: 0, kind: input, shape index: {}]   ;;  %s14317_s1 = inlined_call_operand.vmem [shape: bf16[1152,128], index: 1, kind: input, shape index: {}]   ;;  %s14318_s2 = inlined_call_operand.vmem [shape: bf16[9,128,128], index: 2, kind: input, shape index: {}]   ;;  %s14319_s3 = inlined_call_operand.vmem [shape: bf16[9,128,128], index: 3, kind: input, shape index: {}]   ;;  %s14320_s4 = inlined_call_operand.vmem [shape: bf16[128,256], index: 4, kind: input, shape index: {}]   ;;  %s14321_s5 = inlined_call_operand.vmem [shape: bf16[128,64], index: 5, kind: input, shape index: {}]   ;;  %s14322_s6 = inlined_call_operand.vmem [shape: bf16[256,64], index: 6, kind: input, shape index: {}]   ;;  %s14323_s7 = inlined_call_operand.vmem [shape: bf16[64,64], index: 7, kind: input, shape index: {}]   ;;  %s14324_s8 = inlined_call_operand.hbm [shape: f32[128,64], index: 8, kind: output, shape index: {}]  }
   0x1   :  { %v10473_v0 = vld [vmem:[%s14317_s1 + $0x38] sm:$0xff]  ;;  %v10472_v4 = vld [vmem:[%s14317_s1 + $0x30] sm:$0xff]  ;;  %v10471_v8 = vld [vmem:[%s14317_s1 + $0x28] sm:$0xff] }
   0x2   :  { %v10481_v1 = vld [vmem:[%s14317_s1 + $0x78] sm:$0xff]  ;;  %1055 = vmatpush.bf16.msra.mxu0 %v10473_v0  ;;  %v10480_v5 = vld [vmem:[%s14317_s1 + $0x70] sm:$0xff]  ;;  %v10479_v9 = vld [vmem:[%s14317_s1 + $0x68] sm:$0xff] }
   0x3   :  { %v10489_v2 = vld [vmem:[%s14317_s1 + $0xb8] sm:$0xff]  ;;  %1104 = vmatpush.bf16.msra.mxu1 %v10481_v1  ;;  %v10488_v6 = vld [vmem:[%s14317_s1 + $0xb0] sm:$0xff]  ;;  %v10487_v10 = vld [vmem:[%s14317_s1 + $0xa8] sm:$0xff] }
   0x4   :  { %v10497_v3 = vld [vmem:[%s14317_s1 + $0xf8] sm:$0xff]  ;;  %1153 = vmatpush.bf16.msra.mxu2 %v10489_v2  ;;  %v10496_v7 = vld [vmem:[%s14317_s1 + $0xf0] sm:$0xff]  ;;  %v10495_v11 = vld [vmem:[%s14317_s1 + $0xe8] sm:$0xff] }
   0x5   :  { %1202 = vmatpush.bf16.msra.mxu3 %v10497_v3  ;;  %v10470_v12 = vld [vmem:[%s14317_s1 + $0x20] sm:$0xff]  ;;  %v10469_v16 = vld [vmem:[%s14317_s1 + $0x18] sm:$0xff] }
   0x6   :  { %1056 = vmatpush.bf16.msra.mxu0 %v10472_v4  ;;  %v10478_v13 = vld [vmem:[%s14317_s1 + $0x60] sm:$0xff]  ;;  %v10477_v17 = vld [vmem:[%s14317_s1 + $0x58] sm:$0xff] }
   0x7   :  { %1105 = vmatpush.bf16.msra.mxu1 %v10480_v5  ;;  %v10486_v14 = vld [vmem:[%s14317_s1 + $0xa0] sm:$0xff] }
   0x8   :  { %1154 = vmatpush.bf16.msra.mxu2 %v10488_v6  ;;  %v10494_v15 = vld [vmem:[%s14317_s1 + $0xe0] sm:$0xff] }
   0x9   :  { %1203 = vmatpush.bf16.msra.mxu3 %v10496_v7 }
   0xa   :  { %1057 = vmatpush.bf16.msra.mxu0 %v10471_v8 }
   0xb   :  { %1106 = vmatpush.bf16.msra.mxu1 %v10479_v9 }
   0xc   :  { %1155 = vmatpush.bf16.msra.mxu2 %v10487_v10 }
   0xd   :  { %1204 = vmatpush.bf16.msra.mxu3 %v10495_v11 }
   0xe   :  { %1058 = vmatpush.bf16.msra.mxu0 %v10470_v12 }
   0xf   :  { %1107 = vmatpush.bf16.msra.mxu1 %v10478_v13 }
  0x10   :  { %13 = vsyncpa [#allocation5], 0  ;;  %1156 = vmatpush.bf16.msra.mxu2 %v10486_v14  ;;  %v10485_v18 = vld [vmem:[%s14317_s1 + $0x98] sm:$0xff]  ;;  %v10468_v20 = vld [vmem:[%s14317_s1 + $0x10] sm:$0xff]  ;;  %vm1729_vm0 = vcmask 1043456   ;;  %vm1735_vm2 = vcmask 1040384  }
  0x11   :  { %1205 = vmatpush.bf16.msra.mxu3 %v10494_v15  ;;  %v10493_v19 = vld [vmem:[%s14317_s1 + $0xd8] sm:$0xff]  ;;  %v10476_v21 = vld [vmem:[%s14317_s1 + $0x50] sm:$0xff]  ;;  %v10467_v24 = vld [vmem:[%s14317_s1 + $0x8] sm:$0xff]  ;;  %vm1730_vm1 = vsmask.f32 7938  ;;  %vm2445_vm6 = vcmask 1042432  }
  0x12   :  { %1059 = vmatpush.bf16.msra.mxu0 %v10469_v16  ;;  %v10484_v22 = vld [vmem:[%s14317_s1 + $0x90] sm:$0xff]  ;;  %v10475_v25 = vld [vmem:[%s14317_s1 + $0x48] sm:$0xff]  ;;  %v10466_v28 = vld [vmem:[%s14317_s1] sm:$0xff]  ;;  %vm1736_vm3 = vsmask.f32 256  ;;  %vm2446_vm7 = vcmask 1046532  }
  0x13   :  { %1108 = vmatpush.bf16.msra.mxu1 %v10477_v17  ;;  %v10492_v23 = vld [vmem:[%s14317_s1 + $0xd0] sm:$0xff]  ;;  %v10483_v26 = vld [vmem:[%s14317_s1 + $0x88] sm:$0xff]  ;;  %v10474_v29 = vld [vmem:[%s14317_s1 + $0x40] sm:$0xff]  ;;  %vm1879_vm9 = vsmask.f32 3328  ;;  %vm8154_vm13 = vcmask 1041409  }
  0x14   :  { %1157 = vmatpush.bf16.msra.mxu2 %v10485_v18  ;;  %v10491_v27 = vld [vmem:[%s14317_s1 + $0xc8] sm:$0xff]  ;;  %v10482_v30 = vld [vmem:[%s14317_s1 + $0x80] sm:$0xff]  ;;  %v8533_v39 = vld [vmem:[%s14316_s0 + $0x2c] sm:$0xf0]  ;;  %vm1880_vm10 = vsmask.f32 7440 }
  0x15   :  { %1206 = vmatpush.bf16.msra.mxu3 %v10493_v19  ;;  %v10490_v31 = vld [vmem:[%s14317_s1 + $0xc0] sm:$0xff]  ;;  %v8525_v35 = vld [vmem:[%s14316_s0 + $0x24] sm:$0xf0]  ;;  %v10399_v37 = vld [vmem:[%s14316_s0 + $0x28] sm:$0xf0]  ;;  %vm8219_vm15 = vcmask 517120  }
  0x16   :  { %1060 = vmatpush.bf16.msra.mxu0 %v10468_v20  ;;  %v8523_v32 = vld [vmem:[%s14316_s0] sm:$0xf]  ;;  %v10398_v33 = vld [vmem:[%s14316_s0 + $0x20] sm:$0xf0]  ;;  %v8531_v36 = vld [vmem:[%s14316_s0 + $0x8] sm:$0xf] }
  0x17   :  { %1109 = vmatpush.bf16.msra.mxu1 %v10476_v21  ;;  %v10394_v34 = vld [vmem:[%s14316_s0 + $0x4] sm:$0xf]  ;;  %v10395_v38 = vld [vmem:[%s14316_s0 + $0xc] sm:$0xf]  ;;  %v10505_v40 = vld [vmem:[%s14317_s1 + $0x138] sm:$0xff]  ;;  %v8524_v41 = vor.u32 %v10398_v33, %v8523_v32  ;;  %v8532_v43 = vor.u32 %v10399_v37, %v8531_v36  ;;  %s8509_s22 = sshll.u32 %s14324_s8, 4  ;;  %s8510_s22 = int_to_ptr.hbm [resolvable:$true] %s8509_s22 }
  0x18   :  { %1158 = vmatpush.bf16.msra.mxu2 %v10484_v22  ;;  %v8528_v42 = vor.u32 %v10394_v34, %v8525_v35  ;;  %v8536_v44 = vor.u32 %v10395_v38, %v8533_v39  ;;  %v10504_v45 = vld [vmem:[%s14317_s1 + $0x130] sm:$0xff]  ;;  %v10503_v46 = vld [vmem:[%s14317_s1 + $0x128] sm:$0xff]  ;;  %v8569_v54 = vld [vmem:[%s14316_s0 + $0x74] sm:$0xf0]  ;;  %s10838_s23 = smov 8  }
  0x19   :  { %1207 = vmatpush.bf16.msra.mxu3 %v10492_v23  ;;  %v8559_v47 = vld [vmem:[%s14316_s0 + $0x48] sm:$0xf]  ;;  %v10407_v48 = vld [vmem:[%s14316_s0 + $0x68] sm:$0xf0]  ;;  %v8561_v50 = vld [vmem:[%s14316_s0 + $0x6c] sm:$0xf0] }
  0x1a   :  { %1061 = vmatpush.bf16.msra.mxu0 %v10467_v24  ;;  %v10403_v49 = vld [vmem:[%s14316_s0 + $0x4c] sm:$0xf]  ;;  %v8567_v51 = vld [vmem:[%s14316_s0 + $0x50] sm:$0xf]  ;;  %v10408_v52 = vld [vmem:[%s14316_s0 + $0x70] sm:$0xf0]  ;;  %v8560_v55 = vor.u32 %v10407_v48, %v8559_v47 }
  0x1b   :  { %1110 = vmatpush.bf16.msra.mxu1 %v10475_v25  ;;  %v10404_v53 = vld [vmem:[%s14316_s0 + $0x54] sm:$0xf]  ;;  %v8564_v56 = vor.u32 %v10403_v49, %v8561_v50  ;;  %v8568_v57 = vor.u32 %v10408_v52, %v8567_v51  ;;  %v10502_v59 = vld [vmem:[%s14317_s1 + $0x120] sm:$0xff]  ;;  %v8595_v60 = vld [vmem:[%s14316_s0 + $0x90] sm:$0xf] }
  0x1c   :  { %1159 = vmatpush.bf16.msra.mxu2 %v10483_v26  ;;  %v8572_v58 = vor.u32 %v10404_v53, %v8569_v54  ;;  %v10416_v61 = vld [vmem:[%s14316_s0 + $0xb0] sm:$0xf0]  ;;  %v8597_v63 = vld [vmem:[%s14316_s0 + $0xb4] sm:$0xf0]  ;;  %v10417_v1 = vld [vmem:[%s14316_s0 + $0xb8] sm:$0xf0] }
  0x1d   :  { %1208 = vmatpush.bf16.msra.mxu3 %v10491_v27  ;;  %v10412_v62 = vld [vmem:[%s14316_s0 + $0x94] sm:$0xf]  ;;  %v8603_v0 = vld [vmem:[%s14316_s0 + $0x98] sm:$0xf]  ;;  %v10413_v2 = vld [vmem:[%s14316_s0 + $0x9c] sm:$0xf]  ;;  %v8596_v4 = vor.u32 %v10416_v61, %v8595_v60 }
  0x1e   :  { %1062 = vmatpush.bf16.msra.mxu0 %v10466_v28  ;;  %v8605_v3 = vld [vmem:[%s14316_s0 + $0xbc] sm:$0xf0]  ;;  %v8600_v5 = vor.u32 %v10412_v62, %v8597_v63  ;;  %v8604_v6 = vor.u32 %v10417_v1, %v8603_v0  ;;  %v10501_v8 = vld [vmem:[%s14317_s1 + $0x118] sm:$0xff]  ;;  %v10426_v14 = vld [vmem:[%s14316_s0 + $0x100] sm:$0xf0] }
  0x1f   :  { %1111 = vmatpush.bf16.msra.mxu1 %v10474_v29  ;;  %v8608_v7 = vor.u32 %v10413_v2, %v8605_v3  ;;  %v8631_v9 = vld [vmem:[%s14316_s0 + $0xd8] sm:$0xf]  ;;  %v10425_v10 = vld [vmem:[%s14316_s0 + $0xf8] sm:$0xf0]  ;;  %v8633_v12 = vld [vmem:[%s14316_s0 + $0xfc] sm:$0xf0] }
  0x20   :  { %1160 = vmatpush.bf16.msra.mxu2 %v10482_v30  ;;  %v10421_v11 = vld [vmem:[%s14316_s0 + $0xdc] sm:$0xf]  ;;  %v8639_v13 = vld [vmem:[%s14316_s0 + $0xe0] sm:$0xf]  ;;  %v10422_v15 = vld [vmem:[%s14316_s0 + $0xe4] sm:$0xf]  ;;  %v8632_v17 = vor.u32 %v10425_v10, %v8631_v9 }
  0x21   :  { %1209 = vmatpush.bf16.msra.mxu3 %v10490_v31  ;;  %1063 = vmatmul.bf16.vlgmr.msra.gmra.mxu0 %v8524_v41  ;;  %v8641_v16 = vld [vmem:[%s14316_s0 + $0x104] sm:$0xf0]  ;;  %v8636_v18 = vor.u32 %v10421_v11, %v8633_v12  ;;  %v8640_v19 = vor.u32 %v10426_v14, %v8639_v13  ;;  %v10500_v21 = vld [vmem:[%s14317_s1 + $0x110] sm:$0xff]  ;;  %v8667_v22 = vld [vmem:[%s14316_s0 + $0x120] sm:$0xf] }
  0x22   :  { %1251 = vmatpush.bf16.msrb.mxu0 %v10505_v40  ;;  %1112 = vmatmul.bf16.vlgmr.msra.gmra.mxu1 %v8528_v42  ;;  %v8644_v20 = vor.u32 %v10422_v15, %v8641_v16  ;;  %v10434_v23 = vld [vmem:[%s14316_s0 + $0x140] sm:$0xf0]  ;;  %v8669_v25 = vld [vmem:[%s14316_s0 + $0x144] sm:$0xf0]  ;;  %v10435_v27 = vld [vmem:[%s14316_s0 + $0x148] sm:$0xf0] }
  0x23   :  { %1161 = vmatmul.bf16.vlgmr.msra.gmra.mxu2 %v8532_v43  ;;  %v10430_v24 = vld [vmem:[%s14316_s0 + $0x124] sm:$0xf]  ;;  %v8675_v26 = vld [vmem:[%s14316_s0 + $0x128] sm:$0xf]  ;;  %v10431_v28 = vld [vmem:[%s14316_s0 + $0x12c] sm:$0xf]  ;;  %v8668_v30 = vor.u32 %v10434_v23, %v8667_v22 }
  0x24   :  { %1210 = vmatmul.bf16.vlgmr.msra.gmra.mxu3 %v8536_v44  ;;  %v8677_v29 = vld [vmem:[%s14316_s0 + $0x14c] sm:$0xf0]  ;;  %v8672_v31 = vor.u32 %v10430_v24, %v8669_v25  ;;  %v8676_v32 = vor.u32 %v10435_v27, %v8675_v26  ;;  %v10521_v34 = vld [vmem:[%s14317_s1 + $0x1b8] sm:$0xff]  ;;  %v10499_v35 = vld [vmem:[%s14317_s1 + $0x108] sm:$0xff] }
  0x25   :  { %v8680_v33 = vor.u32 %v10431_v28, %v8677_v29  ;;  %v10513_v36 = vld [vmem:[%s14317_s1 + $0x178] sm:$0xff]  ;;  %1349 = vmatpush.bf16.msrb.mxu2 %v10521_v34  ;;  %v10520_v38 = vld [vmem:[%s14317_s1 + $0x1b0] sm:$0xff]  ;;  %v10519_v41 = vld [vmem:[%s14317_s1 + $0x1a8] sm:$0xff] }
  0x26   :  { %1252 = vmatpush.bf16.msrb.mxu0 %v10504_v45  ;;  %v10529_v37 = vld [vmem:[%s14317_s1 + $0x1f8] sm:$0xff]  ;;  %1300 = vmatpush.bf16.msrb.mxu1 %v10513_v36  ;;  %v10512_v39 = vld [vmem:[%s14317_s1 + $0x170] sm:$0xff]  ;;  %v8703_v42 = vld [vmem:[%s14316_s0 + $0x168] sm:$0xf] }
  0x27   :  { %1398 = vmatpush.bf16.msrb.mxu3 %v10529_v37  ;;  %v10528_v40 = vld [vmem:[%s14317_s1 + $0x1f0] sm:$0xff]  ;;  %v10511_v43 = vld [vmem:[%s14317_s1 + $0x168] sm:$0xff]  ;;  %v8713_v51 = vld [vmem:[%s14316_s0 + $0x194] sm:$0xf0] }
  0x28   :  { %v10443_v44 = vld [vmem:[%s14316_s0 + $0x188] sm:$0xf0]  ;;  %v8705_v47 = vld [vmem:[%s14316_s0 + $0x18c] sm:$0xf0]  ;;  %v10444_v49 = vld [vmem:[%s14316_s0 + $0x190] sm:$0xf0] }
  0x29   :  { %1350 = vmatpush.bf16.msrb.mxu2 %v10520_v38  ;;  %v10439_v45 = vld [vmem:[%s14316_s0 + $0x16c] sm:$0xf]  ;;  %v8711_v48 = vld [vmem:[%s14316_s0 + $0x170] sm:$0xf]  ;;  %v10440_v50 = vld [vmem:[%s14316_s0 + $0x174] sm:$0xf]  ;;  %v8704_v54 = vor.u32 %v10443_v44, %v8703_v42 }
  0x2a   :  { %1253 = vmatpush.bf16.msrb.mxu0 %v10503_v46  ;;  %1301 = vmatpush.bf16.msrb.mxu1 %v10512_v39  ;;  %v10527_v46 = vld [vmem:[%s14317_s1 + $0x1e8] sm:$0xff]  ;;  %v10518_v52 = vld [vmem:[%s14317_s1 + $0x1a0] sm:$0xff]  ;;  %v10509_v61 = vld [vmem:[%s14317_s1 + $0x158] sm:$0xff] }
  0x2b   :  { %1399 = vmatpush.bf16.msrb.mxu3 %v10528_v40  ;;  %v10510_v53 = vld [vmem:[%s14317_s1 + $0x160] sm:$0xff]  ;;  %v10525_v62 = vld [vmem:[%s14317_s1 + $0x1d8] sm:$0xff]  ;;  %v10516_v63 = vld [vmem:[%s14317_s1 + $0x190] sm:$0xff] }
  0x2c   :  { %v10498_v60 = vld [vmem:[%s14317_s1 + $0x100] sm:$0xff]  ;;  %v10508_v0 = vld [vmem:[%s14317_s1 + $0x150] sm:$0xff]  ;;  %v10515_v2 = vld [vmem:[%s14317_s1 + $0x188] sm:$0xff] }
  0x2d   :  { %1351 = vmatpush.bf16.msrb.mxu2 %v10519_v41  ;;  %v10524_v1 = vld [vmem:[%s14317_s1 + $0x1d0] sm:$0xff]  ;;  %v10507_v3 = vld [vmem:[%s14317_s1 + $0x148] sm:$0xff]  ;;  %v10453_v9 = vld [vmem:[%s14316_s0 + $0x1d8] sm:$0xf0] }
  0x2e   :  { %1254 = vmatpush.bf16.msrb.mxu0 %v10502_v59  ;;  %1302 = vmatpush.bf16.msrb.mxu1 %v10511_v43  ;;  %v10517_v59 = vld [vmem:[%s14317_s1 + $0x198] sm:$0xff]  ;;  %v8749_v11 = vld [vmem:[%s14316_s0 + $0x1dc] sm:$0xf0]  ;;  %v10523_v12 = vld [vmem:[%s14317_s1 + $0x1c8] sm:$0xff] }
  0x2f   :  { %1400 = vmatpush.bf16.msrb.mxu3 %v10527_v46  ;;  %v10449_v10 = vld [vmem:[%s14316_s0 + $0x1bc] sm:$0xf]  ;;  %v10514_v15 = vld [vmem:[%s14317_s1 + $0x180] sm:$0xff]  ;;  %v8785_v28 = vld [vmem:[%s14316_s0 + $0x224] sm:$0xf0] }
  0x30   :  { %v10461_v22 = vld [vmem:[%s14316_s0 + $0x218] sm:$0xf0]  ;;  %v8777_v24 = vld [vmem:[%s14316_s0 + $0x21c] sm:$0xf0]  ;;  %v10462_v26 = vld [vmem:[%s14316_s0 + $0x220] sm:$0xf0] }
  0x31   :  { %1068 = vmatmul.bf16.gmra.mxu0 %v8560_v55  ;;  %v8708_v55 = vor.u32 %v10439_v45, %v8705_v47  ;;  %1352 = vmatpush.bf16.msrb.mxu2 %v10518_v52  ;;  %v10457_v23 = vld [vmem:[%s14316_s0 + $0x1fc] sm:$0xf]  ;;  %v8783_v25 = vld [vmem:[%s14316_s0 + $0x200] sm:$0xf]  ;;  %v10458_v27 = vld [vmem:[%s14316_s0 + $0x204] sm:$0xf] }
  0x32   :  { %1117 = vmatmul.bf16.gmra.mxu1 %v8564_v56  ;;  %1255 = vmatpush.bf16.msrb.mxu0 %v10501_v8  ;;  %v8712_v56 = vor.u32 %v10444_v49, %v8711_v48  ;;  %v8747_v8 = vld [vmem:[%s14316_s0 + $0x1b8] sm:$0xf]  ;;  %v8539_v34 = vld [vmem:[%s14316_s0 + $0x10] sm:$0xf]  ;;  %v10396_v37 = vld [vmem:[%s14316_s0 + $0x14] sm:$0xf] }
  0x33   :  { %1166 = vmatmul.bf16.gmra.mxu2 %v8568_v57  ;;  %v8716_v57 = vor.u32 %v10440_v50, %v8713_v51  ;;  %1303 = vmatpush.bf16.msrb.mxu1 %v10510_v53  ;;  %v8748_v16 = vor.u32 %v10453_v9, %v8747_v8  ;;  %v8547_v36 = vld [vmem:[%s14316_s0 + $0x18] sm:$0xf]  ;;  %v10401_v39 = vld [vmem:[%s14316_s0 + $0x38] sm:$0xf0]  ;;  %v8549_v41 = vld [vmem:[%s14316_s0 + $0x3c] sm:$0xf0] }
  0x34   :  { %1215 = vmatmul.bf16.gmra.mxu3 %v8572_v58  ;;  %v10526_v58 = vld [vmem:[%s14317_s1 + $0x1e0] sm:$0xff]  ;;  %v8541_v38 = vld [vmem:[%s14316_s0 + $0x34] sm:$0xf0]  ;;  %v10397_v40 = vld [vmem:[%s14316_s0 + $0x1c] sm:$0xf]  ;;  %v8548_v46 = vor.u32 %v10401_v39, %v8547_v36 }
  0x35   :  { %1401 = vmatpush.bf16.msrb.mxu3 %v10526_v58  ;;  %1353 = vmatpush.bf16.msrb.mxu2 %v10517_v59  ;;  %v8544_v43 = vor.u32 %v10396_v37, %v8541_v38  ;;  %v8552_v47 = vor.u32 %v10397_v40, %v8549_v41  ;;  %v10535_v49 = vld [vmem:[%s14317_s1 + $0x228] sm:$0xff]  ;;  %v10409_v58 = vld [vmem:[%s14316_s0 + $0x78] sm:$0xf0]  ;;  %v8583_v59 = vld [vmem:[%s14316_s0 + $0x60] sm:$0xf] }
  0x36   :  { %1256 = vmatpush.bf16.msrb.mxu0 %v10500_v21  ;;  %v8775_v21 = vld [vmem:[%s14316_s0 + $0x1f8] sm:$0xf]  ;;  %vm11756_vm4 = vmand %vm1729_vm0, %vm1730_vm1 }
  0x37   :  { %1304 = vmatpush.bf16.msrb.mxu1 %v10509_v61  ;;  %v8776_v29 = vor.u32 %v10461_v22, %v8775_v21  ;;  %v8577_v61 = vld [vmem:[%s14316_s0 + $0x7c] sm:$0xf0]  ;;  %v10418_v21 = vld [vmem:[%s14316_s0 + $0xc0] sm:$0xf0]  ;;  %v8619_v22 = vld [vmem:[%s14316_s0 + $0xa8] sm:$0xf] }
  0x38   :  { %v10533_v39 = vld [vmem:[%s14317_s1 + $0x218] sm:$0xff]  ;;  %vm11767_vm5 = vmand %vm1735_vm2, %vm1736_vm3 }
  0x39   :  { %1402 = vmatpush.bf16.msrb.mxu3 %v10525_v62  ;;  %1354 = vmatpush.bf16.msrb.mxu2 %v10516_v63  ;;  %v10410_v62 = vld [vmem:[%s14316_s0 + $0x80] sm:$0xf0]  ;;  %vm11869_vm8 = vmor %vm2445_vm6, %vm2446_vm7 }
  0x3a   :  { %1257 = vmatpush.bf16.msrb.mxu0 %v10499_v35  ;;  %v10400_v35 = vld [vmem:[%s14316_s0 + $0x30] sm:$0xf0]  ;;  %v10406_v63 = vld [vmem:[%s14316_s0 + $0x64] sm:$0xf]  ;;  %v8584_v8 = vor.u32 %v10410_v62, %v8583_v59  ;;  %vm11916_vm11 = vmor %vm1879_vm9, %vm1880_vm10  ;;  %vm8294_vm10 = vcmask 523264  }
  0x3b   :  { %1305 = vmatpush.bf16.msrb.mxu1 %v10508_v0  ;;  %v8540_v42 = vor.u32 %v10400_v35, %v8539_v34  ;;  %v8585_v0 = vld [vmem:[%s14316_s0 + $0x84] sm:$0xf0] }
  0x3c   :  { %v8588_v9 = vor.u32 %v10406_v63, %v8585_v0 }
  0x3d   :  { %1403 = vmatpush.bf16.msrb.mxu3 %v10524_v1  ;;  %1355 = vmatpush.bf16.msrb.mxu2 %v10515_v2 }
  0x3e   :  { %1258 = vmatpush.bf16.msrb.mxu0 %v10498_v60  ;;  %v10405_v60 = vld [vmem:[%s14316_s0 + $0x5c] sm:$0xf] }
  0x3f   :  { %1306 = vmatpush.bf16.msrb.mxu1 %v10507_v3 }
  0x41   :  { %1073 = vmatmul.bf16.gmra.mxu0 %v8596_v4  ;;  %v8739_v4 = vld [vmem:[%s14316_s0 + $0x1b0] sm:$0xf]  ;;  %1404 = vmatpush.bf16.msrb.mxu3 %v10523_v12  ;;  %v10534_v12 = vld [vmem:[%s14317_s1 + $0x220] sm:$0xff] }
  0x42   :  { %1122 = vmatmul.bf16.gmra.mxu1 %v8600_v5  ;;  %v10452_v5 = vld [vmem:[%s14316_s0 + $0x1d0] sm:$0xf0]  ;;  %1356 = vmatpush.bf16.msrb.mxu2 %v10514_v15 }
  0x43   :  { %1171 = vmatmul.bf16.gmra.mxu2 %v8604_v6  ;;  %v10448_v6 = vld [vmem:[%s14316_s0 + $0x1b4] sm:$0xf]  ;;  %v8740_v13 = vor.u32 %v10452_v5, %v8739_v4  ;;  %v8580_v4 = vor.u32 %v10405_v60, %v8577_v61 }
  0x44   :  { %1220 = vmatmul.bf16.gmra.mxu3 %v8608_v7  ;;  %v8741_v7 = vld [vmem:[%s14316_s0 + $0x1d4] sm:$0xf0] }
  0x45   :  { %v8744_v14 = vor.u32 %v10448_v6, %v8741_v7 }
  0x51   :  { %1078 = vmatmul.bf16.gmra.mxu0 %v8632_v17  ;;  %v8752_v17 = vor.u32 %v10449_v10, %v8749_v11 }
  0x52   :  { %1127 = vmatmul.bf16.gmra.mxu1 %v8636_v18  ;;  %v10506_v18 = vld [vmem:[%s14317_s1 + $0x140] sm:$0xff] }
  0x53   :  { %1176 = vmatmul.bf16.gmra.mxu2 %v8640_v19  ;;  %v10522_v19 = vld [vmem:[%s14317_s1 + $0x1c0] sm:$0xff]  ;;  %1307 = vmatpush.bf16.msrb.mxu1 %v10506_v18 }
  0x54   :  { %1225 = vmatmul.bf16.gmra.mxu3 %v8644_v20  ;;  %v10537_v20 = vld [vmem:[%s14317_s1 + $0x238] sm:$0xff] }
  0x55   :  { %1405 = vmatpush.bf16.msrb.mxu3 %v10522_v19  ;;  %1447 = vmatpush.bf16.msra.mxu0 %v10537_v20  ;;  %v8611_v20 = vld [vmem:[%s14316_s0 + $0xa0] sm:$0xf] }
  0x61   :  { %1083 = vmatmul.bf16.gmra.mxu0 %v8668_v30  ;;  %v8780_v30 = vor.u32 %v10457_v23, %v8777_v24  ;;  %v10414_v23 = vld [vmem:[%s14316_s0 + $0xa4] sm:$0xf]  ;;  %v8613_v24 = vld [vmem:[%s14316_s0 + $0xc4] sm:$0xf0] }
  0x62   :  { %1132 = vmatmul.bf16.gmra.mxu1 %v8672_v31  ;;  %v8784_v31 = vor.u32 %v10462_v26, %v8783_v25  ;;  %v10419_v25 = vld [vmem:[%s14316_s0 + $0xc8] sm:$0xf0] }
  0x63   :  { %1181 = vmatmul.bf16.gmra.mxu2 %v8676_v32  ;;  %v8788_v32 = vor.u32 %v10458_v27, %v8785_v28  ;;  %v10415_v26 = vld [vmem:[%s14316_s0 + $0xac] sm:$0xf]  ;;  %v8621_v27 = vld [vmem:[%s14316_s0 + $0xcc] sm:$0xf0]  ;;  %v8620_v35 = vor.u32 %v10419_v25, %v8619_v22 }
  0x64   :  { %1230 = vmatmul.bf16.gmra.mxu3 %v8680_v33  ;;  %v10536_v33 = vld [vmem:[%s14317_s1 + $0x230] sm:$0xff]  ;;  %v8624_v36 = vor.u32 %v10415_v26, %v8621_v27 }
  0x65   :  { %1448 = vmatpush.bf16.msra.mxu0 %v10536_v33 }
  0x69   :  { %1449 = vmatpush.bf16.msra.mxu0 %v10535_v49  ;;  %v8655_v49 = vld [vmem:[%s14316_s0 + $0xf0] sm:$0xf] }
  0x6d   :  { %1450 = vmatpush.bf16.msra.mxu0 %v10534_v12  ;;  %v8683_v12 = vld [vmem:[%s14316_s0 + $0x130] sm:$0xf] }
  0x71   :  { %1088 = vmatmul.bf16.gmra.mxu0 %v8704_v54 }
  0x72   :  { %1137 = vmatmul.bf16.gmra.mxu1 %v8708_v55  ;;  %1451 = vmatpush.bf16.msra.mxu0 %v10533_v39 }
  0x73   :  { %1186 = vmatmul.bf16.gmra.mxu2 %v8712_v56 }
  0x74   :  { %1235 = vmatmul.bf16.gmra.mxu3 %v8716_v57  ;;  %v8575_v57 = vld [vmem:[%s14316_s0 + $0x58] sm:$0xf] }
  0x75   :  { %v8576_v3 = vor.u32 %v10409_v58, %v8575_v57 }
  0x81   :  { %1093 = vmatmul.bf16.gmra.mxu0 %v8740_v13 }
  0x82   :  { %1142 = vmatmul.bf16.gmra.mxu1 %v8744_v14 }
  0x83   :  { %1191 = vmatmul.bf16.gmra.mxu2 %v8748_v16 }
  0x84   :  { %1240 = vmatmul.bf16.gmra.mxu3 %v8752_v17 }
  0x91   :  { %1098 = vmatmul.bf16.gmra.mxu0 %v8776_v29 }
  0x92   :  { %1147 = vmatmul.bf16.gmra.mxu1 %v8780_v30  ;;  %v8612_v30 = vor.u32 %v10418_v21, %v8611_v20  ;;  %v8693_v20 = vld [vmem:[%s14316_s0 + $0x15c] sm:$0xf0] }
  0x93   :  { %1196 = vmatmul.bf16.gmra.mxu2 %v8784_v31  ;;  %v8616_v31 = vor.u32 %v10414_v23, %v8613_v24 }
  0x94   :  { %1245 = vmatmul.bf16.gmra.mxu3 %v8788_v32 }
  0x9e   :  { %v1064_v44 = vpop.f32.mrf.mxu0 }
  0x9f   :  { %v1113_v45 = vpop.f32.mrf.mxu1 }
  0xa0   :  { %v1114_v48 = vadd.f32 %v1113_v45, %v1064_v44 }
  0xa1   :  { %1259 = vmatmul.bf16.vlgmr.msrb.gmra.mxu0 %v8540_v42 }
  0xa2   :  { %1308 = vmatmul.bf16.vlgmr.msrb.gmra.mxu1 %v8544_v43 }
  0xa3   :  { %1357 = vmatmul.bf16.vlgmr.msrb.gmra.mxu2 %v8548_v46 }
  0xa4   :  { %1406 = vmatmul.bf16.vlgmr.msrb.gmra.mxu3 %v8552_v47  ;;  %v8647_v47 = vld [vmem:[%s14316_s0 + $0xe8] sm:$0xf] }
  0xa6   :  { %v1162_v50 = vpop.f32.mrf.mxu2  ;;  %v1066_v53 = vpop.f32.mrf.mxu0 }
  0xa7   :  { %v1211_v51 = vpop.f32.mrf.mxu3  ;;  %v1163_v52 = vadd.f32 %v1162_v50, %v1114_v48  ;;  %v1115_v54 = vpop.f32.mrf.mxu1  ;;  %v10427_v48 = vld [vmem:[%s14316_s0 + $0x108] sm:$0xf0] }
  0xa8   :  { %v1116_v55 = vadd.f32 %v1115_v54, %v1066_v53  ;;  %v10423_v50 = vld [vmem:[%s14316_s0 + $0xec] sm:$0xf]  ;;  %v10424_v53 = vld [vmem:[%s14316_s0 + $0xf4] sm:$0xf]  ;;  %v8657_v54 = vld [vmem:[%s14316_s0 + $0x114] sm:$0xf0]  ;;  %v8648_v58 = vor.u32 %v10427_v48, %v8647_v47 }
  0xa9   :  { %v11301_v56 = vadd.f32 %v1211_v51, %v1163_v52  ;;  %v8649_v51 = vld [vmem:[%s14316_s0 + $0x10c] sm:$0xf0]  ;;  %v10428_v52 = vld [vmem:[%s14316_s0 + $0x110] sm:$0xf0]  ;;  %v8660_v0 = vor.u32 %v10424_v53, %v8657_v54  ;;  %v10442_v47 = vld [vmem:[%s14316_s0 + $0x184] sm:$0xf] }
  0xaa   :  { %v8652_v59 = vor.u32 %v10423_v50, %v8649_v51  ;;  %v8656_v63 = vor.u32 %v10428_v52, %v8655_v49  ;;  %v8729_v48 = vld [vmem:[%s14316_s0 + $0x1a4] sm:$0xf0] }
  0xae   :  { %v1164_v1 = vpop.f32.mrf.mxu2  ;;  %v1069_v6 = vpop.f32.mrf.mxu0 }
  0xaf   :  { %v1213_v2 = vpop.f32.mrf.mxu3  ;;  %v1165_v5 = vadd.f32 %v1164_v1, %v1116_v55  ;;  %v1118_v7 = vpop.f32.mrf.mxu1 }
  0xb0   :  { %v1119_v10 = vadd.f32 %v1118_v7, %v1069_v6 }
  0xb1   :  { %v11327_v11 = vadd.f32 %v1213_v2, %v1165_v5  ;;  %1264 = vmatmul.bf16.gmra.mxu0 %v8576_v3  ;;  %v10532_v3 = vld [vmem:[%s14317_s1 + $0x210] sm:$0xff] }
  0xb2   :  { %1313 = vmatmul.bf16.gmra.mxu1 %v8580_v4  ;;  %1452 = vmatpush.bf16.msra.mxu0 %v10532_v3  ;;  %v8755_v3 = vld [vmem:[%s14316_s0 + $0x1c0] sm:$0xf] }
  0xb3   :  { %1362 = vmatmul.bf16.gmra.mxu2 %v8584_v8 }
  0xb4   :  { %1411 = vmatmul.bf16.gmra.mxu3 %v8588_v9 }
  0xb6   :  { %v1167_v13 = vpop.f32.mrf.mxu2  ;;  %v1071_v16 = vpop.f32.mrf.mxu0 }
  0xb7   :  { %v1216_v14 = vpop.f32.mrf.mxu3  ;;  %v1168_v15 = vadd.f32 %v1167_v13, %v1119_v10  ;;  %v1120_v17 = vpop.f32.mrf.mxu1  ;;  %v10436_v13 = vld [vmem:[%s14316_s0 + $0x150] sm:$0xf0] }
  0xb8   :  { %v1121_v18 = vadd.f32 %v1120_v17, %v1071_v16  ;;  %v8685_v16 = vld [vmem:[%s14316_s0 + $0x154] sm:$0xf0]  ;;  %v10437_v17 = vld [vmem:[%s14316_s0 + $0x158] sm:$0xf0]  ;;  %v8684_v23 = vor.u32 %v10436_v13, %v8683_v12  ;;  %v8765_v12 = vld [vmem:[%s14316_s0 + $0x1ec] sm:$0xf0] }
  0xb9   :  { %v11332_v19 = vadd.f32 %v1216_v14, %v1168_v15  ;;  %v8691_v14 = vld [vmem:[%s14316_s0 + $0x138] sm:$0xf]  ;;  %v10432_v15 = vld [vmem:[%s14316_s0 + $0x134] sm:$0xf] }
  0xba   :  { %v8688_v24 = vor.u32 %v10432_v15, %v8685_v16 }
  0xbe   :  { %v1169_v28 = vpop.f32.mrf.mxu2  ;;  %v1074_v33 = vpop.f32.mrf.mxu0 }
  0xbf   :  { %v1218_v29 = vpop.f32.mrf.mxu3  ;;  %v1170_v32 = vadd.f32 %v1169_v28, %v1121_v18  ;;  %v1123_v34 = vpop.f32.mrf.mxu1  ;;  %v10433_v18 = vld [vmem:[%s14316_s0 + $0x13c] sm:$0xf]  ;;  %v8692_v28 = vor.u32 %v10437_v17, %v8691_v14 }
  0xc0   :  { %v1124_v37 = vadd.f32 %v1123_v34, %v1074_v33 }
  0xc1   :  { %v11358_v38 = vadd.f32 %v1218_v29, %v1170_v32  ;;  %1269 = vmatmul.bf16.gmra.mxu0 %v8612_v30  ;;  %v8696_v29 = vor.u32 %v10433_v18, %v8693_v20  ;;  %v10531_v32 = vld [vmem:[%s14317_s1 + $0x208] sm:$0xff] }
  0xc2   :  { %1318 = vmatmul.bf16.gmra.mxu1 %v8616_v31  ;;  %1453 = vmatpush.bf16.msra.mxu0 %v10531_v32  ;;  %v8799_v32 = vld [vmem:[%s14316_s0 + $0x210] sm:$0xf] }
  0xc3   :  { %1367 = vmatmul.bf16.gmra.mxu2 %v8620_v35 }
  0xc4   :  { %1416 = vmatmul.bf16.gmra.mxu3 %v8624_v36 }
  0xc6   :  { %v1172_v40 = vpop.f32.mrf.mxu2  ;;  %v1076_v43 = vpop.f32.mrf.mxu0 }
  0xc7   :  { %v1221_v41 = vpop.f32.mrf.mxu3  ;;  %v1173_v42 = vadd.f32 %v1172_v40, %v1124_v37  ;;  %v1125_v44 = vpop.f32.mrf.mxu1  ;;  %v8719_v40 = vld [vmem:[%s14316_s0 + $0x178] sm:$0xf] }
  0xc8   :  { %v1126_v45 = vadd.f32 %v1125_v44, %v1076_v43  ;;  %v10441_v43 = vld [vmem:[%s14316_s0 + $0x17c] sm:$0xf]  ;;  %v8721_v44 = vld [vmem:[%s14316_s0 + $0x19c] sm:$0xf0] }
  0xc9   :  { %v11363_v46 = vadd.f32 %v1221_v41, %v1173_v42  ;;  %v10445_v41 = vld [vmem:[%s14316_s0 + $0x198] sm:$0xf0]  ;;  %v8727_v42 = vld [vmem:[%s14316_s0 + $0x180] sm:$0xf]  ;;  %v8724_v52 = vor.u32 %v10441_v43, %v8721_v44 }
  0xca   :  { %v8720_v51 = vor.u32 %v10445_v41, %v8719_v40  ;;  %v10460_v40 = vld [vmem:[%s14316_s0 + $0x214] sm:$0xf]  ;;  %v8801_v41 = vld [vmem:[%s14316_s0 + $0x234] sm:$0xf0] }
  0xce   :  { %v1174_v55 = vpop.f32.mrf.mxu2  ;;  %v1079_v61 = vpop.f32.mrf.mxu0 }
  0xcf   :  { %v1223_v57 = vpop.f32.mrf.mxu3  ;;  %v1175_v60 = vadd.f32 %v1174_v55, %v1126_v45  ;;  %v1128_v62 = vpop.f32.mrf.mxu1  ;;  %v10446_v45 = vld [vmem:[%s14316_s0 + $0x1a0] sm:$0xf0] }
  0xd0   :  { %v1129_v1 = vadd.f32 %v1128_v62, %v1079_v61  ;;  %v8728_v55 = vor.u32 %v10446_v45, %v8727_v42 }
  0xd1   :  { %v11389_v2 = vadd.f32 %v1223_v57, %v1175_v60  ;;  %1274 = vmatmul.bf16.gmra.mxu0 %v8648_v58  ;;  %v8732_v57 = vor.u32 %v10442_v47, %v8729_v48 }
  0xd2   :  { %1323 = vmatmul.bf16.gmra.mxu1 %v8652_v59  ;;  %v10530_v59 = vld [vmem:[%s14317_s1 + $0x200] sm:$0xff] }
  0xd3   :  { %1372 = vmatmul.bf16.gmra.mxu2 %v8656_v63  ;;  %1454 = vmatpush.bf16.msra.mxu0 %v10530_v59 }
  0xd4   :  { %1421 = vmatmul.bf16.gmra.mxu3 %v8660_v0 }
  0xd6   :  { %v1177_v4 = vpop.f32.mrf.mxu2  ;;  %v1081_v7 = vpop.f32.mrf.mxu0 }
  0xd7   :  { %v1226_v5 = vpop.f32.mrf.mxu3  ;;  %v1178_v6 = vadd.f32 %v1177_v4, %v1129_v1  ;;  %v1130_v8 = vpop.f32.mrf.mxu1  ;;  %v10454_v4 = vld [vmem:[%s14316_s0 + $0x1e0] sm:$0xf0] }
  0xd8   :  { %v1131_v9 = vadd.f32 %v1130_v8, %v1081_v7  ;;  %v8757_v7 = vld [vmem:[%s14316_s0 + $0x1e4] sm:$0xf0]  ;;  %v10455_v8 = vld [vmem:[%s14316_s0 + $0x1e8] sm:$0xf0]  ;;  %v8756_v15 = vor.u32 %v10454_v4, %v8755_v3 }
  0xd9   :  { %v11394_v10 = vadd.f32 %v1226_v5, %v1178_v6  ;;  %v8763_v5 = vld [vmem:[%s14316_s0 + $0x1c8] sm:$0xf]  ;;  %v10450_v6 = vld [vmem:[%s14316_s0 + $0x1c4] sm:$0xf] }
  0xda   :  { %v8760_v16 = vor.u32 %v10450_v6, %v8757_v7  ;;  %v8764_v20 = vor.u32 %v10455_v8, %v8763_v5  ;;  %v10561_v5 = vld [vmem:[%s14318_s2 + $0x78] sm:$0xff]  ;;  %v8591_v8 = vld [vmem:[%s14316_s0 + $0x68] sm:$0xf] }
  0xdb   :  { %2203 = vmatpush.bf16.msra.mxu1 %v10561_v5 }
  0xde   :  { %v1179_v21 = vpop.f32.mrf.mxu2  ;;  %v1084_v26 = vpop.f32.mrf.mxu0 }
  0xdf   :  { %v1228_v22 = vpop.f32.mrf.mxu3  ;;  %v1180_v25 = vadd.f32 %v1179_v21, %v1131_v9  ;;  %v1133_v27 = vpop.f32.mrf.mxu1  ;;  %v10451_v9 = vld [vmem:[%s14316_s0 + $0x1cc] sm:$0xf] }
  0xe0   :  { %v1134_v30 = vadd.f32 %v1133_v27, %v1084_v26  ;;  %v8768_v21 = vor.u32 %v10451_v9, %v8765_v12  ;;  %v10411_v9 = vld [vmem:[%s14316_s0 + $0x88] sm:$0xf0] }
  0xe1   :  { %v11420_v31 = vadd.f32 %v1228_v22, %v1180_v25  ;;  %1279 = vmatmul.bf16.gmra.mxu0 %v8684_v23 }
  0xe2   :  { %1328 = vmatmul.bf16.gmra.mxu1 %v8688_v24 }
  0xe3   :  { %1377 = vmatmul.bf16.gmra.mxu2 %v8692_v28 }
  0xe4   :  { %1426 = vmatmul.bf16.gmra.mxu3 %v8696_v29  ;;  %v8791_v29 = vld [vmem:[%s14316_s0 + $0x208] sm:$0xf] }
  0xe6   :  { %v1182_v33 = vpop.f32.mrf.mxu2  ;;  %v11425_v36 = vpop.f32.mrf.mxu0 }
  0xe7   :  { %v1231_v34 = vpop.f32.mrf.mxu3  ;;  %v1183_v35 = vadd.f32 %v1182_v33, %v1134_v30  ;;  %v11427_v37 = vpop.f32.mrf.mxu1  ;;  %v10463_v30 = vld [vmem:[%s14316_s0 + $0x228] sm:$0xf0] }
  0xe8   :  { %v10459_v33 = vld [vmem:[%s14316_s0 + $0x20c] sm:$0xf]  ;;  %v8792_v44 = vor.u32 %v10463_v30, %v8791_v29  ;;  %v10429_v29 = vld [vmem:[%s14316_s0 + $0x118] sm:$0xf0] }
  0xe9   :  { %v11429_v39 = vadd.f32 %v1231_v34, %v1183_v35  ;;  %v8793_v34 = vld [vmem:[%s14316_s0 + $0x22c] sm:$0xf0]  ;;  %v10464_v35 = vld [vmem:[%s14316_s0 + $0x230] sm:$0xf0] }
  0xea   :  { %v8796_v45 = vor.u32 %v10459_v33, %v8793_v34  ;;  %v10558_v33 = vld [vmem:[%s14318_s2 + $0x60] sm:$0xff] }
  0xee   :  { %v11455_v49 = vpop.f32.mrf.mxu2  ;;  %v1089_v53 = vpop.f32.mrf.mxu0 }
  0xef   :  { %v11457_v50 = vpop.f32.mrf.mxu3  ;;  %v1138_v54 = vpop.f32.mrf.mxu1 }
  0xf0   :  { %v1139_v58 = vadd.f32 %v1138_v54, %v1089_v53 }
  0xf1   :  { %1284 = vmatmul.bf16.gmra.mxu0 %v8720_v51  ;;  %v8800_v51 = vor.u32 %v10464_v35, %v8799_v32  ;;  %v8699_v35 = vld [vmem:[%s14316_s0 + $0x140] sm:$0xf] }
  0xf2   :  { %1333 = vmatmul.bf16.gmra.mxu1 %v8724_v52  ;;  %v8804_v52 = vor.u32 %v10460_v40, %v8801_v41  ;;  %v10438_v40 = vld [vmem:[%s14316_s0 + $0x160] sm:$0xf0] }
  0xf3   :  { %1382 = vmatmul.bf16.gmra.mxu2 %v8728_v55 }
  0xf4   :  { %1431 = vmatmul.bf16.gmra.mxu3 %v8732_v57 }
  0xf6   :  { %v1187_v60 = vpop.f32.mrf.mxu2  ;;  %v11462_v63 = vpop.f32.mrf.mxu0 }
  0xf7   :  { %v1236_v61 = vpop.f32.mrf.mxu3  ;;  %v1188_v62 = vadd.f32 %v1187_v60, %v1139_v58  ;;  %v11464_v0 = vpop.f32.mrf.mxu1  ;;  %v8555_v60 = vld [vmem:[%s14316_s0 + $0x20] sm:$0xf] }
  0xf9   :  { %v11466_v1 = vadd.f32 %v1236_v61, %v1188_v62  ;;  %v10402_v61 = vld [vmem:[%s14316_s0 + $0x40] sm:$0xf0] }
  0xfa   :  { %v8556_v62 = vor.u32 %v10402_v61, %v8555_v60  ;;  %v10556_v61 = vld [vmem:[%s14318_s2 + $0x50] sm:$0xff] }
  0xfe   :  { %v11492_v13 = vpop.f32.mrf.mxu2  ;;  %v1094_v17 = vpop.f32.mrf.mxu0 }
  0xff   :  { %v11494_v14 = vpop.f32.mrf.mxu3  ;;  %v1143_v18 = vpop.f32.mrf.mxu1 }
 0x100   :  { %v1144_v22 = vadd.f32 %v1143_v18, %v1094_v17  ;;  %v8627_v18 = vld [vmem:[%s14316_s0 + $0xb0] sm:$0xf] }
 0x101   :  { %1289 = vmatmul.bf16.gmra.mxu0 %v8756_v15 }
 0x102   :  { %1338 = vmatmul.bf16.gmra.mxu1 %v8760_v16  ;;  %v10560_v16 = vld [vmem:[%s14318_s2 + $0x70] sm:$0xff] }
 0x103   :  { %1387 = vmatmul.bf16.gmra.mxu2 %v8764_v20  ;;  %2204 = vmatpush.bf16.msra.mxu1 %v10560_v16  ;;  %v10420_v20 = vld [vmem:[%s14316_s0 + $0xd0] sm:$0xf0] }
 0x104   :  { %1436 = vmatmul.bf16.gmra.mxu3 %v8768_v21 }
 0x106   :  { %v1192_v23 = vpop.f32.mrf.mxu2  ;;  %v11496_v26 = vpop.f32.mrf.mxu0 }
 0x107   :  { %v1241_v24 = vpop.f32.mrf.mxu3  ;;  %v1193_v25 = vadd.f32 %v1192_v23, %v1144_v22  ;;  %v11498_v27 = vpop.f32.mrf.mxu1  ;;  %v10559_v23 = vld [vmem:[%s14318_s2 + $0x68] sm:$0xff] }
 0x108   :  { %2205 = vmatpush.bf16.msra.mxu1 %v10559_v23 }
 0x109   :  { %v11500_v28 = vadd.f32 %v1241_v24, %v1193_v25  ;;  %v8663_v25 = vld [vmem:[%s14316_s0 + $0xf8] sm:$0xf] }
 0x10c   :  { %2206 = vmatpush.bf16.msra.mxu1 %v10558_v33 }
 0x10e   :  { %v11526_v42 = vpop.f32.mrf.mxu2  ;;  %v1099_v47 = vpop.f32.mrf.mxu0 }
 0x10f   :  { %v11528_v43 = vpop.f32.mrf.mxu3  ;;  %v1148_v48 = vpop.f32.mrf.mxu1 }
 0x110   :  { %v1149_v53 = vadd.f32 %v1148_v48, %v1099_v47 }
 0x111   :  { %1294 = vmatmul.bf16.gmra.mxu0 %v8792_v44 }
 0x112   :  { %1343 = vmatmul.bf16.gmra.mxu1 %v8796_v45  ;;  %v10557_v45 = vld [vmem:[%s14318_s2 + $0x58] sm:$0xff] }
 0x113   :  { %1392 = vmatmul.bf16.gmra.mxu2 %v8800_v51  ;;  %2207 = vmatpush.bf16.msra.mxu1 %v10557_v45  ;;  %v8735_v51 = vld [vmem:[%s14316_s0 + $0x188] sm:$0xf] }
 0x114   :  { %1441 = vmatmul.bf16.gmra.mxu3 %v8804_v52 }
 0x116   :  { %v1197_v54 = vpop.f32.mrf.mxu2  ;;  %v11530_v58 = vpop.f32.mrf.mxu0 }
 0x117   :  { %v1246_v55 = vpop.f32.mrf.mxu3  ;;  %v1198_v57 = vadd.f32 %v1197_v54, %v1149_v53  ;;  %2208 = vmatpush.bf16.msra.mxu1 %v10556_v61 }
 0x119   :  { %v11532_v59 = vadd.f32 %v1246_v55, %v1198_v57 }
 0x11e   :  { %v1260_v3 = vpop.f32.mrf.mxu0  ;;  %v11608_v47 = vpop.f32.mrf.mxu2 }
 0x11f   :  { %v11541_v4 = vadd.f32 %v1260_v3, %v11301_v56  ;;  %v8592_v56 = vor.u32 %v10411_v9, %v8591_v8  ;;  %v11620_v55 = vpop.f32.mrf.mxu3  ;;  %v10553_v3 = vld [vmem:[%s14318_s2 + $0x38] sm:$0xff]  ;;  %v8771_v9 = vld [vmem:[%s14316_s0 + $0x1d0] sm:$0xf] }
 0x120   :  { %2348 = vmatpush.bf16.msra.mxu2 %v10553_v3 }
 0x121   :  { %1455 = vmatmul.bf16.vlgmr.msra.gmra.mxu0 %v8556_v62 }
 0x126   :  { %v1262_v6 = vpop.f32.mrf.mxu0  ;;  %v11625_v60 = vpop.f32.mrf.mxu2 }
 0x127   :  { %v11547_v7 = vadd.f32 %v1262_v6, %v11327_v11  ;;  %v11637_v6 = vpop.f32.mrf.mxu3 }
 0x12e   :  { %v1265_v12 = vpop.f32.mrf.mxu0  ;;  %v11642_v8 = vpop.f32.mrf.mxu2 }
 0x12f   :  { %v11556_v15 = vadd.f32 %v1265_v12, %v11332_v19  ;;  %v8628_v19 = vor.u32 %v10420_v20, %v8627_v18  ;;  %v10569_v12 = vld [vmem:[%s14318_s2 + $0xb8] sm:$0xff]  ;;  %v10551_v18 = vld [vmem:[%s14318_s2 + $0x28] sm:$0xff] }
 0x130   :  { %2609 = vmatpush.bf16.msra.mxu3 %v10569_v12  ;;  %v10585_v20 = vld [vmem:[%s14318_s2 + $0xf8] sm:$0xff] }
 0x131   :  { %1460 = vmatmul.bf16.gmra.mxu0 %v8592_v56  ;;  %v10456_v56 = vld [vmem:[%s14316_s0 + $0x1f0] sm:$0xf0] }
 0x132   :  { %v8772_v16 = vor.u32 %v10456_v56, %v8771_v9  ;;  %2803 = vmatpush.bf16.msrb.mxu0 %v10585_v20  ;;  %v10555_v9 = vld [vmem:[%s14318_s2 + $0x48] sm:$0xff] }
 0x133   :  { %2209 = vmatpush.bf16.msra.mxu1 %v10555_v9 }
 0x136   :  { %v1267_v11 = vpop.f32.mrf.mxu0 }
 0x137   :  { %v11562_v17 = vadd.f32 %v1267_v11, %v11358_v38 }
 0x13e   :  { %v1270_v21 = vpop.f32.mrf.mxu0 }
 0x13f   :  { %v11571_v22 = vadd.f32 %v1270_v21, %v11363_v46  ;;  %v8664_v46 = vor.u32 %v10429_v29, %v8663_v25  ;;  %v10568_v21 = vld [vmem:[%s14318_s2 + $0xb0] sm:$0xff]  ;;  %v10550_v25 = vld [vmem:[%s14318_s2 + $0x20] sm:$0xff]  ;;  %v11674_v29 = vpop.f32.mrf.mxu3 }
 0x140   :  { %2610 = vmatpush.bf16.msra.mxu3 %v10568_v21 }
 0x141   :  { %1465 = vmatmul.bf16.gmra.mxu0 %v8628_v19 }
 0x146   :  { %v1272_v38 = vpop.f32.mrf.mxu0 }
 0x147   :  { %v11577_v24 = vadd.f32 %v1272_v38, %v11389_v2  ;;  %v10832_v38 = vmov 0  }
 0x148   :  { %1514 = vst [vmem:[#allocation2 + $0x8] sm:$0xf] %v10832_v38 }
 0x149   :  { %1515 = vst [vmem:[#allocation2 + $0xc] sm:$0x1] %v10832_v38 }
 0x14a   :  { %1512 = vst [vmem:[#allocation2] sm:$0xf] %v10832_v38 }
 0x14b   :  { %1513 = vst [vmem:[#allocation2 + $0x4] sm:$0x1] %v10832_v38 }
 0x14c   :  { %1516 = vst [vmem:[#allocation2 + $0x10] sm:$0xf] %v10832_v38 }
 0x14d   :  { %1517 = vst [vmem:[#allocation2 + $0x14] sm:$0x1] %v10832_v38 }
 0x14e   :  { %v1275_v30 = vpop.f32.mrf.mxu0  ;;  %1518 = vst [vmem:[#allocation2 + $0x18] sm:$0xf] %v10832_v38 }
 0x14f   :  { %v11586_v32 = vadd.f32 %v1275_v30, %v11394_v10  ;;  %v8700_v10 = vor.u32 %v10438_v40, %v8699_v35  ;;  %v11680_v30 = vpop.f32.mrf.mxu2  ;;  %v10465_v35 = vld [vmem:[%s14316_s0 + $0x238] sm:$0xf0]  ;;  %1519 = vst [vmem:[#allocation2 + $0x1c] sm:$0x1] %v10832_v38  ;;  %v1732_v20 = vld [vmem:[#allocation2 + $0x8] sm:$0xf] }
 0x150   :  { %1520 = vst [vmem:[#allocation2 + $0x20] sm:$0xf] %v10832_v38 }
 0x151   :  { %1470 = vmatmul.bf16.gmra.mxu0 %v8664_v46  ;;  %v10567_v46 = vld [vmem:[%s14318_s2 + $0xa8] sm:$0xff]  ;;  %1521 = vst [vmem:[#allocation2 + $0x24] sm:$0x1] %v10832_v38 }
 0x152   :  { %2611 = vmatpush.bf16.msra.mxu3 %v10567_v46  ;;  %1522 = vst [vmem:[#allocation2 + $0x28] sm:$0xf] %v10832_v38 }
 0x153   :  { %1523 = vst [vmem:[#allocation2 + $0x2c] sm:$0x1] %v10832_v38 }
 0x154   :  { %1524 = vst [vmem:[#allocation2 + $0x30] sm:$0xf] %v10832_v38 }
 0x155   :  { %1525 = vst [vmem:[#allocation2 + $0x34] sm:$0x1] %v10832_v38 }
 0x156   :  { %v1277_v2 = vpop.f32.mrf.mxu0  ;;  %1526 = vst [vmem:[#allocation2 + $0x38] sm:$0xf] %v10832_v38 }
 0x157   :  { %v11592_v34 = vadd.f32 %v1277_v2, %v11420_v31  ;;  %v11606_v31 = vpop.f32.mrf.mxu1  ;;  %v8807_v2 = vld [vmem:[%s14316_s0 + $0x218] sm:$0xf]  ;;  %v11703_v45 = vpop.f32.mrf.mxu2  ;;  %1527 = vst [vmem:[#allocation2 + $0x3c] sm:$0x1] %v10832_v38 }
 0x158   :  { %1528 = vst [vmem:[#allocation2 + $0x40] sm:$0xf] %v10832_v38 }
 0x159   :  { %1529 = vst [vmem:[#allocation2 + $0x44] sm:$0x1] %v10832_v38 }
 0x15a   :  { %1530 = vst [vmem:[#allocation2 + $0x48] sm:$0xf] %v10832_v38 }
 0x15b   :  { %1531 = vst [vmem:[#allocation2 + $0x4c] sm:$0x1] %v10832_v38 }
 0x15c   :  { %1532 = vst [vmem:[#allocation2 + $0x50] sm:$0xf] %v10832_v38 }
 0x15d   :  { %1533 = vst [vmem:[#allocation2 + $0x54] sm:$0x1] %v10832_v38 }
 0x15e   :  { %v1280_v41 = vpop.f32.mrf.mxu0  ;;  %1534 = vst [vmem:[#allocation2 + $0x58] sm:$0xf] %v10832_v38 }
 0x15f   :  { %v11601_v44 = vadd.f32 %v1280_v41, %v11429_v39  ;;  %v10447_v39 = vld [vmem:[%s14316_s0 + $0x1a8] sm:$0xf0]  ;;  %v11618_v52 = vpop.f32.mrf.mxu1  ;;  %v8808_v41 = vor.u32 %v10465_v35, %v8807_v2  ;;  %v11726_v3 = vpop.f32.mrf.mxu2  ;;  %1535 = vst [vmem:[#allocation2 + $0x5c] sm:$0x1] %v10832_v38  ;;  %v10549_v2 = vld [vmem:[%s14318_s2 + $0x18] sm:$0xff]  ;;  %s10837_s0 = smov 128  }
 0x160   :  { %v8736_v53 = vor.u32 %v10447_v39, %v8735_v51  ;;  %1536 = vst [vmem:[#allocation2 + $0x60] sm:$0xf] %v10832_v38  ;;  %v10583_v35 = vld [vmem:[%s14318_s2 + $0xe8] sm:$0xff] }
 0x161   :  { %1475 = vmatmul.bf16.gmra.mxu0 %v8700_v10  ;;  %v11700_v10 = vpop.f32.mrf.mxu3  ;;  %1537 = vst [vmem:[#allocation2 + $0x64] sm:$0x1] %v10832_v38 }
 0x162   :  { %1538 = vst [vmem:[#allocation2 + $0x68] sm:$0xf] %v10832_v38 }
 0x163   :  { %1539 = vst [vmem:[#allocation2 + $0x6c] sm:$0x1] %v10832_v38 }
 0x164   :  { %1540 = vst [vmem:[#allocation2 + $0x70] sm:$0xf] %v10832_v38 }
 0x165   :  { %1541 = vst [vmem:[#allocation2 + $0x74] sm:$0x1] %v10832_v38 }
 0x166   :  { %v11610_v48 = vpop.f32.mrf.mxu0  ;;  %1542 = vst [vmem:[#allocation2 + $0x78] sm:$0xf] %v10832_v38 }
 0x167   :  { %v11635_v5 = vpop.f32.mrf.mxu1  ;;  %1543 = vst [vmem:[#allocation2 + $0x7c] sm:$0x1] %v10832_v38 }
 0x168   :  { %1544 = vst [vmem:[#allocation2 + $0x80] sm:$0xf] %v10832_v38 }
 0x169   :  { %v11723_v61 = vpop.f32.mrf.mxu3  ;;  %1545 = vst [vmem:[#allocation2 + $0x84] sm:$0x1] %v10832_v38 }
 0x16a   :  { %1546 = vst [vmem:[#allocation2 + $0x88] sm:$0xf] %v10832_v38 }
 0x16b   :  { %1547 = vst [vmem:[#allocation2 + $0x8c] sm:$0x1] %v10832_v38 }
 0x16c   :  { %1548 = vst [vmem:[#allocation2 + $0x90] sm:$0xf] %v10832_v38 }
 0x16d   :  { %1549 = vst [vmem:[#allocation2 + $0x94] sm:$0x1] %v10832_v38 }
 0x16e   :  { %v1285_v54 = vpop.f32.mrf.mxu0  ;;  %1550 = vst [vmem:[#allocation2 + $0x98] sm:$0xf] %v10832_v38 }
 0x16f   :  { %v11623_v57 = vadd.f32 %v1285_v54, %v11466_v1  ;;  %v10552_v1 = vld [vmem:[%s14318_s2 + $0x30] sm:$0xff]  ;;  %v11665_v23 = vpop.f32.mrf.mxu1  ;;  %1551 = vst [vmem:[#allocation2 + $0x9c] sm:$0x1] %v10832_v38 }
 0x170   :  { %2349 = vmatpush.bf16.msra.mxu2 %v10552_v1  ;;  %4463 = vst [vmem:[#allocation3] sm:$0xf] %v10832_v38 }
 0x171   :  { %1480 = vmatmul.bf16.gmra.mxu0 %v8736_v53  ;;  %v11744_v12 = vpop.f32.mrf.mxu3  ;;  %4464 = vst [vmem:[#allocation3 + $0x4] sm:$0x1] %v10832_v38 }
 0x172   :  { %4465 = vst [vmem:[#allocation3 + $0x8] sm:$0xf] %v10832_v38 }
 0x173   :  { %4466 = vst [vmem:[#allocation3 + $0xc] sm:$0x1] %v10832_v38 }
 0x174   :  { %2350 = vmatpush.bf16.msra.mxu2 %v10551_v18  ;;  %4467 = vst [vmem:[#allocation3 + $0x10] sm:$0xf] %v10832_v38 }
 0x175   :  { %4468 = vst [vmem:[#allocation3 + $0x14] sm:$0x1] %v10832_v38 }
 0x176   :  { %v11630_v62 = vpop.f32.mrf.mxu0  ;;  %4469 = vst [vmem:[#allocation3 + $0x18] sm:$0xf] %v10832_v38 }
 0x177   :  { %v11696_v40 = vpop.f32.mrf.mxu1  ;;  %4470 = vst [vmem:[#allocation3 + $0x1c] sm:$0x1] %v10832_v38 }
 0x178   :  { %2351 = vmatpush.bf16.msra.mxu2 %v10550_v25  ;;  %4471 = vst [vmem:[#allocation3 + $0x20] sm:$0xf] %v10832_v38 }
 0x179   :  { %4472 = vst [vmem:[#allocation3 + $0x24] sm:$0x1] %v10832_v38 }
 0x17a   :  { %4473 = vst [vmem:[#allocation3 + $0x28] sm:$0xf] %v10832_v38 }
 0x17b   :  { %4474 = vst [vmem:[#allocation3 + $0x2c] sm:$0x1] %v10832_v38 }
 0x17c   :  { %2352 = vmatpush.bf16.msra.mxu2 %v10549_v2  ;;  %v10581_v2 = vld [vmem:[%s14318_s2 + $0xd8] sm:$0xff]  ;;  %4475 = vst [vmem:[#allocation3 + $0x30] sm:$0xf] %v10832_v38 }
 0x17d   :  { %4476 = vst [vmem:[#allocation3 + $0x34] sm:$0x1] %v10832_v38 }
 0x17e   :  { %v1290_v11 = vpop.f32.mrf.mxu0  ;;  %4477 = vst [vmem:[#allocation3 + $0x38] sm:$0xf] %v10832_v38 }
 0x17f   :  { %v11660_v19 = vadd.f32 %v1290_v11, %v11500_v28  ;;  %v10584_v28 = vld [vmem:[%s14318_s2 + $0xf0] sm:$0xff]  ;;  %v11715_v53 = vpop.f32.mrf.mxu1  ;;  %v11747_v11 = vpop.f32.mrf.mxu2  ;;  %4478 = vst [vmem:[#allocation3 + $0x3c] sm:$0x1] %v10832_v38 }
 0x180   :  { %2804 = vmatpush.bf16.msrb.mxu0 %v10584_v28  ;;  %4479 = vst [vmem:[#allocation3 + $0x40] sm:$0xf] %v10832_v38 }
 0x181   :  { %1485 = vmatmul.bf16.gmra.mxu0 %v8772_v16  ;;  %4480 = vst [vmem:[#allocation3 + $0x44] sm:$0x1] %v10832_v38 }
 0x182   :  { %4481 = vst [vmem:[#allocation3 + $0x48] sm:$0xf] %v10832_v38 }
 0x183   :  { %4482 = vst [vmem:[#allocation3 + $0x4c] sm:$0x1] %v10832_v38 }
 0x184   :  { %2805 = vmatpush.bf16.msrb.mxu0 %v10583_v35  ;;  %4483 = vst [vmem:[#allocation3 + $0x50] sm:$0xf] %v10832_v38 }
 0x185   :  { %4484 = vst [vmem:[#allocation3 + $0x54] sm:$0x1] %v10832_v38 }
 0x186   :  { %v11684_v33 = vpop.f32.mrf.mxu0  ;;  %4485 = vst [vmem:[#allocation3 + $0x58] sm:$0xf] %v10832_v38 }
 0x187   :  { %4486 = vst [vmem:[#allocation3 + $0x5c] sm:$0x1] %v10832_v38 }
 0x188   :  { %4487 = vst [vmem:[#allocation3 + $0x60] sm:$0xf] %v10832_v38 }
 0x189   :  { %4488 = vst [vmem:[#allocation3 + $0x64] sm:$0x1] %v10832_v38 }
 0x18a   :  { %4489 = vst [vmem:[#allocation3 + $0x68] sm:$0xf] %v10832_v38 }
 0x18b   :  { %4490 = vst [vmem:[#allocation3 + $0x6c] sm:$0x1] %v10832_v38 }
 0x18c   :  { %4491 = vst [vmem:[#allocation3 + $0x70] sm:$0xf] %v10832_v38 }
 0x18d   :  { %4492 = vst [vmem:[#allocation3 + $0x74] sm:$0x1] %v10832_v38 }
 0x18e   :  { %v1295_v51 = vpop.f32.mrf.mxu0  ;;  %4493 = vst [vmem:[#allocation3 + $0x78] sm:$0xf] %v10832_v38 }
 0x18f   :  { %v11707_v39 = vadd.f32 %v1295_v51, %v11532_v59  ;;  %v1310_v59 = vadd.f32 %v11618_v52, %v11541_v4  ;;  %v1738_v51 = vld [vmem:[#allocation2 + $0xc] sm:$0x1]  ;;  %4494 = vst [vmem:[#allocation3 + $0x7c] sm:$0x1] %v10832_v38 }
 0x190   :  { %4495 = vst [vmem:[#allocation3 + $0x80] sm:$0xf] %v10832_v38 }
 0x191   :  { %1490 = vmatmul.bf16.gmra.mxu0 %v8808_v41  ;;  %v1359_v1 = vadd.f32 %v11625_v60, %v1310_v59  ;;  %v11740_v60 = vpop.f32.mrf.mxu1  ;;  %v10566_v59 = vld [vmem:[%s14318_s2 + $0xa0] sm:$0xff]  ;;  %4496 = vst [vmem:[#allocation3 + $0x84] sm:$0x1] %v10832_v38 }
 0x192   :  { %2612 = vmatpush.bf16.msra.mxu3 %v10566_v59  ;;  %v1312_v59 = vadd.f32 %v11635_v5, %v11547_v7  ;;  %v10546_v7 = vld [vmem:[%s14318_s2] sm:$0xff]  ;;  %v10580_v5 = vld [vmem:[%s14318_s2 + $0xd0] sm:$0xff]  ;;  %4497 = vst [vmem:[#allocation3 + $0x88] sm:$0xf] %v10832_v38 }
 0x193   :  { %v1408_v4 = vadd.f32 %v11637_v6, %v1359_v1  ;;  %4498 = vst [vmem:[#allocation3 + $0x8c] sm:$0x1] %v10832_v38 }
 0x194   :  { %4499 = vst [vmem:[#allocation3 + $0x90] sm:$0xf] %v10832_v38 }
 0x195   :  { %4500 = vst [vmem:[#allocation3 + $0x94] sm:$0x1] %v10832_v38 }
 0x196   :  { %v11718_v54 = vpop.f32.mrf.mxu0  ;;  %4501 = vst [vmem:[#allocation3 + $0x98] sm:$0xf] %v10832_v38 }
 0x197   :  { %4502 = vst [vmem:[#allocation3 + $0x9c] sm:$0x1] %v10832_v38 }
 0x199   :  { %v11775_v1 = vpop.f32.mrf.mxu1 }
 0x19e   :  { %v1456_v52 = vpop.f32.mrf.mxu0 }
 0x19f   :  { %v1457_v56 = vadd.f32 %v1456_v52, %v1408_v4  ;;  %v11779_v52 = vpop.f32.mrf.mxu3 }
 0x1a1   :  { %v1496_v16 = vmax.f32 %v1457_v56, 0.0 }
 0x1a3   :  { %v1552_v6 = vpack.c.bf16 %v1496_v16, %v1496_v16 }
 0x1a5   :  { %v1569_v18 = vshrl.u32 %v1552_v6, 16  ;;  %v1572_v28 = vshll.u32 %v1552_v6, 16  ;;  %v10548_v6 = vld [vmem:[%s14318_s2 + $0x10] sm:$0xff] }
 0x1a6   :  { %v11754_v21 = vpop.f32.mrf.mxu0  ;;  %2353 = vmatpush.bf16.msra.mxu2 %v10548_v6  ;;  %v9147_v6 = vld [vmem:[#allocation2] sm:$0xf] }
 0x1a7   :  { %v1571_v25 = vrot.slane %v1569_v18, 7  ;;  %v10582_v18 = vld [vmem:[%s14318_s2 + $0xe0] sm:$0xff] }
 0x1a8   :  { %2806 = vmatpush.bf16.msrb.mxu0 %v10582_v18 }
 0x1a9   :  { %v1574_v9 = vor.u32 %v1572_v28, %v1571_v25  ;;  %v1575_v4 = vrot.slane %v1571_v25, 4  ;;  %v11792_v25 = vpop.f32.mrf.mxu2  ;;  %v10547_v28 = vld [vmem:[%s14318_s2 + $0x8] sm:$0xff] }
 0x1aa   :  { %2354 = vmatpush.bf16.msra.mxu2 %v10547_v28 }
 0x1ab   :  { %v1733_v56 = vsel %vm11756_vm4, %v1574_v9, %v1732_v20  ;;  %v1739_v16 = vsel %vm11767_vm5, %v1575_v4, %v1738_v51  ;;  %v10565_v20 = vld [vmem:[%s14318_s2 + $0x98] sm:$0xff]  ;;  %v10564_v51 = vld [vmem:[%s14318_s2 + $0x90] sm:$0xff]  ;;  %v1361_v9 = vadd.f32 %v11642_v8, %v1312_v59  ;;  %v1315_v4 = vadd.f32 %v11665_v23, %v11556_v15  ;;  %v10563_v8 = vld [vmem:[%s14318_s2 + $0x88] sm:$0xff] }
 0x1ac   :  { %1734 = vst [vmem:[#allocation2 + $0x8] sm:$0xf] %v1733_v56  ;;  %2613 = vmatpush.bf16.msra.mxu3 %v10565_v20  ;;  %2807 = vmatpush.bf16.msrb.mxu0 %v10581_v2  ;;  %v11816_v56 = vpop.f32.mrf.mxu1  ;;  %v1317_v23 = vadd.f32 %v11696_v40, %v11562_v17  ;;  %v10554_v17 = vld [vmem:[%s14318_s2 + $0x40] sm:$0xff] }
 0x1ad   :  { %1740 = vst [vmem:[#allocation2 + $0xc] sm:$0x1] %v1739_v16  ;;  %v1364_v15 = vadd.f32 %v11680_v30, %v1315_v4  ;;  %v11832_v16 = vpop.f32.mrf.mxu3  ;;  %v1410_v2 = vadd.f32 %v11674_v29, %v1361_v9  ;;  %v1320_v29 = vadd.f32 %v11715_v53, %v11571_v22  ;;  %v10562_v9 = vld [vmem:[%s14318_s2 + $0x80] sm:$0xff]  ;;  %2210 = vmatpush.bf16.msra.mxu1 %v10554_v17 }
 0x1ae   :  { %v1461_v35 = vpop.f32.mrf.mxu0  ;;  %2355 = vmatpush.bf16.msra.mxu2 %v10546_v7  ;;  %v1366_v30 = vadd.f32 %v11703_v45, %v1317_v23  ;;  %v11856_v4 = vld [vmem:[#allocation2 + $0x4] sm:$0x1]  ;;  %v2397_v7 = vld [vmem:[#allocation2] sm:$0xe]  ;;  %v1322_v17 = vadd.f32 %v11740_v60, %v11577_v24 }
 0x1af   :  { %v1413_v59 = vadd.f32 %v11700_v10, %v1364_v15  ;;  %v1459_v45 = vadd.f32 %v11754_v21, %v1410_v2  ;;  %v2450_v15 = vrot.slane %v11856_v4, 5 }
 0x1b0   :  { %2614 = vmatpush.bf16.msra.mxu3 %v10564_v51  ;;  %2808 = vmatpush.bf16.msrb.mxu0 %v10580_v5  ;;  %v10579_v51 = vld [vmem:[%s14318_s2 + $0xc8] sm:$0xff]  ;;  %v1415_v10 = vadd.f32 %v11723_v61, %v1366_v30  ;;  %v1369_v5 = vadd.f32 %v11726_v3, %v1320_v29  ;;  %v10736_v3 = vld [vmem:[%s14320_s4 + $0x34] sm:$0xf] }
 0x1b1   :  { %v11835_v20 = vpop.f32.mrf.mxu2  ;;  %v1462_v22 = vadd.f32 %v1461_v35, %v1413_v59  ;;  %v1497_v61 = vmax.f32 %v1459_v45, 0.0 }
 0x1b2   :  { %v1418_v30 = vadd.f32 %v11744_v12, %v1369_v5  ;;  %v1371_v12 = vadd.f32 %v11747_v11, %v1322_v17 }
 0x1b3   :  { %v10538_v18 = vld [vmem:[#allocation2 + $0x4] sm:$0xf0]  ;;  %v1498_v59 = vmax.f32 %v1462_v22, 0.0  ;;  %v11893_v24 = vpack.c.bf16 %v1497_v61, %v1497_v61  ;;  %v10593_v22 = vld [vmem:[%s14318_s2 + $0x138] sm:$0xff] }
 0x1b4   :  { %2615 = vmatpush.bf16.msra.mxu3 %v10563_v8  ;;  %v9148_v28 = vor.u32 %v10538_v18, %v9147_v6  ;;  %2809 = vmatpush.bf16.msrb.mxu0 %v10579_v51  ;;  %v11862_v53 = vld [vmem:[#allocation2 + $0xc] sm:$0x1]  ;;  %v2398_v21 = vld [vmem:[#allocation2 + $0x8] sm:$0xe]  ;;  %v9209_v8 = vrot.slane %v2397_v7, 9  ;;  %v11866_v23 = vpop.f32.mrf.mxu1  ;;  %v10578_v6 = vld [vmem:[%s14318_s2 + $0xc0] sm:$0xff] }
 0x1b5   :  { %v9210_v35 = vrot.slane %v2398_v21, 9  ;;  %v2454_v2 = vrot.slane %v11862_v53, 5  ;;  %v11883_v51 = vpop.f32.mrf.mxu3  ;;  %v1831_v7 = vld [vmem:[#allocation2] sm:$0xf]  ;;  %v1832_v5 = vld [vmem:[#allocation2 + $0x8] sm:$0xf]  ;;  %v11901_v11 = vpack.c.bf16 %v1498_v59, %v1498_v59  ;;  %3221 = vmatpush.bf16.msrb.mxu1 %v10593_v22 }
 0x1b6   :  { %v1463_v40 = vpop.f32.mrf.mxu0  ;;  %2356 = vmatmul.bf16.vlgmr.msra.gmra.mxu2 %v9148_v28  ;;  %v2451_v28 = vsel %vm11869_vm8, %v9209_v8, %v2450_v15  ;;  %v1883_v8 = vshrl.u32 %v1831_v7, 16  ;;  %v1886_v15 = vshll.u32 %v1831_v7, 16  ;;  %v1906_v22 = vshll.u32 %v11862_v53, 16 }
 0x1b7   :  { %v1464_v18 = vadd.f32 %v1463_v40, %v1415_v10  ;;  %v2529_v29 = vunpack.c.l.b16 %v2451_v28  ;;  %v2455_v40 = vsel %vm11869_vm8, %v9210_v35, %v2454_v2  ;;  %v1892_v35 = vshll.u32 %v11856_v4, 16 }
 0x1b8   :  { %2616 = vmatpush.bf16.msra.mxu3 %v10562_v9  ;;  %2810 = vmatpush.bf16.msrb.mxu0 %v10578_v6  ;;  %v2530_v60 = vunpack.c.l.b16 %v2455_v40  ;;  %v1885_v28 = vrot.slane %v1883_v8, 4  ;;  %v1888_v2 = vrot.slane %v1886_v15, 5  ;;  %v1900_v4 = vshll.u32 %v1832_v5, 16 }
 0x1b9   :  { %v11886_v45 = vpop.f32.mrf.mxu2  ;;  %v1499_v21 = vmax.f32 %v1464_v18, 0.0  ;;  %v1577_v18 = vshrl.u32 %v11893_v24, 16  ;;  %v1325_v15 = vadd.f32 %v11775_v1, %v11586_v32 }
 0x1ba   :  { %v2545_v61 = vpack.c.b16 %v2530_v60, %v2529_v29  ;;  %v1889_v59 = vor.u32 %v1888_v2, %v1885_v28  ;;  %v1894_v29 = vrot.slane %v1892_v35, 5  ;;  %v1585_v60 = vshrl.u32 %v11901_v11, 16 }
 0x1bb   :  { %v11907_v17 = vpack.c.bf16 %v1499_v21, %v1499_v21  ;;  %v1136_v21 = vadd.f32 %v11427_v37, %v11425_v36  ;;  %v1579_v36 = vrot.slane %v1577_v18, 7  ;;  %v1374_v32 = vadd.f32 %v11792_v25, %v1325_v15  ;;  %v1744_v15 = vld [vmem:[#allocation2 + $0x14] sm:$0x1] }
 0x1bc   :  { %2617 = vmatmul.bf16.vlgmr.msra.gmra.mxu3 %v2545_v61  ;;  %v11910_v7 = vpop.f32.mrf.mxu1  ;;  %v11940_v1 = vrot.slane %v1585_v60, 7  ;;  %v1741_v60 = vld [vmem:[#allocation2 + $0x10] sm:$0xf] }
 0x1bd   :  { %v1185_v28 = vadd.f32 %v11455_v49, %v1136_v21  ;;  %v11930_v2 = vpop.f32.mrf.mxu3  ;;  %v1593_v37 = vshrl.u32 %v11907_v17, 16  ;;  %v1908_v49 = vrot.slane %v1906_v22, 5 }
 0x1be   :  { %v1466_v9 = vpop.f32.mrf.mxu0 }
 0x1bf   :  { %v1467_v10 = vadd.f32 %v1466_v9, %v1418_v30  ;;  %v1897_v30 = vshrl.u32 %v1832_v5, 16  ;;  %v1420_v9 = vadd.f32 %v11779_v52, %v1371_v12  ;;  %v1902_v5 = vrot.slane %v1900_v4, 5 }
 0x1c0   :  { %v1890_v12 = vrot.slane %v1889_v59, 4  ;;  %v1580_v4 = vshll.u32 %v11893_v24, 16  ;;  %v1234_v24 = vadd.f32 %v11457_v50, %v1185_v28  ;;  %v1327_v50 = vadd.f32 %v11816_v56, %v11592_v34 }
 0x1c1   :  { %v1500_v6 = vmax.f32 %v1467_v10, 0.0  ;;  %v1899_v40 = vrot.slane %v1897_v30, 4  ;;  %v11932_v53 = vpop.f32.mrf.mxu2  ;;  %v1591_v28 = vrot.slane %v11940_v1, 4 }
 0x1c2   :  { %v1283_v38 = vadd.f32 %v11610_v48, %v1234_v24  ;;  %v1768_v24 = vld [vmem:[#allocation2 + $0x34] sm:$0x1] }
 0x1c3   :  { %v11924_v52 = vpack.c.bf16 %v1500_v6, %v1500_v6  ;;  %v1903_v35 = vor.u32 %v1902_v5, %v1899_v40  ;;  %v1895_v6 = vsel %vm11916_vm11, %v1890_v12, %v1894_v29  ;;  %v1588_v29 = vshll.u32 %v11901_v11, 16 }
 0x1c4   :  { %v2123_v18 = vunpack.c.l.b16 %v1895_v6  ;;  %v1595_v5 = vrot.slane %v1593_v37, 7  ;;  %v1423_v12 = vadd.f32 %v11832_v16, %v1374_v32  ;;  %v1334_v16 = vpop.f32.mrf.mxu1 }
 0x1c5   :  { %v1904_v30 = vrot.slane %v1903_v35, 4  ;;  %v1601_v59 = vshrl.u32 %v11924_v52, 16  ;;  %v1590_v11 = vor.u32 %v1588_v29, %v11940_v1  ;;  %v1596_v35 = vshll.u32 %v11907_v17, 16  ;;  %v10592_v17 = vld [vmem:[%s14318_s2 + $0x130] sm:$0xff] }
 0x1c6   :  { %v1468_v8 = vpop.f32.mrf.mxu0  ;;  %v1604_v34 = vshll.u32 %v11924_v52, 16  ;;  %3222 = vmatpush.bf16.msrb.mxu1 %v10592_v17 }
 0x1c7   :  { %v1469_v61 = vadd.f32 %v1468_v8, %v1420_v9  ;;  %v1909_v25 = vsel %vm11916_vm11, %v1904_v30, %v1908_v49  ;;  %v1582_v9 = vor.u32 %v1580_v4, %v1579_v36  ;;  %v1583_v8 = vrot.slane %v1579_v36, 4  ;;  %v1747_v36 = vld [vmem:[#allocation2 + $0x18] sm:$0xf] }
 0x1c8   :  { %v2124_v22 = vunpack.c.l.b16 %v1909_v25  ;;  %v1141_v49 = vadd.f32 %v11464_v0, %v11462_v63  ;;  %v1750_v63 = vld [vmem:[#allocation2 + $0x1c] sm:$0x1]  ;;  %v1598_v0 = vor.u32 %v1596_v35, %v1595_v5  ;;  %v1748_v52 = vsel %vm11756_vm4, %v1590_v11, %v1747_v36 }
 0x1c9   :  { %v1501_v40 = vmax.f32 %v1469_v61, 0.0  ;;  %v1603_v61 = vrot.slane %v1601_v59, 7  ;;  %v1742_v4 = vsel %vm11756_vm4, %v1582_v9, %v1741_v60  ;;  %v1376_v59 = vadd.f32 %v11835_v20, %v1327_v50  ;;  %v11974_v9 = vpop.f32.mrf.mxu3  ;;  %v1383_v60 = vpop.f32.mrf.mxu2  ;;  %v1756_v20 = vld [vmem:[#allocation2 + $0x24] sm:$0x1]  ;;  %1749 = vst [vmem:[#allocation2 + $0x18] sm:$0xf] %v1748_v52 }
 0x1ca   :  { %v2139_v6 = vpack.c.b16 %v2124_v22, %v2123_v18  ;;  %v1745_v1 = vsel %vm11767_vm5, %v1583_v8, %v1744_v15  ;;  %v1599_v18 = vrot.slane %v1595_v5, 4  ;;  %v1190_v25 = vadd.f32 %v11492_v13, %v1141_v49  ;;  %1743 = vst [vmem:[#allocation2 + $0x10] sm:$0xf] %v1742_v4  ;;  %v1759_v13 = vld [vmem:[#allocation2 + $0x28] sm:$0xf] }
 0x1cb   :  { %v1557_v21 = vpack.c.bf16 %v1501_v40, %v1501_v40  ;;  %v1753_v40 = vld [vmem:[#allocation2 + $0x20] sm:$0xf]  ;;  %v1606_v22 = vor.u32 %v1604_v34, %v1603_v61  ;;  %v1146_v8 = vadd.f32 %v11498_v27, %v11496_v26  ;;  %v1751_v5 = vsel %vm11767_vm5, %v1591_v28, %v1750_v63  ;;  %1746 = vst [vmem:[#allocation2 + $0x14] sm:$0x1] %v1745_v1  ;;  %v9291_v4 = vld [vmem:[#allocation2 + $0x8] sm:$0xf] }
 0x1cc   :  { %2211 = vmatmul.bf16.vlgmr.msra.gmra.mxu1 %v2139_v6  ;;  %v1607_v15 = vrot.slane %v1603_v61, 4  ;;  %v1151_v6 = vadd.f32 %v11606_v31, %v11530_v58  ;;  %v1754_v11 = vsel %vm11756_vm4, %v1598_v0, %v1753_v40  ;;  %v1425_v26 = vadd.f32 %v11883_v51, %v1376_v59  ;;  %1752 = vst [vmem:[#allocation2 + $0x1c] sm:$0x1] %v1751_v5  ;;  %v1771_v0 = vld [vmem:[#allocation2 + $0x38] sm:$0xf]  ;;  %v1336_v34 = vpop.f32.mrf.mxu1 }
 0x1cd   :  { %v1609_v30 = vshrl.u32 %v1557_v21, 16  ;;  %v1757_v27 = vsel %vm11767_vm5, %v1599_v18, %v1756_v20  ;;  %v1239_v50 = vadd.f32 %v11494_v14, %v1190_v25  ;;  %v1195_v58 = vadd.f32 %v11526_v42, %v1146_v8  ;;  %1755 = vst [vmem:[#allocation2 + $0x20] sm:$0xf] %v1754_v11  ;;  %v1774_v18 = vld [vmem:[#allocation2 + $0x3c] sm:$0x1] }
 0x1ce   :  { %v1471_v37 = vpop.f32.mrf.mxu0  ;;  %v1200_v31 = vadd.f32 %v11608_v47, %v1151_v6  ;;  %v1760_v48 = vsel %vm11756_vm4, %v1606_v22, %v1759_v13  ;;  %v1330_v14 = vadd.f32 %v11866_v23, %v11601_v44  ;;  %v1332_v42 = vadd.f32 %v11910_v7, %v1283_v38  ;;  %1758 = vst [vmem:[#allocation2 + $0x24] sm:$0x1] %v1757_v27 }
 0x1cf   :  { %v1472_v32 = vadd.f32 %v1471_v37, %v1423_v12  ;;  %v1611_v56 = vrot.slane %v1609_v30, 7  ;;  %v1612_v12 = vshll.u32 %v1557_v21, 16  ;;  %v1762_v21 = vld [vmem:[#allocation2 + $0x2c] sm:$0x1]  ;;  %v1765_v37 = vld [vmem:[#allocation2 + $0x30] sm:$0xf]  ;;  %v1335_v47 = vadd.f32 %v1334_v16, %v11623_v57 }
 0x1d0   :  { %v1763_v51 = vsel %vm11767_vm5, %v1607_v15, %v1762_v21  ;;  %1761 = vst [vmem:[#allocation2 + $0x28] sm:$0xf] %v1760_v48  ;;  %v1379_v44 = vadd.f32 %v11886_v45, %v1330_v14  ;;  %v1288_v23 = vadd.f32 %v11630_v62, %v1239_v50  ;;  %v1381_v16 = vadd.f32 %v11932_v53, %v1332_v42  ;;  %v10539_v5 = vld [vmem:[#allocation2 + $0x14] sm:$0xf0] }
 0x1d1   :  { %v1502_v29 = vmax.f32 %v1472_v32, 0.0  ;;  %v1614_v30 = vor.u32 %v1612_v12, %v1611_v56  ;;  %v1615_v61 = vrot.slane %v1611_v56, 4  ;;  %1764 = vst [vmem:[#allocation2 + $0x2c] sm:$0x1] %v1763_v51  ;;  %v10570_v57 = vld [vmem:[#allocation2 + $0xc] sm:$0xf0]  ;;  %v1244_v12 = vadd.f32 %v11528_v43, %v1195_v58  ;;  %v1432_v62 = vpop.f32.mrf.mxu3  ;;  %v1385_v8 = vpop.f32.mrf.mxu2 }
 0x1d2   :  { %v9151_v7 = vld [vmem:[#allocation2 + $0x10] sm:$0xf]  ;;  %v9292_v25 = vor.u32 %v10570_v57, %v9291_v4  ;;  %v12009_v52 = vld [vmem:[#allocation2 + $0x14] sm:$0x1]  ;;  %v12015_v45 = vadd.f32 %v11620_v55, %v1200_v31  ;;  %v2400_v15 = vld [vmem:[#allocation2 + $0x18] sm:$0xe]  ;;  %v1428_v43 = vadd.f32 %v11930_v2, %v1379_v44  ;;  %v1337_v11 = vadd.f32 %v1336_v34, %v1288_v23 }
 0x1d3   :  { %v1558_v35 = vpack.c.bf16 %v1502_v29, %v1502_v29  ;;  %v1766_v63 = vsel %vm11756_vm4, %v1614_v30, %v1765_v37  ;;  %v1769_v56 = vsel %vm11767_vm5, %v1615_v61, %v1768_v24  ;;  %v1384_v29 = vadd.f32 %v1383_v60, %v1335_v47  ;;  %v2399_v20 = vld [vmem:[#allocation2 + $0x10] sm:$0xe]  ;;  %v1866_v13 = vld [vmem:[#allocation2 + $0x1c] sm:$0x1]  ;;  %v1834_v50 = vld [vmem:[#allocation2 + $0x18] sm:$0xf] }
 0x1d4   :  { %1767 = vst [vmem:[#allocation2 + $0x30] sm:$0xf] %v1766_v63  ;;  %2811 = vmatmul.bf16.vlgmr.msrb.gmra.mxu0 %v9292_v25  ;;  %v9152_v60 = vor.u32 %v10539_v5, %v9151_v7  ;;  %v2458_v6 = vrot.slane %v12009_v52, 5  ;;  %v9212_v38 = vrot.slane %v2400_v15, 9  ;;  %v2462_v55 = vrot.slane %v1866_v13, 5  ;;  %v12038_v47 = vpop.f32.mrf.mxu1 }
 0x1d5   :  { %v1617_v49 = vshrl.u32 %v1558_v35, 16  ;;  %v1620_v32 = vshll.u32 %v1558_v35, 16  ;;  %1770 = vst [vmem:[#allocation2 + $0x34] sm:$0x1] %v1769_v56  ;;  %v9211_v35 = vrot.slane %v2399_v20, 9  ;;  %v12024_v27 = vadd.f32 %v1432_v62, %v1384_v29 }
 0x1d6   :  { %v1473_v28 = vpop.f32.mrf.mxu0  ;;  %2361 = vmatmul.bf16.gmra.mxu2 %v9152_v60  ;;  %v1833_v37 = vld [vmem:[#allocation2 + $0x10] sm:$0xf]  ;;  %v2463_v2 = vsel %vm11869_vm8, %v9212_v38, %v2462_v55  ;;  %v1920_v31 = vshll.u32 %v12009_v52, 16  ;;  %v1925_v51 = vshrl.u32 %v1834_v50, 16  ;;  %v12036_v14 = vld [vmem:[#allocation2 + $0x24] sm:$0x1] }
 0x1d7   :  { %v1619_v36 = vrot.slane %v1617_v49, 7  ;;  %v1474_v17 = vadd.f32 %v1473_v28, %v1425_v26  ;;  %v12022_v26 = vadd.f32 %v11974_v9, %v1381_v16  ;;  %v2459_v61 = vsel %vm11869_vm8, %v9211_v35, %v2458_v6  ;;  %v10591_v9 = vld [vmem:[%s14318_s2 + $0x128] sm:$0xff]  ;;  %v1777_v56 = vld [vmem:[#allocation2 + $0x40] sm:$0xf] }
 0x1d8   :  { %v12028_v49 = vadd.f32 %v1385_v8, %v1337_v11  ;;  %v1911_v58 = vshrl.u32 %v1833_v37, 16  ;;  %v2531_v48 = vunpack.c.l.b16 %v2459_v61  ;;  %v2532_v24 = vunpack.c.l.b16 %v2463_v2  ;;  %3223 = vmatpush.bf16.msrb.mxu1 %v10591_v9  ;;  %v2401_v57 = vld [vmem:[#allocation2 + $0x20] sm:$0xe]  ;;  %v2402_v16 = vld [vmem:[#allocation2 + $0x28] sm:$0xe] }
 0x1d9   :  { %v1622_v59 = vor.u32 %v1620_v32, %v1619_v36  ;;  %v1623_v1 = vrot.slane %v1619_v36, 4  ;;  %v1503_v40 = vmax.f32 %v1474_v17, 0.0  ;;  %v1914_v28 = vshll.u32 %v1833_v37, 16  ;;  %v12047_v20 = vpop.f32.mrf.mxu2  ;;  %v1835_v6 = vld [vmem:[#allocation2 + $0x20] sm:$0xf]  ;;  %v1434_v38 = vpop.f32.mrf.mxu3 }
 0x1da   :  { %v1913_v36 = vrot.slane %v1911_v58, 4  ;;  %v1928_v32 = vshll.u32 %v1834_v50, 16  ;;  %v2546_v4 = vpack.c.b16 %v2532_v24, %v2531_v48  ;;  %v1934_v34 = vshll.u32 %v1866_v13, 16  ;;  %v9155_v2 = vld [vmem:[#allocation2 + $0x20] sm:$0xf] }
 0x1db   :  { %v1772_v22 = vsel %vm11756_vm4, %v1622_v59, %v1771_v0  ;;  %v1775_v53 = vsel %vm11767_vm5, %v1623_v1, %v1774_v18  ;;  %v1559_v21 = vpack.c.bf16 %v1503_v40, %v1503_v40  ;;  %v1916_v63 = vrot.slane %v1914_v28, 5  ;;  %v1780_v59 = vld [vmem:[#allocation2 + $0x44] sm:$0x1]  ;;  %v12040_v1 = vld [vmem:[#allocation2 + $0x2c] sm:$0x1] }
 0x1dc   :  { %1773 = vst [vmem:[#allocation2 + $0x38] sm:$0xf] %v1772_v22  ;;  %v1927_v0 = vrot.slane %v1925_v51, 4  ;;  %v12043_v18 = vadd.f32 %v11684_v33, %v1244_v12  ;;  %v1930_v40 = vrot.slane %v1928_v32, 5  ;;  %2622 = vmatmul.bf16.gmra.mxu3 %v2546_v4  ;;  %v9213_v29 = vrot.slane %v2401_v57, 9 }
 0x1dd   :  { %1776 = vst [vmem:[#allocation2 + $0x3c] sm:$0x1] %v1775_v53  ;;  %v1625_v17 = vshrl.u32 %v1559_v21, 16  ;;  %v1628_v23 = vshll.u32 %v1559_v21, 16  ;;  %v1917_v7 = vor.u32 %v1916_v63, %v1913_v36  ;;  %v2466_v25 = vrot.slane %v12036_v14, 5 }
 0x1de   :  { %v1476_v30 = vpop.f32.mrf.mxu0  ;;  %v2470_v52 = vrot.slane %v12040_v1, 5  ;;  %v10571_v22 = vld [vmem:[#allocation2 + $0x1c] sm:$0xf0]  ;;  %v1931_v62 = vor.u32 %v1930_v40, %v1927_v0  ;;  %v10540_v33 = vld [vmem:[#allocation2 + $0x24] sm:$0xf0]  ;;  %v9214_v12 = vrot.slane %v2402_v16, 9 }
 0x1df   :  { %v1477_v42 = vadd.f32 %v1476_v30, %v1428_v43  ;;  %v1627_v44 = vrot.slane %v1625_v17, 7  ;;  %v1918_v53 = vrot.slane %v1917_v7, 4  ;;  %v1922_v60 = vrot.slane %v1920_v31, 5  ;;  %v9295_v43 = vld [vmem:[#allocation2 + $0x18] sm:$0xf] }
 0x1e0   :  { %v1936_v13 = vrot.slane %v1934_v34, 5  ;;  %v1932_v11 = vrot.slane %v1931_v62, 4  ;;  %v2467_v30 = vsel %vm11869_vm8, %v9213_v29, %v2466_v25  ;;  %v9296_v61 = vor.u32 %v10571_v22, %v9295_v43  ;;  %v1836_v31 = vld [vmem:[#allocation2 + $0x28] sm:$0xf]  ;;  %v1341_v34 = vpop.f32.mrf.mxu1  ;;  %v1786_v57 = vld [vmem:[#allocation2 + $0x5c] sm:$0x1] }
 0x1e1   :  { %v1630_v8 = vor.u32 %v1628_v23, %v1627_v44  ;;  %v1631_v5 = vrot.slane %v1627_v44, 4  ;;  %v1504_v35 = vmax.f32 %v1477_v42, 0.0  ;;  %v1923_v37 = vsel %vm11916_vm11, %v1918_v53, %v1922_v60  ;;  %v1783_v23 = vld [vmem:[#allocation2 + $0x58] sm:$0xf]  ;;  %v1390_v53 = vpop.f32.mrf.mxu2  ;;  %v12070_v60 = vld [vmem:[#allocation2 + $0x2c] sm:$0xf0] }
 0x1e2   :  { %v2471_v50 = vsel %vm11869_vm8, %v9214_v12, %v2470_v52  ;;  %v1937_v9 = vsel %vm11916_vm11, %v1932_v11, %v1936_v13  ;;  %v9156_v48 = vor.u32 %v10540_v33, %v9155_v2  ;;  %v1939_v24 = vshrl.u32 %v1835_v6, 16  ;;  %v10590_v33 = vld [vmem:[%s14318_s2 + $0x120] sm:$0xff]  ;;  %v12078_v11 = vld [vmem:[#allocation2 + $0x30] sm:$0xf] }
 0x1e3   :  { %v1778_v55 = vsel %vm11756_vm4, %v1630_v8, %v1777_v56  ;;  %v1781_v21 = vsel %vm11767_vm5, %v1631_v5, %v1780_v59  ;;  %v1560_v58 = vpack.c.bf16 %v1504_v35, %v1504_v35  ;;  %v1942_v28 = vshll.u32 %v1835_v6, 16  ;;  %v12076_v6 = vld [vmem:[#allocation2 + $0x28] sm:$0xf]  ;;  %3224 = vmatpush.bf16.msrb.mxu1 %v10590_v33 }
 0x1e4   :  { %1779 = vst [vmem:[#allocation2 + $0x40] sm:$0xf] %v1778_v55  ;;  %v2125_v51 = vunpack.c.l.b16 %v1923_v37  ;;  %v2126_v36 = vunpack.c.l.b16 %v1937_v9  ;;  %v2533_v32 = vunpack.c.l.b16 %v2467_v30  ;;  %v2534_v42 = vunpack.c.l.b16 %v2471_v50  ;;  %2816 = vmatmul.bf16.gmra.mxu0 %v9296_v61  ;;  %v2404_v37 = vld [vmem:[#allocation2 + $0x38] sm:$0xe]  ;;  %v1837_v9 = vld [vmem:[#allocation2 + $0x30] sm:$0xf] }
 0x1e5   :  { %1782 = vst [vmem:[#allocation2 + $0x44] sm:$0x1] %v1781_v21  ;;  %v1633_v17 = vshrl.u32 %v1560_v58, 16  ;;  %v1941_v4 = vrot.slane %v1939_v24, 4  ;;  %v1944_v63 = vrot.slane %v1942_v28, 5  ;;  %v1953_v0 = vshrl.u32 %v1836_v31, 16  ;;  %v1437_v21 = vpop.f32.mrf.mxu3 }
 0x1e6   :  { %v1478_v15 = vpop.f32.mrf.mxu0  ;;  %v2140_v56 = vpack.c.b16 %v2126_v36, %v2125_v51  ;;  %v1636_v40 = vshll.u32 %v1560_v58, 16  ;;  %v1956_v44 = vshll.u32 %v1836_v31, 16  ;;  %v1948_v16 = vshll.u32 %v12036_v14, 16  ;;  %2366 = vmatmul.bf16.gmra.mxu2 %v9156_v48  ;;  %v2403_v24 = vld [vmem:[#allocation2 + $0x30] sm:$0xe] }
 0x1e7   :  { %v1635_v59 = vrot.slane %v1633_v17, 7  ;;  %v1945_v7 = vor.u32 %v1944_v63, %v1941_v4  ;;  %v1955_v29 = vrot.slane %v1953_v0, 4  ;;  %v1479_v25 = vadd.f32 %v1478_v15, %v12022_v26  ;;  %v1838_v28 = vld [vmem:[#allocation2 + $0x38] sm:$0xf]  ;;  %v12097_v36 = vld [vmem:[#allocation2 + $0x34] sm:$0x1] }
 0x1e8   :  { %2216 = vmatmul.bf16.gmra.mxu1 %v2140_v56  ;;  %v1958_v8 = vrot.slane %v1956_v44, 5  ;;  %v1962_v5 = vshll.u32 %v12040_v1, 16  ;;  %v1340_v12 = vadd.f32 %v12038_v47, %v11660_v19  ;;  %v1342_v14 = vadd.f32 %v1341_v34, %v12043_v18  ;;  %v12080_v19 = vld [vmem:[#allocation2 + $0x34] sm:$0xf0]  ;;  %v12082_v47 = vld [vmem:[#allocation2 + $0x3c] sm:$0x1] }
 0x1e9   :  { %v1638_v22 = vor.u32 %v1636_v40, %v1635_v59  ;;  %v1639_v62 = vrot.slane %v1635_v59, 4  ;;  %v1946_v26 = vrot.slane %v1945_v7, 4  ;;  %v1505_v15 = vmax.f32 %v1479_v25, 0.0  ;;  %v1789_v59 = vld [vmem:[#allocation2 + $0x60] sm:$0xf] }
 0x1ea   :  { %v2547_v13 = vpack.c.b16 %v2534_v42, %v2533_v32  ;;  %v1959_v43 = vor.u32 %v1958_v8, %v1955_v29  ;;  %v1435_v18 = vadd.f32 %v1434_v38, %v12028_v49  ;;  %v1389_v55 = vadd.f32 %v12047_v20, %v1340_v12  ;;  %v1792_v40 = vld [vmem:[#allocation2 + $0x64] sm:$0x1] }
 0x1eb   :  { %v1784_v35 = vsel %vm11756_vm4, %v1638_v22, %v1783_v23  ;;  %v1787_v1 = vsel %vm11767_vm5, %v1639_v62, %v1786_v57  ;;  %v1950_v30 = vrot.slane %v1948_v16, 5  ;;  %v1561_v61 = vpack.c.bf16 %v1505_v15, %v1505_v15 }
 0x1ec   :  { %1785 = vst [vmem:[#allocation2 + $0x58] sm:$0xf] %v1784_v35  ;;  %v12086_v2 = vadd.f32 %v1390_v53, %v1342_v14  ;;  %v1960_v50 = vrot.slane %v1959_v43, 4  ;;  %v1964_v58 = vrot.slane %v1962_v5, 5  ;;  %v9300_v48 = vor.u32 %v12070_v60, %v12076_v6  ;;  %2627 = vmatmul.bf16.gmra.mxu3 %v2547_v13  ;;  %v1344_v53 = vpop.f32.mrf.mxu1  ;;  %v1795_v13 = vld [vmem:[#allocation2 + $0x68] sm:$0xf] }
 0x1ed   :  { %1788 = vst [vmem:[#allocation2 + $0x5c] sm:$0x1] %v1787_v1  ;;  %v1951_v49 = vsel %vm11916_vm11, %v1946_v26, %v1950_v30  ;;  %v1641_v20 = vshrl.u32 %v1561_v61, 16  ;;  %v9160_v38 = vor.u32 %v12080_v19, %v12078_v11  ;;  %v2478_v32 = vrot.slane %v12082_v47, 5  ;;  %v1439_v6 = vpop.f32.mrf.mxu3  ;;  %v1798_v11 = vld [vmem:[#allocation2 + $0x6c] sm:$0x1] }
 0x1ee   :  { %v1481_v52 = vpop.f32.mrf.mxu0  ;;  %v1965_v51 = vsel %vm11916_vm11, %v1960_v50, %v1964_v58  ;;  %v1644_v4 = vshll.u32 %v1561_v61, 16  ;;  %v1967_v63 = vshrl.u32 %v1837_v9, 16  ;;  %v1970_v0 = vshll.u32 %v1837_v9, 16  ;;  %v1393_v61 = vpop.f32.mrf.mxu2 }
 0x1ef   :  { %v1482_v31 = vadd.f32 %v1481_v52, %v12024_v27  ;;  %v9216_v27 = vrot.slane %v2404_v37, 9  ;;  %v1643_v42 = vrot.slane %v1641_v20, 7  ;;  %v2128_v56 = vunpack.c.l.b16 %v1965_v51 }
 0x1f0   :  { %v9215_v44 = vrot.slane %v2403_v24, 9  ;;  %v1981_v57 = vshrl.u32 %v1838_v28, 16  ;;  %v2474_v29 = vrot.slane %v12097_v36, 5  ;;  %v1969_v25 = vrot.slane %v1967_v63, 4 }
 0x1f1   :  { %v1506_v17 = vmax.f32 %v1482_v31, 0.0  ;;  %v1646_v7 = vor.u32 %v1644_v4, %v1643_v42  ;;  %v1647_v16 = vrot.slane %v1643_v42, 4  ;;  %v2127_v52 = vunpack.c.l.b16 %v1951_v49 }
 0x1f2   :  { %v2479_v22 = vsel %vm11869_vm8, %v9216_v27, %v2478_v32  ;;  %v1972_v8 = vrot.slane %v1970_v0, 5  ;;  %v1983_v12 = vrot.slane %v1981_v57, 4  ;;  %v1984_v14 = vshll.u32 %v1838_v28, 16 }
 0x1f3   :  { %v1562_v23 = vpack.c.bf16 %v1506_v17, %v1506_v17  ;;  %v1790_v5 = vsel %vm11756_vm4, %v1646_v7, %v1789_v59  ;;  %v1793_v33 = vsel %vm11767_vm5, %v1647_v16, %v1792_v40  ;;  %v2141_v60 = vpack.c.b16 %v2128_v56, %v2127_v52  ;;  %v1840_v40 = vld [vmem:[#allocation2 + $0x58] sm:$0xf] }
 0x1f4   :  { %1791 = vst [vmem:[#allocation2 + $0x60] sm:$0xf] %v1790_v5  ;;  %v1438_v1 = vadd.f32 %v1437_v21, %v1389_v55  ;;  %v2475_v43 = vsel %vm11869_vm8, %v9215_v44, %v2474_v29  ;;  %v1973_v19 = vor.u32 %v1972_v8, %v1969_v25  ;;  %v1986_v30 = vrot.slane %v1984_v14, 5  ;;  %2821 = vmatmul.bf16.gmra.mxu0 %v9300_v48  ;;  %v12112_v21 = vld [vmem:[#allocation2 + $0x54] sm:$0x1] }
 0x1f5   :  { %v1649_v62 = vshrl.u32 %v1562_v23, 16  ;;  %v1652_v15 = vshll.u32 %v1562_v23, 16  ;;  %1794 = vst [vmem:[#allocation2 + $0x64] sm:$0x1] %v1793_v33  ;;  %v2536_v37 = vunpack.c.l.b16 %v2479_v22  ;;  %v1976_v31 = vshll.u32 %v12097_v36, 16 }
 0x1f6   :  { %v1483_v34 = vpop.f32.mrf.mxu0  ;;  %v1345_v9 = vadd.f32 %v1344_v53, %v11707_v39  ;;  %v1987_v49 = vor.u32 %v1986_v30, %v1983_v12  ;;  %v12115_v24 = vadd.f32 %v1439_v6, %v12086_v2  ;;  %2371 = vmatmul.bf16.gmra.mxu2 %v9160_v38  ;;  %v2535_v48 = vunpack.c.l.b16 %v2475_v43  ;;  %v2405_v39 = vld [vmem:[#allocation2 + $0x50] sm:$0xe]  ;;  %v2406_v38 = vld [vmem:[#allocation2 + $0x58] sm:$0xe]  ;;  %v12130_v0 = vld [vmem:[#allocation2 + $0x5c] sm:$0x1] }
 0x1f7   :  { %v1651_v26 = vrot.slane %v1649_v62, 7  ;;  %v1484_v35 = vadd.f32 %v1483_v34, %v1435_v18  ;;  %v1990_v18 = vshll.u32 %v12082_v47, 16  ;;  %v1839_v36 = vld [vmem:[#allocation2 + $0x50] sm:$0xf]  ;;  %v10589_v47 = vld [vmem:[%s14318_s2 + $0x118] sm:$0xff]  ;;  %v1974_v2 = vrot.slane %v1973_v19, 4 }
 0x1f8   :  { %2221 = vmatmul.bf16.gmra.mxu1 %v2141_v60  ;;  %v12124_v27 = vadd.f32 %v1393_v61, %v1345_v9  ;;  %v1988_v32 = vrot.slane %v1987_v49, 4  ;;  %v12128_v42 = vadd.f32 %v11718_v54, %v12015_v45  ;;  %v2548_v4 = vpack.c.b16 %v2536_v37, %v2535_v48  ;;  %v10573_v25 = vld [vmem:[#allocation2 + $0x3c] sm:$0xf0]  ;;  %v1801_v62 = vld [vmem:[#allocation2 + $0x70] sm:$0xf]  ;;  %v1442_v60 = vpop.f32.mrf.mxu3  ;;  %v1346_v9 = vpop.f32.mrf.mxu1 }
 0x1f9   :  { %v1654_v50 = vor.u32 %v1652_v15, %v1651_v26  ;;  %v1655_v58 = vrot.slane %v1651_v26, 4  ;;  %v1507_v55 = vmax.f32 %v1484_v35, 0.0  ;;  %v1978_v63 = vrot.slane %v1976_v31, 5  ;;  %3225 = vmatpush.bf16.msrb.mxu1 %v10589_v47  ;;  %v9303_v8 = vld [vmem:[#allocation2 + $0x38] sm:$0xf] }
 0x1fa   :  { %v1992_v56 = vrot.slane %v1990_v18, 5  ;;  %v1995_v44 = vshrl.u32 %v1839_v36, 16  ;;  %v1998_v23 = vshll.u32 %v1839_v36, 16  ;;  %v9217_v57 = vrot.slane %v2405_v39, 9  ;;  %v1804_v5 = vld [vmem:[#allocation2 + $0x74] sm:$0x1] }
 0x1fb   :  { %v1796_v28 = vsel %vm11756_vm4, %v1654_v50, %v1795_v13  ;;  %v1799_v51 = vsel %vm11767_vm5, %v1655_v58, %v1798_v11  ;;  %v1563_v17 = vpack.c.bf16 %v1507_v55, %v1507_v55  ;;  %v2482_v7 = vrot.slane %v12112_v21, 5  ;;  %v9163_v13 = vld [vmem:[#allocation2 + $0x50] sm:$0xf]  ;;  %v10542_v11 = vld [vmem:[#allocation2 + $0x54] sm:$0xf0] }
 0x1fc   :  { %1797 = vst [vmem:[#allocation2 + $0x68] sm:$0xf] %v1796_v28  ;;  %v9218_v16 = vrot.slane %v2406_v38, 9  ;;  %v1979_v54 = vsel %vm11916_vm11, %v1974_v2, %v1978_v63  ;;  %v1993_v45 = vsel %vm11916_vm11, %v1988_v32, %v1992_v56  ;;  %2632 = vmatmul.bf16.gmra.mxu3 %v2548_v4  ;;  %v2486_v33 = vrot.slane %v12130_v0, 5  ;;  %v1810_v39 = vld [vmem:[#allocation2 + $0x7c] sm:$0x1] }
 0x1fd   :  { %1800 = vst [vmem:[#allocation2 + $0x6c] sm:$0x1] %v1799_v51  ;;  %v1657_v59 = vshrl.u32 %v1563_v17, 16  ;;  %v1660_v22 = vshll.u32 %v1563_v17, 16  ;;  %v2009_v14 = vshrl.u32 %v1840_v40, 16  ;;  %v2012_v53 = vshll.u32 %v1840_v40, 16 }
 0x1fe   :  { %v1486_v20 = vpop.f32.mrf.mxu0  ;;  %v1997_v35 = vrot.slane %v1995_v44, 4  ;;  %v2130_v43 = vunpack.c.l.b16 %v1993_v45  ;;  %v9304_v37 = vor.u32 %v10573_v25, %v9303_v8  ;;  %v2483_v31 = vsel %vm11869_vm8, %v9217_v57, %v2482_v7  ;;  %v10588_v25 = vld [vmem:[%s14318_s2 + $0x110] sm:$0xff] }
 0x1ff   :  { %v1487_v34 = vadd.f32 %v1486_v20, %v1438_v1  ;;  %v1659_v52 = vrot.slane %v1657_v59, 7  ;;  %v2000_v1 = vrot.slane %v1998_v23, 5  ;;  %v2011_v30 = vrot.slane %v2009_v14, 4  ;;  %v1807_v20 = vld [vmem:[#allocation2 + $0x78] sm:$0xf]  ;;  %3226 = vmatpush.bf16.msrb.mxu1 %v10588_v25 }
 0x200   :  { %v2014_v61 = vrot.slane %v2012_v53, 5  ;;  %v2129_v49 = vunpack.c.l.b16 %v1979_v54  ;;  %v9164_v28 = vor.u32 %v10542_v11, %v9163_v13  ;;  %v2487_v51 = vsel %vm11869_vm8, %v9218_v16, %v2486_v33  ;;  %v10601_v54 = vld [vmem:[%s14318_s2 + $0x178] sm:$0xff]  ;;  %v1816_v13 = vld [vmem:[#allocation2 + $0x84] sm:$0x1] }
 0x201   :  { %v1508_v29 = vmax.f32 %v1487_v34, 0.0  ;;  %v1662_v26 = vor.u32 %v1660_v22, %v1659_v52  ;;  %v1663_v15 = vrot.slane %v1659_v52, 4  ;;  %v2001_v36 = vor.u32 %v2000_v1, %v1997_v35  ;;  %v1395_v34 = vpop.f32.mrf.mxu2  ;;  %3495 = vmatpush.bf16.msrb.mxu2 %v10601_v54  ;;  %v1841_v1 = vld [vmem:[#allocation2 + $0x60] sm:$0xf] }
 0x202   :  { %v2004_v47 = vshll.u32 %v12112_v21, 16  ;;  %v2142_v2 = vpack.c.b16 %v2130_v43, %v2129_v49  ;;  %v2015_v38 = vor.u32 %v2014_v61, %v2011_v30  ;;  %v1443_v4 = vadd.f32 %v1442_v60, %v12124_v27  ;;  %v9307_v49 = vld [vmem:[#allocation2 + $0x58] sm:$0xf] }
 0x203   :  { %v1564_v12 = vpack.c.bf16 %v1508_v29, %v1508_v29  ;;  %v1802_v50 = vsel %vm11756_vm4, %v1662_v26, %v1801_v62  ;;  %v1805_v58 = vsel %vm11767_vm5, %v1663_v15, %v1804_v5  ;;  %v1347_v63 = vadd.f32 %v1346_v9, %v12128_v42  ;;  %v1842_v8 = vld [vmem:[#allocation2 + $0x68] sm:$0xf]  ;;  %v1813_v15 = vld [vmem:[#allocation2 + $0x80] sm:$0xf] }
 0x204   :  { %1803 = vst [vmem:[#allocation2 + $0x70] sm:$0xf] %v1802_v50  ;;  %v2537_v56 = vunpack.c.l.b16 %v2483_v31  ;;  %2826 = vmatmul.bf16.gmra.mxu0 %v9304_v37  ;;  %v2538_v59 = vunpack.c.l.b16 %v2487_v51  ;;  %v2018_v21 = vshll.u32 %v12130_v0, 16  ;;  %v2002_v23 = vrot.slane %v2001_v36, 4  ;;  %v1444_v0 = vpop.f32.mrf.mxu3  ;;  %v12163_v14 = vld [vmem:[#allocation2 + $0x6c] sm:$0x1] }
 0x205   :  { %v1665_v19 = vshrl.u32 %v1564_v12, 16  ;;  %v1668_v55 = vshll.u32 %v1564_v12, 16  ;;  %1806 = vst [vmem:[#allocation2 + $0x74] sm:$0x1] %v1805_v58  ;;  %v2006_v57 = vrot.slane %v2004_v47, 5  ;;  %v1396_v16 = vadd.f32 %v1395_v34, %v1347_v63  ;;  %v10600_v47 = vld [vmem:[%s14318_s2 + $0x170] sm:$0xff] }
 0x206   :  { %v1488_v6 = vpop.f32.mrf.mxu0  ;;  %2376 = vmatmul.bf16.gmra.mxu2 %v9164_v28  ;;  %v2016_v42 = vrot.slane %v2015_v38, 4  ;;  %v2549_v52 = vpack.c.b16 %v2538_v59, %v2537_v56  ;;  %v2020_v22 = vrot.slane %v2018_v21, 5  ;;  %v2408_v53 = vld [vmem:[#allocation2 + $0x68] sm:$0xe]  ;;  %v2037_v30 = vshrl.u32 %v1842_v8, 16 }
 0x207   :  { %v1667_v18 = vrot.slane %v1665_v19, 7  ;;  %v1489_v48 = vadd.f32 %v1488_v6, %v12115_v24  ;;  %v2007_v5 = vsel %vm11916_vm11, %v2002_v23, %v2006_v57  ;;  %v1445_v60 = vadd.f32 %v1444_v0, %v1396_v16  ;;  %v10574_v6 = vld [vmem:[#allocation2 + $0x5c] sm:$0xf0]  ;;  %v12167_v19 = vld [vmem:[#allocation2 + $0x64] sm:$0x1]  ;;  %3496 = vmatpush.bf16.msrb.mxu2 %v10600_v47  ;;  %v10623_v47 = vld [vmem:[%s14318_s2 + $0x1e8] sm:$0xff] }
 0x208   :  { %2226 = vmatmul.bf16.gmra.mxu1 %v2142_v2  ;;  %v2021_v26 = vsel %vm11916_vm11, %v2016_v42, %v2020_v22  ;;  %v2040_v61 = vshll.u32 %v1842_v8, 16  ;;  %v2131_v37 = vunpack.c.l.b16 %v2007_v5  ;;  %v2407_v50 = vld [vmem:[#allocation2 + $0x60] sm:$0xe]  ;;  %v9220_v58 = vrot.slane %v2408_v53, 9  ;;  %v1822_v28 = vld [vmem:[#allocation2 + $0x8c] sm:$0x1] }
 0x209   :  { %v1670_v32 = vor.u32 %v1668_v55, %v1667_v18  ;;  %v1671_v17 = vrot.slane %v1667_v18, 4  ;;  %v1509_v24 = vmax.f32 %v1489_v48, 0.0  ;;  %v2494_v31 = vrot.slane %v12163_v14, 5  ;;  %v1819_v48 = vld [vmem:[#allocation2 + $0x88] sm:$0xf]  ;;  %v10625_v8 = vld [vmem:[%s14318_s2 + $0x1f8] sm:$0xff] }
 0x20a   :  { %v2023_v51 = vshrl.u32 %v1841_v1, 16  ;;  %v2132_v2 = vunpack.c.l.b16 %v2021_v26  ;;  %v9219_v63 = vrot.slane %v2407_v50, 9  ;;  %v2490_v34 = vrot.slane %v12167_v19, 5  ;;  %v10616_v53 = vld [vmem:[%s14318_s2 + $0x1b0] sm:$0xff]  ;;  %4108 = vmatpush.bf16.msra.mxu0 %v10625_v8 }
 0x20b   :  { %v1808_v40 = vsel %vm11756_vm4, %v1670_v32, %v1807_v20  ;;  %v1811_v44 = vsel %vm11767_vm5, %v1671_v17, %v1810_v39  ;;  %v1565_v7 = vpack.c.bf16 %v1509_v24, %v1509_v24  ;;  %v10543_v20 = vld [vmem:[#allocation2 + $0x64] sm:$0xf0]  ;;  %v2026_v39 = vshll.u32 %v1841_v1, 16 }
 0x20c   :  { %1809 = vst [vmem:[#allocation2 + $0x78] sm:$0xf] %v1808_v40  ;;  %2637 = vmatmul.bf16.gmra.mxu3 %v2549_v52  ;;  %v2039_v56 = vrot.slane %v2037_v30, 4  ;;  %v2042_v24 = vrot.slane %v2040_v61, 5  ;;  %v9308_v59 = vor.u32 %v10574_v6, %v9307_v49  ;;  %v9167_v40 = vld [vmem:[#allocation2 + $0x60] sm:$0xf]  ;;  %v2143_v42 = vpack.c.b16 %v2132_v2, %v2131_v37 }
 0x20d   :  { %1812 = vst [vmem:[#allocation2 + $0x7c] sm:$0x1] %v1811_v44  ;;  %v1673_v45 = vshrl.u32 %v1565_v7, 16  ;;  %v1676_v12 = vshll.u32 %v1565_v7, 16  ;;  %v9168_v57 = vor.u32 %v10543_v20, %v9167_v40  ;;  %v2495_v7 = vsel %vm11869_vm8, %v9220_v58, %v2494_v31  ;;  %v1828_v6 = vld [vmem:[#allocation2 + $0x94] sm:$0x1] }
 0x20e   :  { %v1491_v27 = vpop.f32.mrf.mxu0  ;;  %v2028_v16 = vrot.slane %v2026_v39, 5  ;;  %v2491_v0 = vsel %vm11869_vm8, %v9219_v63, %v2490_v34  ;;  %v2540_v52 = vunpack.c.l.b16 %v2495_v7  ;;  %v1843_v31 = vld [vmem:[#allocation2 + $0x70] sm:$0xf] }
 0x20f   :  { %v1492_v29 = vadd.f32 %v1491_v27, %v1443_v4  ;;  %v1675_v33 = vrot.slane %v1673_v45, 7  ;;  %v10617_v4 = vld [vmem:[%s14318_s2 + $0x1b8] sm:$0xff]  ;;  %v2025_v27 = vrot.slane %v2023_v51, 4  ;;  %v2043_v45 = vor.u32 %v2042_v24, %v2039_v56  ;;  %v2409_v2 = vld [vmem:[#allocation2 + $0x70] sm:$0xe]  ;;  %v10614_v56 = vld [vmem:[%s14318_s2 + $0x1a0] sm:$0xff] }
 0x210   :  { %3690 = vmatpush.bf16.msrb.mxu3 %v10617_v4  ;;  %v9311_v24 = vld [vmem:[#allocation2 + $0x68] sm:$0xf]  ;;  %v10596_v7 = vld [vmem:[%s14318_s2 + $0x150] sm:$0xff] }
 0x211   :  { %v1510_v62 = vmax.f32 %v1492_v29, 0.0  ;;  %v1678_v43 = vor.u32 %v1676_v12, %v1675_v33  ;;  %v1679_v11 = vrot.slane %v1675_v33, 4  ;;  %v2029_v5 = vor.u32 %v2028_v16, %v2025_v27  ;;  %v10622_v27 = vld [vmem:[%s14318_s2 + $0x1e0] sm:$0xff] }
 0x212   :  { %v2032_v33 = vshll.u32 %v12167_v19, 16  ;;  %v2046_v12 = vshll.u32 %v12163_v14, 16  ;;  %v2044_v1 = vrot.slane %v2043_v45, 4  ;;  %v10598_v14 = vld [vmem:[%s14318_s2 + $0x160] sm:$0xff]  ;;  %v10613_v45 = vld [vmem:[%s14318_s2 + $0x198] sm:$0xff] }
 0x213   :  { %v1566_v35 = vpack.c.bf16 %v1510_v62, %v1510_v62  ;;  %v1814_v18 = vsel %vm11756_vm4, %v1678_v43, %v1813_v15  ;;  %v1817_v55 = vsel %vm11767_vm5, %v1679_v11, %v1816_v13  ;;  %v10599_v62 = vld [vmem:[%s14318_s2 + $0x168] sm:$0xff]  ;;  %v1825_v13 = vld [vmem:[#allocation2 + $0x90] sm:$0xf]  ;;  %v1844_v61 = vld [vmem:[#allocation2 + $0x78] sm:$0xf]  ;;  %v2030_v37 = vrot.slane %v2029_v5, 4 }
 0x214   :  { %1815 = vst [vmem:[#allocation2 + $0x80] sm:$0xf] %v1814_v18  ;;  %2831 = vmatmul.bf16.gmra.mxu0 %v9308_v59  ;;  %3497 = vmatpush.bf16.msrb.mxu2 %v10599_v62  ;;  %v10624_v43 = vld [vmem:[%s14318_s2 + $0x1f0] sm:$0xff]  ;;  %v2034_v50 = vrot.slane %v2032_v33, 5  ;;  %v2048_v58 = vrot.slane %v2046_v12, 5  ;;  %v2065_v51 = vshrl.u32 %v1844_v61, 16 }
 0x215   :  { %v1681_v9 = vshrl.u32 %v1566_v35, 16  ;;  %v1684_v17 = vshll.u32 %v1566_v35, 16  ;;  %1818 = vst [vmem:[#allocation2 + $0x84] sm:$0x1] %v1817_v55  ;;  %v10587_v35 = vld [vmem:[%s14318_s2 + $0x108] sm:$0xff]  ;;  %3691 = vmatpush.bf16.msrb.mxu3 %v10616_v53  ;;  %v2068_v39 = vshll.u32 %v1844_v61, 16  ;;  %4109 = vmatpush.bf16.msra.mxu0 %v10624_v43 }
 0x216   :  { %v1493_v36 = vpop.f32.mrf.mxu0  ;;  %2381 = vmatmul.bf16.gmra.mxu2 %v9168_v57  ;;  %3227 = vmatpush.bf16.msrb.mxu1 %v10587_v35  ;;  %v12216_v55 = vld [vmem:[#allocation2 + $0x74] sm:$0x1]  ;;  %v12218_v20 = vld [vmem:[#allocation2 + $0x7c] sm:$0x1]  ;;  %v2035_v4 = vsel %vm11916_vm11, %v2030_v37, %v2034_v50  ;;  %v10544_v40 = vld [vmem:[#allocation2 + $0x74] sm:$0xf0] }
 0x217   :  { %v1683_v32 = vrot.slane %v1681_v9, 7  ;;  %v1494_v38 = vadd.f32 %v1493_v36, %v1445_v60  ;;  %v2539_v60 = vunpack.c.l.b16 %v2491_v0  ;;  %v10615_v9 = vld [vmem:[%s14318_s2 + $0x1a8] sm:$0xff]  ;;  %v10597_v36 = vld [vmem:[%s14318_s2 + $0x158] sm:$0xff]  ;;  %v2502_v34 = vrot.slane %v12218_v20, 5 }
 0x218   :  { %2231 = vmatmul.bf16.gmra.mxu1 %v2143_v42  ;;  %3498 = vmatpush.bf16.msrb.mxu2 %v10598_v14  ;;  %v2070_v57 = vrot.slane %v2068_v39, 5  ;;  %v2133_v42 = vunpack.c.l.b16 %v2035_v4  ;;  %v10595_v12 = vld [vmem:[%s14318_s2 + $0x148] sm:$0xff]  ;;  %v10621_v53 = vld [vmem:[%s14318_s2 + $0x1d8] sm:$0xff]  ;;  %v2060_v35 = vshll.u32 %v12216_v55, 16  ;;  %v10620_v14 = vld [vmem:[%s14318_s2 + $0x1d0] sm:$0xff] }
 0x219   :  { %v1686_v44 = vor.u32 %v1684_v17, %v1683_v32  ;;  %v1687_v21 = vrot.slane %v1683_v32, 4  ;;  %v1511_v23 = vmax.f32 %v1494_v38, 0.0  ;;  %v2550_v11 = vpack.c.b16 %v2540_v52, %v2539_v60  ;;  %v10575_v38 = vld [vmem:[#allocation2 + $0x6c] sm:$0xf0]  ;;  %3692 = vmatpush.bf16.msrb.mxu3 %v10615_v9  ;;  %4110 = vmatpush.bf16.msra.mxu0 %v10623_v47  ;;  %v10611_v50 = vld [vmem:[%s14318_s2 + $0x188] sm:$0xff] }
 0x21a   :  { %v2051_v32 = vshrl.u32 %v1843_v31, 16  ;;  %v2054_v17 = vshll.u32 %v1843_v31, 16  ;;  %v9312_v16 = vor.u32 %v10575_v38, %v9311_v24  ;;  %v2074_v60 = vshll.u32 %v12218_v20, 16 }
 0x21b   :  { %v1820_v29 = vsel %vm11756_vm4, %v1686_v44, %v1819_v48  ;;  %v1823_v25 = vsel %vm11767_vm5, %v1687_v21, %v1822_v28  ;;  %v1567_v54 = vpack.c.bf16 %v1511_v23, %v1511_v23  ;;  %v2410_v48 = vld [vmem:[#allocation2 + $0x78] sm:$0xe]  ;;  %v2049_v28 = vsel %vm11916_vm11, %v2044_v1, %v2048_v58  ;;  %v1845_v31 = vld [vmem:[#allocation2 + $0x80] sm:$0xf] }
 0x21c   :  { %1821 = vst [vmem:[#allocation2 + $0x88] sm:$0xf] %v1820_v29  ;;  %2642 = vmatmul.bf16.gmra.mxu3 %v2550_v11  ;;  %v9222_v63 = vrot.slane %v2410_v48, 9  ;;  %v2134_v59 = vunpack.c.l.b16 %v2049_v28  ;;  %v9221_v44 = vrot.slane %v2409_v2, 9  ;;  %v2498_v21 = vrot.slane %v12216_v55, 5  ;;  %3499 = vmatpush.bf16.msrb.mxu2 %v10597_v36  ;;  %v10619_v48 = vld [vmem:[%s14318_s2 + $0x1c8] sm:$0xff] }
 0x21d   :  { %1824 = vst [vmem:[#allocation2 + $0x8c] sm:$0x1] %v1823_v25  ;;  %v1689_v22 = vshrl.u32 %v1567_v54, 16  ;;  %v1692_v15 = vshll.u32 %v1567_v54, 16  ;;  %v2067_v23 = vrot.slane %v2065_v51, 4  ;;  %v2053_v29 = vrot.slane %v2051_v32, 4  ;;  %3693 = vmatpush.bf16.msrb.mxu3 %v10614_v56  ;;  %4111 = vmatpush.bf16.msra.mxu0 %v10622_v27 }
 0x21e   :  { %v2056_v25 = vrot.slane %v2054_v17, 5  ;;  %v9171_v54 = vld [vmem:[#allocation2 + $0x70] sm:$0xf]  ;;  %v2503_v0 = vsel %vm11869_vm8, %v9222_v63, %v2502_v34  ;;  %v2144_v52 = vpack.c.b16 %v2134_v59, %v2133_v42  ;;  %v2499_v62 = vsel %vm11869_vm8, %v9221_v44, %v2498_v21  ;;  %v12273_v58 = vld [vmem:[#allocation2 + $0x84] sm:$0x1] }
 0x21f   :  { %v1691_v26 = vrot.slane %v1689_v22, 7  ;;  %v9172_v22 = vor.u32 %v10544_v40, %v9171_v54  ;;  %v2071_v8 = vor.u32 %v2070_v57, %v2067_v23  ;;  %v2542_v5 = vunpack.c.l.b16 %v2503_v0  ;;  %v10576_v39 = vld [vmem:[#allocation2 + $0x7c] sm:$0xf0]  ;;  %v9315_v63 = vld [vmem:[#allocation2 + $0x78] sm:$0xf] }
 0x220   :  { %3500 = vmatpush.bf16.msrb.mxu2 %v10596_v7  ;;  %v2057_v33 = vor.u32 %v2056_v25, %v2053_v29  ;;  %v2062_v9 = vrot.slane %v2060_v35, 5  ;;  %v2079_v47 = vshrl.u32 %v1845_v31, 16  ;;  %v2082_v2 = vshll.u32 %v1845_v31, 16  ;;  %v10610_v32 = vld [vmem:[%s14318_s2 + $0x180] sm:$0xff]  ;;  %v3287_v54 = vld [vmem:[#allocation2 + $0x10] sm:$0xe] }
 0x221   :  { %v1694_v19 = vor.u32 %v1692_v15, %v1691_v26  ;;  %v1695_v30 = vrot.slane %v1691_v26, 4  ;;  %3694 = vmatpush.bf16.msrb.mxu3 %v10613_v45  ;;  %v10612_v26 = vld [vmem:[%s14318_s2 + $0x190] sm:$0xff]  ;;  %v2541_v15 = vunpack.c.l.b16 %v2499_v62  ;;  %v2072_v1 = vrot.slane %v2071_v8, 4  ;;  %4112 = vmatpush.bf16.msra.mxu0 %v10621_v53  ;;  %v9175_v21 = vld [vmem:[#allocation2 + $0x80] sm:$0xf] }
 0x222   :  { %v2058_v11 = vrot.slane %v2057_v33, 4  ;;  %v2506_v4 = vrot.slane %v12273_v58, 5  ;;  %v9316_v59 = vor.u32 %v10576_v39, %v9315_v63  ;;  %v2081_v23 = vrot.slane %v2079_v47, 4  ;;  %v10618_v7 = vld [vmem:[%s14318_s2 + $0x1c0] sm:$0xff]  ;;  %v12294_v0 = vld [vmem:[#allocation2 + $0x14] sm:$0x1] }
 0x223   :  { %v1826_v49 = vsel %vm11756_vm4, %v1694_v19, %v1825_v13  ;;  %v1829_v18 = vsel %vm11767_vm5, %v1695_v30, %v1828_v6  ;;  %v10586_v13 = vld [vmem:[%s14318_s2 + $0x100] sm:$0xff]  ;;  %v2551_v43 = vpack.c.b16 %v2542_v5, %v2541_v15  ;;  %v1846_v19 = vld [vmem:[#allocation2 + $0x88] sm:$0xf]  ;;  %v2076_v30 = vrot.slane %v2074_v60, 5  ;;  %v3755_v62 = vld [vmem:[#allocation2 + $0x10] sm:$0xf] }
 0x224   :  { %1827 = vst [vmem:[#allocation2 + $0x90] sm:$0xf] %v1826_v49  ;;  %2836 = vmatmul.bf16.gmra.mxu0 %v9312_v16  ;;  %3501 = vmatpush.bf16.msrb.mxu2 %v10595_v12  ;;  %v10594_v6 = vld [vmem:[%s14318_s2 + $0x140] sm:$0xff]  ;;  %v12268_v61 = vld [vmem:[#allocation2 + $0x8c] sm:$0x1]  ;;  %v2093_v55 = vshrl.u32 %v1846_v19, 16  ;;  %v2063_v36 = vsel %vm11916_vm11, %v2058_v11, %v2062_v9 }
 0x225   :  { %1830 = vst [vmem:[#allocation2 + $0x94] sm:$0x1] %v1829_v18  ;;  %3228 = vmatpush.bf16.msrb.mxu1 %v10586_v13  ;;  %v2412_v37 = vld [vmem:[#allocation2 + $0x88] sm:$0xe]  ;;  %3695 = vmatpush.bf16.msrb.mxu3 %v10612_v26  ;;  %v2077_v49 = vsel %vm11916_vm11, %v2072_v1, %v2076_v30  ;;  %v2411_v18 = vld [vmem:[#allocation2 + $0x80] sm:$0xe]  ;;  %v2135_v40 = vunpack.c.l.b16 %v2063_v36 }
 0x226   :  { %2386 = vmatmul.bf16.gmra.mxu2 %v9172_v22  ;;  %v2096_v20 = vshll.u32 %v1846_v19, 16  ;;  %4113 = vmatpush.bf16.msra.mxu0 %v10620_v14  ;;  %v9224_v28 = vrot.slane %v2412_v37, 9  ;;  %v2510_v51 = vrot.slane %v12268_v61, 5  ;;  %v2136_v17 = vunpack.c.l.b16 %v2077_v49  ;;  %v10545_v34 = vld [vmem:[#allocation2 + $0x84] sm:$0xf0]  ;;  %v10633_v12 = vld [vmem:[%s14318_s2 + $0x238] sm:$0xff] }
 0x227   :  { %v9223_v38 = vrot.slane %v2411_v18, 9  ;;  %v2095_v56 = vrot.slane %v2093_v55, 4  ;;  %v2084_v57 = vrot.slane %v2082_v2, 5  ;;  %v9176_v16 = vor.u32 %v10545_v34, %v9175_v21  ;;  %v3757_v8 = vld [vmem:[#allocation2 + $0x18] sm:$0xf] }
 0x228   :  { %2236 = vmatmul.bf16.gmra.mxu1 %v2144_v52  ;;  %3502 = vmatpush.bf16.msrb.mxu2 %v10594_v6  ;;  %v2098_v24 = vrot.slane %v2096_v20, 5  ;;  %v2511_v44 = vsel %vm11869_vm8, %v9224_v28, %v2510_v51  ;;  %v2145_v27 = vpack.c.b16 %v2136_v17, %v2135_v40  ;;  %v2102_v22 = vshll.u32 %v12268_v61, 16  ;;  %v12297_v5 = vld [vmem:[#allocation2 + $0xc] sm:$0x1]  ;;  %v3286_v15 = vld [vmem:[#allocation2 + $0x8] sm:$0xe] }
 0x229   :  { %3696 = vmatpush.bf16.msrb.mxu3 %v10611_v50  ;;  %v2507_v42 = vsel %vm11869_vm8, %v9223_v38, %v2506_v4  ;;  %v2544_v29 = vunpack.c.l.b16 %v2511_v44  ;;  %v2085_v52 = vor.u32 %v2084_v57, %v2081_v23  ;;  %v9402_v33 = vrot.slane %v3287_v54, 9  ;;  %4382 = vmatpush.bf16.msra.mxu1 %v10633_v12  ;;  %v2870_v61 = vld [vmem:[#allocation2 + $0x10] sm:$0xf]  ;;  %v2868_v31 = vld [vmem:[#allocation2 + $0x8] sm:$0xf] }
 0x22a   :  { %4114 = vmatpush.bf16.msra.mxu0 %v10619_v48  ;;  %v2099_v25 = vor.u32 %v2098_v24, %v2095_v56  ;;  %v2543_v45 = vunpack.c.l.b16 %v2507_v42  ;;  %v2088_v60 = vshll.u32 %v12273_v58, 16  ;;  %v3340_v13 = vrot.slane %v12294_v0, 5  ;;  %v3756_v47 = vld [vmem:[#allocation2 + $0x14] sm:$0x1]  ;;  %v9319_v17 = vld [vmem:[#allocation2 + $0x88] sm:$0xf] }
 0x22b   :  { %v3788_v35 = vshrl.u32 %v3755_v62, 16  ;;  %v3791_v1 = vshll.u32 %v3755_v62, 16  ;;  %v3802_v6 = vshrl.u32 %v3757_v8, 16  ;;  %v3805_v14 = vshll.u32 %v3757_v8, 16  ;;  %v10577_v20 = vld [vmem:[#allocation2 + $0x8c] sm:$0xf0] }
 0x22c   :  { %2647 = vmatmul.bf16.gmra.mxu3 %v2551_v43  ;;  %v2552_v53 = vpack.c.b16 %v2544_v29, %v2543_v45  ;;  %v2100_v26 = vrot.slane %v2099_v25, 4  ;;  %v2086_v43 = vrot.slane %v2085_v52, 4  ;;  %v2104_v11 = vrot.slane %v2102_v22, 5  ;;  %v3758_v4 = vld [vmem:[#allocation2 + $0x1c] sm:$0x1] }
 0x22d   :  { %3697 = vmatpush.bf16.msrb.mxu3 %v10610_v32  ;;  %v9401_v19 = vrot.slane %v3286_v15, 9  ;;  %v3336_v30 = vrot.slane %v12297_v5, 5  ;;  %v2090_v37 = vrot.slane %v2088_v60, 5  ;;  %v3341_v58 = vsel %vm11869_vm8, %v9402_v33, %v3340_v13  ;;  %v12313_v62 = vld [vmem:[#allocation2 + $0x1c] sm:$0x1]  ;;  %v10632_v13 = vld [vmem:[%s14318_s2 + $0x230] sm:$0xff] }
 0x22e   :  { %4115 = vmatpush.bf16.msra.mxu0 %v10618_v7  ;;  %v2105_v50 = vsel %vm11916_vm11, %v2100_v26, %v2104_v11  ;;  %v3790_v9 = vrot.slane %v3788_v35, 4  ;;  %v3793_v49 = vrot.slane %v3791_v1, 5  ;;  %v3804_v18 = vrot.slane %v3802_v6, 4  ;;  %v12315_v8 = vld [vmem:[#allocation2 + $0x24] sm:$0x1]  ;;  %4383 = vmatpush.bf16.msra.mxu1 %v10632_v13 }
 0x22f   :  { %v3807_v55 = vrot.slane %v3805_v14, 5  ;;  %v2091_v48 = vsel %vm11916_vm11, %v2086_v43, %v2090_v37  ;;  %v2915_v28 = vshrl.u32 %v2870_v61, 16  ;;  %v2918_v51 = vshll.u32 %v2870_v61, 16  ;;  %v3288_v33 = vld [vmem:[#allocation2 + $0x18] sm:$0xe] }
 0x230   :  { %v2138_v39 = vunpack.c.l.b16 %v2105_v50  ;;  %v3337_v36 = vsel %vm11869_vm8, %v9401_v19, %v3336_v30  ;;  %v2901_v2 = vshrl.u32 %v2868_v31, 16  ;;  %v2904_v32 = vshll.u32 %v2868_v31, 16  ;;  %v3289_v15 = vld [vmem:[#allocation2 + $0x20] sm:$0xe]  ;;  %v10602_v35 = vld [vmem:[#allocation2 + $0x14] sm:$0xf0] }
 0x231   :  { %v3416_v38 = vunpack.c.l.b16 %v3341_v58  ;;  %v9320_v63 = vor.u32 %v10577_v20, %v9319_v17  ;;  %v2137_v34 = vunpack.c.l.b16 %v2091_v48  ;;  %v3794_v56 = vor.u32 %v3793_v49, %v3790_v9  ;;  %v3759_v14 = vld [vmem:[#allocation2 + $0x20] sm:$0xf]  ;;  %v9483_v43 = vld [vmem:[#allocation2 + $0x10] sm:$0xf] }
 0x232   :  { %v3808_v24 = vor.u32 %v3807_v55, %v3804_v18  ;;  %v3797_v40 = vshll.u32 %v3756_v47, 16  ;;  %v2917_v44 = vrot.slane %v2915_v28, 4  ;;  %v2920_v21 = vrot.slane %v2918_v51, 5  ;;  %v2874_v31 = vld [vmem:[#allocation2 + $0x20] sm:$0xf] }
 0x233   :  { %v2146_v23 = vpack.c.b16 %v2138_v39, %v2137_v34  ;;  %v3811_v7 = vshll.u32 %v3758_v4, 16  ;;  %v3795_v54 = vrot.slane %v3794_v56, 4  ;;  %v2910_v26 = vshll.u32 %v12297_v5, 16  ;;  %v3761_v5 = vld [vmem:[#allocation2 + $0x28] sm:$0xf] }
 0x234   :  { %2841 = vmatmul.bf16.gmra.mxu0 %v9316_v59  ;;  %v3415_v59 = vunpack.c.l.b16 %v3337_v36  ;;  %v3809_v45 = vrot.slane %v3808_v24, 4  ;;  %v2921_v22 = vor.u32 %v2920_v21, %v2917_v44  ;;  %v3799_v12 = vrot.slane %v3797_v40, 5  ;;  %v2872_v51 = vld [vmem:[#allocation2 + $0x18] sm:$0xf] }
 0x235   :  { %v2924_v6 = vshll.u32 %v12294_v0, 16  ;;  %v9403_v30 = vrot.slane %v3288_v33, 9  ;;  %v3344_v37 = vrot.slane %v12313_v62, 5  ;;  %v9404_v50 = vrot.slane %v3289_v15, 9 }
 0x236   :  { %2391 = vmatmul.bf16.gmra.mxu2 %v9176_v16  ;;  %v2906_v16 = vrot.slane %v2904_v32, 5  ;;  %v3431_v42 = vpack.c.b16 %v3416_v38, %v3415_v59  ;;  %v3800_v11 = vsel %vm11916_vm11, %v3795_v54, %v3799_v12  ;;  %v2922_v61 = vrot.slane %v2921_v22, 4  ;;  %v3762_v22 = vld [vmem:[#allocation2 + $0x2c] sm:$0x1] }
 0x237   :  { %v3348_v58 = vrot.slane %v12315_v8, 5  ;;  %v9484_v9 = vor.u32 %v10602_v35, %v9483_v43  ;;  %v2912_v49 = vrot.slane %v2910_v26, 5  ;;  %v3816_v18 = vshrl.u32 %v3759_v14, 16  ;;  %v3291_v43 = vld [vmem:[#allocation2 + $0x30] sm:$0xe] }
 0x238   :  { %2241 = vmatmul.bf16.gmra.mxu1 %v2145_v27  ;;  %v2903_v27 = vrot.slane %v2901_v2, 4  ;;  %v2926_v55 = vrot.slane %v2924_v6, 5  ;;  %v3819_v20 = vshll.u32 %v3759_v14, 16  ;;  %v3830_v48 = vshrl.u32 %v3761_v5, 16  ;;  %v9487_v6 = vld [vmem:[#allocation2 + $0x20] sm:$0xf] }
 0x239   :  { %v2357_v57 = vpop.f32.mrf.mxu2  ;;  %v3833_v28 = vshll.u32 %v3761_v5, 16  ;;  %v4028_v39 = vunpack.c.l.b16 %v3800_v11  ;;  %v2943_v32 = vshrl.u32 %v2874_v31, 16  ;;  %v2946_v17 = vshll.u32 %v2874_v31, 16  ;;  %v3763_v5 = vld [vmem:[#allocation2 + $0x30] sm:$0xf] }
 0x23a   :  { %v2907_v60 = vor.u32 %v2906_v16, %v2903_v27  ;;  %v2927_v38 = vsel %vm11916_vm11, %v2922_v61, %v2926_v55  ;;  %v3349_v34 = vsel %vm11869_vm8, %v9404_v50, %v3348_v58  ;;  %v3818_v59 = vrot.slane %v3816_v18, 4  ;;  %v12344_v58 = vld [vmem:[#allocation2 + $0x2c] sm:$0x1]  ;;  %v3765_v31 = vld [vmem:[#allocation2 + $0x38] sm:$0xf] }
 0x23b   :  { %v2929_v40 = vshrl.u32 %v2872_v51, 16  ;;  %v2932_v44 = vshll.u32 %v2872_v51, 16  ;;  %v3142_v27 = vunpack.c.l.b16 %v2927_v38  ;;  %v3418_v16 = vunpack.c.l.b16 %v3349_v34  ;;  %v2876_v34 = vld [vmem:[#allocation2 + $0x28] sm:$0xf] }
 0x23c   :  { %2652 = vmatmul.bf16.gmra.mxu3 %v2552_v53  ;;  %v3813_v53 = vrot.slane %v3811_v7, 5  ;;  %v2908_v0 = vrot.slane %v2907_v60, 4  ;;  %v3835_v7 = vrot.slane %v3833_v28, 5  ;;  %v3839_v11 = vshll.u32 %v3762_v22, 16 }
 0x23d   :  { %v2931_v33 = vrot.slane %v2929_v40, 4  ;;  %v2934_v12 = vrot.slane %v2932_v44, 5  ;;  %v2952_v50 = vshll.u32 %v12315_v8, 16  ;;  %v9406_v55 = vrot.slane %v3291_v43, 9 }
 0x23e   :  { %v3814_v19 = vsel %vm11916_vm11, %v3809_v45, %v3813_v53  ;;  %v2913_v56 = vsel %vm11916_vm11, %v2908_v0, %v2912_v49  ;;  %v10603_v53 = vld [vmem:[#allocation2 + $0x24] sm:$0xf0]  ;;  %v3844_v28 = vshrl.u32 %v3763_v5, 16  ;;  %v3847_v51 = vshll.u32 %v3763_v5, 16 }
 0x23f   :  { %v2618_v25 = vpop.f32.mrf.mxu3  ;;  %v4029_v36 = vunpack.c.l.b16 %v3814_v19  ;;  %v3141_v45 = vunpack.c.l.b16 %v2913_v56  ;;  %v2938_v19 = vshll.u32 %v12313_v62, 16  ;;  %v9488_v61 = vor.u32 %v10603_v53, %v9487_v6  ;;  %v3290_v62 = vld [vmem:[#allocation2 + $0x28] sm:$0xe] }
 0x240   :  { %v2954_v38 = vrot.slane %v2952_v50, 5  ;;  %v3292_v50 = vld [vmem:[#allocation2 + $0x38] sm:$0xe] }
 0x241   :  { %v2359_v47 = vpop.f32.mrf.mxu2  ;;  %v4044_v54 = vpack.c.b16 %v4029_v36, %v4028_v39  ;;  %v3157_v13 = vpack.c.b16 %v3142_v27, %v3141_v45  ;;  %v2878_v39 = vld [vmem:[#allocation2 + $0x30] sm:$0xf]  ;;  %v3841_v36 = vrot.slane %v3839_v11, 5  ;;  %v3849_v27 = vrot.slane %v3847_v51, 5 }
 0x242   :  { %v2974_v40 = vshll.u32 %v2878_v39, 16  ;;  %v2966_v51 = vshll.u32 %v12344_v58, 16 }
 0x244   :  { %2846 = vmatmul.bf16.gmra.mxu0 %v9320_v63  ;;  %v3345_v63 = vsel %vm11869_vm8, %v9403_v30, %v3344_v37  ;;  %v12341_v30 = vld [vmem:[#allocation2 + $0x34] sm:$0x1]  ;;  %v2935_v37 = vor.u32 %v2934_v12, %v2931_v33 }
 0x246   :  { %3503 = vmatmul.bf16.vlgmr.msrb.gmra.mxu2 %v3431_v42  ;;  %v3760_v42 = vld [vmem:[#allocation2 + $0x24] sm:$0x1] }
 0x247   :  { %v2620_v24 = vpop.f32.mrf.mxu3  ;;  %v3825_v26 = vshll.u32 %v3760_v42, 16 }
 0x248   :  { %2246 = vmatmul.bf16.gmra.mxu1 %v2146_v23  ;;  %v3821_v23 = vrot.slane %v3819_v20, 5 }
 0x249   :  { %v2212_v29 = vpop.f32.mrf.mxu1  ;;  %v3827_v49 = vrot.slane %v3825_v26, 5 }
 0x24a   :  { %v2358_v52 = vadd.f32 %v2357_v57, %v2212_v29  ;;  %v3832_v57 = vrot.slane %v3830_v48, 4  ;;  %v2945_v29 = vrot.slane %v2943_v32, 4  ;;  %v3822_v60 = vor.u32 %v3821_v23, %v3818_v59 }
 0x24b   :  { %v3356_v48 = vrot.slane %v12341_v30, 5  ;;  %v3861_v32 = vshll.u32 %v3765_v31, 16  ;;  %v2971_v59 = vshrl.u32 %v2878_v39, 16  ;;  %v3293_v39 = vld [vmem:[#allocation2 + $0x40] sm:$0xe] }
 0x24c   :  { %v12321_v1 = vadd.f32 %v2618_v25, %v2358_v52  ;;  %3698 = vmatmul.bf16.vlgmr.msrb.gmra.mxu3 %v9484_v9  ;;  %v2948_v25 = vrot.slane %v2946_v17, 5  ;;  %v3417_v52 = vunpack.c.l.b16 %v3345_v63  ;;  %v3836_v15 = vor.u32 %v3835_v7, %v3832_v57  ;;  %v10631_v9 = vld [vmem:[%s14318_s2 + $0x228] sm:$0xff]  ;;  %v3764_v57 = vld [vmem:[#allocation2 + $0x34] sm:$0x1] }
 0x24d   :  { %v3823_v0 = vrot.slane %v3822_v60, 4  ;;  %4384 = vmatpush.bf16.msra.mxu1 %v10631_v9  ;;  %v2936_v17 = vrot.slane %v2935_v37, 4  ;;  %v3352_v63 = vrot.slane %v12344_v58, 5  ;;  %v3357_v23 = vsel %vm11869_vm8, %v9406_v55, %v3356_v48  ;;  %v12365_v37 = vld [vmem:[#allocation2 + $0x3c] sm:$0x1]  ;;  %v10630_v58 = vld [vmem:[%s14318_s2 + $0x220] sm:$0xff] }
 0x24e   :  { %v3432_v35 = vpack.c.b16 %v3418_v16, %v3417_v52  ;;  %v2949_v14 = vor.u32 %v2948_v25, %v2945_v29  ;;  %v3837_v18 = vrot.slane %v3836_v15, 4  ;;  %v3846_v7 = vrot.slane %v3844_v28, 4  ;;  %v3767_v55 = vld [vmem:[#allocation2 + $0x40] sm:$0xf] }
 0x24f   :  { %v3828_v56 = vsel %vm11916_vm11, %v3823_v0, %v3827_v49  ;;  %v3863_v42 = vrot.slane %v3861_v32, 5  ;;  %v2957_v29 = vshrl.u32 %v2876_v34, 16  ;;  %v2960_v25 = vshll.u32 %v2876_v34, 16 }
 0x250   :  { %v2950_v20 = vrot.slane %v2949_v14, 4  ;;  %v3420_v33 = vunpack.c.l.b16 %v3357_v23  ;;  %v3853_v12 = vshll.u32 %v3764_v57, 16  ;;  %v2973_v53 = vrot.slane %v2971_v59, 4 }
 0x251   :  { %v2214_v2 = vpop.f32.mrf.mxu1  ;;  %v2976_v60 = vrot.slane %v2974_v40, 5  ;;  %v4030_v26 = vunpack.c.l.b16 %v3828_v56  ;;  %v2959_v11 = vrot.slane %v2957_v29, 4  ;;  %v2980_v32 = vshll.u32 %v12341_v30, 16  ;;  %4385 = vmatpush.bf16.msra.mxu1 %v10630_v58 }
 0x252   :  { %v2360_v4 = vadd.f32 %v2359_v47, %v2214_v2  ;;  %v2940_v47 = vrot.slane %v2938_v19, 5  ;;  %v3858_v2 = vshrl.u32 %v3765_v31, 16  ;;  %v2955_v44 = vsel %vm11916_vm11, %v2950_v20, %v2954_v38 }
 0x253   :  { %v3144_v15 = vunpack.c.l.b16 %v2955_v44  ;;  %v2962_v19 = vrot.slane %v2960_v25, 5  ;;  %v3855_v0 = vrot.slane %v3853_v12, 5  ;;  %v3875_v34 = vshll.u32 %v3767_v55, 16  ;;  %v9491_v44 = vld [vmem:[#allocation2 + $0x30] sm:$0xf] }
 0x254   :  { %v12338_v21 = vadd.f32 %v2620_v24, %v2360_v4  ;;  %4116 = vmatmul.bf16.vlgmr.msra.gmra.mxu0 %v4044_v54  ;;  %v9405_v4 = vrot.slane %v3290_v62, 9  ;;  %v3842_v24 = vsel %vm11916_vm11, %v3837_v18, %v3841_v36  ;;  %v3860_v16 = vrot.slane %v3858_v2, 4  ;;  %v12368_v62 = vld [vmem:[#allocation2 + $0x44] sm:$0x1]  ;;  %v3769_v36 = vld [vmem:[#allocation2 + $0x48] sm:$0xf] }
 0x255   :  { %v4031_v54 = vunpack.c.l.b16 %v3842_v24  ;;  %v2941_v45 = vsel %vm11916_vm11, %v2936_v17, %v2940_v47  ;;  %v2977_v18 = vor.u32 %v2976_v60, %v2973_v53  ;;  %v2963_v2 = vor.u32 %v2962_v19, %v2959_v11  ;;  %v2882_v25 = vld [vmem:[#allocation2 + $0x40] sm:$0xf] }
 0x256   :  { %3508 = vmatmul.bf16.gmra.mxu2 %v3432_v35  ;;  %v3353_v52 = vsel %vm11869_vm8, %v9405_v4, %v3352_v63  ;;  %v3850_v35 = vor.u32 %v3849_v27, %v3846_v7  ;;  %v3864_v43 = vor.u32 %v3863_v42, %v3860_v16  ;;  %v9407_v17 = vrot.slane %v3292_v50, 9  ;;  %v10604_v4 = vld [vmem:[#allocation2 + $0x34] sm:$0xf0] }
 0x257   :  { %v3419_v14 = vunpack.c.l.b16 %v3353_v52  ;;  %v4045_v5 = vpack.c.b16 %v4031_v54, %v4030_v26  ;;  %v3360_v63 = vrot.slane %v12365_v37, 5  ;;  %v2978_v24 = vrot.slane %v2977_v18, 4 }
 0x258   :  { %3229 = vmatmul.bf16.vlgmr.msrb.gmra.mxu1 %v3157_v13  ;;  %v12363_v13 = vld [vmem:[#allocation2 + $0x3c] sm:$0x1]  ;;  %v3851_v28 = vrot.slane %v3850_v35, 4  ;;  %v3865_v47 = vrot.slane %v3864_v43, 4  ;;  %v9408_v59 = vrot.slane %v3293_v39, 9  ;;  %v3364_v40 = vrot.slane %v12368_v62, 5 }
 0x259   :  { %v2362_v8 = vpop.f32.mrf.mxu2  ;;  %v3433_v9 = vpack.c.b16 %v3420_v33, %v3419_v14  ;;  %v3867_v49 = vshll.u32 %v12363_v13, 16  ;;  %v3886_v30 = vshrl.u32 %v3769_v36, 16  ;;  %v3889_v57 = vshll.u32 %v3769_v36, 16  ;;  %v12389_v14 = vld [vmem:[#allocation2 + $0x44] sm:$0x1] }
 0x25a   :  { %v9492_v27 = vor.u32 %v10604_v4, %v9491_v44  ;;  %v3856_v16 = vsel %vm11916_vm11, %v3851_v28, %v3855_v0  ;;  %v2964_v42 = vrot.slane %v2963_v2, 4  ;;  %v2982_v29 = vrot.slane %v2980_v32, 5 }
 0x25b   :  { %v3869_v23 = vrot.slane %v3867_v49, 5  ;;  %v3361_v53 = vsel %vm11869_vm8, %v9407_v17, %v3360_v63  ;;  %v3365_v60 = vsel %vm11869_vm8, %v9408_v59, %v3364_v40  ;;  %v3888_v26 = vrot.slane %v3886_v30, 4  ;;  %v12399_v59 = vld [vmem:[#allocation2 + $0x5c] sm:$0x1] }
 0x25c   :  { %3703 = vmatmul.bf16.gmra.mxu3 %v9488_v61  ;;  %v3143_v61 = vunpack.c.l.b16 %v2941_v45  ;;  %v2968_v45 = vrot.slane %v2966_v51, 5  ;;  %v2983_v12 = vsel %vm11916_vm11, %v2978_v24, %v2982_v29  ;;  %v3891_v43 = vrot.slane %v3889_v57, 5  ;;  %v3294_v57 = vld [vmem:[#allocation2 + $0x58] sm:$0xe]  ;;  %v3771_v29 = vld [vmem:[#allocation2 + $0x60] sm:$0xf] }
 0x25d   :  { %v3870_v54 = vsel %vm11916_vm11, %v3865_v47, %v3869_v23  ;;  %v2999_v11 = vshrl.u32 %v2882_v25, 16  ;;  %v3002_v19 = vshll.u32 %v2882_v25, 16  ;;  %v3422_v0 = vunpack.c.l.b16 %v3365_v60 }
 0x25e   :  { %v3158_v48 = vpack.c.b16 %v3144_v15, %v3143_v61  ;;  %v2880_v15 = vld [vmem:[#allocation2 + $0x38] sm:$0xf]  ;;  %v4033_v61 = vunpack.c.l.b16 %v3870_v54  ;;  %v2969_v50 = vsel %vm11916_vm11, %v2964_v42, %v2968_v45  ;;  %v3892_v51 = vor.u32 %v3891_v43, %v3888_v26  ;;  %v12401_v42 = vld [vmem:[#allocation2 + $0x64] sm:$0x1]  ;;  %v10605_v54 = vld [vmem:[#allocation2 + $0x44] sm:$0xf0] }
 0x25f   :  { %v2623_v22 = vpop.f32.mrf.mxu3  ;;  %v2988_v28 = vshll.u32 %v2880_v15, 16  ;;  %v3001_v36 = vrot.slane %v2999_v11, 4  ;;  %v3004_v47 = vrot.slane %v3002_v19, 5  ;;  %v3145_v32 = vunpack.c.l.b16 %v2969_v50 }
 0x260   :  { %v3893_v30 = vrot.slane %v3892_v51, 4  ;;  %v3368_v60 = vrot.slane %v12399_v59, 5  ;;  %v3372_v11 = vrot.slane %v12401_v42, 5 }
 0x261   :  { %v2364_v6 = vpop.f32.mrf.mxu2  ;;  %v2990_v24 = vrot.slane %v2988_v28, 5  ;;  %v3005_v23 = vor.u32 %v3004_v47, %v3001_v36 }
 0x263   :  { %v3006_v43 = vrot.slane %v3005_v23, 4 }
 0x264   :  { %4121 = vmatmul.bf16.gmra.mxu0 %v4045_v5  ;;  %v4032_v5 = vunpack.c.l.b16 %v3856_v16  ;;  %v9495_v16 = vld [vmem:[#allocation2 + $0x40] sm:$0xf] }
 0x265   :  { %v2217_v31 = vpop.f32.mrf.mxu1  ;;  %v9496_v19 = vor.u32 %v10605_v54, %v9495_v16  ;;  %v12430_v54 = vld [vmem:[#allocation2 + $0x6c] sm:$0x1] }
 0x266   :  { %v2363_v20 = vadd.f32 %v2362_v8, %v2217_v31  ;;  %3513 = vmatmul.bf16.gmra.mxu2 %v3433_v9  ;;  %v3872_v8 = vshrl.u32 %v3767_v55, 16  ;;  %v3421_v9 = vunpack.c.l.b16 %v3361_v53  ;;  %v3146_v55 = vunpack.c.l.b16 %v2983_v12 }
 0x267   :  { %v2625_v56 = vpop.f32.mrf.mxu3  ;;  %v4046_v17 = vpack.c.b16 %v4033_v61, %v4032_v5  ;;  %v9409_v53 = vrot.slane %v3294_v57, 9  ;;  %v3903_v5 = vshll.u32 %v3771_v29, 16  ;;  %v2884_v61 = vld [vmem:[#allocation2 + $0x58] sm:$0xf] }
 0x268   :  { %v12372_v38 = vadd.f32 %v2623_v22, %v2363_v20  ;;  %3234 = vmatmul.bf16.gmra.mxu1 %v3158_v48  ;;  %v3874_v52 = vrot.slane %v3872_v8, 4  ;;  %v3877_v22 = vrot.slane %v3875_v34, 5  ;;  %v12395_v20 = vld [vmem:[#allocation2 + $0x4c] sm:$0x1]  ;;  %v2985_v48 = vshrl.u32 %v2880_v15, 16 }
 0x269   :  { %v2367_v7 = vpop.f32.mrf.mxu2  ;;  %v3895_v39 = vshll.u32 %v12395_v20, 16  ;;  %v3434_v4 = vpack.c.b16 %v3422_v0, %v3421_v9  ;;  %v3159_v34 = vpack.c.b16 %v3146_v55, %v3145_v32  ;;  %v3773_v15 = vld [vmem:[#allocation2 + $0x68] sm:$0xf]  ;;  %v3369_v51 = vsel %vm11869_vm8, %v9409_v53, %v3368_v60 }
 0x26a   :  { %v3878_v49 = vor.u32 %v3877_v22, %v3874_v52  ;;  %v3008_v52 = vshll.u32 %v12368_v62, 16  ;;  %v10629_v22 = vld [vmem:[%s14318_s2 + $0x218] sm:$0xff]  ;;  %v3914_v0 = vshrl.u32 %v3773_v15, 16  ;;  %v3423_v23 = vunpack.c.l.b16 %v3369_v51 }
 0x26b   :  { %v3897_v44 = vrot.slane %v3895_v39, 5  ;;  %4386 = vmatpush.bf16.msra.mxu1 %v10629_v22 }
 0x26c   :  { %3708 = vmatmul.bf16.gmra.mxu3 %v9492_v27  ;;  %v3879_v63 = vrot.slane %v3878_v49, 4  ;;  %v3295_v27 = vld [vmem:[#allocation2 + $0x60] sm:$0xe]  ;;  %v3010_v9 = vrot.slane %v3008_v52, 5  ;;  %v3917_v49 = vshll.u32 %v3773_v15, 16 }
 0x26d   :  { %v2219_v33 = vpop.f32.mrf.mxu1  ;;  %v9410_v26 = vrot.slane %v3295_v27, 9  ;;  %v12428_v27 = vld [vmem:[#allocation2 + $0x64] sm:$0x1] }
 0x26e   :  { %v2365_v35 = vadd.f32 %v2364_v6, %v2219_v33  ;;  %v3881_v6 = vshll.u32 %v12389_v14, 16  ;;  %v3011_v36 = vsel %vm11916_vm11, %v3006_v43, %v3010_v9  ;;  %v3909_v15 = vshll.u32 %v12428_v27, 16 }
 0x26f   :  { %v2628_v18 = vpop.f32.mrf.mxu3  ;;  %v3373_v47 = vsel %vm11869_vm8, %v9410_v26, %v3372_v11  ;;  %v10606_v26 = vld [vmem:[#allocation2 + $0x64] sm:$0xf0] }
 0x270   :  { %v12393_v31 = vadd.f32 %v2625_v56, %v2365_v35  ;;  %v3883_v58 = vrot.slane %v3881_v6, 5  ;;  %v2987_v56 = vrot.slane %v2985_v48, 4  ;;  %v3898_v35 = vsel %vm11916_vm11, %v3893_v30, %v3897_v44 }
 0x271   :  { %v2369_v2 = vpop.f32.mrf.mxu2  ;;  %v4035_v6 = vunpack.c.l.b16 %v3898_v35  ;;  %v3148_v44 = vunpack.c.l.b16 %v3011_v36  ;;  %v3424_v57 = vunpack.c.l.b16 %v3373_v47 }
 0x272   :  { %v3884_v45 = vsel %vm11916_vm11, %v3879_v63, %v3883_v58  ;;  %v2991_v12 = vor.u32 %v2990_v24, %v2987_v56  ;;  %v3916_v56 = vrot.slane %v3914_v0, 4  ;;  %v3919_v24 = vrot.slane %v3917_v49, 5  ;;  %v12436_v0 = vld [vmem:[#allocation2 + $0x6c] sm:$0x1]  ;;  %v3777_v49 = vld [vmem:[#allocation2 + $0x78] sm:$0xf] }
 0x273   :  { %v4034_v50 = vunpack.c.l.b16 %v3884_v45  ;;  %v3435_v11 = vpack.c.b16 %v3424_v57, %v3423_v23 }
 0x274   :  { %4126 = vmatmul.bf16.gmra.mxu0 %v4046_v17  ;;  %v2992_v48 = vrot.slane %v2991_v12, 4  ;;  %v3905_v17 = vrot.slane %v3903_v5, 5  ;;  %v3297_v5 = vld [vmem:[#allocation2 + $0x70] sm:$0xe] }
 0x275   :  { %v2222_v8 = vpop.f32.mrf.mxu1  ;;  %v4047_v16 = vpack.c.b16 %v4035_v6, %v4034_v50  ;;  %v3036_v6 = vshll.u32 %v12401_v42, 16  ;;  %v9412_v36 = vrot.slane %v3297_v5, 9 }
 0x276   :  { %v2368_v40 = vadd.f32 %v2367_v7, %v2222_v8  ;;  %3518 = vmatmul.bf16.gmra.mxu2 %v3434_v4  ;;  %v2994_v7 = vshll.u32 %v12365_v37, 16  ;;  %v3900_v37 = vshrl.u32 %v3771_v29, 16  ;;  %v3013_v4 = vshrl.u32 %v2884_v61, 16 }
 0x277   :  { %v2630_v33 = vpop.f32.mrf.mxu3 }
 0x278   :  { %v12403_v25 = vadd.f32 %v2628_v18, %v2368_v40  ;;  %3239 = vmatmul.bf16.gmra.mxu1 %v3159_v34  ;;  %v2886_v18 = vld [vmem:[#allocation2 + $0x60] sm:$0xf]  ;;  %v2996_v28 = vrot.slane %v2994_v7, 5  ;;  %v3902_v32 = vrot.slane %v3900_v37, 4  ;;  %v12422_v34 = vpop.f32.mrf.mxu0  ;;  %v3016_v40 = vshll.u32 %v2884_v61, 16 }
 0x279   :  { %v2372_v62 = vpop.f32.mrf.mxu2  ;;  %v3027_v63 = vshrl.u32 %v2886_v18, 16  ;;  %v3030_v8 = vshll.u32 %v2886_v18, 16  ;;  %v3015_v12 = vrot.slane %v3013_v4, 4  ;;  %v3923_v37 = vshll.u32 %v12430_v54, 16  ;;  %v9499_v61 = vld [vmem:[#allocation2 + $0x60] sm:$0xf] }
 0x27a   :  { %v2997_v30 = vsel %vm11916_vm11, %v2992_v48, %v2996_v28  ;;  %v3906_v45 = vor.u32 %v3905_v17, %v3902_v32  ;;  %v3018_v53 = vrot.slane %v3016_v40, 5  ;;  %v3296_v48 = vld [vmem:[#allocation2 + $0x68] sm:$0xe]  ;;  %v10628_v28 = vld [vmem:[%s14318_s2 + $0x210] sm:$0xff]  ;;  %v9500_v4 = vor.u32 %v10606_v26, %v9499_v61 }
 0x27b   :  { %v3029_v7 = vrot.slane %v3027_v63, 4  ;;  %v3032_v52 = vrot.slane %v3030_v8, 5  ;;  %v3147_v22 = vunpack.c.l.b16 %v2997_v30  ;;  %v2888_v32 = vld [vmem:[#allocation2 + $0x68] sm:$0xf]  ;;  %v3925_v63 = vrot.slane %v3923_v37, 5  ;;  %4387 = vmatpush.bf16.msra.mxu1 %v10628_v28 }
 0x27c   :  { %3713 = vmatmul.bf16.gmra.mxu3 %v9496_v19  ;;  %v12434_v19 = vld [vmem:[#allocation2 + $0x74] sm:$0x1]  ;;  %v3907_v50 = vrot.slane %v3906_v45, 4  ;;  %v3775_v8 = vld [vmem:[#allocation2 + $0x70] sm:$0xf]  ;;  %v3376_v45 = vrot.slane %v12436_v0, 5 }
 0x27d   :  { %v2224_v55 = vpop.f32.mrf.mxu1  ;;  %v3160_v43 = vpack.c.b16 %v3148_v44, %v3147_v22  ;;  %v3033_v9 = vor.u32 %v3032_v52, %v3029_v7  ;;  %v3380_v47 = vrot.slane %v12434_v19, 5  ;;  %v9411_v44 = vrot.slane %v3296_v48, 9  ;;  %v2890_v7 = vld [vmem:[#allocation2 + $0x70] sm:$0xf] }
 0x27e   :  { %v2370_v39 = vadd.f32 %v2369_v2, %v2224_v55  ;;  %v3058_v37 = vshll.u32 %v2890_v7, 16 }
 0x27f   :  { %v2633_v2 = vpop.f32.mrf.mxu3  ;;  %v3034_v30 = vrot.slane %v3033_v9, 4  ;;  %v3381_v22 = vsel %vm11869_vm8, %v9412_v36, %v3380_v47  ;;  %v3377_v9 = vsel %vm11869_vm8, %v9411_v44, %v3376_v45 }
 0x280   :  { %v12424_v58 = vadd.f32 %v2630_v33, %v2370_v39  ;;  %v3920_v33 = vor.u32 %v3919_v24, %v3916_v56  ;;  %v3911_v39 = vrot.slane %v3909_v15, 5  ;;  %v12445_v17 = vpop.f32.mrf.mxu0  ;;  %v3942_v56 = vshrl.u32 %v3777_v49, 16 }
 0x281   :  { %v2374_v29 = vpop.f32.mrf.mxu2  ;;  %v3945_v24 = vshll.u32 %v3777_v49, 16  ;;  %v3044_v15 = vshll.u32 %v2888_v32, 16 }
 0x282   :  { %v3921_v55 = vrot.slane %v3920_v33, 4  ;;  %v3912_v40 = vsel %vm11916_vm11, %v3907_v50, %v3911_v39  ;;  %v3928_v33 = vshrl.u32 %v3775_v8, 16 }
 0x283   :  { %v3947_v26 = vrot.slane %v3945_v24, 5  ;;  %v4036_v61 = vunpack.c.l.b16 %v3912_v40  ;;  %v3046_v47 = vrot.slane %v3044_v15, 5  ;;  %v12469_v40 = vld [vmem:[#allocation2 + $0x74] sm:$0x1]  ;;  %v10627_v15 = vld [vmem:[%s14318_s2 + $0x208] sm:$0xff] }
 0x284   :  { %4131 = vmatmul.bf16.gmra.mxu0 %v4047_v16  ;;  %v3926_v23 = vsel %vm11916_vm11, %v3921_v55, %v3925_v63  ;;  %v3038_v16 = vrot.slane %v3036_v6, 5  ;;  %v3426_v55 = vunpack.c.l.b16 %v3381_v22  ;;  %v3930_v6 = vrot.slane %v3928_v33, 4  ;;  %4388 = vmatpush.bf16.msra.mxu1 %v10627_v15 }
 0x285   :  { %v2227_v60 = vpop.f32.mrf.mxu1  ;;  %v4037_v50 = vunpack.c.l.b16 %v3926_v23  ;;  %v3060_v63 = vrot.slane %v3058_v37, 5  ;;  %v3937_v22 = vshll.u32 %v12469_v40, 16  ;;  %v3064_v37 = vshll.u32 %v12434_v19, 16  ;;  %v3779_v19 = vld [vmem:[#allocation2 + $0x80] sm:$0xf] }
 0x286   :  { %v2373_v35 = vadd.f32 %v2372_v62, %v2227_v60  ;;  %3523 = vmatmul.bf16.gmra.mxu2 %v3435_v11  ;;  %v3019_v62 = vor.u32 %v3018_v53, %v3015_v12  ;;  %v3931_v12 = vshll.u32 %v3775_v8, 16  ;;  %v3041_v53 = vshrl.u32 %v2888_v32, 16 }
 0x287   :  { %v2635_v51 = vpop.f32.mrf.mxu3  ;;  %v3055_v11 = vshrl.u32 %v2890_v7, 16  ;;  %v3425_v32 = vunpack.c.l.b16 %v3377_v9  ;;  %v9503_v9 = vld [vmem:[#allocation2 + $0x70] sm:$0xf] }
 0x288   :  { %v12438_v18 = vadd.f32 %v2633_v2, %v2373_v35  ;;  %3244 = vmatmul.bf16.gmra.mxu1 %v3160_v43  ;;  %v3022_v2 = vshll.u32 %v12399_v59, 16  ;;  %v3020_v57 = vrot.slane %v3019_v62, 4  ;;  %v3944_v59 = vrot.slane %v3942_v56, 4  ;;  %v12463_v62 = vld [vmem:[#allocation2 + $0x7c] sm:$0x1]  ;;  %v12467_v8 = vpop.f32.mrf.mxu0 }
 0x289   :  { %v2377_v42 = vpop.f32.mrf.mxu2  ;;  %v3039_v43 = vsel %vm11916_vm11, %v3034_v30, %v3038_v16  ;;  %v3933_v48 = vrot.slane %v3931_v12, 5  ;;  %v3043_v36 = vrot.slane %v3041_v53, 4  ;;  %v4048_v56 = vpack.c.b16 %v4037_v50, %v4036_v61  ;;  %v12475_v12 = vld [vmem:[#allocation2 + $0x84] sm:$0x1]  ;;  %v3299_v53 = vld [vmem:[#allocation2 + $0x80] sm:$0xe] }
 0x28a   :  { %v3024_v35 = vrot.slane %v3022_v2, 5  ;;  %v3150_v28 = vunpack.c.l.b16 %v3039_v43  ;;  %v3948_v39 = vor.u32 %v3947_v26, %v3944_v59  ;;  %v3951_v2 = vshll.u32 %v12463_v62, 16  ;;  %v10607_v43 = vld [vmem:[#allocation2 + $0x74] sm:$0xf0]  ;;  %v3781_v61 = vld [vmem:[#allocation2 + $0x88] sm:$0xf] }
 0x28b   :  { %v3436_v44 = vpack.c.b16 %v3426_v55, %v3425_v32  ;;  %v3934_v23 = vor.u32 %v3933_v48, %v3930_v6  ;;  %v3047_v7 = vor.u32 %v3046_v47, %v3043_v36  ;;  %v3050_v26 = vshll.u32 %v12436_v0, 16 }
 0x28c   :  { %3718 = vmatmul.bf16.gmra.mxu3 %v9500_v4  ;;  %v3057_v4 = vrot.slane %v3055_v11, 4  ;;  %v3949_v45 = vrot.slane %v3948_v39, 4  ;;  %v3953_v59 = vrot.slane %v3951_v2, 5  ;;  %v12488_v50 = vadd.f32 %v12422_v34, %v12321_v1  ;;  %v2894_v34 = vld [vmem:[#allocation2 + $0x80] sm:$0xf] }
 0x28d   :  { %v2229_v52 = vpop.f32.mrf.mxu1  ;;  %v3935_v11 = vrot.slane %v3934_v23, 4  ;;  %v3388_v55 = vrot.slane %v12475_v12, 5  ;;  %v3939_v6 = vrot.slane %v3937_v22, 5  ;;  %v9504_v36 = vor.u32 %v10607_v43, %v9503_v9  ;;  %v12508_v9 = vld [vmem:[#allocation2 + $0x84] sm:$0x1] }
 0x28e   :  { %v2375_v60 = vadd.f32 %v2374_v29, %v2229_v52  ;;  %v3025_v29 = vsel %vm11916_vm11, %v3020_v57, %v3024_v35  ;;  %v12472_v52 = vld [vmem:[#allocation2 + $0x7c] sm:$0x1]  ;;  %v3061_v33 = vor.u32 %v3060_v63, %v3057_v4  ;;  %v3954_v0 = vsel %vm11916_vm11, %v3949_v45, %v3953_v59 }
 0x28f   :  { %v2638_v49 = vpop.f32.mrf.mxu3  ;;  %v3149_v24 = vunpack.c.l.b16 %v3025_v29  ;;  %v9414_v29 = vrot.slane %v3299_v53, 9  ;;  %v3384_v39 = vrot.slane %v12472_v52, 5  ;;  %v3052_v47 = vrot.slane %v3050_v26, 5 }
 0x290   :  { %v12457_v5 = vadd.f32 %v2635_v51, %v2375_v60  ;;  %v3062_v48 = vrot.slane %v3061_v33, 4  ;;  %v3970_v32 = vshrl.u32 %v3781_v61, 16  ;;  %v3973_v1 = vshll.u32 %v3781_v61, 16 }
 0x291   :  { %v12465_v51 = vpop.f32.mrf.mxu2  ;;  %v3161_v16 = vpack.c.b16 %v3150_v28, %v3149_v24  ;;  %v4039_v24 = vunpack.c.l.b16 %v3954_v0  ;;  %v3066_v2 = vrot.slane %v3064_v37, 5  ;;  %v3959_v45 = vshll.u32 %v3779_v19, 16 }
 0x292   :  { %14333 = vst [vmem:[#allocation7_spill] sm:$0xff] %v12465_v51  ;;  %v3083_v33 = vshrl.u32 %v2894_v34, 16  ;;  %v3086_v53 = vshll.u32 %v2894_v34, 16  ;;  %v3972_v59 = vrot.slane %v3970_v32, 4  ;;  %v3975_v26 = vrot.slane %v3973_v1, 5 }
 0x293   :  { %v3965_v34 = vshll.u32 %v12508_v9, 16 }
 0x294   :  { %4136 = vmatmul.bf16.gmra.mxu0 %v4048_v56  ;;  %v3940_v56 = vsel %vm11916_vm11, %v3935_v11, %v3939_v6  ;;  %v12510_v6 = vld [vmem:[#allocation2 + $0x8c] sm:$0x1] }
 0x295   :  { %v2232_v30 = vpop.f32.mrf.mxu1  ;;  %v4038_v37 = vunpack.c.l.b16 %v3940_v56 }
 0x296   :  { %v2378_v57 = vadd.f32 %v2377_v42, %v2232_v30  ;;  %3528 = vmatmul.bf16.gmra.mxu2 %v3436_v44  ;;  %v3298_v42 = vld [vmem:[#allocation2 + $0x78] sm:$0xe]  ;;  %v12498_v44 = vpop.f32.mrf.mxu0 }
 0x297   :  { %v12483_v35 = vpop.f32.mrf.mxu3  ;;  %v9413_v28 = vrot.slane %v3298_v42, 9  ;;  %v2892_v30 = vld [vmem:[#allocation2 + $0x78] sm:$0xf] }
 0x298   :  { %v12477_v60 = vadd.f32 %v2638_v49, %v2378_v57  ;;  %3249 = vmatmul.bf16.gmra.mxu1 %v3161_v16  ;;  %14334 = vst [vmem:[#allocation8_spill] sm:$0xff] %v12483_v35  ;;  %v3048_v49 = vrot.slane %v3047_v7, 4  ;;  %v3389_v57 = vsel %vm11869_vm8, %v9414_v29, %v3388_v55  ;;  %v3956_v16 = vshrl.u32 %v3779_v19, 16 }
 0x299   :  { %v2382_v63 = vpop.f32.mrf.mxu2  ;;  %v3067_v7 = vsel %vm11916_vm11, %v3062_v48, %v3066_v2  ;;  %v3385_v22 = vsel %vm11869_vm8, %v9413_v28, %v3384_v39  ;;  %v3069_v42 = vshrl.u32 %v2892_v30, 16  ;;  %v3072_v15 = vshll.u32 %v2892_v30, 16 }
 0x29a   :  { %v3053_v23 = vsel %vm11916_vm11, %v3048_v49, %v3052_v47  ;;  %v3428_v11 = vunpack.c.l.b16 %v3389_v57  ;;  %v3152_v61 = vunpack.c.l.b16 %v3067_v7  ;;  %v3958_v0 = vrot.slane %v3956_v16, 4  ;;  %v10608_v16 = vld [vmem:[#allocation2 + $0x84] sm:$0xf0] }
 0x29b   :  { %v3961_v49 = vrot.slane %v3959_v45, 5  ;;  %v3151_v29 = vunpack.c.l.b16 %v3053_v23  ;;  %v3427_v55 = vunpack.c.l.b16 %v3385_v22  ;;  %v3085_v48 = vrot.slane %v3083_v33, 4 }
 0x29c   :  { %3723 = vmatmul.bf16.gmra.mxu3 %v9504_v36  ;;  %v3088_v28 = vrot.slane %v3086_v53, 5  ;;  %v4049_v39 = vpack.c.b16 %v4039_v24, %v4038_v37  ;;  %v3976_v19 = vor.u32 %v3975_v26, %v3972_v59  ;;  %v3071_v36 = vrot.slane %v3069_v42, 4  ;;  %v3300_v24 = vld [vmem:[#allocation2 + $0x88] sm:$0xe]  ;;  %v12521_v59 = vld [vmem:[#allocation2 + $0x94] sm:$0x1] }
 0x29d   :  { %v12494_v4 = vpop.f32.mrf.mxu1  ;;  %v3074_v47 = vrot.slane %v3072_v15, 5  ;;  %v3437_v1 = vpack.c.b16 %v3428_v11, %v3427_v55  ;;  %v3162_v2 = vpack.c.b16 %v3152_v61, %v3151_v29  ;;  %v3962_v30 = vor.u32 %v3961_v49, %v3958_v0  ;;  %v3301_v26 = vld [vmem:[#allocation2 + $0x90] sm:$0xe]  ;;  %v10626_v42 = vld [vmem:[%s14318_s2 + $0x200] sm:$0xff]  ;;  %v12529_v61 = vld [vmem:[#allocation2 + $0x8c] sm:$0x1] }
 0x29e   :  { %14335 = vst [vmem:[#allocation9_spill] sm:$0xff] %v12494_v4  ;;  %v3979_v57 = vshll.u32 %v12510_v6, 16  ;;  %v3089_v45 = vor.u32 %v3088_v28, %v3085_v48  ;;  %v3092_v7 = vshll.u32 %v12475_v12, 16  ;;  %v12517_v22 = vpop.f32.mrf.mxu0  ;;  %v3977_v53 = vrot.slane %v3976_v19, 4  ;;  %v9507_v11 = vld [vmem:[#allocation2 + $0x80] sm:$0xf]  ;;  %4389 = vmatpush.bf16.msra.mxu1 %v10626_v42 }
 0x29f   :  { %v2643_v43 = vpop.f32.mrf.mxu3  ;;  %v3967_v12 = vrot.slane %v3965_v34, 5  ;;  %v3078_v37 = vshll.u32 %v12472_v52, 16  ;;  %v3963_v0 = vrot.slane %v3962_v30, 4  ;;  %v3783_v29 = vld [vmem:[#allocation2 + $0x90] sm:$0xf]  ;;  %v9415_v28 = vrot.slane %v3300_v24, 9 }
 0x2a0   :  { %v3981_v49 = vrot.slane %v3979_v57, 5  ;;  %v3785_v55 = vld [vmem:[#allocation2 + $0x98] sm:$0xf]  ;;  %v3090_v48 = vrot.slane %v3089_v45, 4  ;;  %v3396_v19 = vrot.slane %v12521_v59, 5  ;;  %v3392_v52 = vrot.slane %v12529_v61, 5 }
 0x2a1   :  { %v12514_v23 = vpop.f32.mrf.mxu2  ;;  %v2898_v34 = vld [vmem:[#allocation2 + $0x90] sm:$0xf]  ;;  %v3987_v30 = vshll.u32 %v3783_v29, 16  ;;  %v3998_v57 = vshrl.u32 %v3785_v55, 16  ;;  %v3968_v45 = vsel %vm11916_vm11, %v3963_v0, %v3967_v12  ;;  %v3080_v24 = vrot.slane %v3078_v37, 5 }
 0x2a2   :  { %14336 = vst [vmem:[#allocation10_spill] sm:$0xff] %v12514_v23  ;;  %v3114_v42 = vshll.u32 %v2898_v34, 16 }
 0x2a3   :  { %v3989_v37 = vrot.slane %v3987_v30, 5  ;;  %v4000_v0 = vrot.slane %v3998_v57, 4 }
 0x2a4   :  { %4141 = vmatmul.bf16.gmra.mxu0 %v4049_v39  ;;  %v9416_v39 = vrot.slane %v3301_v26, 9 }
 0x2a5   :  { %v2237_v32 = vpop.f32.mrf.mxu1 }
 0x2a6   :  { %v2383_v56 = vadd.f32 %v2382_v63, %v2237_v32  ;;  %3533 = vmatmul.bf16.gmra.mxu2 %v3437_v1  ;;  %v3075_v63 = vor.u32 %v3074_v47, %v3071_v36  ;;  %v2896_v36 = vld [vmem:[#allocation2 + $0x88] sm:$0xf]  ;;  %v3982_v47 = vsel %vm11916_vm11, %v3977_v53, %v3981_v49  ;;  %v3094_v1 = vrot.slane %v3092_v7, 5  ;;  %v12547_v23 = vpop.f32.mrf.mxu0 }
 0x2a7   :  { %v12526_v15 = vpop.f32.mrf.mxu3  ;;  %v3097_v26 = vshrl.u32 %v2896_v36, 16  ;;  %v3397_v7 = vsel %vm11869_vm8, %v9416_v39, %v3396_v19 }
 0x2a8   :  { %v12519_v33 = vadd.f32 %v2643_v43, %v2383_v56  ;;  %3254 = vmatmul.bf16.gmra.mxu1 %v3162_v2  ;;  %14337 = vst [vmem:[#allocation11_spill] sm:$0xff] %v12526_v15  ;;  %v9508_v43 = vor.u32 %v10608_v16, %v9507_v11  ;;  %v3076_v32 = vrot.slane %v3075_v63, 4  ;;  %v3984_v2 = vshrl.u32 %v3783_v29, 16 }
 0x2a9   :  { %v4001_v16 = vshll.u32 %v3785_v55, 16  ;;  %v3095_v53 = vsel %vm11916_vm11, %v3090_v48, %v3094_v1  ;;  %v3111_v63 = vshrl.u32 %v2898_v34, 16  ;;  %v4041_v11 = vunpack.c.l.b16 %v3982_v47  ;;  %v2387_v55 = vpop.f32.mrf.mxu2  ;;  %v12549_v34 = vld [vmem:[#allocation2 + $0x9c] sm:$0x1] }
 0x2aa   :  { %v3081_v49 = vsel %vm11916_vm11, %v3076_v32, %v3080_v24  ;;  %v3100_v29 = vshll.u32 %v2896_v36, 16  ;;  %v3986_v12 = vrot.slane %v3984_v2, 4  ;;  %v4040_v48 = vunpack.c.l.b16 %v3968_v45 }
 0x2ab   :  { %v4003_v15 = vrot.slane %v4001_v16, 5  ;;  %v3154_v1 = vunpack.c.l.b16 %v3095_v53  ;;  %v3430_v39 = vunpack.c.l.b16 %v3397_v7  ;;  %v3113_v47 = vrot.slane %v3111_v63, 4 }
 0x2ac   :  { %3728 = vmatmul.bf16.gmra.mxu3 %v9508_v43  ;;  %v3393_v43 = vsel %vm11869_vm8, %v9415_v28, %v3392_v52  ;;  %v4050_v32 = vpack.c.b16 %v4041_v11, %v4040_v48  ;;  %v3153_v24 = vunpack.c.l.b16 %v3081_v49  ;;  %v12551_v28 = vld [vmem:[#allocation2 + $0x94] sm:$0x1]  ;;  %v4007_v36 = vshll.u32 %v12549_v34, 16  ;;  %v9511_v11 = vld [vmem:[#allocation2 + $0x90] sm:$0xf] }
 0x2ad   :  { %v12535_v56 = vpop.f32.mrf.mxu1  ;;  %v3429_v35 = vunpack.c.l.b16 %v3393_v43  ;;  %v3990_v2 = vor.u32 %v3989_v37, %v3986_v12  ;;  %v4004_v30 = vor.u32 %v4003_v15, %v4000_v0  ;;  %v3099_v57 = vrot.slane %v3097_v26, 4  ;;  %v10609_v43 = vld [vmem:[#allocation2 + $0x94] sm:$0xf0] }
 0x2ae   :  { %14338 = vst [vmem:[#allocation12_spill] sm:$0xff] %v12535_v56  ;;  %v3116_v56 = vrot.slane %v3114_v42, 5  ;;  %v3102_v16 = vrot.slane %v3100_v29, 5  ;;  %v3163_v53 = vpack.c.b16 %v3154_v1, %v3153_v24  ;;  %v3993_v51 = vshll.u32 %v12551_v28, 16  ;;  %v12561_v37 = vpop.f32.mrf.mxu0 }
 0x2af   :  { %v2648_v19 = vpop.f32.mrf.mxu3  ;;  %v3438_v7 = vpack.c.b16 %v3430_v39, %v3429_v35  ;;  %v4009_v49 = vrot.slane %v4007_v36, 5  ;;  %v3991_v48 = vrot.slane %v3990_v2, 4  ;;  %v4005_v4 = vrot.slane %v4004_v30, 4 }
 0x2b0   :  { %v3117_v63 = vor.u32 %v3116_v56, %v3113_v47  ;;  %v3103_v12 = vor.u32 %v3102_v16, %v3099_v57  ;;  %v3120_v15 = vshll.u32 %v12521_v59, 16  ;;  %v3995_v29 = vrot.slane %v3993_v51, 5 }
 0x2b1   :  { %v12558_v26 = vpop.f32.mrf.mxu2  ;;  %v3106_v35 = vshll.u32 %v12529_v61, 16  ;;  %v9512_v56 = vor.u32 %v10609_v43, %v9511_v11  ;;  %v4174_v11 = vld [vmem:[#allocation2 + $0x18] sm:$0xe] }
 0x2b2   :  { %v3996_v39 = vsel %vm11916_vm11, %v3991_v48, %v3995_v29  ;;  %v3104_v59 = vrot.slane %v3103_v12, 4  ;;  %v3122_v47 = vrot.slane %v3120_v15, 5  ;;  %v9594_v43 = vrot.slane %v4174_v11, 9  ;;  %v10795_v48 = vld [vmem:[#allocation2 + $0x1c] sm:$0x1] }
 0x2b3   :  { %v3108_v51 = vrot.slane %v3106_v35, 5  ;;  %v4227_v12 = vrot.slane %v10795_v48, 5  ;;  %v10796_v35 = vld [vmem:[#allocation2 + $0x14] sm:$0x1]  ;;  %v2854_v48 = vadd.f32 %v12467_v8, %v12372_v38  ;;  %v2855_v38 = vadd.f32 %v12498_v44, %v12393_v31 }
 0x2b4   :  { %4146 = vmatmul.bf16.gmra.mxu0 %v4050_v32  ;;  %v4042_v32 = vunpack.c.l.b16 %v3996_v39 }
 0x2b5   :  { %v2242_v52 = vpop.f32.mrf.mxu1  ;;  %v3109_v36 = vsel %vm11916_vm11, %v3104_v59, %v3108_v51 }
 0x2b6   :  { %v2388_v45 = vadd.f32 %v2387_v55, %v2242_v52  ;;  %3538 = vmatmul.bf16.gmra.mxu2 %v3438_v7  ;;  %v3118_v55 = vrot.slane %v3117_v63, 4  ;;  %v3155_v30 = vunpack.c.l.b16 %v3109_v36  ;;  %v10657_v36 = vld [vmem:[%s14319_s3 + $0x78] sm:$0xff] }
 0x2b7   :  { %v12565_v1 = vpop.f32.mrf.mxu3  ;;  %5145 = vmatpush.bf16.msra.mxu2 %v10657_v36 }
 0x2b8   :  { %v12555_v42 = vadd.f32 %v2648_v19, %v2388_v45  ;;  %3259 = vmatmul.bf16.gmra.mxu1 %v3163_v53  ;;  %v4010_v19 = vsel %vm11916_vm11, %v4005_v4, %v4009_v49  ;;  %v3123_v61 = vsel %vm11916_vm11, %v3118_v55, %v3122_v47  ;;  %v12575_v45 = vpop.f32.mrf.mxu0  ;;  %v4173_v49 = vld [vmem:[#allocation2 + $0x10] sm:$0xe]  ;;  %v4223_v55 = vrot.slane %v10796_v35, 5 }
 0x2b9   :  { %v4043_v24 = vunpack.c.l.b16 %v4010_v19  ;;  %v3156_v52 = vunpack.c.l.b16 %v3123_v61  ;;  %v2392_v57 = vpop.f32.mrf.mxu2  ;;  %v9593_v29 = vrot.slane %v4173_v49, 9 }
 0x2bb   :  { %v4051_v2 = vpack.c.b16 %v4043_v24, %v4042_v32  ;;  %v3164_v53 = vpack.c.b16 %v3156_v52, %v3155_v30  ;;  %v4224_v39 = vsel %vm11869_vm8, %v9593_v29, %v4223_v55  ;;  %v4176_v32 = vld [vmem:[#allocation2 + $0x28] sm:$0xe]  ;;  %v4175_v24 = vld [vmem:[#allocation2 + $0x20] sm:$0xe]  ;;  %v4178_v55 = vld [vmem:[#allocation2 + $0x38] sm:$0xe] }
 0x2bc   :  { %3733 = vmatmul.bf16.gmra.mxu3 %v9512_v56  ;;  %v4228_v56 = vsel %vm11869_vm8, %v9594_v43, %v4227_v12  ;;  %v4302_v59 = vunpack.c.l.b16 %v4224_v39  ;;  %v9596_v52 = vrot.slane %v4176_v32, 9  ;;  %v10656_v39 = vld [vmem:[%s14319_s3 + $0x70] sm:$0xff] }
 0x2bd   :  { %v12563_v0 = vpop.f32.mrf.mxu1  ;;  %v4303_v19 = vunpack.c.l.b16 %v4228_v56  ;;  %v4177_v56 = vld [vmem:[#allocation2 + $0x30] sm:$0xe]  ;;  %5146 = vmatpush.bf16.msra.mxu2 %v10656_v39 }
 0x2bf   :  { %v2653_v7 = vpop.f32.mrf.mxu3  ;;  %v4318_v61 = vpack.c.b16 %v4303_v19, %v4302_v59  ;;  %v9598_v19 = vrot.slane %v4178_v55, 9  ;;  %v4243_v59 = vrot.slane %v12363_v13, 5  ;;  %v2856_v13 = vadd.f32 %v12517_v22, %v12403_v25 }
 0x2c0   :  { %v12601_v29 = vpop.f32.mrf.mxu0  ;;  %v2857_v25 = vadd.f32 %v12547_v23, %v12424_v58  ;;  %v4182_v23 = vld [vmem:[#allocation2 + $0x68] sm:$0xe] }
 0x2c4   :  { %4151 = vmatmul.bf16.gmra.mxu0 %v4051_v2  ;;  %v10797_v2 = vld [vmem:[#allocation2 + $0x2c] sm:$0x1] }
 0x2c5   :  { %v2247_v16 = vpop.f32.mrf.mxu1  ;;  %v4235_v30 = vrot.slane %v10797_v2, 5 }
 0x2c6   :  { %v2393_v4 = vadd.f32 %v2392_v57, %v2247_v16  ;;  %v2853_v57 = vadd.f32 %v12445_v17, %v12338_v21 }
 0x2c7   :  { %v4236_v11 = vsel %vm11869_vm8, %v9596_v52, %v4235_v30  ;;  %v4244_v52 = vsel %vm11869_vm8, %v9598_v19, %v4243_v59 }
 0x2c8   :  { %v12577_v63 = vadd.f32 %v2653_v7, %v2393_v4  ;;  %3264 = vmatmul.bf16.gmra.mxu1 %v3164_v53  ;;  %v9595_v4 = vrot.slane %v4175_v24, 9  ;;  %v10798_v53 = vld [vmem:[#allocation2 + $0x24] sm:$0x1]  ;;  %v4305_v43 = vunpack.c.l.b16 %v4236_v11  ;;  %v12613_v36 = vpop.f32.mrf.mxu0  ;;  %v4307_v30 = vunpack.c.l.b16 %v4244_v52  ;;  %v10655_v11 = vld [vmem:[%s14319_s3 + $0x68] sm:$0xff] }
 0x2c9   :  { %5147 = vmatpush.bf16.msra.mxu2 %v10655_v11  ;;  %v4183_v11 = vld [vmem:[#allocation2 + $0x70] sm:$0xe] }
 0x2cd   :  { %v12579_v15 = vpop.f32.mrf.mxu1 }
 0x2d5   :  { %v3230_v47 = vpop.f32.mrf.mxu1 }
 0x2d6   :  { %v12586_v51 = vadd.f32 %v3230_v47, %v12488_v50  ;;  %v4231_v50 = vrot.slane %v10798_v53, 5  ;;  %v9597_v47 = vrot.slane %v4177_v56, 9  ;;  %v4180_v53 = vld [vmem:[#allocation2 + $0x48] sm:$0xe] }
 0x2d8   :  { %4390 = vmatmul.bf16.vlgmr.msra.gmra.mxu1 %v4318_v61  ;;  %v4232_v49 = vsel %vm11869_vm8, %v9595_v4, %v4231_v50  ;;  %v10799_v61 = vld [vmem:[#allocation2 + $0x34] sm:$0x1]  ;;  %v4179_v4 = vld [vmem:[#allocation2 + $0x40] sm:$0xe]  ;;  %v2837_v50 = vpop.f32.mrf.mxu0 }
 0x2d9   :  { %v4304_v12 = vunpack.c.l.b16 %v4232_v49  ;;  %v4239_v32 = vrot.slane %v10799_v61, 5  ;;  %v9599_v49 = vrot.slane %v4179_v4, 9  ;;  %v4259_v61 = vrot.slane %v12430_v54, 5 }
 0x2da   :  { %v2860_v54 = vadd.f32 %v12601_v29, %v12477_v60  ;;  %v9603_v60 = vrot.slane %v4183_v11, 9  ;;  %v4263_v29 = vrot.slane %v12469_v40, 5  ;;  %v4186_v40 = vld [vmem:[#allocation2 + $0x88] sm:$0xe] }
 0x2db   :  { %v4319_v35 = vpack.c.b16 %v4305_v43, %v4304_v12  ;;  %v4240_v2 = vsel %vm11869_vm8, %v9597_v47, %v4239_v32  ;;  %v4247_v43 = vrot.slane %v12389_v14, 5  ;;  %v4251_v12 = vrot.slane %v12395_v20, 5 }
 0x2dc   :  { %v4306_v31 = vunpack.c.l.b16 %v4240_v2  ;;  %v2858_v14 = vadd.f32 %v12561_v37, %v12438_v18  ;;  %v9602_v47 = vrot.slane %v4182_v23, 9  ;;  %v2859_v32 = vadd.f32 %v12575_v45, %v12457_v5 }
 0x2dd   :  { %v3232_v16 = vpop.f32.mrf.mxu1  ;;  %v4255_v2 = vrot.slane %v12428_v27, 5  ;;  %v4184_v27 = vld [vmem:[#allocation2 + $0x78] sm:$0xe] }
 0x2de   :  { %v12593_v7 = vadd.f32 %v3232_v16, %v2853_v57  ;;  %v4320_v16 = vpack.c.b16 %v4307_v30, %v4306_v31 }
 0x2e0   :  { %v12636_v19 = vpop.f32.mrf.mxu0 }
 0x2e5   :  { %v3235_v21 = vpop.f32.mrf.mxu1 }
 0x2e6   :  { %v12603_v17 = vadd.f32 %v3235_v21, %v2854_v48  ;;  %v9600_v48 = vrot.slane %v4180_v53, 9 }
 0x2e8   :  { %4395 = vmatmul.bf16.gmra.mxu1 %v4319_v35  ;;  %v4248_v35 = vsel %vm11869_vm8, %v9599_v49, %v4247_v43  ;;  %v4252_v55 = vsel %vm11869_vm8, %v9600_v48, %v4251_v12  ;;  %v2842_v52 = vpop.f32.mrf.mxu0  ;;  %v10653_v49 = vld [vmem:[%s14319_s3 + $0x58] sm:$0xff]  ;;  %v9604_v43 = vrot.slane %v4184_v27, 9  ;;  %v4267_v48 = vrot.slane %v12463_v62, 5 }
 0x2e9   :  { %v4308_v56 = vunpack.c.l.b16 %v4248_v35  ;;  %v4309_v39 = vunpack.c.l.b16 %v4252_v55  ;;  %v4264_v55 = vsel %vm11869_vm8, %v9603_v60, %v4263_v29  ;;  %v2862_v62 = vadd.f32 %v2837_v50, %v12519_v33  ;;  %v4187_v60 = vld [vmem:[#allocation2 + $0x90] sm:$0xe]  ;;  %v4188_v29 = vld [vmem:[#allocation2 + $0x98] sm:$0xe] }
 0x2eb   :  { %v4321_v58 = vpack.c.b16 %v4309_v39, %v4308_v56  ;;  %v12674_v39 = vpop.f32.mrf.mxu3 }
 0x2ed   :  { %v3237_v8 = vpop.f32.mrf.mxu1 }
 0x2ee   :  { %v12611_v24 = vadd.f32 %v3237_v8, %v2855_v38  ;;  %v4181_v38 = vld [vmem:[#allocation2 + $0x60] sm:$0xe] }
 0x2ef   :  { %v10654_v8 = vld [vmem:[%s14319_s3 + $0x60] sm:$0xff]  ;;  %v9601_v37 = vrot.slane %v4181_v38, 9 }
 0x2f0   :  { %5148 = vmatpush.bf16.msra.mxu2 %v10654_v8  ;;  %v12659_v53 = vpop.f32.mrf.mxu0  ;;  %v4185_v8 = vld [vmem:[#allocation2 + $0x80] sm:$0xe] }
 0x2f1   :  { %v4256_v31 = vsel %vm11869_vm8, %v9601_v37, %v4255_v2  ;;  %v9605_v50 = vrot.slane %v4185_v8, 9  ;;  %v4271_v37 = vrot.slane %v12508_v9, 5  ;;  %v2864_v9 = vadd.f32 %v2842_v52, %v12555_v42 }
 0x2f2   :  { %v4279_v42 = vrot.slane %v12551_v28, 5  ;;  %v9608_v52 = vrot.slane %v4188_v29, 9  ;;  %v10661_v29 = vld [vmem:[%s14319_s3 + $0x98] sm:$0xff] }
 0x2f3   :  { %v12690_v2 = vpop.f32.mrf.mxu3 }
 0x2f4   :  { %5149 = vmatpush.bf16.msra.mxu2 %v10653_v49 }
 0x2f5   :  { %v3240_v44 = vpop.f32.mrf.mxu1 }
 0x2f6   :  { %v12621_v57 = vadd.f32 %v3240_v44, %v2856_v13  ;;  %v4260_v13 = vsel %vm11869_vm8, %v9602_v47, %v4259_v61  ;;  %v10652_v47 = vld [vmem:[%s14319_s3 + $0x50] sm:$0xff] }
 0x2f7   :  { %v4311_v44 = vunpack.c.l.b16 %v4260_v13 }
 0x2f8   :  { %4400 = vmatmul.bf16.gmra.mxu1 %v4320_v16  ;;  %v4310_v16 = vunpack.c.l.b16 %v4256_v31  ;;  %v2847_v35 = vpop.f32.mrf.mxu0  ;;  %5150 = vmatpush.bf16.msra.mxu2 %v10652_v47  ;;  %v4272_v31 = vsel %vm11869_vm8, %v9605_v50, %v4271_v37  ;;  %v10651_v37 = vld [vmem:[%s14319_s3 + $0x48] sm:$0xff] }
 0x2f9   :  { %v2866_v28 = vadd.f32 %v2847_v35, %v12577_v63  ;;  %v10646_v35 = vld [vmem:[%s14319_s3 + $0x20] sm:$0xff] }
 0x2fa   :  { %v4322_v4 = vpack.c.b16 %v4311_v44, %v4310_v16 }
 0x2fc   :  { %5151 = vmatpush.bf16.msra.mxu2 %v10651_v37 }
 0x2fd   :  { %v3242_v22 = vpop.f32.mrf.mxu1 }
 0x2fe   :  { %v12630_v21 = vadd.f32 %v3242_v22, %v2857_v25  ;;  %v4268_v25 = vsel %vm11869_vm8, %v9604_v43, %v4267_v48  ;;  %v12670_v22 = vpop.f32.mrf.mxu2  ;;  %v12710_v48 = vpop.f32.mrf.mxu3 }
 0x2ff   :  { %v4313_v56 = vunpack.c.l.b16 %v4268_v25  ;;  %v9607_v25 = vrot.slane %v4187_v60, 9 }
 0x300   :  { %v12684_v61 = vpop.f32.mrf.mxu0 }
 0x305   :  { %v3245_v20 = vpop.f32.mrf.mxu1 }
 0x306   :  { %v12640_v59 = vadd.f32 %v3245_v20, %v2858_v14  ;;  %v4312_v14 = vunpack.c.l.b16 %v4264_v55  ;;  %v12679_v38 = vpop.f32.mrf.mxu2  ;;  %v4283_v55 = vrot.slane %v12549_v34, 5  ;;  %v10647_v34 = vld [vmem:[%s14319_s3 + $0x28] sm:$0xff] }
 0x308   :  { %4405 = vmatmul.bf16.gmra.mxu1 %v4321_v58  ;;  %v4323_v23 = vpack.c.b16 %v4313_v56, %v4312_v14  ;;  %v4117_v27 = vpop.f32.mrf.mxu0 }
 0x30d   :  { %v3247_v18 = vpop.f32.mrf.mxu1 }
 0x30e   :  { %v12649_v30 = vadd.f32 %v3247_v18, %v2859_v32  ;;  %v9606_v32 = vrot.slane %v4186_v40, 9  ;;  %v4275_v18 = vrot.slane %v12510_v6, 5  ;;  %v10665_v6 = vld [vmem:[%s14319_s3 + $0xb8] sm:$0xff]  ;;  %v12702_v16 = vpop.f32.mrf.mxu2  ;;  %v12724_v40 = vpop.f32.mrf.mxu3 }
 0x30f   :  { %5548 = vmatpush.bf16.msrb.mxu0 %v10665_v6 }
 0x310   :  { %v4276_v13 = vsel %vm11869_vm8, %v9606_v32, %v4275_v18  ;;  %v12718_v14 = vpop.f32.mrf.mxu0  ;;  %v10681_v32 = vld [vmem:[%s14319_s3 + $0xf8] sm:$0xff]  ;;  %v10664_v18 = vld [vmem:[%s14319_s3 + $0xb0] sm:$0xff] }
 0x311   :  { %v4315_v44 = vunpack.c.l.b16 %v4276_v13  ;;  %5742 = vmatpush.bf16.msrb.mxu1 %v10681_v32  ;;  %v10659_v32 = vld [vmem:[%s14319_s3 + $0x88] sm:$0xff] }
 0x313   :  { %5549 = vmatpush.bf16.msrb.mxu0 %v10664_v18 }
 0x315   :  { %v3250_v5 = vpop.f32.mrf.mxu1 }
 0x316   :  { %v12657_v45 = vadd.f32 %v3250_v5, %v2860_v54  ;;  %v10649_v54 = vld [vmem:[%s14319_s3 + $0x38] sm:$0xff]  ;;  %v4314_v5 = vunpack.c.l.b16 %v4272_v31  ;;  %v10680_v31 = vld [vmem:[%s14319_s3 + $0xf0] sm:$0xff] }
 0x317   :  { %5290 = vmatpush.bf16.msra.mxu3 %v10649_v54  ;;  %5743 = vmatpush.bf16.msrb.mxu1 %v10680_v31 }
 0x318   :  { %4410 = vmatmul.bf16.gmra.mxu1 %v4322_v4  ;;  %v10648_v4 = vld [vmem:[%s14319_s3 + $0x30] sm:$0xff]  ;;  %v4324_v43 = vpack.c.b16 %v4315_v44, %v4314_v5  ;;  %v10663_v44 = vld [vmem:[%s14319_s3 + $0xa8] sm:$0xff]  ;;  %v12752_v6 = vpop.f32.mrf.mxu0  ;;  %v12756_v5 = vpop.f32.mrf.mxu3 }
 0x319   :  { %5550 = vmatpush.bf16.msrb.mxu0 %v10663_v44 }
 0x31b   :  { %5291 = vmatpush.bf16.msra.mxu3 %v10648_v4  ;;  %v10645_v4 = vld [vmem:[%s14319_s3 + $0x18] sm:$0xff] }
 0x31d   :  { %v12665_v12 = vpop.f32.mrf.mxu1 }
 0x31f   :  { %5292 = vmatpush.bf16.msra.mxu3 %v10647_v34 }
 0x320   :  { %v12797_v34 = vpop.f32.mrf.mxu3 }
 0x323   :  { %5293 = vmatpush.bf16.msra.mxu3 %v10646_v35 }
 0x325   :  { %v3255_v20 = vpop.f32.mrf.mxu1 }
 0x326   :  { %v12677_v58 = vadd.f32 %v3255_v20, %v2862_v62  ;;  %v12716_v62 = vpop.f32.mrf.mxu2  ;;  %v4280_v20 = vsel %vm11869_vm8, %v9607_v25, %v4279_v42 }
 0x327   :  { %v4316_v8 = vunpack.c.l.b16 %v4280_v20  ;;  %5294 = vmatpush.bf16.msra.mxu3 %v10645_v4 }
 0x328   :  { %4415 = vmatmul.bf16.gmra.mxu1 %v4323_v23  ;;  %v4284_v23 = vsel %vm11869_vm8, %v9608_v52, %v4283_v55  ;;  %v12781_v52 = vpop.f32.mrf.mxu0  ;;  %v3545_v55 = vadd.f32 %v12702_v16, %v12593_v7  ;;  %v10642_v16 = vld [vmem:[%s14319_s3] sm:$0xff] }
 0x329   :  { %v4317_v47 = vunpack.c.l.b16 %v4284_v23  ;;  %v10643_v23 = vld [vmem:[%s14319_s3 + $0x8] sm:$0xff] }
 0x32a   :  { %v3740_v18 = vadd.f32 %v12710_v48, %v3545_v55  ;;  %v10658_v48 = vld [vmem:[%s14319_s3 + $0x80] sm:$0xff] }
 0x32b   :  { %v4325_v63 = vpack.c.b16 %v4317_v47, %v4316_v8  ;;  %v10677_v8 = vld [vmem:[%s14319_s3 + $0xd8] sm:$0xff] }
 0x32c   :  { %v4158_v44 = vadd.f32 %v12718_v14, %v3740_v18  ;;  %v4683_v14 = vld [vmem:[#allocation3 + $0xc] sm:$0x1] }
 0x32d   :  { %v12687_v33 = vpop.f32.mrf.mxu1 }
 0x32e   :  { %v12750_v54 = vpop.f32.mrf.mxu2 }
 0x330   :  { %v12820_v4 = vpop.f32.mrf.mxu0 }
 0x335   :  { %v3260_v11 = vpop.f32.mrf.mxu1 }
 0x336   :  { %v12708_v49 = vadd.f32 %v3260_v11, %v2864_v9  ;;  %v3544_v9 = vadd.f32 %v12679_v38, %v12586_v51  ;;  %v10679_v11 = vld [vmem:[%s14319_s3 + $0xe8] sm:$0xff]  ;;  %v10644_v51 = vld [vmem:[%s14319_s3 + $0x10] sm:$0xff]  ;;  %v10678_v38 = vld [vmem:[%s14319_s3 + $0xe0] sm:$0xff]  ;;  %v12779_v42 = vpop.f32.mrf.mxu2 }
 0x337   :  { %5744 = vmatpush.bf16.msrb.mxu1 %v10679_v11  ;;  %5295 = vmatpush.bf16.msra.mxu3 %v10644_v51 }
 0x338   :  { %4420 = vmatmul.bf16.gmra.mxu1 %v4324_v43  ;;  %v10662_v43 = vld [vmem:[%s14319_s3 + $0xa0] sm:$0xff]  ;;  %v3739_v25 = vadd.f32 %v12690_v2, %v3544_v9  ;;  %v10660_v2 = vld [vmem:[%s14319_s3 + $0x90] sm:$0xff]  ;;  %v10675_v9 = vld [vmem:[%s14319_s3 + $0xc8] sm:$0xff] }
 0x339   :  { %5551 = vmatpush.bf16.msrb.mxu0 %v10662_v43 }
 0x33a   :  { %v4157_v20 = vadd.f32 %v4117_v27, %v3739_v25  ;;  %v10676_v27 = vld [vmem:[%s14319_s3 + $0xd0] sm:$0xff]  ;;  %v12826_v25 = vpop.f32.mrf.mxu3 }
 0x33b   :  { %5745 = vmatpush.bf16.msrb.mxu1 %v10678_v38  ;;  %5296 = vmatpush.bf16.msra.mxu3 %v10643_v23 }
 0x33d   :  { %v12714_v56 = vpop.f32.mrf.mxu1  ;;  %5552 = vmatpush.bf16.msrb.mxu0 %v10661_v29 }
 0x33e   :  { %v12811_v35 = vpop.f32.mrf.mxu2 }
 0x33f   :  { %5746 = vmatpush.bf16.msrb.mxu1 %v10677_v8  ;;  %5297 = vmatpush.bf16.msra.mxu3 %v10642_v16  ;;  %v3547_v16 = vadd.f32 %v12750_v54, %v12611_v24  ;;  %v12840_v24 = vpop.f32.mrf.mxu0  ;;  %v4686_v54 = vld [vmem:[#allocation3 + $0x10] sm:$0xf] }
 0x341   :  { %5553 = vmatpush.bf16.msrb.mxu0 %v10660_v2 }
 0x343   :  { %5747 = vmatpush.bf16.msrb.mxu1 %v10676_v27 }
 0x345   :  { %v3265_v50 = vpop.f32.mrf.mxu1  ;;  %5554 = vmatpush.bf16.msrb.mxu0 %v10659_v32  ;;  %v4776_v32 = vld [vmem:[#allocation3] sm:$0xf] }
 0x346   :  { %v12739_v13 = vadd.f32 %v3265_v50, %v2866_v28  ;;  %v10650_v28 = vld [vmem:[%s14319_s3 + $0x40] sm:$0xff] }
 0x347   :  { %5152 = vmatpush.bf16.msra.mxu2 %v10650_v28  ;;  %5748 = vmatpush.bf16.msrb.mxu1 %v10675_v9  ;;  %v5339_v28 = vld [vmem:[#allocation3] sm:$0xe] }
 0x348   :  { %4425 = vmatmul.bf16.gmra.mxu1 %v4325_v63  ;;  %v3546_v63 = vadd.f32 %v12716_v62, %v12603_v17  ;;  %v10674_v17 = vld [vmem:[%s14319_s3 + $0xc0] sm:$0xff]  ;;  %v4680_v62 = vld [vmem:[#allocation3 + $0x8] sm:$0xf] }
 0x349   :  { %5555 = vmatpush.bf16.msrb.mxu0 %v10658_v48 }
 0x34a   :  { %v3741_v29 = vadd.f32 %v12724_v40, %v3546_v63  ;;  %v4828_v63 = vshll.u32 %v4776_v32, 16 }
 0x34b   :  { %5749 = vmatpush.bf16.msrb.mxu1 %v10674_v17  ;;  %v3742_v17 = vadd.f32 %v12756_v5, %v3547_v16  ;;  %v3548_v16 = vadd.f32 %v12779_v42, %v12621_v57 }
 0x34c   :  { %v4159_v27 = vadd.f32 %v12752_v6, %v3741_v29 }
 0x34d   :  { %v12767_v60 = vpop.f32.mrf.mxu1 }
 0x355   :  { %v4391_v47 = vpop.f32.mrf.mxu1 }
 0x356   :  { %v4431_v7 = vadd.f32 %v4391_v47, %v4157_v20 }
 0x358   :  { %v4447_v50 = vmax.f32 %v4431_v7, 0.0  ;;  %v4808_v7 = vld [vmem:[#allocation3 + $0x4] sm:$0x1] }
 0x35a   :  { %v4503_v37 = vpack.c.bf16 %v4447_v50, %v4447_v50  ;;  %v9769_v50 = vrot.slane %v5339_v28, 9 }
 0x35c   :  { %v4520_v31 = vshrl.u32 %v4503_v37, 16  ;;  %v4523_v51 = vshll.u32 %v4503_v37, 16  ;;  %v4825_v37 = vshrl.u32 %v4776_v32, 16 }
 0x35d   :  { %v4393_v11 = vpop.f32.mrf.mxu1 }
 0x35e   :  { %v4522_v43 = vrot.slane %v4520_v31, 7  ;;  %v4432_v38 = vadd.f32 %v4393_v11, %v4158_v44  ;;  %v10689_v31 = vld [vmem:[%s14319_s3 + $0x138] sm:$0xff]  ;;  %v12838_v44 = vpop.f32.mrf.mxu2  ;;  %v4827_v6 = vrot.slane %v4825_v37, 4 }
 0x35f   :  { %6160 = vmatpush.bf16.msrb.mxu2 %v10689_v31 }
 0x360   :  { %v4525_v55 = vor.u32 %v4523_v51, %v4522_v43  ;;  %v4526_v20 = vrot.slane %v4522_v43, 4  ;;  %v4448_v23 = vmax.f32 %v4432_v38, 0.0  ;;  %v5389_v43 = vrot.slane %v4808_v7, 5  ;;  %v4689_v51 = vld [vmem:[#allocation3 + $0x14] sm:$0x1] }
 0x361   :  { %v4830_v38 = vrot.slane %v4828_v63, 5  ;;  %v4160_v63 = vadd.f32 %v12781_v52, %v3742_v17 }
 0x362   :  { %v4681_v8 = vsel %vm11756_vm4, %v4525_v55, %v4680_v62  ;;  %v4684_v2 = vsel %vm11767_vm5, %v4526_v20, %v4683_v14  ;;  %v4504_v47 = vpack.c.bf16 %v4448_v23, %v4448_v23  ;;  %v9707_v55 = vld [vmem:[#allocation3] sm:$0xf]  ;;  %v4834_v23 = vshll.u32 %v4808_v7, 16 }
 0x363   :  { %4682 = vst [vmem:[#allocation3 + $0x8] sm:$0xf] %v4681_v8  ;;  %v4831_v20 = vor.u32 %v4830_v38, %v4827_v6  ;;  %v12843_v8 = vpop.f32.mrf.mxu3  ;;  %v5390_v5 = vsel %vm11869_vm8, %v9769_v50, %v5389_v43  ;;  %v3743_v38 = vadd.f32 %v12797_v34, %v3548_v16 }
 0x364   :  { %4685 = vst [vmem:[#allocation3 + $0xc] sm:$0x1] %v4684_v2  ;;  %v4528_v40 = vshrl.u32 %v4504_v47, 16  ;;  %v4531_v48 = vshll.u32 %v4504_v47, 16  ;;  %v4836_v6 = vrot.slane %v4834_v23, 5  ;;  %v12859_v23 = vpop.f32.mrf.mxu0 }
 0x365   :  { %v4396_v18 = vpop.f32.mrf.mxu1 }
 0x366   :  { %v4530_v9 = vrot.slane %v4528_v40, 7  ;;  %v4433_v11 = vadd.f32 %v4396_v18, %v4159_v27 }
 0x368   :  { %v4533_v62 = vor.u32 %v4531_v48, %v4530_v9  ;;  %v4534_v14 = vrot.slane %v4530_v9, 4  ;;  %v4449_v29 = vmax.f32 %v4433_v11, 0.0  ;;  %v5468_v11 = vunpack.c.l.b16 %v5390_v5 }
 0x36a   :  { %v4687_v2 = vsel %vm11756_vm4, %v4533_v62, %v4686_v54  ;;  %v4690_v47 = vsel %vm11767_vm5, %v4534_v14, %v4689_v51  ;;  %v4505_v28 = vpack.c.bf16 %v4449_v29, %v4449_v29  ;;  %v10634_v40 = vld [vmem:[#allocation3 + $0x4] sm:$0xf0]  ;;  %v4832_v51 = vrot.slane %v4831_v20, 4  ;;  %v4692_v62 = vld [vmem:[#allocation3 + $0x18] sm:$0xf] }
 0x36b   :  { %v5340_v27 = vld [vmem:[#allocation3 + $0x8] sm:$0xe]  ;;  %4688 = vst [vmem:[#allocation3 + $0x10] sm:$0xf] %v4687_v2  ;;  %v9708_v32 = vor.u32 %v10634_v40, %v9707_v55  ;;  %v4809_v7 = vld [vmem:[#allocation3 + $0xc] sm:$0x1]  ;;  %v12857_v55 = vpop.f32.mrf.mxu2 }
 0x36c   :  { %v9770_v18 = vrot.slane %v5340_v27, 9  ;;  %4691 = vst [vmem:[#allocation3 + $0x14] sm:$0x1] %v4690_v47  ;;  %v4536_v37 = vshrl.u32 %v4505_v28, 16  ;;  %v5393_v31 = vrot.slane %v4809_v7, 5  ;;  %v4539_v9 = vshll.u32 %v4505_v28, 16 }
 0x36d   :  { %v4398_v48 = vpop.f32.mrf.mxu1  ;;  %5298 = vmatmul.bf16.vlgmr.msra.gmra.mxu3 %v9708_v32  ;;  %v4777_v54 = vld [vmem:[#allocation3 + $0x8] sm:$0xf]  ;;  %v4695_v14 = vld [vmem:[#allocation3 + $0x1c] sm:$0x1]  ;;  %v4848_v17 = vshll.u32 %v4809_v7, 16  ;;  %v4837_v7 = vsel %vm11916_vm11, %v4832_v51, %v4836_v6 }
 0x36e   :  { %v4538_v50 = vrot.slane %v4536_v37, 7  ;;  %v4434_v43 = vadd.f32 %v4398_v48, %v4160_v63  ;;  %v5394_v57 = vsel %vm11869_vm8, %v9770_v18, %v5393_v31  ;;  %v4839_v42 = vshrl.u32 %v4777_v54, 16  ;;  %v9851_v32 = vld [vmem:[#allocation3 + $0x8] sm:$0xf] }
 0x36f   :  { %v5469_v29 = vunpack.c.l.b16 %v5394_v57  ;;  %v4842_v52 = vshll.u32 %v4777_v54, 16  ;;  %v3549_v63 = vadd.f32 %v12811_v35, %v12630_v21  ;;  %v5065_v6 = vunpack.c.l.b16 %v4837_v7 }
 0x370   :  { %v4541_v2 = vor.u32 %v4539_v9, %v4538_v50  ;;  %v4542_v47 = vrot.slane %v4538_v50, 4  ;;  %v4450_v28 = vmax.f32 %v4434_v43, 0.0  ;;  %v4841_v20 = vrot.slane %v4839_v42, 4 }
 0x371   :  { %v5484_v40 = vpack.c.b16 %v5469_v29, %v5468_v11  ;;  %v4844_v27 = vrot.slane %v4842_v52, 5  ;;  %v12871_v11 = vpop.f32.mrf.mxu3  ;;  %v4161_v50 = vadd.f32 %v12820_v4, %v3743_v38  ;;  %v4850_v43 = vrot.slane %v4848_v17, 5  ;;  %v4698_v4 = vld [vmem:[#allocation3 + $0x20] sm:$0xf]  ;;  %v4701_v38 = vld [vmem:[#allocation3 + $0x24] sm:$0x1] }
 0x372   :  { %v4693_v5 = vsel %vm11756_vm4, %v4541_v2, %v4692_v62  ;;  %v4696_v34 = vsel %vm11767_vm5, %v4542_v47, %v4695_v14  ;;  %v4506_v16 = vpack.c.bf16 %v4450_v28, %v4450_v28  ;;  %v10666_v18 = vld [vmem:[#allocation3 + $0xc] sm:$0xf0]  ;;  %v3744_v47 = vadd.f32 %v12826_v25, %v3549_v63 }
 0x373   :  { %v5341_v37 = vld [vmem:[#allocation3 + $0x10] sm:$0xe]  ;;  %4694 = vst [vmem:[#allocation3 + $0x18] sm:$0xf] %v4693_v5  ;;  %5556 = vmatmul.bf16.vlgmr.msrb.gmra.mxu0 %v5484_v40  ;;  %v9852_v31 = vor.u32 %v10666_v18, %v9851_v32  ;;  %v4845_v9 = vor.u32 %v4844_v27, %v4841_v20  ;;  %v12869_v48 = vld [vmem:[#allocation3 + $0x14] sm:$0x1]  ;;  %v12885_v25 = vpop.f32.mrf.mxu2 }
 0x374   :  { %4697 = vst [vmem:[#allocation3 + $0x1c] sm:$0x1] %v4696_v34  ;;  %v4544_v54 = vshrl.u32 %v4506_v16, 16  ;;  %v9771_v42 = vrot.slane %v5341_v37, 9  ;;  %v5397_v21 = vrot.slane %v12869_v48, 5  ;;  %v10688_v62 = vld [vmem:[%s14319_s3 + $0x130] sm:$0xff]  ;;  %v3550_v34 = vadd.f32 %v12838_v44, %v12640_v59 }
 0x375   :  { %v4401_v57 = vpop.f32.mrf.mxu1  ;;  %5750 = vmatmul.bf16.vlgmr.msrb.gmra.mxu1 %v9852_v31  ;;  %v4846_v51 = vrot.slane %v4845_v9, 4  ;;  %v4778_v35 = vld [vmem:[#allocation3 + $0x10] sm:$0xf]  ;;  %v4547_v29 = vshll.u32 %v4506_v16, 16  ;;  %6161 = vmatpush.bf16.msrb.mxu2 %v10688_v62 }
 0x376   :  { %v4546_v14 = vrot.slane %v4544_v54, 7  ;;  %v4435_v52 = vadd.f32 %v4401_v57, %v4161_v50  ;;  %v4853_v2 = vshrl.u32 %v4778_v35, 16  ;;  %v4856_v28 = vshll.u32 %v4778_v35, 16  ;;  %v9711_v9 = vld [vmem:[#allocation3 + $0x10] sm:$0xf] }
 0x377   :  { %v4851_v17 = vsel %vm11916_vm11, %v4846_v51, %v4850_v43  ;;  %v5398_v16 = vsel %vm11869_vm8, %v9771_v42, %v5397_v21  ;;  %v12891_v43 = vpop.f32.mrf.mxu0  ;;  %v14339_v42 = vld [vmem:[#allocation9_spill] sm:$0xff]  ;;  %v14340_v21 = vld [vmem:[#allocation7_spill] sm:$0xff] }
 0x378   :  { %v4549_v20 = vor.u32 %v4547_v29, %v4546_v14  ;;  %v4550_v40 = vrot.slane %v4546_v14, 4  ;;  %v4451_v27 = vmax.f32 %v4435_v52, 0.0  ;;  %v5066_v5 = vunpack.c.l.b16 %v4851_v17 }
 0x379   :  { %v4855_v32 = vrot.slane %v4853_v2, 4  ;;  %v4858_v18 = vrot.slane %v4856_v28, 5  ;;  %v2380_v35 = vadd.f32 %v14340_v21, %v14339_v42  ;;  %v4162_v14 = vadd.f32 %v12840_v24, %v3744_v47  ;;  %v12898_v28 = vpop.f32.mrf.mxu3  ;;  %v4707_v24 = vld [vmem:[#allocation3 + $0x2c] sm:$0x1] }
 0x37a   :  { %v4699_v7 = vsel %vm11756_vm4, %v4549_v20, %v4698_v4  ;;  %v4702_v37 = vsel %vm11767_vm5, %v4550_v40, %v4701_v38  ;;  %v4507_v63 = vpack.c.bf16 %v4451_v27, %v4451_v27  ;;  %v5081_v31 = vpack.c.b16 %v5066_v5, %v5065_v6  ;;  %v10635_v54 = vld [vmem:[#allocation3 + $0x14] sm:$0xf0]  ;;  %v4704_v40 = vld [vmem:[#allocation3 + $0x28] sm:$0xf] }
 0x37b   :  { %v5342_v50 = vld [vmem:[#allocation3 + $0x18] sm:$0xe]  ;;  %4700 = vst [vmem:[#allocation3 + $0x20] sm:$0xf] %v4699_v7  ;;  %v9712_v59 = vor.u32 %v10635_v54, %v9711_v9  ;;  %v4811_v44 = vld [vmem:[#allocation3 + $0x1c] sm:$0x1]  ;;  %v4859_v51 = vor.u32 %v4858_v18, %v4855_v32  ;;  %v3745_v6 = vadd.f32 %v12843_v8, %v3550_v34  ;;  %v5470_v4 = vunpack.c.l.b16 %v5398_v16 }
 0x37c   :  { %v9772_v57 = vrot.slane %v5342_v50, 9  ;;  %4703 = vst [vmem:[#allocation3 + $0x24] sm:$0x1] %v4702_v37  ;;  %v4552_v62 = vshrl.u32 %v4507_v63, 16  ;;  %5153 = vmatmul.bf16.vlgmr.msra.gmra.mxu2 %v5081_v31  ;;  %v5401_v29 = vrot.slane %v4811_v44, 5  ;;  %v4555_v52 = vshll.u32 %v4507_v63, 16 }
 0x37d   :  { %v4403_v2 = vpop.f32.mrf.mxu1  ;;  %5303 = vmatmul.bf16.gmra.mxu3 %v9712_v59  ;;  %v4779_v38 = vld [vmem:[#allocation3 + $0x18] sm:$0xf]  ;;  %v4862_v17 = vshll.u32 %v12869_v48, 16  ;;  %v4860_v18 = vrot.slane %v4859_v51, 4  ;;  %v4876_v34 = vshll.u32 %v4811_v44, 16  ;;  %v3551_v48 = vadd.f32 %v12857_v55, %v12649_v30  ;;  %v14341_v21 = vld [vmem:[#allocation8_spill] sm:$0xff]  ;;  %v12911_v55 = vpop.f32.mrf.mxu2 }
 0x37e   :  { %v4554_v20 = vrot.slane %v4552_v62, 7  ;;  %v4436_v27 = vadd.f32 %v4403_v2, %v4162_v14  ;;  %v5402_v5 = vsel %vm11869_vm8, %v9772_v57, %v5401_v29  ;;  %v4867_v32 = vshrl.u32 %v4779_v38, 16  ;;  %v9855_v51 = vld [vmem:[#allocation3 + $0x18] sm:$0xf] }
 0x37f   :  { %v5471_v47 = vunpack.c.l.b16 %v5402_v5  ;;  %v4870_v8 = vshll.u32 %v4779_v38, 16  ;;  %v4864_v9 = vrot.slane %v4862_v17, 5  ;;  %v2667_v62 = vadd.f32 %v14341_v21, %v2380_v35 }
 0x380   :  { %v4557_v7 = vor.u32 %v4555_v52, %v4554_v20  ;;  %v4558_v37 = vrot.slane %v4554_v20, 4  ;;  %v4452_v16 = vmax.f32 %v4436_v27, 0.0  ;;  %v4869_v63 = vrot.slane %v4867_v32, 4  ;;  %v12917_v20 = vpop.f32.mrf.mxu0 }
 0x381   :  { %v5485_v31 = vpack.c.b16 %v5471_v47, %v5470_v4  ;;  %v4872_v54 = vrot.slane %v4870_v8, 5  ;;  %v4163_v2 = vadd.f32 %v12859_v23, %v3745_v6  ;;  %v4865_v4 = vsel %vm11916_vm11, %v4860_v18, %v4864_v9  ;;  %v4710_v8 = vld [vmem:[#allocation3 + $0x30] sm:$0xf] }
 0x382   :  { %v4705_v50 = vsel %vm11756_vm4, %v4557_v7, %v4704_v40  ;;  %v4708_v59 = vsel %vm11767_vm5, %v4558_v37, %v4707_v24  ;;  %v4508_v57 = vpack.c.bf16 %v4452_v16, %v4452_v16  ;;  %v10667_v42 = vld [vmem:[#allocation3 + $0x1c] sm:$0xf0]  ;;  %v4878_v38 = vrot.slane %v4876_v34, 5  ;;  %v10687_v24 = vld [vmem:[%s14319_s3 + $0x128] sm:$0xff]  ;;  %v4713_v34 = vld [vmem:[#allocation3 + $0x34] sm:$0x1] }
 0x383   :  { %v5343_v44 = vld [vmem:[#allocation3 + $0x20] sm:$0xe]  ;;  %4706 = vst [vmem:[#allocation3 + $0x28] sm:$0xf] %v4705_v50  ;;  %5561 = vmatmul.bf16.gmra.mxu0 %v5485_v31  ;;  %v9856_v14 = vor.u32 %v10667_v42, %v9855_v51  ;;  %v4873_v29 = vor.u32 %v4872_v54, %v4869_v63  ;;  %v12909_v30 = vld [vmem:[#allocation3 + $0x24] sm:$0x1]  ;;  %v3746_v17 = vadd.f32 %v12871_v11, %v3551_v48  ;;  %v5067_v37 = vunpack.c.l.b16 %v4865_v4  ;;  %v12927_v63 = vpop.f32.mrf.mxu3 }
 0x384   :  { %4709 = vst [vmem:[#allocation3 + $0x2c] sm:$0x1] %v4708_v59  ;;  %v4560_v52 = vshrl.u32 %v4508_v57, 16  ;;  %v9773_v27 = vrot.slane %v5343_v44, 9  ;;  %v5405_v5 = vrot.slane %v12909_v30, 5  ;;  %v4563_v6 = vshll.u32 %v4508_v57, 16  ;;  %6162 = vmatpush.bf16.msrb.mxu2 %v10687_v24 }
 0x385   :  { %v4406_v35 = vpop.f32.mrf.mxu1  ;;  %5755 = vmatmul.bf16.gmra.mxu1 %v9856_v14  ;;  %v4874_v40 = vrot.slane %v4873_v29, 4  ;;  %v4780_v32 = vld [vmem:[#allocation3 + $0x20] sm:$0xf]  ;;  %v3552_v11 = vadd.f32 %v12885_v25, %v12657_v45  ;;  %v14342_v50 = vld [vmem:[#allocation12_spill] sm:$0xff]  ;;  %v14343_v59 = vld [vmem:[#allocation10_spill] sm:$0xff]  ;;  %v2861_v4 = vadd.f32 %v12613_v36, %v2667_v62  ;;  %v4164_v24 = vadd.f32 %v12891_v43, %v3746_v17 }
 0x386   :  { %v4562_v23 = vrot.slane %v4560_v52, 7  ;;  %v4437_v47 = vadd.f32 %v4406_v35, %v4163_v2  ;;  %v4881_v18 = vshrl.u32 %v4780_v32, 16  ;;  %v4884_v16 = vshll.u32 %v4780_v32, 16  ;;  %v9715_v29 = vld [vmem:[#allocation3 + $0x20] sm:$0xf] }
 0x387   :  { %v4879_v7 = vsel %vm11916_vm11, %v4874_v40, %v4878_v38  ;;  %v2385_v57 = vadd.f32 %v14343_v59, %v14342_v50  ;;  %v5406_v45 = vsel %vm11869_vm8, %v9773_v27, %v5405_v5  ;;  %v3747_v5 = vadd.f32 %v12898_v28, %v3552_v11  ;;  %v4719_v43 = vld [vmem:[#allocation3 + $0x3c] sm:$0x1] }
 0x388   :  { %v4565_v48 = vor.u32 %v4563_v6, %v4562_v23  ;;  %v4566_v31 = vrot.slane %v4562_v23, 4  ;;  %v4453_v9 = vmax.f32 %v4437_v47, 0.0  ;;  %v5068_v54 = vunpack.c.l.b16 %v4879_v7 }
 0x389   :  { %v4883_v25 = vrot.slane %v4881_v18, 4  ;;  %v4886_v51 = vrot.slane %v4884_v16, 5  ;;  %v3279_v6 = vadd.f32 %v12665_v12, %v2861_v4  ;;  %v4890_v62 = vshll.u32 %v12909_v30, 16 }
 0x38a   :  { %v4711_v42 = vsel %vm11756_vm4, %v4565_v48, %v4710_v8  ;;  %v4714_v44 = vsel %vm11767_vm5, %v4566_v31, %v4713_v34  ;;  %v4509_v21 = vpack.c.bf16 %v4453_v9, %v4453_v9  ;;  %v5082_v14 = vpack.c.b16 %v5068_v54, %v5067_v37  ;;  %v10636_v52 = vld [vmem:[#allocation3 + $0x24] sm:$0xf0]  ;;  %v3529_v34 = vpop.f32.mrf.mxu2  ;;  %v4716_v37 = vld [vmem:[#allocation3 + $0x38] sm:$0xf]  ;;  %v12944_v48 = vpop.f32.mrf.mxu0 }
 0x38b   :  { %v5344_v2 = vld [vmem:[#allocation3 + $0x28] sm:$0xe]  ;;  %4712 = vst [vmem:[#allocation3 + $0x30] sm:$0xf] %v4711_v42  ;;  %v9716_v38 = vor.u32 %v10636_v52, %v9715_v29  ;;  %v4813_v35 = vld [vmem:[#allocation3 + $0x2c] sm:$0x1]  ;;  %v4887_v27 = vor.u32 %v4886_v51, %v4883_v25  ;;  %v5472_v8 = vunpack.c.l.b16 %v5406_v45  ;;  %v3553_v30 = vadd.f32 %v12911_v55, %v3279_v6 }
 0x38c   :  { %v9774_v40 = vrot.slane %v5344_v2, 9  ;;  %4715 = vst [vmem:[#allocation3 + $0x34] sm:$0x1] %v4714_v44  ;;  %v4568_v32 = vshrl.u32 %v4509_v21, 16  ;;  %5158 = vmatmul.bf16.gmra.mxu2 %v5082_v14  ;;  %v5409_v23 = vrot.slane %v4813_v35, 5  ;;  %v4571_v47 = vshll.u32 %v4509_v21, 16  ;;  %v3724_v44 = vpop.f32.mrf.mxu3 }
 0x38d   :  { %v4408_v18 = vpop.f32.mrf.mxu1  ;;  %5308 = vmatmul.bf16.gmra.mxu3 %v9716_v38  ;;  %v4781_v36 = vld [vmem:[#allocation3 + $0x28] sm:$0xf]  ;;  %v4888_v12 = vrot.slane %v4887_v27, 4  ;;  %v4904_v9 = vshll.u32 %v4813_v35, 16  ;;  %v4892_v51 = vrot.slane %v4890_v62, 5  ;;  %v14344_v38 = vld [vmem:[#allocation11_spill] sm:$0xff] }
 0x38e   :  { %v4570_v7 = vrot.slane %v4568_v32, 7  ;;  %v4438_v16 = vadd.f32 %v4408_v18, %v4164_v24  ;;  %v5410_v28 = vsel %vm11869_vm8, %v9774_v40, %v5409_v23  ;;  %v4895_v11 = vshrl.u32 %v4781_v36, 16  ;;  %v9859_v52 = vld [vmem:[#allocation3 + $0x28] sm:$0xf] }
 0x38f   :  { %v5473_v17 = vunpack.c.l.b16 %v5410_v28  ;;  %v4898_v31 = vshll.u32 %v4781_v36, 16  ;;  %v2669_v35 = vadd.f32 %v14344_v38, %v2385_v57  ;;  %v4165_v24 = vadd.f32 %v12917_v20, %v3747_v5 }
 0x390   :  { %v4573_v54 = vor.u32 %v4571_v47, %v4570_v7  ;;  %v4574_v50 = vrot.slane %v4570_v7, 4  ;;  %v4454_v59 = vmax.f32 %v4438_v16, 0.0  ;;  %v4897_v45 = vrot.slane %v4895_v11, 4  ;;  %v10686_v7 = vld [vmem:[%s14319_s3 + $0x120] sm:$0xff] }
 0x391   :  { %v5486_v25 = vpack.c.b16 %v5473_v17, %v5472_v8  ;;  %v4900_v42 = vrot.slane %v4898_v31, 5  ;;  %v4893_v23 = vsel %vm11916_vm11, %v4888_v12, %v4892_v51  ;;  %v4906_v6 = vrot.slane %v4904_v9, 5  ;;  %v4722_v11 = vld [vmem:[#allocation3 + $0x40] sm:$0xf]  ;;  %6163 = vmatpush.bf16.msrb.mxu2 %v10686_v7  ;;  %v4728_v7 = vld [vmem:[#allocation3 + $0x58] sm:$0xf] }
 0x392   :  { %v4717_v21 = vsel %vm11756_vm4, %v4573_v54, %v4716_v37  ;;  %v4720_v14 = vsel %vm11767_vm5, %v4574_v50, %v4719_v43  ;;  %v4510_v29 = vpack.c.bf16 %v4454_v59, %v4454_v59  ;;  %v10668_v2 = vld [vmem:[#allocation3 + $0x2c] sm:$0xf0]  ;;  %v3748_v47 = vadd.f32 %v12927_v63, %v3553_v30  ;;  %v4725_v43 = vld [vmem:[#allocation3 + $0x44] sm:$0x1]  ;;  %v3531_v31 = vpop.f32.mrf.mxu2  ;;  %v12967_v30 = vpop.f32.mrf.mxu0 }
 0x393   :  { %v5345_v4 = vld [vmem:[#allocation3 + $0x30] sm:$0xe]  ;;  %4718 = vst [vmem:[#allocation3 + $0x38] sm:$0xf] %v4717_v21  ;;  %5566 = vmatmul.bf16.gmra.mxu0 %v5486_v25  ;;  %v9860_v40 = vor.u32 %v10668_v2, %v9859_v52  ;;  %v4901_v55 = vor.u32 %v4900_v42, %v4897_v45  ;;  %v12952_v27 = vld [vmem:[#allocation3 + $0x34] sm:$0x1]  ;;  %v3554_v28 = vadd.f32 %v3529_v34, %v12677_v58  ;;  %v5069_v17 = vunpack.c.l.b16 %v4893_v23 }
 0x394   :  { %4721 = vst [vmem:[#allocation3 + $0x3c] sm:$0x1] %v4720_v14  ;;  %v4576_v32 = vshrl.u32 %v4510_v29, 16  ;;  %v9775_v57 = vrot.slane %v5345_v4, 9  ;;  %v5413_v36 = vrot.slane %v12952_v27, 5  ;;  %v4579_v16 = vshll.u32 %v4510_v29, 16 }
 0x395   :  { %v4411_v18 = vpop.f32.mrf.mxu1  ;;  %5760 = vmatmul.bf16.gmra.mxu1 %v9860_v40  ;;  %v4902_v8 = vrot.slane %v4901_v55, 4  ;;  %v4782_v62 = vld [vmem:[#allocation3 + $0x30] sm:$0xf]  ;;  %v2390_v45 = vadd.f32 %v12558_v26, %v12563_v0  ;;  %v2863_v26 = vadd.f32 %v12636_v19, %v2669_v35  ;;  %v3749_v55 = vadd.f32 %v3724_v44, %v3554_v28 }
 0x396   :  { %v4578_v37 = vrot.slane %v4576_v32, 7  ;;  %v4439_v20 = vadd.f32 %v4411_v18, %v4165_v24  ;;  %v4909_v5 = vshrl.u32 %v4782_v62, 16  ;;  %v4912_v12 = vshll.u32 %v4782_v62, 16  ;;  %v9719_v29 = vld [vmem:[#allocation3 + $0x30] sm:$0xf]  ;;  %v3726_v32 = vpop.f32.mrf.mxu3 }
 0x397   :  { %v4907_v63 = vsel %vm11916_vm11, %v4902_v8, %v4906_v6  ;;  %v5414_v58 = vsel %vm11869_vm8, %v9775_v57, %v5413_v36  ;;  %v4166_v23 = vadd.f32 %v12944_v48, %v3748_v47  ;;  %v3281_v18 = vadd.f32 %v12687_v33, %v2863_v26 }
 0x398   :  { %v4581_v9 = vor.u32 %v4579_v16, %v4578_v37  ;;  %v4582_v54 = vrot.slane %v4578_v37, 4  ;;  %v4455_v50 = vmax.f32 %v4439_v20, 0.0  ;;  %v5070_v59 = vunpack.c.l.b16 %v4907_v63  ;;  %v4731_v20 = vld [vmem:[#allocation3 + $0x5c] sm:$0x1] }
 0x399   :  { %v4911_v34 = vrot.slane %v4909_v5, 4  ;;  %v4914_v25 = vrot.slane %v4912_v12, 5  ;;  %v5474_v36 = vunpack.c.l.b16 %v5414_v58  ;;  %v4918_v35 = vshll.u32 %v12952_v27, 16  ;;  %v5347_v27 = vld [vmem:[#allocation3 + $0x50] sm:$0xe] }
 0x39a   :  { %v4723_v51 = vsel %vm11756_vm4, %v4581_v9, %v4722_v11  ;;  %v4726_v42 = vsel %vm11767_vm5, %v4582_v54, %v4725_v43  ;;  %v4511_v21 = vpack.c.bf16 %v4455_v50, %v4455_v50  ;;  %v5083_v14 = vpack.c.b16 %v5070_v59, %v5069_v17  ;;  %v10637_v52 = vld [vmem:[#allocation3 + $0x34] sm:$0xf0]  ;;  %v3534_v50 = vpop.f32.mrf.mxu2 }
 0x39b   :  { %v5346_v2 = vld [vmem:[#allocation3 + $0x38] sm:$0xe]  ;;  %4724 = vst [vmem:[#allocation3 + $0x40] sm:$0xf] %v4723_v51  ;;  %v9720_v0 = vor.u32 %v10637_v52, %v9719_v29  ;;  %v4815_v4 = vld [vmem:[#allocation3 + $0x3c] sm:$0x1]  ;;  %v4915_v40 = vor.u32 %v4914_v25, %v4911_v34  ;;  %v3555_v54 = vadd.f32 %v3531_v31, %v3281_v18  ;;  %v4167_v26 = vadd.f32 %v12967_v30, %v3749_v55 }
 0x39c   :  { %v9776_v38 = vrot.slane %v5346_v2, 9  ;;  %4727 = vst [vmem:[#allocation3 + $0x44] sm:$0x1] %v4726_v42  ;;  %v4584_v24 = vshrl.u32 %v4511_v21, 16  ;;  %5163 = vmatmul.bf16.gmra.mxu2 %v5083_v14  ;;  %v5417_v6 = vrot.slane %v4815_v4, 5  ;;  %v4587_v8 = vshll.u32 %v4511_v21, 16  ;;  %v4144_v14 = vpop.f32.mrf.mxu0 }
 0x39d   :  { %v4413_v57 = vpop.f32.mrf.mxu1  ;;  %5313 = vmatmul.bf16.gmra.mxu3 %v9720_v0  ;;  %v4783_v19 = vld [vmem:[#allocation3 + $0x38] sm:$0xf]  ;;  %v4916_v48 = vrot.slane %v4915_v40, 4  ;;  %v4932_v28 = vshll.u32 %v4815_v4, 16  ;;  %v4920_v12 = vrot.slane %v4918_v35, 5  ;;  %v2671_v21 = vadd.f32 %v12565_v1, %v2390_v45 }
 0x39e   :  { %v4586_v62 = vrot.slane %v4584_v24, 7  ;;  %v4440_v37 = vadd.f32 %v4413_v57, %v4166_v23  ;;  %v5418_v44 = vsel %vm11869_vm8, %v9776_v38, %v5417_v6  ;;  %v4923_v16 = vshrl.u32 %v4783_v19, 16  ;;  %v9863_v25 = vld [vmem:[#allocation3 + $0x38] sm:$0xf]  ;;  %v12985_v42 = vld [vmem:[#allocation3 + $0x54] sm:$0x1] }
 0x39f   :  { %v5475_v5 = vunpack.c.l.b16 %v5418_v44  ;;  %v4926_v47 = vshll.u32 %v4783_v19, 16  ;;  %v4934_v31 = vrot.slane %v4932_v28, 5  ;;  %v4921_v0 = vsel %vm11916_vm11, %v4916_v48, %v4920_v12  ;;  %v4784_v38 = vld [vmem:[#allocation3 + $0x50] sm:$0xf]  ;;  %v10685_v6 = vld [vmem:[%s14319_s3 + $0x118] sm:$0xff] }
 0x3a0   :  { %v4589_v33 = vor.u32 %v4587_v8, %v4586_v62  ;;  %v4590_v11 = vrot.slane %v4586_v62, 4  ;;  %v4456_v43 = vmax.f32 %v4440_v37, 0.0  ;;  %v4925_v63 = vrot.slane %v4923_v16, 4  ;;  %v3729_v8 = vpop.f32.mrf.mxu3  ;;  %v4737_v19 = vld [vmem:[#allocation3 + $0x64] sm:$0x1]  ;;  %6164 = vmatpush.bf16.msrb.mxu2 %v10685_v6 }
 0x3a1   :  { %v5487_v17 = vpack.c.b16 %v5475_v5, %v5474_v36  ;;  %v4928_v9 = vrot.slane %v4926_v47, 5  ;;  %v9777_v4 = vrot.slane %v5347_v27, 9  ;;  %v5421_v1 = vrot.slane %v12985_v42, 5  ;;  %v4734_v36 = vld [vmem:[#allocation3 + $0x60] sm:$0xf] }
 0x3a2   :  { %v4729_v59 = vsel %vm11756_vm4, %v4589_v33, %v4728_v7  ;;  %v4732_v58 = vsel %vm11767_vm5, %v4590_v11, %v4731_v20  ;;  %v4512_v34 = vpack.c.bf16 %v4456_v43, %v4456_v43  ;;  %v10669_v51 = vld [vmem:[#allocation3 + $0x3c] sm:$0xf0]  ;;  %v4937_v45 = vshrl.u32 %v4784_v38, 16  ;;  %v9723_v48 = vld [vmem:[#allocation3 + $0x50] sm:$0xf] }
 0x3a3   :  { %4730 = vst [vmem:[#allocation3 + $0x58] sm:$0xf] %v4729_v59  ;;  %5571 = vmatmul.bf16.gmra.mxu0 %v5487_v17  ;;  %v9864_v29 = vor.u32 %v10669_v51, %v9863_v25  ;;  %v4929_v52 = vor.u32 %v4928_v9, %v4925_v63  ;;  %v4940_v23 = vshll.u32 %v4784_v38, 16  ;;  %v3750_v18 = vadd.f32 %v3726_v32, %v3555_v54 }
 0x3a4   :  { %4733 = vst [vmem:[#allocation3 + $0x5c] sm:$0x1] %v4732_v58  ;;  %v4592_v2 = vshrl.u32 %v4512_v34, 16  ;;  %v4595_v30 = vshll.u32 %v4512_v34, 16  ;;  %v5071_v62 = vunpack.c.l.b16 %v4921_v0  ;;  %v4939_v7 = vrot.slane %v4937_v45, 4  ;;  %v3536_v58 = vpop.f32.mrf.mxu2 }
 0x3a5   :  { %v4416_v40 = vpop.f32.mrf.mxu1  ;;  %5765 = vmatmul.bf16.gmra.mxu1 %v9864_v29  ;;  %v4930_v24 = vrot.slane %v4929_v52, 4  ;;  %v4942_v37 = vrot.slane %v4940_v23, 5  ;;  %v2865_v32 = vadd.f32 %v12659_v53, %v2671_v21  ;;  %v5422_v47 = vsel %vm11869_vm8, %v9777_v4, %v5421_v1  ;;  %v4147_v21 = vpop.f32.mrf.mxu0 }
 0x3a6   :  { %v4594_v57 = vrot.slane %v4592_v2, 7  ;;  %v4441_v55 = vadd.f32 %v4416_v40, %v4167_v26  ;;  %v4946_v33 = vshll.u32 %v12985_v42, 16  ;;  %v3556_v27 = vadd.f32 %v3534_v50, %v12708_v49 }
 0x3a7   :  { %v4935_v35 = vsel %vm11916_vm11, %v4930_v24, %v4934_v31  ;;  %v4943_v28 = vor.u32 %v4942_v37, %v4939_v7  ;;  %v3283_v34 = vadd.f32 %v12714_v56, %v2865_v32  ;;  %v4168_v51 = vadd.f32 %v4144_v14, %v3750_v18  ;;  %v4740_v14 = vld [vmem:[#allocation3 + $0x68] sm:$0xf]  ;;  %v4743_v24 = vld [vmem:[#allocation3 + $0x6c] sm:$0x1] }
 0x3a8   :  { %v4597_v44 = vor.u32 %v4595_v30, %v4594_v57  ;;  %v4598_v16 = vrot.slane %v4594_v57, 4  ;;  %v4457_v20 = vmax.f32 %v4441_v55, 0.0  ;;  %v5072_v5 = vunpack.c.l.b16 %v4935_v35  ;;  %v3731_v23 = vpop.f32.mrf.mxu3 }
 0x3a9   :  { %v5476_v31 = vunpack.c.l.b16 %v5422_v47  ;;  %v4944_v26 = vrot.slane %v4943_v28, 4  ;;  %v4948_v49 = vrot.slane %v4946_v33, 5  ;;  %v2395_v56 = vadd.f32 %v12670_v22, %v12579_v15 }
 0x3aa   :  { %v4735_v11 = vsel %vm11756_vm4, %v4597_v44, %v4734_v36  ;;  %v4738_v43 = vsel %vm11767_vm5, %v4598_v16, %v4737_v19  ;;  %v4513_v63 = vpack.c.bf16 %v4457_v20, %v4457_v20  ;;  %v5084_v17 = vpack.c.b16 %v5072_v5, %v5071_v62  ;;  %v10638_v12 = vld [vmem:[#allocation3 + $0x54] sm:$0xf0] }
 0x3ab   :  { %v5348_v9 = vld [vmem:[#allocation3 + $0x58] sm:$0xe]  ;;  %4736 = vst [vmem:[#allocation3 + $0x60] sm:$0xf] %v4735_v11  ;;  %v9724_v53 = vor.u32 %v10638_v12, %v9723_v48  ;;  %v4817_v54 = vld [vmem:[#allocation3 + $0x5c] sm:$0x1]  ;;  %v3751_v40 = vadd.f32 %v3729_v8, %v3556_v27  ;;  %v3557_v55 = vadd.f32 %v3536_v58, %v3283_v34  ;;  %v4949_v37 = vsel %vm11916_vm11, %v4944_v26, %v4948_v49 }
 0x3ac   :  { %v9778_v59 = vrot.slane %v5348_v9, 9  ;;  %4739 = vst [vmem:[#allocation3 + $0x64] sm:$0x1] %v4738_v43  ;;  %v4600_v25 = vshrl.u32 %v4513_v63, 16  ;;  %5168 = vmatmul.bf16.gmra.mxu2 %v5084_v17  ;;  %v5425_v42 = vrot.slane %v4817_v54, 5  ;;  %v4603_v29 = vshll.u32 %v4513_v63, 16  ;;  %v3539_v9 = vpop.f32.mrf.mxu2 }
 0x3ad   :  { %v4418_v52 = vpop.f32.mrf.mxu1  ;;  %5318 = vmatmul.bf16.gmra.mxu3 %v9724_v53  ;;  %v4785_v2 = vld [vmem:[#allocation3 + $0x58] sm:$0xf]  ;;  %v4960_v35 = vshll.u32 %v4817_v54, 16  ;;  %v2673_v5 = vadd.f32 %v12674_v39, %v2395_v56  ;;  %v4169_v32 = vadd.f32 %v4147_v21, %v3751_v40  ;;  %v3752_v28 = vadd.f32 %v3731_v23, %v3557_v55  ;;  %v10684_v12 = vld [vmem:[%s14319_s3 + $0x110] sm:$0xff]  ;;  %v4149_v58 = vpop.f32.mrf.mxu0 }
 0x3ae   :  { %v4602_v50 = vrot.slane %v4600_v25, 7  ;;  %v4442_v0 = vadd.f32 %v4418_v52, %v4168_v51  ;;  %v5426_v4 = vsel %vm11869_vm8, %v9778_v59, %v5425_v42  ;;  %v4951_v38 = vshrl.u32 %v4785_v2, 16  ;;  %v9867_v8 = vld [vmem:[#allocation3 + $0x58] sm:$0xf]  ;;  %v4746_v39 = vld [vmem:[#allocation3 + $0x70] sm:$0xf]  ;;  %6165 = vmatpush.bf16.msrb.mxu2 %v10684_v12 }
 0x3af   :  { %v5477_v1 = vunpack.c.l.b16 %v5426_v4  ;;  %v4954_v45 = vshll.u32 %v4785_v2, 16  ;;  %v4962_v43 = vrot.slane %v4960_v35, 5  ;;  %v5073_v63 = vunpack.c.l.b16 %v4949_v37  ;;  %v4749_v34 = vld [vmem:[#allocation3 + $0x74] sm:$0x1]  ;;  %v10697_v37 = vld [vmem:[%s14319_s3 + $0x178] sm:$0xff] }
 0x3b0   :  { %v4605_v6 = vor.u32 %v4603_v29, %v4602_v50  ;;  %v4606_v18 = vrot.slane %v4602_v50, 4  ;;  %v4458_v57 = vmax.f32 %v4442_v0, 0.0  ;;  %v4953_v30 = vrot.slane %v4951_v38, 4  ;;  %v3734_v4 = vpop.f32.mrf.mxu3  ;;  %6434 = vmatpush.bf16.msrb.mxu3 %v10697_v37 }
 0x3b1   :  { %v5488_v36 = vpack.c.b16 %v5477_v1, %v5476_v31  ;;  %v4956_v19 = vrot.slane %v4954_v45, 5  ;;  %v3558_v26 = vadd.f32 %v3539_v9, %v12739_v13  ;;  %v2867_v49 = vadd.f32 %v12684_v61, %v2673_v5 }
 0x3b2   :  { %v4741_v62 = vsel %vm11756_vm4, %v4605_v6, %v4740_v14  ;;  %v4744_v15 = vsel %vm11767_vm5, %v4606_v18, %v4743_v24  ;;  %v4514_v22 = vpack.c.bf16 %v4458_v57, %v4458_v57  ;;  %v10670_v7 = vld [vmem:[#allocation3 + $0x5c] sm:$0xf0] }
 0x3b3   :  { %4742 = vst [vmem:[#allocation3 + $0x68] sm:$0xf] %v4741_v62  ;;  %5576 = vmatmul.bf16.gmra.mxu0 %v5488_v36  ;;  %v9868_v44 = vor.u32 %v10670_v7, %v9867_v8  ;;  %v4957_v16 = vor.u32 %v4956_v19, %v4953_v30  ;;  %v5349_v20 = vld [vmem:[#allocation3 + $0x60] sm:$0xe]  ;;  %v13018_v47 = vld [vmem:[#allocation3 + $0x64] sm:$0x1]  ;;  %v4170_v30 = vadd.f32 %v4149_v58, %v3752_v28 }
 0x3b4   :  { %4745 = vst [vmem:[#allocation3 + $0x6c] sm:$0x1] %v4744_v15  ;;  %v4608_v48 = vshrl.u32 %v4514_v22, 16  ;;  %v4786_v17 = vld [vmem:[#allocation3 + $0x60] sm:$0xf]  ;;  %v4611_v53 = vshll.u32 %v4514_v22, 16  ;;  %v3753_v19 = vadd.f32 %v3734_v4, %v3558_v26  ;;  %v3285_v35 = vadd.f32 %v12767_v60, %v2867_v49 }
 0x3b5   :  { %v4421_v33 = vpop.f32.mrf.mxu1  ;;  %5770 = vmatmul.bf16.gmra.mxu1 %v9868_v44  ;;  %v4958_v11 = vrot.slane %v4957_v16, 4  ;;  %v4965_v59 = vshrl.u32 %v4786_v17, 16  ;;  %v9779_v51 = vrot.slane %v5349_v20, 9  ;;  %v5429_v42 = vrot.slane %v13018_v47, 5  ;;  %v9727_v24 = vld [vmem:[#allocation3 + $0x60] sm:$0xf] }
 0x3b6   :  { %v4610_v27 = vrot.slane %v4608_v48, 7  ;;  %v4443_v54 = vadd.f32 %v4421_v33, %v4169_v32  ;;  %v4968_v21 = vshll.u32 %v4786_v17, 16  ;;  %v4974_v18 = vshll.u32 %v13018_v47, 16  ;;  %v4752_v15 = vld [vmem:[#allocation3 + $0x78] sm:$0xf]  ;;  %v3541_v17 = vpop.f32.mrf.mxu2 }
 0x3b7   :  { %v4963_v25 = vsel %vm11916_vm11, %v4958_v11, %v4962_v43  ;;  %v4967_v50 = vrot.slane %v4965_v59, 4  ;;  %v5430_v55 = vsel %vm11869_vm8, %v9779_v51, %v5429_v42  ;;  %v4755_v16 = vld [vmem:[#allocation3 + $0x7c] sm:$0x1]  ;;  %v10696_v11 = vld [vmem:[%s14319_s3 + $0x170] sm:$0xff]  ;;  %v3559_v59 = vadd.f32 %v3541_v17, %v3285_v35 }
 0x3b8   :  { %v4613_v29 = vor.u32 %v4611_v53, %v4610_v27  ;;  %v4614_v52 = vrot.slane %v4610_v27, 4  ;;  %v4459_v31 = vmax.f32 %v4443_v54, 0.0  ;;  %v5074_v2 = vunpack.c.l.b16 %v4963_v25  ;;  %v10713_v60 = vld [vmem:[%s14319_s3 + $0x1b8] sm:$0xff]  ;;  %v4152_v54 = vpop.f32.mrf.mxu0  ;;  %6435 = vmatpush.bf16.msrb.mxu3 %v10696_v11  ;;  %v3736_v4 = vpop.f32.mrf.mxu3 }
 0x3b9   :  { %v4970_v0 = vrot.slane %v4968_v21, 5  ;;  %v5478_v32 = vunpack.c.l.b16 %v5430_v55  ;;  %v4976_v28 = vrot.slane %v4974_v18, 5  ;;  %v10721_v43 = vld [vmem:[%s14319_s3 + $0x1f8] sm:$0xff]  ;;  %6629 = vmatpush.bf16.msra.mxu0 %v10713_v60 }
 0x3ba   :  { %v4747_v38 = vsel %vm11756_vm4, %v4613_v29, %v4746_v39  ;;  %v4750_v56 = vsel %vm11767_vm5, %v4614_v52, %v4749_v34  ;;  %v4515_v40 = vpack.c.bf16 %v4459_v31, %v4459_v31  ;;  %v5085_v14 = vpack.c.b16 %v5074_v2, %v5073_v63  ;;  %v10639_v1 = vld [vmem:[#allocation3 + $0x64] sm:$0xf0]  ;;  %v10712_v39 = vld [vmem:[%s14319_s3 + $0x1b0] sm:$0xff]  ;;  %7047 = vmatpush.bf16.msra.mxu1 %v10721_v43 }
 0x3bb   :  { %v5350_v45 = vld [vmem:[#allocation3 + $0x68] sm:$0xe]  ;;  %4748 = vst [vmem:[#allocation3 + $0x70] sm:$0xf] %v4747_v38  ;;  %v9728_v23 = vor.u32 %v10639_v1, %v9727_v24  ;;  %v13032_v6 = vld [vmem:[#allocation3 + $0x6c] sm:$0x1]  ;;  %v4971_v61 = vor.u32 %v4970_v0, %v4967_v50  ;;  %v3754_v24 = vadd.f32 %v3736_v4, %v3559_v59 }
 0x3bc   :  { %v9780_v13 = vrot.slane %v5350_v45, 9  ;;  %4751 = vst [vmem:[#allocation3 + $0x74] sm:$0x1] %v4750_v56  ;;  %v4616_v57 = vshrl.u32 %v4515_v40, 16  ;;  %5173 = vmatmul.bf16.gmra.mxu2 %v5085_v14  ;;  %v5433_v36 = vrot.slane %v13032_v6, 5  ;;  %v4619_v62 = vshll.u32 %v4515_v40, 16 }
 0x3bd   :  { %v4423_v22 = vpop.f32.mrf.mxu1  ;;  %5323 = vmatmul.bf16.gmra.mxu3 %v9728_v23  ;;  %v4787_v8 = vld [vmem:[#allocation3 + $0x68] sm:$0xf]  ;;  %v4972_v7 = vrot.slane %v4971_v61, 4  ;;  %v4988_v25 = vshll.u32 %v13032_v6, 16  ;;  %v10720_v2 = vld [vmem:[%s14319_s3 + $0x1f0] sm:$0xff]  ;;  %v4171_v56 = vadd.f32 %v4152_v54, %v3753_v19  ;;  %6630 = vmatpush.bf16.msra.mxu0 %v10712_v39  ;;  %v10693_v39 = vld [vmem:[%s14319_s3 + $0x158] sm:$0xff] }
 0x3be   :  { %v4618_v44 = vrot.slane %v4616_v57, 7  ;;  %v4444_v20 = vadd.f32 %v4423_v22, %v4170_v30  ;;  %v5434_v5 = vsel %vm11869_vm8, %v9780_v13, %v5433_v36  ;;  %v4979_v48 = vshrl.u32 %v4787_v8, 16  ;;  %v10683_v63 = vld [vmem:[%s14319_s3 + $0x108] sm:$0xff]  ;;  %v4758_v57 = vld [vmem:[#allocation3 + $0x80] sm:$0xf]  ;;  %7048 = vmatpush.bf16.msra.mxu1 %v10720_v2 }
 0x3bf   :  { %v5479_v47 = vunpack.c.l.b16 %v5434_v5  ;;  %v4982_v33 = vshll.u32 %v4787_v8, 16  ;;  %6166 = vmatpush.bf16.msrb.mxu2 %v10683_v63  ;;  %v9871_v29 = vld [vmem:[#allocation3 + $0x68] sm:$0xf]  ;;  %v4977_v31 = vsel %vm11916_vm11, %v4972_v7, %v4976_v28  ;;  %v4990_v23 = vrot.slane %v4988_v25, 5  ;;  %v4761_v19 = vld [vmem:[#allocation3 + $0x84] sm:$0x1] }
 0x3c0   :  { %v4621_v12 = vor.u32 %v4619_v62, %v4618_v44  ;;  %v4622_v9 = vrot.slane %v4618_v44, 4  ;;  %v4460_v27 = vmax.f32 %v4444_v20, 0.0  ;;  %v4981_v53 = vrot.slane %v4979_v48, 4  ;;  %v10695_v0 = vld [vmem:[%s14319_s3 + $0x168] sm:$0xff]  ;;  %v10694_v8 = vld [vmem:[%s14319_s3 + $0x160] sm:$0xff]  ;;  %v4154_v17 = vpop.f32.mrf.mxu0  ;;  %v10709_v25 = vld [vmem:[%s14319_s3 + $0x198] sm:$0xff] }
 0x3c1   :  { %v5489_v58 = vpack.c.b16 %v5479_v47, %v5478_v32  ;;  %v4984_v34 = vrot.slane %v4982_v33, 5  ;;  %v10711_v14 = vld [vmem:[%s14319_s3 + $0x1a8] sm:$0xff]  ;;  %v5075_v6 = vunpack.c.l.b16 %v4977_v31  ;;  %6436 = vmatpush.bf16.msrb.mxu3 %v10695_v0  ;;  %v10710_v20 = vld [vmem:[%s14319_s3 + $0x1a0] sm:$0xff]  ;;  %v4172_v59 = vadd.f32 %v4154_v17, %v3754_v24  ;;  %v10717_v0 = vld [vmem:[%s14319_s3 + $0x1d8] sm:$0xff] }
 0x3c2   :  { %v4753_v51 = vsel %vm11756_vm4, %v4621_v12, %v4752_v15  ;;  %v4756_v42 = vsel %vm11767_vm5, %v4622_v9, %v4755_v16  ;;  %v4516_v21 = vpack.c.bf16 %v4460_v27, %v4460_v27  ;;  %v10671_v52 = vld [vmem:[#allocation3 + $0x6c] sm:$0xf0]  ;;  %v10719_v36 = vld [vmem:[%s14319_s3 + $0x1e8] sm:$0xff]  ;;  %6631 = vmatpush.bf16.msra.mxu0 %v10711_v14  ;;  %v10718_v63 = vld [vmem:[%s14319_s3 + $0x1e0] sm:$0xff] }
 0x3c3   :  { %4754 = vst [vmem:[#allocation3 + $0x78] sm:$0xf] %v4753_v51  ;;  %5581 = vmatmul.bf16.gmra.mxu0 %v5489_v58  ;;  %v9872_v26 = vor.u32 %v10671_v52, %v9871_v29  ;;  %v4985_v49 = vor.u32 %v4984_v34, %v4981_v53  ;;  %v5351_v50 = vld [vmem:[#allocation3 + $0x70] sm:$0xe]  ;;  %v13072_v40 = vld [vmem:[#allocation3 + $0x74] sm:$0x1]  ;;  %7049 = vmatpush.bf16.msra.mxu1 %v10719_v36 }
 0x3c4   :  { %4757 = vst [vmem:[#allocation3 + $0x7c] sm:$0x1] %v4756_v42  ;;  %v4624_v38 = vshrl.u32 %v4516_v21, 16  ;;  %v4788_v13 = vld [vmem:[#allocation3 + $0x70] sm:$0xf]  ;;  %v4627_v18 = vshll.u32 %v4516_v21, 16 }
 0x3c5   :  { %v4426_v1 = vpop.f32.mrf.mxu1  ;;  %5775 = vmatmul.bf16.gmra.mxu1 %v9872_v26  ;;  %v4986_v45 = vrot.slane %v4985_v49, 4  ;;  %v4993_v55 = vshrl.u32 %v4788_v13, 16  ;;  %v9781_v62 = vrot.slane %v5351_v50, 9  ;;  %v5437_v15 = vrot.slane %v13072_v40, 5  ;;  %v9731_v5 = vld [vmem:[#allocation3 + $0x70] sm:$0xf]  ;;  %6437 = vmatpush.bf16.msrb.mxu3 %v10694_v8 }
 0x3c6   :  { %v4626_v61 = vrot.slane %v4624_v38, 7  ;;  %v4445_v30 = vadd.f32 %v4426_v1, %v4171_v56  ;;  %v4996_v22 = vshll.u32 %v4788_v13, 16  ;;  %6632 = vmatpush.bf16.msra.mxu0 %v10710_v20  ;;  %v5002_v29 = vshll.u32 %v13072_v40, 16  ;;  %v10682_v52 = vld [vmem:[%s14319_s3 + $0x100] sm:$0xff]  ;;  %v4764_v2 = vld [vmem:[#allocation3 + $0x88] sm:$0xf] }
 0x3c7   :  { %v4991_v35 = vsel %vm11916_vm11, %v4986_v45, %v4990_v23  ;;  %v4995_v48 = vrot.slane %v4993_v55, 4  ;;  %v5438_v58 = vsel %vm11869_vm8, %v9781_v62, %v5437_v15  ;;  %7050 = vmatpush.bf16.msra.mxu1 %v10718_v63  ;;  %v4767_v4 = vld [vmem:[#allocation3 + $0x8c] sm:$0x1]  ;;  %v10692_v24 = vld [vmem:[%s14319_s3 + $0x150] sm:$0xff]  ;;  %6167 = vmatpush.bf16.msrb.mxu2 %v10682_v52 }
 0x3c8   :  { %v4629_v7 = vor.u32 %v4627_v18, %v4626_v61  ;;  %v4630_v37 = vrot.slane %v4626_v61, 4  ;;  %v4461_v44 = vmax.f32 %v4445_v30, 0.0  ;;  %v5076_v16 = vunpack.c.l.b16 %v4991_v35  ;;  %v10708_v13 = vld [vmem:[%s14319_s3 + $0x190] sm:$0xff] }
 0x3c9   :  { %v4998_v60 = vrot.slane %v4996_v22, 5  ;;  %v5480_v38 = vunpack.c.l.b16 %v5438_v58  ;;  %6438 = vmatpush.bf16.msrb.mxu3 %v10693_v39  ;;  %v5004_v62 = vrot.slane %v5002_v29, 5  ;;  %v10716_v15 = vld [vmem:[%s14319_s3 + $0x1d0] sm:$0xff] }
 0x3ca   :  { %v4759_v32 = vsel %vm11756_vm4, %v4629_v7, %v4758_v57  ;;  %v4762_v47 = vsel %vm11767_vm5, %v4630_v37, %v4761_v19  ;;  %v4517_v28 = vpack.c.bf16 %v4461_v44, %v4461_v44  ;;  %v5086_v33 = vpack.c.b16 %v5076_v16, %v5075_v6  ;;  %v10640_v11 = vld [vmem:[#allocation3 + $0x74] sm:$0xf0]  ;;  %6633 = vmatpush.bf16.msra.mxu0 %v10709_v25  ;;  %v10691_v37 = vld [vmem:[%s14319_s3 + $0x148] sm:$0xff] }
 0x3cb   :  { %v5352_v43 = vld [vmem:[#allocation3 + $0x78] sm:$0xe]  ;;  %4760 = vst [vmem:[#allocation3 + $0x80] sm:$0xf] %v4759_v32  ;;  %v9732_v12 = vor.u32 %v10640_v11, %v9731_v5  ;;  %v13096_v9 = vld [vmem:[#allocation3 + $0x7c] sm:$0x1]  ;;  %v4999_v53 = vor.u32 %v4998_v60, %v4995_v48  ;;  %7051 = vmatpush.bf16.msra.mxu1 %v10717_v0 }
 0x3cc   :  { %v9782_v27 = vrot.slane %v5352_v43, 9  ;;  %4763 = vst [vmem:[#allocation3 + $0x84] sm:$0x1] %v4762_v47  ;;  %v4632_v54 = vshrl.u32 %v4517_v28, 16  ;;  %5178 = vmatmul.bf16.gmra.mxu2 %v5086_v33  ;;  %v5441_v34 = vrot.slane %v13096_v9, 5  ;;  %v4635_v51 = vshll.u32 %v4517_v28, 16 }
 0x3cd   :  { %v4428_v42 = vpop.f32.mrf.mxu1  ;;  %5328 = vmatmul.bf16.gmra.mxu3 %v9732_v12  ;;  %v4789_v21 = vld [vmem:[#allocation3 + $0x78] sm:$0xf]  ;;  %v5000_v40 = vrot.slane %v4999_v53, 4  ;;  %v5016_v57 = vshll.u32 %v13096_v9, 16  ;;  %v10707_v5 = vld [vmem:[%s14319_s3 + $0x188] sm:$0xff] }
 0x3ce   :  { %v4634_v31 = vrot.slane %v4632_v54, 7  ;;  %v4446_v26 = vadd.f32 %v4428_v42, %v4172_v59  ;;  %v5442_v49 = vsel %vm11869_vm8, %v9782_v27, %v5441_v34  ;;  %v5007_v50 = vshrl.u32 %v4789_v21, 16  ;;  %v9875_v19 = vld [vmem:[#allocation3 + $0x78] sm:$0xf]  ;;  %6439 = vmatpush.bf16.msrb.mxu3 %v10692_v24  ;;  %6634 = vmatpush.bf16.msra.mxu0 %v10708_v13  ;;  %v4770_v48 = vld [vmem:[#allocation3 + $0x90] sm:$0xf] }
 0x3cf   :  { %v5481_v56 = vunpack.c.l.b16 %v5442_v49  ;;  %v5010_v14 = vshll.u32 %v4789_v21, 16  ;;  %v5005_v16 = vsel %vm11916_vm11, %v5000_v40, %v5004_v62  ;;  %v4773_v60 = vld [vmem:[#allocation3 + $0x94] sm:$0x1]  ;;  %v5018_v47 = vrot.slane %v5016_v57, 5  ;;  %v13140_v33 = vld [vmem:[#allocation3 + $0x8] sm:$0xe]  ;;  %7052 = vmatpush.bf16.msra.mxu1 %v10716_v15 }
 0x3d0   :  { %v4637_v1 = vor.u32 %v4635_v51, %v4634_v31  ;;  %v4638_v45 = vrot.slane %v4634_v31, 4  ;;  %v4462_v23 = vmax.f32 %v4446_v26, 0.0  ;;  %v5009_v6 = vrot.slane %v5007_v50, 4  ;;  %v10715_v12 = vld [vmem:[%s14319_s3 + $0x1c8] sm:$0xff]  ;;  %v10690_v54 = vld [vmem:[%s14319_s3 + $0x140] sm:$0xff]  ;;  %v10729_v15 = vld [vmem:[%s14319_s3 + $0x238] sm:$0xff] }
 0x3d1   :  { %v5490_v61 = vpack.c.b16 %v5481_v56, %v5480_v38  ;;  %v5012_v18 = vrot.slane %v5010_v14, 5  ;;  %v5077_v27 = vunpack.c.l.b16 %v5005_v16  ;;  %v13151_v59 = vld [vmem:[#allocation3 + $0xc] sm:$0x1]  ;;  %v13153_v42 = vld [vmem:[#allocation3 + $0x10] sm:$0xe]  ;;  %v10706_v21 = vld [vmem:[%s14319_s3 + $0x180] sm:$0xff]  ;;  %7321 = vmatpush.bf16.msra.mxu2 %v10729_v15 }
 0x3d2   :  { %v4765_v30 = vsel %vm11756_vm4, %v4637_v1, %v4764_v2  ;;  %v4768_v55 = vsel %vm11767_vm5, %v4638_v45, %v4767_v4  ;;  %v4518_v36 = vpack.c.bf16 %v4462_v23, %v4462_v23  ;;  %v10672_v35 = vld [vmem:[#allocation3 + $0x7c] sm:$0xf0]  ;;  %6440 = vmatpush.bf16.msrb.mxu3 %v10691_v37  ;;  %6635 = vmatpush.bf16.msra.mxu0 %v10707_v5  ;;  %v9961_v2 = vrot.slane %v13140_v33, 9  ;;  %v6694_v56 = vld [vmem:[#allocation3 + $0x10] sm:$0xf] }
 0x3d3   :  { %4766 = vst [vmem:[#allocation3 + $0x88] sm:$0xf] %v4765_v30  ;;  %5586 = vmatmul.bf16.gmra.mxu0 %v5490_v61  ;;  %v9876_v22 = vor.u32 %v10672_v35, %v9875_v19  ;;  %v5013_v8 = vor.u32 %v5012_v18, %v5009_v6  ;;  %v5353_v7 = vld [vmem:[#allocation3 + $0x80] sm:$0xe]  ;;  %v13135_v20 = vld [vmem:[#allocation3 + $0x84] sm:$0x1]  ;;  %7053 = vmatpush.bf16.msra.mxu1 %v10715_v12 }
 0x3d4   :  { %4769 = vst [vmem:[#allocation3 + $0x8c] sm:$0x1] %v4768_v55  ;;  %v4640_v44 = vshrl.u32 %v4518_v36, 16  ;;  %v4790_v28 = vld [vmem:[#allocation3 + $0x80] sm:$0xf]  ;;  %v4643_v43 = vshll.u32 %v4518_v36, 16 }
 0x3d5   :  { %5780 = vmatmul.bf16.gmra.mxu1 %v9876_v22  ;;  %v5014_v32 = vrot.slane %v5013_v8, 4  ;;  %v5021_v63 = vshrl.u32 %v4790_v28, 16  ;;  %v5024_v17 = vshll.u32 %v4790_v28, 16  ;;  %v9783_v53 = vrot.slane %v5353_v7, 9  ;;  %v9735_v29 = vld [vmem:[#allocation3 + $0x80] sm:$0xf] }
 0x3d6   :  { %v4642_v11 = vrot.slane %v4640_v44, 7  ;;  %v5445_v39 = vrot.slane %v13135_v20, 5  ;;  %v5030_v31 = vshll.u32 %v13135_v20, 16  ;;  %v10714_v26 = vld [vmem:[%s14319_s3 + $0x1c0] sm:$0xff]  ;;  %6441 = vmatpush.bf16.msrb.mxu3 %v10690_v54  ;;  %v6275_v45 = vrot.slane %v13151_v59, 5  ;;  %6636 = vmatpush.bf16.msra.mxu0 %v10706_v21 }
 0x3d7   :  { %v5019_v9 = vsel %vm11916_vm11, %v5014_v32, %v5018_v47  ;;  %v5023_v51 = vrot.slane %v5021_v63, 4  ;;  %v5026_v52 = vrot.slane %v5024_v17, 5  ;;  %v9962_v6 = vrot.slane %v13153_v42, 9  ;;  %v13171_v57 = vld [vmem:[#allocation3 + $0x14] sm:$0x1]  ;;  %7054 = vmatpush.bf16.msra.mxu1 %v10714_v26 }
 0x3d8   :  { %v4645_v58 = vor.u32 %v4643_v43, %v4642_v11  ;;  %v4646_v34 = vrot.slane %v4642_v11, 4  ;;  %v5078_v25 = vunpack.c.l.b16 %v5019_v9  ;;  %v5446_v46 = vsel %vm11869_vm8, %v9783_v53, %v5445_v39  ;;  %v6696_v35 = vld [vmem:[#allocation3 + $0x18] sm:$0xf]  ;;  %v5807_v44 = vld [vmem:[#allocation3 + $0x8] sm:$0xf] }
 0x3d9   :  { %v5027_v1 = vor.u32 %v5026_v52, %v5023_v51  ;;  %v6727_v30 = vshrl.u32 %v6694_v56, 16  ;;  %v5032_v36 = vrot.slane %v5030_v31, 5  ;;  %v6730_v62 = vshll.u32 %v6694_v56, 16  ;;  %v13181_v5 = vld [vmem:[#allocation3 + $0x1c] sm:$0x1] }
 0x3da   :  { %v4771_v49 = vsel %vm11756_vm4, %v4645_v58, %v4770_v48  ;;  %v4774_v50 = vsel %vm11767_vm5, %v4646_v34, %v4773_v60  ;;  %v5087_v0 = vpack.c.b16 %v5078_v25, %v5077_v27  ;;  %v10641_v4 = vld [vmem:[#allocation3 + $0x84] sm:$0xf0]  ;;  %v5482_v22 = vunpack.c.l.b16 %v5446_v46  ;;  %v5809_v63 = vld [vmem:[#allocation3 + $0x10] sm:$0xf]  ;;  %v13189_v42 = vld [vmem:[#allocation3 + $0x14] sm:$0x1] }
 0x3db   :  { %v5354_v38 = vld [vmem:[#allocation3 + $0x88] sm:$0xe]  ;;  %4772 = vst [vmem:[#allocation3 + $0x90] sm:$0xf] %v4771_v49  ;;  %v9736_v40 = vor.u32 %v10641_v4, %v9735_v29  ;;  %v4823_v14 = vld [vmem:[#allocation3 + $0x8c] sm:$0x1]  ;;  %v6276_v25 = vsel %vm11869_vm8, %v9961_v2, %v6275_v45 }
 0x3dc   :  { %v9784_v24 = vrot.slane %v5354_v38, 9  ;;  %4775 = vst [vmem:[#allocation3 + $0x94] sm:$0x1] %v4774_v50  ;;  %5183 = vmatmul.bf16.gmra.mxu2 %v5087_v0  ;;  %v5449_v41 = vrot.slane %v4823_v14, 5  ;;  %v4791_v23 = vld [vmem:[#allocation3 + $0x88] sm:$0xf] }
 0x3dd   :  { %5333 = vmatmul.bf16.gmra.mxu3 %v9736_v40  ;;  %v5028_v13 = vrot.slane %v5027_v1, 4  ;;  %v5035_v61 = vshrl.u32 %v4791_v23, 16  ;;  %v5038_v18 = vshll.u32 %v4791_v23, 16  ;;  %v5044_v19 = vshll.u32 %v4823_v14, 16  ;;  %v9879_v47 = vld [vmem:[#allocation3 + $0x88] sm:$0xf] }
 0x3de   :  { %v5450_v55 = vsel %vm11869_vm8, %v9784_v24, %v5449_v41  ;;  %v6279_v20 = vrot.slane %v13171_v57, 5  ;;  %v6729_v48 = vrot.slane %v6727_v30, 4  ;;  %v6732_v60 = vrot.slane %v6730_v62, 5  ;;  %v10698_v1 = vld [vmem:[#allocation3 + $0x14] sm:$0xf0] }
 0x3df   :  { %v5483_v8 = vunpack.c.l.b16 %v5450_v55  ;;  %v5037_v7 = vrot.slane %v5035_v61, 4  ;;  %v5040_v37 = vrot.slane %v5038_v18, 5  ;;  %v5033_v16 = vsel %vm11916_vm11, %v5028_v13, %v5032_v36  ;;  %v10043_v45 = vld [vmem:[#allocation3 + $0x10] sm:$0xf]  ;;  %v13195_v30 = vld [vmem:[#allocation3 + $0x1c] sm:$0x1] }
 0x3e0   :  { %v6741_v11 = vshrl.u32 %v6696_v35, 16  ;;  %v6744_v43 = vshll.u32 %v6696_v35, 16  ;;  %v5046_v12 = vrot.slane %v5044_v19, 5  ;;  %v5840_v9 = vshrl.u32 %v5807_v44, 16  ;;  %v6700_v55 = vld [vmem:[#allocation3 + $0x28] sm:$0xf] }
 0x3e1   :  { %v5491_v32 = vpack.c.b16 %v5483_v8, %v5482_v22  ;;  %v5041_v28 = vor.u32 %v5040_v37, %v5037_v7  ;;  %v5843_v27 = vshll.u32 %v5807_v44, 16  ;;  %v5079_v34 = vunpack.c.l.b16 %v5033_v16  ;;  %v13199_v35 = vld [vmem:[#allocation3 + $0x24] sm:$0x1]  ;;  %v6227_v62 = vld [vmem:[#allocation3 + $0x18] sm:$0xe]  ;;  %v10728_v44 = vld [vmem:[%s14319_s3 + $0x230] sm:$0xff] }
 0x3e2   :  { %v10673_v17 = vld [vmem:[#allocation3 + $0x8c] sm:$0xf0]  ;;  %v6743_v54 = vrot.slane %v6741_v11, 4  ;;  %v6746_v58 = vrot.slane %v6744_v43, 5  ;;  %v6280_v51 = vsel %vm11869_vm8, %v9962_v6, %v6279_v20  ;;  %v6733_v21 = vor.u32 %v6732_v60, %v6729_v48  ;;  %v6698_v6 = vld [vmem:[#allocation3 + $0x20] sm:$0xf]  ;;  %7322 = vmatpush.bf16.msra.mxu2 %v10728_v44 }
 0x3e3   :  { %5591 = vmatmul.bf16.gmra.mxu0 %v5491_v32  ;;  %v9880_v53 = vor.u32 %v10673_v17, %v9879_v47  ;;  %v5042_v39 = vrot.slane %v5041_v28, 4  ;;  %v6750_v31 = vshll.u32 %v13181_v5, 16  ;;  %v5854_v26 = vshrl.u32 %v5809_v63, 16  ;;  %v6228_v15 = vld [vmem:[#allocation3 + $0x20] sm:$0xe] }
 0x3e4   :  { %v6747_v52 = vor.u32 %v6746_v58, %v6743_v54  ;;  %v5842_v50 = vrot.slane %v5840_v9, 4  ;;  %v5845_v33 = vrot.slane %v5843_v27, 5  ;;  %v5857_v0 = vshll.u32 %v5809_v63, 16  ;;  %v5813_v43 = vld [vmem:[#allocation3 + $0x20] sm:$0xf] }
 0x3e5   :  { %5785 = vmatmul.bf16.gmra.mxu1 %v9880_v53  ;;  %v5047_v29 = vsel %vm11916_vm11, %v5042_v39, %v5046_v12  ;;  %v6355_v4 = vunpack.c.l.b16 %v6280_v51  ;;  %v6736_v2 = vshll.u32 %v13189_v42, 16  ;;  %v5856_v38 = vrot.slane %v5854_v26, 4  ;;  %v6230_v44 = vld [vmem:[#allocation3 + $0x30] sm:$0xe] }
 0x3e6   :  { %v5080_v49 = vunpack.c.l.b16 %v5047_v29  ;;  %v6748_v40 = vrot.slane %v6747_v52, 4  ;;  %v5859_v14 = vrot.slane %v5857_v0, 5  ;;  %v6354_v24 = vunpack.c.l.b16 %v6276_v25  ;;  %v5811_v25 = vld [vmem:[#allocation3 + $0x18] sm:$0xf]  ;;  %v6699_v52 = vld [vmem:[#allocation3 + $0x24] sm:$0x1] }
 0x3e7   :  { %v6734_v46 = vrot.slane %v6733_v21, 4  ;;  %v6752_v41 = vrot.slane %v6750_v31, 5  ;;  %v5846_v23 = vor.u32 %v5845_v33, %v5842_v50  ;;  %v6738_v61 = vrot.slane %v6736_v2, 5 }
 0x3e8   :  { %v5088_v56 = vpack.c.b16 %v5080_v49, %v5079_v34  ;;  %v6370_v13 = vpack.c.b16 %v6355_v4, %v6354_v24  ;;  %v5860_v18 = vor.u32 %v5859_v14, %v5856_v38  ;;  %v10044_v36 = vor.u32 %v10698_v1, %v10043_v45  ;;  %v6701_v34 = vld [vmem:[#allocation3 + $0x2c] sm:$0x1] }
 0x3e9   :  { %v6753_v19 = vsel %vm11916_vm11, %v6748_v40, %v6752_v41  ;;  %v5863_v22 = vshll.u32 %v13171_v57, 16  ;;  %v6755_v8 = vshrl.u32 %v6698_v6, 16  ;;  %v6758_v7 = vshll.u32 %v6698_v6, 16 }
 0x3ea   :  { %v6769_v37 = vshrl.u32 %v6700_v55, 16  ;;  %v6739_v16 = vsel %vm11916_vm11, %v6734_v46, %v6738_v61  ;;  %v5847_v20 = vrot.slane %v5846_v23, 4  ;;  %v5849_v48 = vshll.u32 %v13151_v59, 16 }
 0x3eb   :  { %v6772_v60 = vshll.u32 %v6700_v55, 16  ;;  %v6968_v32 = vunpack.c.l.b16 %v6753_v19  ;;  %v5861_v47 = vrot.slane %v5860_v18, 4  ;;  %v9963_v28 = vrot.slane %v6227_v62, 9 }
 0x3ec   :  { %5188 = vmatmul.bf16.gmra.mxu2 %v5088_v56  ;;  %v6771_v11 = vrot.slane %v6769_v37, 4  ;;  %v6283_v17 = vrot.slane %v13195_v30, 5  ;;  %v9964_v12 = vrot.slane %v6228_v15, 9  ;;  %v6287_v9 = vrot.slane %v13199_v35, 5  ;;  %v6702_v15 = vld [vmem:[#allocation3 + $0x30] sm:$0xf] }
 0x3ed   :  { %6442 = vmatmul.bf16.vlgmr.msrb.gmra.mxu3 %v6370_v13  ;;  %v6774_v27 = vrot.slane %v6772_v60, 5  ;;  %v6967_v53 = vunpack.c.l.b16 %v6739_v16  ;;  %v5865_v39 = vrot.slane %v5863_v22, 5  ;;  %v6757_v59 = vrot.slane %v6755_v8, 4  ;;  %v6704_v22 = vld [vmem:[#allocation3 + $0x38] sm:$0xf] }
 0x3ee   :  { %v6760_v54 = vrot.slane %v6758_v7, 5  ;;  %v5851_v58 = vrot.slane %v5849_v48, 5  ;;  %v5882_v51 = vshrl.u32 %v5813_v43, 16  ;;  %v5885_v26 = vshll.u32 %v5813_v43, 16  ;;  %v13228_v37 = vld [vmem:[#allocation3 + $0x34] sm:$0x1] }
 0x3ef   :  { %v6983_v21 = vpack.c.b16 %v6968_v32, %v6967_v53  ;;  %v5866_v29 = vsel %vm11916_vm11, %v5861_v47, %v5865_v39  ;;  %v6775_v31 = vor.u32 %v6774_v27, %v6771_v11  ;;  %v6284_v50 = vsel %vm11869_vm8, %v9963_v28, %v6283_v17  ;;  %v10727_v32 = vld [vmem:[%s14319_s3 + $0x228] sm:$0xff] }
 0x3f0   :  { %v13208_v57 = vpop.f32.mrf.mxu0  ;;  %v13210_v63 = vpop.f32.mrf.mxu3  ;;  %v5852_v49 = vsel %vm11916_vm11, %v5847_v20, %v5851_v58  ;;  %v6288_v33 = vsel %vm11869_vm8, %v9964_v12, %v6287_v9  ;;  %v6761_v0 = vor.u32 %v6760_v54, %v6757_v59  ;;  %v6778_v4 = vshll.u32 %v6701_v34, 16  ;;  %v13237_v17 = vld [vmem:[#allocation3 + $0x2c] sm:$0x1]  ;;  %v6229_v12 = vld [vmem:[#allocation3 + $0x28] sm:$0xe]  ;;  %7323 = vmatpush.bf16.msra.mxu2 %v10727_v32 }
 0x3f1   :  { %v5868_v2 = vshrl.u32 %v5811_v25, 16  ;;  %v5871_v38 = vshll.u32 %v5811_v25, 16  ;;  %v6081_v56 = vunpack.c.l.b16 %v5866_v29  ;;  %v6764_v40 = vshll.u32 %v6699_v52, 16  ;;  %v10699_v9 = vld [vmem:[#allocation3 + $0x24] sm:$0xf0] }
 0x3f2   :  { %v5884_v14 = vrot.slane %v5882_v51, 4  ;;  %v5887_v24 = vrot.slane %v5885_v26, 5  ;;  %v6357_v1 = vunpack.c.l.b16 %v6288_v33  ;;  %v6776_v45 = vrot.slane %v6775_v31, 4  ;;  %v10047_v52 = vld [vmem:[#allocation3 + $0x20] sm:$0xf] }
 0x3f3   :  { %6637 = vmatmul.bf16.vlgmr.msra.gmra.mxu0 %v10044_v36  ;;  %v6080_v23 = vunpack.c.l.b16 %v5852_v49  ;;  %v6356_v6 = vunpack.c.l.b16 %v6284_v50  ;;  %v6762_v13 = vrot.slane %v6761_v0, 4  ;;  %v6780_v61 = vrot.slane %v6778_v4, 5 }
 0x3f4   :  { %v5870_v18 = vrot.slane %v5868_v2, 4  ;;  %v5873_v55 = vrot.slane %v5871_v38, 5  ;;  %v6766_v19 = vrot.slane %v6764_v40, 5  ;;  %v5888_v62 = vor.u32 %v5887_v24, %v5884_v14  ;;  %v6703_v2 = vld [vmem:[#allocation3 + $0x34] sm:$0x1] }
 0x3f5   :  { %7055 = vmatmul.bf16.vlgmr.msra.gmra.mxu1 %v6983_v21  ;;  %v6096_v36 = vpack.c.b16 %v6081_v56, %v6080_v23  ;;  %v6371_v8 = vpack.c.b16 %v6357_v1, %v6356_v6  ;;  %v6781_v7 = vsel %vm11916_vm11, %v6776_v45, %v6780_v61  ;;  %v6783_v16 = vshrl.u32 %v6702_v15, 16  ;;  %v5817_v21 = vld [vmem:[#allocation3 + $0x30] sm:$0xf]  ;;  %v6705_v40 = vld [vmem:[#allocation3 + $0x3c] sm:$0x1] }
 0x3f6   :  { %v6786_v20 = vshll.u32 %v6702_v15, 16  ;;  %v6797_v48 = vshrl.u32 %v6704_v22, 16  ;;  %v6800_v60 = vshll.u32 %v6704_v22, 16  ;;  %v6767_v47 = vsel %vm11916_vm11, %v6762_v13, %v6766_v19 }
 0x3f7   :  { %v5874_v28 = vor.u32 %v5873_v55, %v5870_v18  ;;  %v5877_v11 = vshll.u32 %v13195_v30, 16  ;;  %v5891_v43 = vshll.u32 %v13199_v35, 16  ;;  %v6970_v27 = vunpack.c.l.b16 %v6781_v7 }
 0x3f8   :  { %v13222_v46 = vpop.f32.mrf.mxu0  ;;  %v13224_v41 = vpop.f32.mrf.mxu3  ;;  %v5889_v53 = vrot.slane %v5888_v62, 4  ;;  %v9966_v39 = vrot.slane %v6230_v44, 9  ;;  %v6295_v59 = vrot.slane %v13228_v37, 5  ;;  %v6785_v58 = vrot.slane %v6783_v16, 4 }
 0x3f9   :  { %v6788_v34 = vrot.slane %v6786_v20, 5  ;;  %v6799_v25 = vrot.slane %v6797_v48, 4  ;;  %v6802_v51 = vrot.slane %v6800_v60, 5  ;;  %v6969_v31 = vunpack.c.l.b16 %v6767_v47 }
 0x3fa   :  { %v9965_v26 = vrot.slane %v6229_v12, 9  ;;  %v6291_v49 = vrot.slane %v13237_v17, 5  ;;  %v10048_v50 = vor.u32 %v10699_v9, %v10047_v52  ;;  %v5875_v33 = vrot.slane %v5874_v28, 4  ;;  %v10726_v52 = vld [vmem:[%s14319_s3 + $0x220] sm:$0xff] }
 0x3fb   :  { %v5879_v0 = vrot.slane %v5877_v11, 5  ;;  %v5893_v4 = vrot.slane %v5891_v43, 5  ;;  %v6984_v56 = vpack.c.b16 %v6970_v27, %v6969_v31  ;;  %v5910_v14 = vshrl.u32 %v5817_v21, 16  ;;  %7324 = vmatpush.bf16.msra.mxu2 %v10726_v52 }
 0x3fc   :  { %6168 = vmatmul.bf16.vlgmr.msrb.gmra.mxu2 %v6096_v36  ;;  %v5913_v24 = vshll.u32 %v5817_v21, 16  ;;  %v6296_v45 = vsel %vm11869_vm8, %v9966_v39, %v6295_v59  ;;  %v6789_v23 = vor.u32 %v6788_v34, %v6785_v58  ;;  %v6803_v6 = vor.u32 %v6802_v51, %v6799_v25  ;;  %v10700_v39 = vld [vmem:[#allocation3 + $0x34] sm:$0xf0]  ;;  %v6232_v25 = vld [vmem:[#allocation3 + $0x40] sm:$0xe] }
 0x3fd   :  { %6447 = vmatmul.bf16.gmra.mxu3 %v6371_v8  ;;  %v5894_v1 = vsel %vm11916_vm11, %v5889_v53, %v5893_v4  ;;  %v6292_v13 = vsel %vm11869_vm8, %v9965_v26, %v6291_v49  ;;  %v6792_v61 = vshll.u32 %v6703_v2, 16  ;;  %v6806_v18 = vshll.u32 %v6705_v40, 16  ;;  %v13276_v40 = vld [vmem:[#allocation3 + $0x3c] sm:$0x1] }
 0x3fe   :  { %v6083_v19 = vunpack.c.l.b16 %v5894_v1  ;;  %v6359_v62 = vunpack.c.l.b16 %v6296_v45  ;;  %v5912_v15 = vrot.slane %v5910_v14, 4  ;;  %v5915_v22 = vrot.slane %v5913_v24, 5  ;;  %v5821_v14 = vld [vmem:[#allocation3 + $0x40] sm:$0xf]  ;;  %v6231_v1 = vld [vmem:[#allocation3 + $0x38] sm:$0xe] }
 0x3ff   :  { %v5154_v54 = vpop.f32.mrf.mxu2  ;;  %v6790_v7 = vrot.slane %v6789_v23, 4  ;;  %v6804_v44 = vrot.slane %v6803_v6, 4  ;;  %v6358_v32 = vunpack.c.l.b16 %v6292_v13  ;;  %v6794_v47 = vrot.slane %v6792_v61, 5 }
 0x400   :  { %v5300_v30 = vadd.f32 %v13210_v63, %v5154_v54  ;;  %v13241_v29 = vpop.f32.mrf.mxu0  ;;  %v13243_v35 = vpop.f32.mrf.mxu3  ;;  %v5815_v63 = vld [vmem:[#allocation3 + $0x28] sm:$0xf]  ;;  %v6808_v28 = vrot.slane %v6806_v18, 5  ;;  %v5905_v12 = vshll.u32 %v13237_v17, 16  ;;  %v5916_v59 = vor.u32 %v5915_v22, %v5912_v15  ;;  %v10051_v17 = vld [vmem:[#allocation3 + $0x30] sm:$0xf] }
 0x401   :  { %v5896_v55 = vshrl.u32 %v5815_v63, 16  ;;  %v5899_v36 = vshll.u32 %v5815_v63, 16  ;;  %v6372_v53 = vpack.c.b16 %v6359_v62, %v6358_v32  ;;  %v6708_v54 = vld [vmem:[#allocation3 + $0x48] sm:$0xf]  ;;  %v6795_v58 = vsel %vm11916_vm11, %v6790_v7, %v6794_v47  ;;  %v6707_v15 = vld [vmem:[#allocation3 + $0x44] sm:$0x1] }
 0x402   :  { %v13247_v38 = vadd.f32 %v13208_v57, %v5300_v30  ;;  %v5880_v57 = vsel %vm11916_vm11, %v5875_v33, %v5879_v0  ;;  %v6809_v34 = vsel %vm11916_vm11, %v6804_v44, %v6808_v28  ;;  %v6825_v30 = vshrl.u32 %v6708_v54, 16  ;;  %v13274_v33 = vld [vmem:[#allocation3 + $0x44] sm:$0x1]  ;;  %v5819_v0 = vld [vmem:[#allocation3 + $0x38] sm:$0xf] }
 0x403   :  { %6642 = vmatmul.bf16.gmra.mxu0 %v10048_v50  ;;  %v6082_v60 = vunpack.c.l.b16 %v5880_v57  ;;  %v5898_v11 = vrot.slane %v5896_v55, 4  ;;  %v5901_v43 = vrot.slane %v5899_v36, 5  ;;  %v10052_v31 = vor.u32 %v10700_v39, %v10051_v17 }
 0x404   :  { %v5907_v49 = vrot.slane %v5905_v12, 5  ;;  %v5919_v50 = vshll.u32 %v13228_v37, 16  ;;  %v6971_v4 = vunpack.c.l.b16 %v6795_v58  ;;  %v6972_v2 = vunpack.c.l.b16 %v6809_v34 }
 0x405   :  { %7060 = vmatmul.bf16.gmra.mxu1 %v6984_v56  ;;  %v6097_v27 = vpack.c.b16 %v6083_v19, %v6082_v60  ;;  %v5902_v26 = vor.u32 %v5901_v43, %v5898_v11  ;;  %v5917_v56 = vrot.slane %v5916_v59, 4  ;;  %v9968_v63 = vrot.slane %v6232_v25, 9  ;;  %v6709_v60 = vld [vmem:[#allocation3 + $0x4c] sm:$0x1] }
 0x406   :  { %v6827_v6 = vrot.slane %v6825_v30, 4  ;;  %v6303_v18 = vrot.slane %v13274_v33, 5  ;;  %v5924_v55 = vshrl.u32 %v5819_v0, 16  ;;  %v5927_v36 = vshll.u32 %v5819_v0, 16 }
 0x407   :  { %v5156_v8 = vpop.f32.mrf.mxu2  ;;  %v5903_v19 = vrot.slane %v5902_v26, 4  ;;  %v5921_v62 = vrot.slane %v5919_v50, 5  ;;  %v5938_v22 = vshrl.u32 %v5821_v14, 16  ;;  %v6985_v44 = vpack.c.b16 %v6972_v2, %v6971_v4 }
 0x408   :  { %v5302_v16 = vadd.f32 %v13224_v41, %v5156_v8  ;;  %v13258_v20 = vpop.f32.mrf.mxu0  ;;  %v13260_v48 = vpop.f32.mrf.mxu3  ;;  %v6706_v41 = vld [vmem:[#allocation3 + $0x40] sm:$0xf]  ;;  %v5941_v8 = vshll.u32 %v5821_v14, 16  ;;  %v6834_v11 = vshll.u32 %v6709_v60, 16  ;;  %v6304_v43 = vsel %vm11869_vm8, %v9968_v63, %v6303_v18  ;;  %v6233_v63 = vld [vmem:[#allocation3 + $0x58] sm:$0xe] }
 0x409   :  { %v6811_v51 = vshrl.u32 %v6706_v41, 16  ;;  %v6814_v21 = vshll.u32 %v6706_v41, 16  ;;  %v5922_v32 = vsel %vm11916_vm11, %v5917_v56, %v5921_v62  ;;  %v6820_v12 = vshll.u32 %v6707_v15, 16  ;;  %v13305_v56 = vld [vmem:[#allocation3 + $0x64] sm:$0x1]  ;;  %v10725_v60 = vld [vmem:[%s14319_s3 + $0x218] sm:$0xff] }
 0x40a   :  { %v13264_v9 = vadd.f32 %v13222_v46, %v5302_v16  ;;  %v6828_v46 = vshll.u32 %v6708_v54, 16  ;;  %v9967_v16 = vrot.slane %v6231_v1, 9  ;;  %v5940_v39 = vrot.slane %v5938_v22, 4  ;;  %v6710_v1 = vld [vmem:[#allocation3 + $0x60] sm:$0xf]  ;;  %7325 = vmatpush.bf16.msra.mxu2 %v10725_v60 }
 0x40b   :  { %v6813_v45 = vrot.slane %v6811_v51, 4  ;;  %v6816_v23 = vrot.slane %v6814_v21, 5  ;;  %v5943_v59 = vrot.slane %v5941_v8, 5  ;;  %v6085_v41 = vunpack.c.l.b16 %v5922_v32  ;;  %v13316_v8 = vpop.f32.mrf.mxu1 }
 0x40c   :  { %6173 = vmatmul.bf16.gmra.mxu2 %v6097_v27  ;;  %v6830_v13 = vrot.slane %v6828_v46, 5  ;;  %v5926_v27 = vrot.slane %v5924_v55, 4  ;;  %v6361_v34 = vunpack.c.l.b16 %v6304_v43  ;;  %v6836_v21 = vrot.slane %v6834_v11, 5 }
 0x40d   :  { %6452 = vmatmul.bf16.gmra.mxu3 %v6372_v53  ;;  %v6817_v47 = vor.u32 %v6816_v23, %v6813_v45  ;;  %v5929_v53 = vrot.slane %v5927_v36, 5  ;;  %v5933_v0 = vshll.u32 %v13276_v40, 16  ;;  %v5944_v4 = vor.u32 %v5943_v59, %v5940_v39  ;;  %v6712_v45 = vld [vmem:[#allocation3 + $0x68] sm:$0xf]  ;;  %v5823_v59 = vld [vmem:[#allocation3 + $0x58] sm:$0xf] }
 0x40e   :  { %v6831_v28 = vor.u32 %v6830_v13, %v6827_v6  ;;  %v5947_v2 = vshll.u32 %v13274_v33, 16  ;;  %v10055_v33 = vld [vmem:[#allocation3 + $0x40] sm:$0xf]  ;;  %v9969_v18 = vrot.slane %v6233_v63, 9  ;;  %v6853_v55 = vshrl.u32 %v6712_v45, 16 }
 0x40f   :  { %v5159_v24 = vpop.f32.mrf.mxu2  ;;  %v6818_v25 = vrot.slane %v6817_v47, 4  ;;  %v5930_v26 = vor.u32 %v5929_v53, %v5926_v27  ;;  %v10701_v36 = vld [vmem:[#allocation3 + $0x44] sm:$0xf0]  ;;  %v6311_v15 = vrot.slane %v13305_v56, 5  ;;  %v6839_v22 = vshrl.u32 %v6710_v1, 16 }
 0x410   :  { %v5305_v61 = vadd.f32 %v13243_v35, %v5159_v24  ;;  %v13279_v37 = vpop.f32.mrf.mxu0  ;;  %v13281_v57 = vpop.f32.mrf.mxu3  ;;  %v6299_v35 = vrot.slane %v13276_v40, 5  ;;  %v6832_v51 = vrot.slane %v6831_v28, 4  ;;  %v6234_v24 = vld [vmem:[#allocation3 + $0x60] sm:$0xe]  ;;  %v6855_v11 = vrot.slane %v6853_v55, 4 }
 0x411   :  { %v9970_v62 = vrot.slane %v6234_v24, 9 }
 0x412   :  { %v13285_v7 = vadd.f32 %v13241_v29, %v5305_v61  ;;  %v5908_v29 = vsel %vm11916_vm11, %v5903_v19, %v5907_v49  ;;  %v6300_v54 = vsel %vm11869_vm8, %v9967_v16, %v6299_v35  ;;  %v13301_v49 = vld [vmem:[#allocation3 + $0x5c] sm:$0x1]  ;;  %v6837_v40 = vsel %vm11916_vm11, %v6832_v51, %v6836_v21  ;;  %v7113_v51 = vld [vmem:[#allocation3 + $0x18] sm:$0xe] }
 0x413   :  { %6647 = vmatmul.bf16.gmra.mxu0 %v10052_v31  ;;  %v6084_v52 = vunpack.c.l.b16 %v5908_v29  ;;  %v6822_v31 = vrot.slane %v6820_v12, 5  ;;  %v6360_v50 = vunpack.c.l.b16 %v6300_v54  ;;  %v6307_v13 = vrot.slane %v13301_v49, 5  ;;  %v5825_v12 = vld [vmem:[#allocation3 + $0x60] sm:$0xf] }
 0x414   :  { %v5931_v61 = vrot.slane %v5930_v26, 4  ;;  %v5945_v19 = vrot.slane %v5944_v4, 4  ;;  %v5949_v16 = vrot.slane %v5947_v2, 5  ;;  %v6842_v35 = vshll.u32 %v6710_v1, 16  ;;  %v13339_v1 = vld [vmem:[#allocation3 + $0x64] sm:$0x1] }
 0x415   :  { %7065 = vmatmul.bf16.gmra.mxu1 %v6985_v44  ;;  %v6098_v14 = vpack.c.b16 %v6085_v41, %v6084_v52  ;;  %v6373_v23 = vpack.c.b16 %v6361_v34, %v6360_v50  ;;  %v6823_v6 = vsel %vm11916_vm11, %v6818_v25, %v6822_v31  ;;  %v5935_v44 = vrot.slane %v5933_v0, 5  ;;  %v7112_v25 = vld [vmem:[#allocation3 + $0x10] sm:$0xe] }
 0x416   :  { %v6973_v47 = vunpack.c.l.b16 %v6823_v6  ;;  %v6974_v28 = vunpack.c.l.b16 %v6837_v40  ;;  %v10056_v29 = vor.u32 %v10701_v36, %v10055_v33  ;;  %v5950_v54 = vsel %vm11916_vm11, %v5945_v19, %v5949_v16 }
 0x417   :  { %v5161_v58 = vpop.f32.mrf.mxu2  ;;  %v5936_v39 = vsel %vm11916_vm11, %v5931_v61, %v5935_v44  ;;  %v6312_v34 = vsel %vm11869_vm8, %v9970_v62, %v6311_v15  ;;  %v6844_v52 = vrot.slane %v6842_v35, 5  ;;  %v5966_v31 = vshrl.u32 %v5825_v12, 16  ;;  %v13345_v15 = vpop.f32.mrf.mxu1  ;;  %v10702_v35 = vld [vmem:[#allocation3 + $0x64] sm:$0xf0] }
 0x418   :  { %v5307_v17 = vadd.f32 %v13260_v48, %v5161_v58  ;;  %v13297_v30 = vpop.f32.mrf.mxu0  ;;  %v13299_v46 = vpop.f32.mrf.mxu3  ;;  %v6308_v58 = vsel %vm11869_vm8, %v9969_v18, %v6307_v13  ;;  %v5969_v26 = vshll.u32 %v5825_v12, 16  ;;  %v6986_v50 = vpack.c.b16 %v6974_v28, %v6973_v47 }
 0x419   :  { %v5952_v4 = vshrl.u32 %v5823_v59, 16  ;;  %v5955_v2 = vshll.u32 %v5823_v59, 16  ;;  %v6086_v63 = vunpack.c.l.b16 %v5936_v39  ;;  %v6363_v24 = vunpack.c.l.b16 %v6312_v34 }
 0x41a   :  { %v13308_v48 = vadd.f32 %v13258_v20, %v5307_v17  ;;  %v6856_v20 = vshll.u32 %v6712_v45, 16  ;;  %v13337_v17 = vld [vmem:[#allocation3 + $0x6c] sm:$0x1]  ;;  %v10153_v45 = vrot.slane %v7112_v25, 9  ;;  %v7162_v6 = vrot.slane %v13189_v42, 5 }
 0x41b   :  { %v10154_v40 = vrot.slane %v7113_v51, 9  ;;  %v5968_v33 = vrot.slane %v5966_v31, 4  ;;  %v5971_v61 = vrot.slane %v5969_v26, 5  ;;  %v7166_v18 = vrot.slane %v13181_v5, 5  ;;  %v13363_v31 = vld [vmem:[#allocation3 + $0x6c] sm:$0x1] }
 0x41c   :  { %6178 = vmatmul.bf16.gmra.mxu2 %v6098_v14  ;;  %v6858_v43 = vrot.slane %v6856_v20, 5  ;;  %v6362_v14 = vunpack.c.l.b16 %v6308_v58  ;;  %v6848_v20 = vshll.u32 %v13339_v1, 16  ;;  %v5954_v19 = vrot.slane %v5952_v4, 4  ;;  %v13365_v26 = vld [vmem:[#allocation3 + $0x74] sm:$0x1] }
 0x41d   :  { %6457 = vmatmul.bf16.gmra.mxu3 %v6373_v23  ;;  %v6087_v23 = vunpack.c.l.b16 %v5950_v54  ;;  %v5957_v62 = vrot.slane %v5955_v2, 5  ;;  %v5972_v28 = vor.u32 %v5971_v61, %v5968_v33  ;;  %v7167_v12 = vsel %vm11869_vm8, %v10154_v40, %v7166_v18  ;;  %v6235_v2 = vld [vmem:[#allocation3 + $0x68] sm:$0xe]  ;;  %v5829_v18 = vld [vmem:[#allocation3 + $0x70] sm:$0xf] }
 0x41e   :  { %v6859_v0 = vor.u32 %v6858_v43, %v6855_v11  ;;  %v6374_v42 = vpack.c.b16 %v6363_v24, %v6362_v14  ;;  %v6714_v11 = vld [vmem:[#allocation3 + $0x70] sm:$0xf]  ;;  %v6716_v43 = vld [vmem:[#allocation3 + $0x78] sm:$0xf]  ;;  %v5961_v51 = vshll.u32 %v13301_v49, 16 }
 0x41f   :  { %v5164_v32 = vpop.f32.mrf.mxu2  ;;  %v6099_v16 = vpack.c.b16 %v6087_v23, %v6086_v63  ;;  %v5958_v59 = vor.u32 %v5957_v62, %v5954_v19  ;;  %v6867_v54 = vshrl.u32 %v6714_v11, 16  ;;  %v6870_v58 = vshll.u32 %v6714_v11, 16  ;;  %v10724_v24 = vld [vmem:[%s14319_s3 + $0x210] sm:$0xff]  ;;  %v13375_v19 = vld [vmem:[#allocation3 + $0x7c] sm:$0x1] }
 0x420   :  { %v5310_v27 = vadd.f32 %v13281_v57, %v5164_v32  ;;  %v13322_v53 = vpop.f32.mrf.mxu3  ;;  %v13326_v41 = vpop.f32.mrf.mxu0  ;;  %v6841_v57 = vrot.slane %v6839_v22, 4  ;;  %v6860_v36 = vrot.slane %v6859_v0, 4  ;;  %v5975_v32 = vshll.u32 %v13305_v56, 16  ;;  %7326 = vmatpush.bf16.msra.mxu2 %v10724_v24 }
 0x421   :  { %v7163_v56 = vsel %vm11869_vm8, %v10153_v45, %v7162_v6  ;;  %v6881_v34 = vshrl.u32 %v6716_v43, 16  ;;  %v5973_v4 = vrot.slane %v5972_v28, 4  ;;  %v5959_v49 = vrot.slane %v5958_v59, 4  ;;  %v13388_v28 = vld [vmem:[#allocation3 + $0x74] sm:$0x1] }
 0x422   :  { %v13335_v21 = vadd.f32 %v13279_v37, %v5310_v27  ;;  %v6862_v37 = vshll.u32 %v13337_v17, 16  ;;  %v6845_v13 = vor.u32 %v6844_v52, %v6841_v57  ;;  %v6884_v57 = vshll.u32 %v6716_v43, 16 }
 0x423   :  { %6652 = vmatmul.bf16.gmra.mxu0 %v10056_v29  ;;  %v6850_v29 = vrot.slane %v6848_v20, 5  ;;  %v5977_v52 = vrot.slane %v5975_v32, 5  ;;  %v6883_v63 = vrot.slane %v6881_v34, 4  ;;  %v7241_v6 = vunpack.c.l.b16 %v7163_v56 }
 0x424   :  { %v6864_v60 = vrot.slane %v6862_v37, 5  ;;  %v6846_v47 = vrot.slane %v6845_v13, 4  ;;  %v6886_v14 = vrot.slane %v6884_v57, 5  ;;  %v6319_v13 = vrot.slane %v13365_v26, 5 }
 0x425   :  { %7070 = vmatmul.bf16.gmra.mxu1 %v6986_v50  ;;  %v7242_v50 = vunpack.c.l.b16 %v7167_v12  ;;  %v6869_v33 = vrot.slane %v6867_v54, 4  ;;  %v6872_v61 = vrot.slane %v6870_v58, 5  ;;  %v9971_v20 = vrot.slane %v6235_v2, 9 }
 0x426   :  { %v6865_v39 = vsel %vm11916_vm11, %v6860_v36, %v6864_v60  ;;  %v6851_v0 = vsel %vm11916_vm11, %v6846_v47, %v6850_v29  ;;  %v6315_v36 = vrot.slane %v13363_v31, 5  ;;  %v5827_v60 = vld [vmem:[#allocation3 + $0x68] sm:$0xf]  ;;  %v5994_v11 = vshrl.u32 %v5829_v18, 16 }
 0x427   :  { %v5166_v55 = vpop.f32.mrf.mxu2  ;;  %v6976_v23 = vunpack.c.l.b16 %v6865_v39  ;;  %v13377_v62 = vpack.c.b16 %v7242_v50, %v7241_v6  ;;  %v5997_v43 = vshll.u32 %v5829_v18, 16  ;;  %v6890_v29 = vshll.u32 %v13375_v19, 16 }
 0x428   :  { %v5312_v22 = vadd.f32 %v13299_v46, %v5166_v55  ;;  %v13348_v44 = vpop.f32.mrf.mxu3  ;;  %v13356_v27 = vpop.f32.mrf.mxu0  ;;  %v10059_v46 = vld [vmem:[#allocation3 + $0x60] sm:$0xf]  ;;  %v6975_v55 = vunpack.c.l.b16 %v6851_v0  ;;  %v6316_v56 = vsel %vm11869_vm8, %v9971_v20, %v6315_v36  ;;  %v5983_v54 = vshll.u32 %v5827_v60, 16  ;;  %v10063_v20 = vld [vmem:[#allocation3 + $0x70] sm:$0xf] }
 0x429   :  { %v10060_v25 = vor.u32 %v10702_v35, %v10059_v46  ;;  %v6887_v35 = vor.u32 %v6886_v14, %v6883_v63  ;;  %v6873_v46 = vor.u32 %v6872_v61, %v6869_v33  ;;  %v6876_v58 = vshll.u32 %v13388_v28, 16  ;;  %v6720_v33 = vld [vmem:[#allocation3 + $0x88] sm:$0xf]  ;;  %v10703_v61 = vld [vmem:[#allocation3 + $0x74] sm:$0xf0] }
 0x42a   :  { %v13352_v5 = vadd.f32 %v13297_v30, %v5312_v22  ;;  %v6236_v30 = vld [vmem:[#allocation3 + $0x70] sm:$0xe]  ;;  %v13379_v22 = vpop.f32.mrf.mxu1  ;;  %v6987_v47 = vpack.c.b16 %v6976_v23, %v6975_v55  ;;  %v5999_v50 = vrot.slane %v5997_v43, 5  ;;  %v6892_v63 = vrot.slane %v6890_v29, 5 }
 0x42b   :  { %v9972_v37 = vrot.slane %v6236_v30, 9  ;;  %v5980_v30 = vshrl.u32 %v5827_v60, 16  ;;  %v6888_v34 = vrot.slane %v6887_v35, 4  ;;  %v6874_v2 = vrot.slane %v6873_v46, 4  ;;  %v13416_v60 = vld [vmem:[#allocation3 + $0x84] sm:$0x1] }
 0x42c   :  { %6183 = vmatmul.bf16.gmra.mxu2 %v6099_v16  ;;  %v5989_v23 = vshll.u32 %v13363_v31, 16  ;;  %v6909_v36 = vshrl.u32 %v6720_v33, 16  ;;  %v10064_v43 = vor.u32 %v10703_v61, %v10063_v20  ;;  %v6237_v46 = vld [vmem:[#allocation3 + $0x78] sm:$0xe]  ;;  %v13439_v20 = vld [vmem:[#allocation3 + $0x84] sm:$0x1] }
 0x42d   :  { %6462 = vmatmul.bf16.gmra.mxu3 %v6374_v42  ;;  %v5978_v42 = vsel %vm11916_vm11, %v5973_v4, %v5977_v52  ;;  %v5996_v52 = vrot.slane %v5994_v11, 4  ;;  %v6364_v4 = vunpack.c.l.b16 %v6316_v56  ;;  %v5982_v24 = vrot.slane %v5980_v30, 4 }
 0x42e   :  { %v6089_v59 = vunpack.c.l.b16 %v5978_v42  ;;  %v6893_v6 = vsel %vm11916_vm11, %v6888_v34, %v6892_v63  ;;  %v6911_v34 = vrot.slane %v6909_v36, 4 }
 0x42f   :  { %v5169_v45 = vpop.f32.mrf.mxu2  ;;  %v6000_v18 = vor.u32 %v5999_v50, %v5996_v52 }
 0x430   :  { %v5315_v40 = vadd.f32 %v13322_v53, %v5169_v45  ;;  %v5963_v53 = vrot.slane %v5961_v51, 5  ;;  %v13386_v32 = vpop.f32.mrf.mxu3  ;;  %v13395_v39 = vpop.f32.mrf.mxu0  ;;  %v5985_v45 = vrot.slane %v5983_v54, 5 }
 0x432   :  { %v13382_v16 = vadd.f32 %v13326_v41, %v5315_v40  ;;  %v5964_v12 = vsel %vm11916_vm11, %v5959_v49, %v5963_v53  ;;  %v6320_v41 = vsel %vm11869_vm8, %v9972_v37, %v6319_v13  ;;  %v6878_v37 = vrot.slane %v6876_v58, 5  ;;  %v6718_v13 = vld [vmem:[#allocation3 + $0x80] sm:$0xf]  ;;  %v13408_v55 = vpop.f32.mrf.mxu1 }
 0x433   :  { %6657 = vmatmul.bf16.gmra.mxu0 %v10060_v25  ;;  %v6088_v25 = vunpack.c.l.b16 %v5964_v12  ;;  %v6365_v51 = vunpack.c.l.b16 %v6320_v41  ;;  %v6003_v40 = vshll.u32 %v13365_v26, 16  ;;  %v6912_v53 = vshll.u32 %v6720_v33, 16 }
 0x434   :  { %v6879_v31 = vsel %vm11916_vm11, %v6874_v2, %v6878_v37  ;;  %v6978_v26 = vunpack.c.l.b16 %v6893_v6  ;;  %v5986_v35 = vor.u32 %v5985_v45, %v5982_v24  ;;  %v6895_v11 = vshrl.u32 %v6718_v13, 16 }
 0x435   :  { %7075 = vmatmul.bf16.gmra.mxu1 %v6987_v47  ;;  %v6100_v14 = vpack.c.b16 %v6089_v59, %v6088_v25  ;;  %v6238_v47 = vld [vmem:[#allocation3 + $0x80] sm:$0xe]  ;;  %v5991_v12 = vrot.slane %v5989_v23, 5  ;;  %v6005_v41 = vrot.slane %v6003_v40, 5  ;;  %v6898_v29 = vshll.u32 %v6718_v13, 16  ;;  %v10723_v59 = vld [vmem:[%s14319_s3 + $0x208] sm:$0xff] }
 0x436   :  { %v6977_v54 = vunpack.c.l.b16 %v6879_v31  ;;  %v6001_v58 = vrot.slane %v6000_v18, 4  ;;  %v5831_v25 = vld [vmem:[#allocation3 + $0x78] sm:$0xf]  ;;  %v9974_v50 = vrot.slane %v6238_v47, 9  ;;  %7327 = vmatpush.bf16.msra.mxu2 %v10723_v59  ;;  %v5987_v63 = vrot.slane %v5986_v35, 4 }
 0x437   :  { %v5171_v57 = vpop.f32.mrf.mxu2  ;;  %v6897_v24 = vrot.slane %v6895_v11, 4  ;;  %v13429_v23 = vld [vmem:[#allocation3 + $0x8c] sm:$0x1]  ;;  %v6900_v37 = vrot.slane %v6898_v29, 5  ;;  %v6008_v6 = vshrl.u32 %v5831_v25, 16  ;;  %v6011_v40 = vshll.u32 %v5831_v25, 16 }
 0x438   :  { %v5317_v0 = vadd.f32 %v13348_v44, %v5171_v57  ;;  %v6375_v44 = vpack.c.b16 %v6365_v51, %v6364_v4  ;;  %v13414_v42 = vpop.f32.mrf.mxu3  ;;  %v13421_v56 = vpop.f32.mrf.mxu0  ;;  %v6914_v57 = vrot.slane %v6912_v53, 5  ;;  %v5833_v4 = vld [vmem:[#allocation3 + $0x80] sm:$0xf]  ;;  %v6988_v2 = vpack.c.b16 %v6978_v26, %v6977_v54 }
 0x439   :  { %v6022_v33 = vshrl.u32 %v5833_v4, 16  ;;  %v6918_v31 = vshll.u32 %v13429_v23, 16  ;;  %v6901_v26 = vor.u32 %v6900_v37, %v6897_v24  ;;  %v6010_v35 = vrot.slane %v6008_v6, 4  ;;  %v13450_v24 = vld [vmem:[#allocation3 + $0x94] sm:$0x1] }
 0x43a   :  { %v13403_v49 = vadd.f32 %v13356_v27, %v5317_v0  ;;  %v13412_v27 = vld [vmem:[#allocation3 + $0x7c] sm:$0x1]  ;;  %v6327_v0 = vrot.slane %v13416_v60, 5  ;;  %v6915_v13 = vor.u32 %v6914_v57, %v6911_v34  ;;  %v13442_v36 = vpop.f32.mrf.mxu1  ;;  %v6013_v47 = vrot.slane %v6011_v40, 5  ;;  %v6240_v40 = vld [vmem:[#allocation3 + $0x90] sm:$0xe] }
 0x43b   :  { %v6323_v52 = vrot.slane %v13412_v27, 5  ;;  %v6024_v29 = vrot.slane %v6022_v33, 4  ;;  %v6920_v34 = vrot.slane %v6918_v31, 5  ;;  %v6017_v57 = vshll.u32 %v13412_v27, 16  ;;  %v10067_v33 = vld [vmem:[#allocation3 + $0x80] sm:$0xf] }
 0x43c   :  { %6188 = vmatmul.bf16.gmra.mxu2 %v6100_v14  ;;  %v9973_v14 = vrot.slane %v6237_v46, 9  ;;  %v6328_v61 = vsel %vm11869_vm8, %v9974_v50, %v6327_v0  ;;  %v6916_v46 = vrot.slane %v6915_v13, 4  ;;  %v6722_v50 = vld [vmem:[#allocation3 + $0x90] sm:$0xf]  ;;  %v6724_v0 = vld [vmem:[#allocation3 + $0x98] sm:$0xf] }
 0x43d   :  { %6467 = vmatmul.bf16.gmra.mxu3 %v6375_v44  ;;  %v6025_v44 = vshll.u32 %v5833_v4, 16  ;;  %v6923_v37 = vshrl.u32 %v6722_v50, 16  ;;  %v6937_v13 = vshrl.u32 %v6724_v0, 16  ;;  %v6940_v27 = vshll.u32 %v6724_v0, 16 }
 0x43e   :  { %v6324_v18 = vsel %vm11869_vm8, %v9973_v14, %v6323_v52  ;;  %v6014_v52 = vor.u32 %v6013_v47, %v6010_v35  ;;  %v6239_v35 = vld [vmem:[#allocation3 + $0x88] sm:$0xe]  ;;  %v10722_v47 = vld [vmem:[%s14319_s3 + $0x200] sm:$0xff] }
 0x43f   :  { %v5174_v30 = vpop.f32.mrf.mxu2  ;;  %7328 = vmatpush.bf16.msra.mxu2 %v10722_v47  ;;  %v9975_v0 = vrot.slane %v6239_v35, 9  ;;  %v7120_v47 = vld [vmem:[#allocation3 + $0x60] sm:$0xe] }
 0x440   :  { %v5320_v51 = vadd.f32 %v13386_v32, %v5174_v30  ;;  %v6006_v32 = vsel %vm11916_vm11, %v6001_v58, %v6005_v41  ;;  %v5324_v11 = vpop.f32.mrf.mxu3  ;;  %v6367_v41 = vunpack.c.l.b16 %v6328_v61  ;;  %v6904_v30 = vshll.u32 %v13439_v20, 16  ;;  %v5582_v54 = vpop.f32.mrf.mxu0 }
 0x441   :  { %v6091_v53 = vunpack.c.l.b16 %v6006_v32  ;;  %v6366_v58 = vunpack.c.l.b16 %v6324_v18  ;;  %v6926_v32 = vshll.u32 %v6722_v50, 16  ;;  %v6031_v61 = vshll.u32 %v13416_v60, 16 }
 0x442   :  { %v13427_v45 = vadd.f32 %v13395_v39, %v5320_v51  ;;  %v5992_v39 = vsel %vm11916_vm11, %v5987_v63, %v5991_v12  ;;  %v6027_v12 = vrot.slane %v6025_v44, 5  ;;  %v6902_v51 = vrot.slane %v6901_v26, 4  ;;  %v13455_v26 = vld [vmem:[#allocation3 + $0x8c] sm:$0x1] }
 0x443   :  { %6662 = vmatmul.bf16.gmra.mxu0 %v10064_v43  ;;  %v6090_v59 = vunpack.c.l.b16 %v5992_v39  ;;  %v6376_v4 = vpack.c.b16 %v6367_v41, %v6366_v58  ;;  %v6921_v63 = vsel %vm11916_vm11, %v6916_v46, %v6920_v34  ;;  %v6906_v6 = vrot.slane %v6904_v30, 5 }
 0x444   :  { %v6028_v14 = vor.u32 %v6027_v12, %v6024_v29  ;;  %v6019_v44 = vrot.slane %v6017_v57, 5  ;;  %v6980_v31 = vunpack.c.l.b16 %v6921_v63  ;;  %v9976_v29 = vrot.slane %v6240_v40, 9  ;;  %v5837_v57 = vld [vmem:[#allocation3 + $0x90] sm:$0xf]  ;;  %v13474_v40 = vld [vmem:[#allocation3 + $0x94] sm:$0x1] }
 0x445   :  { %7080 = vmatmul.bf16.gmra.mxu1 %v6988_v2  ;;  %v6101_v25 = vpack.c.b16 %v6091_v53, %v6090_v59  ;;  %v10704_v2 = vld [vmem:[#allocation3 + $0x84] sm:$0xf0]  ;;  %v6907_v18 = vsel %vm11916_vm11, %v6902_v51, %v6906_v6  ;;  %v6015_v53 = vrot.slane %v6014_v52, 4  ;;  %v6335_v12 = vrot.slane %v13450_v24, 5 }
 0x446   :  { %v10068_v39 = vor.u32 %v10704_v2, %v10067_v33  ;;  %v6029_v46 = vrot.slane %v6028_v14, 4  ;;  %v6925_v59 = vrot.slane %v6923_v37, 4  ;;  %v6928_v30 = vrot.slane %v6926_v32, 5  ;;  %v13476_v32 = vld [vmem:[#allocation3 + $0x9c] sm:$0x1] }
 0x447   :  { %v13444_v43 = vpop.f32.mrf.mxu2  ;;  %v6939_v58 = vrot.slane %v6937_v13, 4  ;;  %v6942_v34 = vrot.slane %v6940_v27, 5  ;;  %v6979_v52 = vunpack.c.l.b16 %v6907_v18  ;;  %v6033_v50 = vrot.slane %v6031_v61, 5 }
 0x448   :  { %v13463_v51 = vpop.f32.mrf.mxu3  ;;  %v6020_v63 = vsel %vm11916_vm11, %v6015_v53, %v6019_v44  ;;  %v13470_v14 = vpop.f32.mrf.mxu0  ;;  %v6050_v13 = vshrl.u32 %v5837_v57, 16  ;;  %v6053_v27 = vshll.u32 %v5837_v57, 16  ;;  %v6929_v33 = vor.u32 %v6928_v30, %v6925_v59 }
 0x449   :  { %14345 = vst [vmem:[#allocation9_spill] sm:$0xff] %v13463_v51  ;;  %v6989_v37 = vpack.c.b16 %v6980_v31, %v6979_v52  ;;  %v6034_v6 = vsel %vm11916_vm11, %v6029_v46, %v6033_v50  ;;  %v6943_v61 = vor.u32 %v6942_v34, %v6939_v58  ;;  %v6946_v44 = vshll.u32 %v13476_v32, 16 }
 0x44a   :  { %14346 = vst [vmem:[#allocation7_spill] sm:$0xff] %v13470_v14  ;;  %v6093_v53 = vunpack.c.l.b16 %v6034_v6  ;;  %v6932_v35 = vshll.u32 %v13474_v40, 16  ;;  %v6092_v46 = vunpack.c.l.b16 %v6020_v63  ;;  %v6052_v57 = vrot.slane %v6050_v13, 4 }
 0x44b   :  { %v6930_v30 = vrot.slane %v6929_v33, 4  ;;  %v6944_v58 = vrot.slane %v6943_v61, 4  ;;  %v6948_v34 = vrot.slane %v6946_v44, 5  ;;  %v7198_v14 = vrot.slane %v13337_v17, 5 }
 0x44c   :  { %6193 = vmatmul.bf16.gmra.mxu2 %v6101_v25  ;;  %v13461_v25 = vpop.f32.mrf.mxu1 }
 0x44d   :  { %6472 = vmatmul.bf16.gmra.mxu3 %v6376_v4  ;;  %v6331_v4 = vrot.slane %v13455_v26, 5 }
 0x44f   :  { %v5179_v41 = vpop.f32.mrf.mxu2 }
 0x450   :  { %v5325_v60 = vadd.f32 %v5324_v11, %v5179_v41  ;;  %v5835_v11 = vld [vmem:[#allocation3 + $0x88] sm:$0xf]  ;;  %v5329_v63 = vpop.f32.mrf.mxu3  ;;  %v5587_v44 = vpop.f32.mrf.mxu0 }
 0x451   :  { %v6036_v18 = vshrl.u32 %v5835_v11, 16  ;;  %v6039_v31 = vshll.u32 %v5835_v11, 16  ;;  %v6102_v11 = vpack.c.b16 %v6093_v53, %v6092_v46  ;;  %v10071_v53 = vld [vmem:[#allocation3 + $0x90] sm:$0xf] }
 0x452   :  { %v13466_v2 = vadd.f32 %v5582_v54, %v5325_v60  ;;  %v6336_v54 = vsel %vm11869_vm8, %v9976_v29, %v6335_v12  ;;  %v6055_v29 = vrot.slane %v6053_v27, 5  ;;  %v7121_v12 = vld [vmem:[#allocation3 + $0x68] sm:$0xe] }
 0x453   :  { %6667 = vmatmul.bf16.gmra.mxu0 %v10068_v39  ;;  %v6332_v39 = vsel %vm11869_vm8, %v9975_v0, %v6331_v4  ;;  %v6369_v60 = vunpack.c.l.b16 %v6336_v54  ;;  %v6038_v52 = vrot.slane %v6036_v18, 4  ;;  %v6041_v50 = vrot.slane %v6039_v31, 5 }
 0x454   :  { %v6368_v59 = vunpack.c.l.b16 %v6332_v39  ;;  %v10161_v0 = vrot.slane %v7120_v47, 9  ;;  %v7194_v4 = vrot.slane %v13339_v1, 5  ;;  %v10162_v6 = vrot.slane %v7121_v12, 9  ;;  %v13488_v51 = vpop.f32.mrf.mxu1 }
 0x455   :  { %7085 = vmatmul.bf16.gmra.mxu1 %v6989_v37  ;;  %v6934_v37 = vrot.slane %v6932_v35, 5  ;;  %v6056_v27 = vor.u32 %v6055_v29, %v6052_v57  ;;  %v6949_v1 = vsel %vm11916_vm11, %v6944_v58, %v6948_v34  ;;  %v6042_v17 = vor.u32 %v6041_v50, %v6038_v52  ;;  %v10705_v35 = vld [vmem:[#allocation3 + $0x94] sm:$0xf0]  ;;  %v7122_v34 = vld [vmem:[#allocation3 + $0x70] sm:$0xe] }
 0x456   :  { %v6377_v13 = vpack.c.b16 %v6369_v60, %v6368_v59  ;;  %v7195_v54 = vsel %vm11869_vm8, %v10161_v0, %v7194_v4  ;;  %v7199_v61 = vsel %vm11869_vm8, %v10162_v6, %v7198_v14  ;;  %v6059_v39 = vshll.u32 %v13450_v24, 16 }
 0x457   :  { %v13484_v41 = vpop.f32.mrf.mxu2  ;;  %v6935_v33 = vsel %vm11916_vm11, %v6930_v30, %v6934_v37  ;;  %v7249_v18 = vunpack.c.l.b16 %v7195_v54  ;;  %v7250_v31 = vunpack.c.l.b16 %v7199_v61  ;;  %v6045_v47 = vshll.u32 %v13455_v26, 16  ;;  %v7123_v54 = vld [vmem:[#allocation3 + $0x78] sm:$0xe] }
 0x458   :  { %v6981_v60 = vunpack.c.l.b16 %v6935_v33  ;;  %v6982_v57 = vunpack.c.l.b16 %v6949_v1  ;;  %v6057_v29 = vrot.slane %v6056_v27, 4  ;;  %v10072_v30 = vor.u32 %v10705_v35, %v10071_v53  ;;  %v13509_v37 = vpop.f32.mrf.mxu3  ;;  %v10744_v53 = vld [vmem:[%s14320_s4 + $0x74] sm:$0xf]  ;;  %v10277_v35 = vld [vmem:[%s14320_s4 + $0x78] sm:$0xf0] }
 0x459   :  { %v13500_v12 = vpack.c.b16 %v7250_v31, %v7249_v18  ;;  %v6043_v14 = vrot.slane %v6042_v17, 4  ;;  %v6061_v58 = vrot.slane %v6059_v39, 5  ;;  %v6047_v50 = vrot.slane %v6045_v47, 5  ;;  %v10275_v18 = vld [vmem:[%s14320_s4 + $0x70] sm:$0xf] }
 0x45a   :  { %v6990_v24 = vpack.c.b16 %v6982_v57, %v6981_v60  ;;  %v10163_v26 = vrot.slane %v7122_v34, 9  ;;  %v7202_v4 = vrot.slane %v13388_v28, 5  ;;  %v10164_v61 = vrot.slane %v7123_v54, 9  ;;  %v10745_v31 = vld [vmem:[%s14320_s4 + $0x74] sm:$0xf0] }
 0x45b   :  { %v6062_v0 = vsel %vm11916_vm11, %v6057_v29, %v6061_v58  ;;  %v6048_v6 = vsel %vm11916_vm11, %v6043_v14, %v6047_v50  ;;  %v7206_v28 = vrot.slane %v13375_v19, 5  ;;  %v10276_v19 = vor.u32 %v10745_v31, %v10275_v18  ;;  %v7125_v50 = vld [vmem:[#allocation3 + $0x88] sm:$0xe]  ;;  %v10800_v31 = vld [vmem:[#allocation3 + $0x2c] sm:$0x1] }
 0x45c   :  { %6198 = vmatmul.bf16.gmra.mxu2 %v6102_v11  ;;  %v13507_v11 = vpop.f32.mrf.mxu1  ;;  %v6094_v33 = vunpack.c.l.b16 %v6048_v6  ;;  %v7203_v1 = vsel %vm11869_vm8, %v10163_v26, %v7202_v4  ;;  %v7210_v34 = vrot.slane %v13439_v20, 5  ;;  %v10166_v26 = vrot.slane %v7125_v50, 9  ;;  %v10267_v20 = vld [vmem:[%s14320_s4 + $0x60] sm:$0xf] }
 0x45d   :  { %6477 = vmatmul.bf16.gmra.mxu3 %v6377_v13  ;;  %v13513_v13 = vpop.f32.mrf.mxu0  ;;  %v7207_v17 = vsel %vm11869_vm8, %v10164_v61, %v7206_v28  ;;  %v7251_v39 = vunpack.c.l.b16 %v7203_v1  ;;  %v7214_v4 = vrot.slane %v13429_v23, 5  ;;  %v10743_v1 = vld [vmem:[%s14320_s4 + $0x64] sm:$0xf0]  ;;  %v10742_v23 = vld [vmem:[%s14320_s4 + $0x64] sm:$0xf] }
 0x45e   :  { %v7252_v10 = vunpack.c.l.b16 %v7207_v17  ;;  %7506 = vmatpush.bf16.msra.mxu3 %v10276_v19  ;;  %v10268_v61 = vor.u32 %v10743_v1, %v10267_v20  ;;  %v10269_v28 = vld [vmem:[%s14320_s4 + $0x68] sm:$0xf0]  ;;  %v7114_v17 = vld [vmem:[#allocation3 + $0x20] sm:$0xe]  ;;  %v7126_v19 = vld [vmem:[#allocation3 + $0x90] sm:$0xe] }
 0x45f   :  { %v5184_v46 = vpop.f32.mrf.mxu2  ;;  %v7215_v6 = vsel %vm11869_vm8, %v10166_v26, %v7214_v4  ;;  %v5792_v4 = vadd.f32 %v13345_v15, %v13264_v9  ;;  %v7117_v1 = vld [vmem:[#allocation3 + $0x38] sm:$0xe]  ;;  %v10740_v9 = vld [vmem:[%s14320_s4 + $0x54] sm:$0xf] }
 0x460   :  { %v5330_v59 = vadd.f32 %v5329_v63, %v5184_v46  ;;  %v6095_v63 = vunpack.c.l.b16 %v6062_v0  ;;  %v13534_v47 = vpack.c.b16 %v7252_v10, %v7251_v39  ;;  %v10280_v46 = vor.u32 %v10744_v53, %v10277_v35  ;;  %v5334_v60 = vpop.f32.mrf.mxu3  ;;  %v7127_v35 = vld [vmem:[#allocation3 + $0x98] sm:$0xe] }
 0x461   :  { %v10272_v39 = vor.u32 %v10742_v23, %v10269_v28  ;;  %v7174_v53 = vrot.slane %v10800_v31, 5  ;;  %v10259_v23 = vld [vmem:[%s14320_s4 + $0x50] sm:$0xf]  ;;  %v10261_v28 = vld [vmem:[%s14320_s4 + $0x58] sm:$0xf0]  ;;  %v10158_v31 = vrot.slane %v7117_v1, 9 }
 0x462   :  { %v13502_v52 = vadd.f32 %v5587_v44, %v5330_v59  ;;  %v6103_v44 = vpack.c.b16 %v6095_v63, %v6094_v33  ;;  %7555 = vmatpush.bf16.msrb.mxu0 %v10280_v46  ;;  %v7115_v63 = vld [vmem:[#allocation3 + $0x28] sm:$0xe]  ;;  %v7254_v33 = vunpack.c.l.b16 %v7215_v6  ;;  %7507 = vmatpush.bf16.msra.mxu3 %v10268_v61  ;;  %v10741_v61 = vld [vmem:[%s14320_s4 + $0x54] sm:$0xf0] }
 0x463   :  { %6672 = vmatmul.bf16.gmra.mxu0 %v10072_v30  ;;  %v7124_v30 = vld [vmem:[#allocation3 + $0x80] sm:$0xe]  ;;  %v10156_v18 = vrot.slane %v7115_v63, 9  ;;  %v10260_v15 = vor.u32 %v10741_v61, %v10259_v23  ;;  %v10804_v23 = vld [vmem:[#allocation3 + $0x44] sm:$0x1] }
 0x464   :  { %v10165_v58 = vrot.slane %v7124_v30, 9  ;;  %v10801_v30 = vld [vmem:[#allocation3 + $0x24] sm:$0x1]  ;;  %v7186_v61 = vrot.slane %v10804_v23, 5 }
 0x465   :  { %7090 = vmatmul.bf16.gmra.mxu1 %v6990_v24  ;;  %v5592_v59 = vpop.f32.mrf.mxu0 }
 0x466   :  { %v7211_v0 = vsel %vm11869_vm8, %v10165_v58, %v7210_v34  ;;  %7556 = vmatpush.bf16.msrb.mxu0 %v10272_v39  ;;  %v7170_v58 = vrot.slane %v10801_v30, 5  ;;  %v7175_v34 = vsel %vm11869_vm8, %v10156_v18, %v7174_v53  ;;  %v10264_v39 = vor.u32 %v10740_v9, %v10261_v28  ;;  %v10802_v53 = vld [vmem:[#allocation3 + $0x3c] sm:$0x1]  ;;  %7508 = vmatpush.bf16.msra.mxu3 %v10260_v15  ;;  %v10805_v15 = vld [vmem:[#allocation3 + $0x4c] sm:$0x1] }
 0x467   :  { %v13515_v27 = vpop.f32.mrf.mxu2  ;;  %v7253_v54 = vunpack.c.l.b16 %v7211_v0  ;;  %v7244_v6 = vunpack.c.l.b16 %v7175_v34  ;;  %v7190_v28 = vrot.slane %v10805_v15, 5 }
 0x46a   :  { %7557 = vmatpush.bf16.msrb.mxu0 %v10264_v39 }
 0x46c   :  { %6203 = vmatmul.bf16.gmra.mxu2 %v6103_v44  ;;  %v13559_v44 = vpack.c.b16 %v7254_v33, %v7253_v54 }
 0x46f   :  { %v5189_v57 = vpop.f32.mrf.mxu2 }
 0x470   :  { %v5335_v29 = vadd.f32 %v5334_v60, %v5189_v57  ;;  %v10167_v60 = vrot.slane %v7126_v19, 9  ;;  %v7218_v57 = vrot.slane %v13474_v40, 5  ;;  %v7182_v19 = vrot.slane %v10802_v53, 5 }
 0x472   :  { %v13536_v14 = vadd.f32 %v5592_v59, %v5335_v29  ;;  %v10168_v29 = vrot.slane %v7127_v35, 9  ;;  %v10155_v59 = vrot.slane %v7114_v17, 9  ;;  %v7116_v17 = vld [vmem:[#allocation3 + $0x30] sm:$0xe] }
 0x474   :  { %v7171_v40 = vsel %vm11869_vm8, %v10155_v59, %v7170_v58  ;;  %v7183_v59 = vsel %vm11869_vm8, %v10158_v31, %v7182_v19 }
 0x475   :  { %v7243_v33 = vunpack.c.l.b16 %v7171_v40  ;;  %v7246_v30 = vunpack.c.l.b16 %v7183_v59  ;;  %v10251_v40 = vld [vmem:[%s14320_s4 + $0x40] sm:$0xf]  ;;  %v10245_v59 = vld [vmem:[%s14320_s4 + $0x38] sm:$0xf0] }
 0x477   :  { %v13539_v24 = vpop.f32.mrf.mxu2  ;;  %v7258_v20 = vpack.c.b16 %v7244_v6, %v7243_v33  ;;  %v10253_v6 = vld [vmem:[%s14320_s4 + $0x48] sm:$0xf0] }
 0x47c   :  { %7329 = vmatmul.bf16.vlgmr.msra.gmra.mxu2 %v13377_v62  ;;  %v5791_v62 = vadd.f32 %v13316_v8, %v13247_v38  ;;  %v7222_v38 = vrot.slane %v13476_v32, 5  ;;  %v7219_v8 = vsel %vm11869_vm8, %v10167_v60, %v7218_v57  ;;  %v10157_v60 = vrot.slane %v7116_v17, 9  ;;  %v10803_v57 = vld [vmem:[#allocation3 + $0x34] sm:$0x1] }
 0x47d   :  { %v7255_v0 = vunpack.c.l.b16 %v7219_v8 }
 0x47e   :  { %v7223_v50 = vsel %vm11869_vm8, %v10168_v29, %v7222_v38  ;;  %v7178_v29 = vrot.slane %v10803_v57, 5  ;;  %v10243_v57 = vld [vmem:[%s14320_s4 + $0x30] sm:$0xf] }
 0x47f   :  { %v6169_v10 = vpop.f32.mrf.mxu2  ;;  %v7256_v26 = vunpack.c.l.b16 %v7223_v50 }
 0x480   :  { %v13563_v46 = vadd.f32 %v6169_v10, %v5791_v62  ;;  %v5793_v62 = vadd.f32 %v13379_v22, %v13285_v7  ;;  %v13595_v10 = vpop.f32.mrf.mxu1  ;;  %v7179_v7 = vsel %vm11869_vm8, %v10157_v60, %v7178_v29  ;;  %v5794_v22 = vadd.f32 %v13408_v55, %v13308_v48  ;;  %v10738_v48 = vld [vmem:[%s14320_s4 + $0x44] sm:$0xf]  ;;  %v10737_v29 = vld [vmem:[%s14320_s4 + $0x34] sm:$0xf0] }
 0x481   :  { %v13577_v63 = vpack.c.b16 %v7256_v26, %v7255_v0  ;;  %v7245_v8 = vunpack.c.l.b16 %v7179_v7  ;;  %v7118_v0 = vld [vmem:[#allocation3 + $0x40] sm:$0xe]  ;;  %v7119_v26 = vld [vmem:[#allocation3 + $0x48] sm:$0xe]  ;;  %v10256_v33 = vor.u32 %v10738_v48, %v10253_v6  ;;  %v5797_v7 = vadd.f32 %v13488_v51, %v13382_v16  ;;  %v10734_v51 = vld [vmem:[%s14320_s4 + $0x24] sm:$0xf] }
 0x482   :  { %v10159_v1 = vrot.slane %v7118_v0, 9  ;;  %v10160_v9 = vrot.slane %v7119_v26, 9  ;;  %v10735_v16 = vld [vmem:[%s14320_s4 + $0x24] sm:$0xf0] }
 0x483   :  { %v7259_v50 = vpack.c.b16 %v7246_v30, %v7245_v8  ;;  %7558 = vmatpush.bf16.msrb.mxu0 %v10256_v33  ;;  %v5798_v8 = vadd.f32 %v13507_v11, %v13403_v49  ;;  %v10237_v49 = vld [vmem:[%s14320_s4 + $0x28] sm:$0xf0] }
 0x484   :  { %v7187_v39 = vsel %vm11869_vm8, %v10159_v1, %v7186_v61  ;;  %v10240_v11 = vor.u32 %v10734_v51, %v10237_v49  ;;  %v13686_v1 = vpop.f32.mrf.mxu3  ;;  %v10229_v61 = vld [vmem:[%s14320_s4 + $0x18] sm:$0xf0] }
 0x487   :  { %v6171_v32 = vpop.f32.mrf.mxu2 }
 0x488   :  { %v13579_v54 = vadd.f32 %v6171_v32, %v5792_v4  ;;  %v13607_v34 = vpop.f32.mrf.mxu1  ;;  %v10739_v4 = vld [vmem:[%s14320_s4 + $0x44] sm:$0xf0]  ;;  %v5795_v32 = vadd.f32 %v13442_v36, %v13335_v21  ;;  %v5796_v21 = vadd.f32 %v13461_v25, %v13352_v5  ;;  %v7247_v36 = vunpack.c.l.b16 %v7187_v39  ;;  %v13694_v39 = vpop.f32.mrf.mxu0 }
 0x489   :  { %v10252_v55 = vor.u32 %v10739_v4, %v10251_v40  ;;  %v10244_v25 = vor.u32 %v10737_v29, %v10243_v57  ;;  %v10235_v40 = vld [vmem:[%s14320_s4 + $0x20] sm:$0xf]  ;;  %v10221_v57 = vld [vmem:[%s14320_s4 + $0x8] sm:$0xf0] }
 0x48a   :  { %v10236_v4 = vor.u32 %v10735_v16, %v10235_v40 }
 0x48b   :  { %7509 = vmatpush.bf16.msra.mxu3 %v10252_v55 }
 0x48c   :  { %7334 = vmatmul.bf16.gmra.mxu2 %v7258_v20 }
 0x48f   :  { %v6174_v18 = vpop.f32.mrf.mxu2  ;;  %7510 = vmatpush.bf16.msra.mxu3 %v10244_v25 }
 0x490   :  { %v13597_v35 = vadd.f32 %v6174_v18, %v5793_v62  ;;  %v5776_v17 = vpop.f32.mrf.mxu1  ;;  %v7191_v18 = vsel %vm11869_vm8, %v10160_v9, %v7190_v28 }
 0x491   :  { %v7248_v31 = vunpack.c.l.b16 %v7191_v18 }
 0x493   :  { %v7260_v60 = vpack.c.b16 %v7248_v31, %v7247_v36  ;;  %7511 = vmatpush.bf16.msra.mxu3 %v10236_v4  ;;  %v10219_v31 = vld [vmem:[%s14320_s4] sm:$0xf] }
 0x497   :  { %v6176_v58 = vpop.f32.mrf.mxu2 }
 0x498   :  { %v13605_v38 = vadd.f32 %v6176_v58, %v5794_v22  ;;  %v13642_v5 = vpop.f32.mrf.mxu1  ;;  %v10248_v22 = vor.u32 %v10736_v3, %v10245_v59 }
 0x49a   :  { %7559 = vmatpush.bf16.msrb.mxu0 %v10248_v22 }
 0x49c   :  { %7339 = vmatmul.bf16.gmra.mxu2 %v7259_v50 }
 0x49e   :  { %7560 = vmatpush.bf16.msrb.mxu0 %v10240_v11 }
 0x49f   :  { %v6179_v20 = vpop.f32.mrf.mxu2 }
 0x4a0   :  { %v13623_v62 = vadd.f32 %v6179_v20, %v5795_v32  ;;  %v5781_v50 = vpop.f32.mrf.mxu1  ;;  %v10227_v20 = vld [vmem:[%s14320_s4 + $0x10] sm:$0xf] }
 0x4a1   :  { %v5803_v3 = vadd.f32 %v5781_v50, %v13502_v52 }
 0x4a7   :  { %v6181_v53 = vpop.f32.mrf.mxu2 }
 0x4a8   :  { %v13631_v19 = vadd.f32 %v6181_v53, %v5796_v21  ;;  %v13672_v6 = vpop.f32.mrf.mxu1  ;;  %v6443_v21 = vpop.f32.mrf.mxu3 }
 0x4a9   :  { %v6638_v53 = vpop.f32.mrf.mxu0  ;;  %v6483_v11 = vadd.f32 %v6443_v21, %v13563_v46 }
 0x4ac   :  { %7344 = vmatmul.bf16.gmra.mxu2 %v7260_v60 }
 0x4af   :  { %v6184_v30 = vpop.f32.mrf.mxu2 }
 0x4b0   :  { %v13649_v58 = vadd.f32 %v6184_v30, %v5797_v7  ;;  %v5786_v33 = vpop.f32.mrf.mxu1  ;;  %v6445_v22 = vpop.f32.mrf.mxu3 }
 0x4b1   :  { %v6640_v30 = vpop.f32.mrf.mxu0  ;;  %v5805_v16 = vadd.f32 %v5786_v33, %v13536_v14 }
 0x4b7   :  { %v6186_v0 = vpop.f32.mrf.mxu2 }
 0x4b8   :  { %v13653_v26 = vadd.f32 %v6186_v0, %v5798_v8  ;;  %v13696_v18 = vpop.f32.mrf.mxu1  ;;  %v6448_v40 = vpop.f32.mrf.mxu3 }
 0x4b9   :  { %v6485_v33 = vadd.f32 %v6448_v40, %v13597_v35 }
 0x4bc   :  { %7349 = vmatmul.bf16.gmra.mxu2 %v13500_v12  ;;  %v5799_v12 = vadd.f32 %v13595_v10, %v13427_v45  ;;  %v10733_v45 = vld [vmem:[%s14320_s4 + $0x14] sm:$0xf0]  ;;  %v10732_v10 = vld [vmem:[%s14320_s4 + $0x14] sm:$0xf] }
 0x4bd   :  { %v10228_v23 = vor.u32 %v10733_v45, %v10227_v20  ;;  %v10232_v9 = vor.u32 %v10732_v10, %v10229_v61  ;;  %v6484_v20 = vadd.f32 %v6445_v22, %v13579_v54 }
 0x4bf   :  { %v6189_v48 = vpop.f32.mrf.mxu2  ;;  %7512 = vmatpush.bf16.msra.mxu3 %v10228_v23  ;;  %7561 = vmatpush.bf16.msrb.mxu0 %v10232_v9  ;;  %v6678_v23 = vadd.f32 %v6638_v53, %v6483_v11 }
 0x4c0   :  { %v13670_v55 = vadd.f32 %v6189_v48, %v5799_v12  ;;  %v7056_v25 = vpop.f32.mrf.mxu1  ;;  %v6450_v50 = vpop.f32.mrf.mxu3 }
 0x4c1   :  { %v7096_v14 = vadd.f32 %v7056_v25, %v6678_v23 }
 0x4c7   :  { %v13674_v32 = vpop.f32.mrf.mxu2 }
 0x4c8   :  { %v7058_v0 = vpop.f32.mrf.mxu1  ;;  %v6453_v45 = vpop.f32.mrf.mxu3 }
 0x4cc   :  { %7354 = vmatmul.bf16.gmra.mxu2 %v13534_v47  ;;  %v5801_v47 = vadd.f32 %v5776_v17, %v13466_v2  ;;  %v10731_v2 = vld [vmem:[%s14320_s4 + $0x4] sm:$0xf0]  ;;  %v10730_v17 = vld [vmem:[%s14320_s4 + $0x4] sm:$0xf] }
 0x4cd   :  { %v10220_v60 = vor.u32 %v10731_v2, %v10219_v31  ;;  %v10224_v29 = vor.u32 %v10730_v17, %v10221_v57 }
 0x4cf   :  { %v6194_v15 = vpop.f32.mrf.mxu2  ;;  %7513 = vmatpush.bf16.msra.mxu3 %v10220_v60  ;;  %7562 = vmatpush.bf16.msrb.mxu0 %v10224_v29 }
 0x4d0   :  { %v13692_v28 = vadd.f32 %v6194_v15, %v5801_v47  ;;  %v7061_v52 = vpop.f32.mrf.mxu1  ;;  %v6455_v17 = vpop.f32.mrf.mxu3 }
 0x4d7   :  { %v13698_v36 = vpop.f32.mrf.mxu2 }
 0x4d8   :  { %v7063_v48 = vpop.f32.mrf.mxu1 }
 0x4dc   :  { %7359 = vmatmul.bf16.gmra.mxu2 %v13559_v44  ;;  %v6643_v44 = vpop.f32.mrf.mxu0 }
 0x4dd   :  { %v6680_v46 = vadd.f32 %v6643_v44, %v6485_v33 }
 0x4df   :  { %v6199_v59 = vpop.f32.mrf.mxu2  ;;  %v7098_v53 = vadd.f32 %v7061_v52, %v6680_v46  ;;  %v6488_v52 = vadd.f32 %v6455_v17, %v13631_v19 }
 0x4e0   :  { %v13714_v7 = vadd.f32 %v6199_v59, %v5803_v3  ;;  %v7066_v15 = vpop.f32.mrf.mxu1  ;;  %v6486_v3 = vadd.f32 %v6450_v50, %v13605_v38 }
 0x4e4   :  { %v6645_v12 = vpop.f32.mrf.mxu0 }
 0x4e7   :  { %v13716_v8 = vpop.f32.mrf.mxu2 }
 0x4e8   :  { %v7068_v35 = vpop.f32.mrf.mxu1 }
 0x4ec   :  { %7364 = vmatmul.bf16.gmra.mxu2 %v13577_v63  ;;  %v6679_v63 = vadd.f32 %v6640_v30, %v6484_v20  ;;  %v6648_v61 = vpop.f32.mrf.mxu0  ;;  %v6681_v30 = vadd.f32 %v6645_v12, %v6486_v3 }
 0x4ee   :  { %v7097_v9 = vadd.f32 %v7058_v0, %v6679_v63  ;;  %v6458_v0 = vpop.f32.mrf.mxu3 }
 0x4ef   :  { %v6204_v51 = vpop.f32.mrf.mxu2 }
 0x4f0   :  { %v13720_v4 = vadd.f32 %v6204_v51, %v5805_v16  ;;  %v6487_v16 = vadd.f32 %v6453_v45, %v13623_v62  ;;  %v7099_v51 = vadd.f32 %v7063_v48, %v6681_v30  ;;  %v7071_v63 = vpop.f32.mrf.mxu1 }
 0x4f2   :  { %v6682_v23 = vadd.f32 %v6648_v61, %v6487_v16 }
 0x4f4   :  { %v6650_v54 = vpop.f32.mrf.mxu0  ;;  %v7100_v33 = vadd.f32 %v7066_v15, %v6682_v23 }
 0x4f5   :  { %v6683_v62 = vadd.f32 %v6650_v54, %v6488_v52  ;;  %v14347_v52 = vld [vmem:[#allocation9_spill] sm:$0xff] }
 0x4f7   :  { %v13722_v49 = vpop.f32.mrf.mxu2 }
 0x4f8   :  { %v7073_v45 = vpop.f32.mrf.mxu1 }
 0x4fc   :  { %v6653_v11 = vpop.f32.mrf.mxu0 }
 0x4ff   :  { %v7330_v10 = vpop.f32.mrf.mxu2 }
 0x500   :  { %v7370_v47 = vadd.f32 %v7330_v10, %v7096_v14  ;;  %v6460_v14 = vpop.f32.mrf.mxu3 }
 0x501   :  { %v6490_v15 = vadd.f32 %v6460_v14, %v13653_v26 }
 0x502   :  { %v7386_v60 = vmax.f32 %v7370_v47, 0.0 }
 0x507   :  { %v7332_v31 = vpop.f32.mrf.mxu2 }
 0x508   :  { %v7371_v2 = vadd.f32 %v7332_v31, %v7097_v9  ;;  %v6655_v9 = vpop.f32.mrf.mxu0  ;;  %v6463_v61 = vpop.f32.mrf.mxu3 }
 0x509   :  { %v6685_v30 = vadd.f32 %v6655_v9, %v6490_v15  ;;  %v10768_v15 = vld [vmem:[%s14321_s5 + $0x30] sm:$0xff] }
 0x50a   :  { %v7387_v57 = vmax.f32 %v7371_v2, 0.0  ;;  %v6489_v2 = vadd.f32 %v6458_v0, %v13649_v58 }
 0x50c   :  { %v7402_v21 = vpack.c.bf16 %v7387_v57, %v7386_v60  ;;  %v8097_v29 = vadd.f32 %v7387_v57, %v7386_v60  ;;  %v7101_v60 = vadd.f32 %v7068_v35, %v6683_v62 }
 0x50e   :  { %7514 = vmatmul.bf16.vlgmr.msra.gmra.mxu3 %v7402_v21  ;;  %7563 = vmatmul.bf16.vlgmr.msrb.gmra.mxu0 %v7402_v21 }
 0x50f   :  { %v7335_v25 = vpop.f32.mrf.mxu2 }
 0x510   :  { %v7372_v59 = vadd.f32 %v7335_v25, %v7098_v53  ;;  %v6658_v3 = vpop.f32.mrf.mxu0  ;;  %v7076_v25 = vpop.f32.mrf.mxu1 }
 0x511   :  { %v6465_v35 = vpop.f32.mrf.mxu3 }
 0x512   :  { %v7388_v22 = vmax.f32 %v7372_v59, 0.0  ;;  %v5322_v59 = vadd.f32 %v13414_v42, %v13444_v43  ;;  %v6491_v42 = vadd.f32 %v6463_v61, %v13670_v55  ;;  %v14348_v55 = vld [vmem:[#allocation7_spill] sm:$0xff] }
 0x514   :  { %v8098_v40 = vadd.f32 %v8097_v29, %v7388_v22  ;;  %v6684_v29 = vadd.f32 %v6653_v11, %v6489_v2  ;;  %v5606_v0 = vadd.f32 %v13421_v56, %v5322_v59  ;;  %v10769_v56 = vld [vmem:[%s14321_s5 + $0x38] sm:$0xff] }
 0x515   :  { %8206 = vmatpush.bf16.msrb.mxu3 %v10769_v56 }
 0x516   :  { %v7102_v53 = vadd.f32 %v7071_v63, %v6684_v29  ;;  %v5800_v26 = vadd.f32 %v13607_v34, %v5606_v0 }
 0x517   :  { %v7337_v44 = vpop.f32.mrf.mxu2 }
 0x518   :  { %v7373_v20 = vadd.f32 %v7337_v44, %v7099_v51  ;;  %v6660_v16 = vpop.f32.mrf.mxu0  ;;  %v7103_v51 = vadd.f32 %v7073_v45, %v6685_v30 }
 0x519   :  { %v6468_v63 = vpop.f32.mrf.mxu3  ;;  %8207 = vmatpush.bf16.msrb.mxu3 %v10768_v15 }
 0x51a   :  { %v7389_v10 = vmax.f32 %v7373_v20, 0.0  ;;  %v7078_v20 = vpop.f32.mrf.mxu1 }
 0x51c   :  { %v8099_v38 = vadd.f32 %v8098_v40, %v7389_v10  ;;  %v7403_v50 = vpack.c.bf16 %v7389_v10, %v7388_v22  ;;  %v6218_v10 = vadd.f32 %v13674_v32, %v5800_v26  ;;  %v5327_v32 = vadd.f32 %v14347_v52, %v13484_v41 }
 0x51e   :  { %7519 = vmatmul.bf16.gmra.mxu3 %v7403_v50  ;;  %7568 = vmatmul.bf16.gmra.mxu0 %v7403_v50  ;;  %v6492_v50 = vadd.f32 %v6465_v35, %v6218_v10  ;;  %v5608_v9 = vadd.f32 %v14348_v55, %v5327_v32 }
 0x51f   :  { %v7340_v12 = vpop.f32.mrf.mxu2 }
 0x520   :  { %v7374_v47 = vadd.f32 %v7340_v12, %v7100_v33  ;;  %v6663_v14 = vpop.f32.mrf.mxu0  ;;  %v6686_v33 = vadd.f32 %v6658_v3, %v6491_v42  ;;  %v6687_v12 = vadd.f32 %v6660_v16, %v6492_v50  ;;  %v5802_v61 = vadd.f32 %v13642_v5, %v5608_v9 }
 0x521   :  { %v6470_v62 = vpop.f32.mrf.mxu3 }
 0x522   :  { %v7390_v31 = vmax.f32 %v7374_v47, 0.0  ;;  %v7081_v47 = vpop.f32.mrf.mxu1  ;;  %v7105_v2 = vadd.f32 %v7078_v20, %v6687_v12 }
 0x524   :  { %v8100_v48 = vadd.f32 %v8099_v38, %v7390_v31 }
 0x527   :  { %v7342_v57 = vpop.f32.mrf.mxu2 }
 0x528   :  { %v7375_v46 = vadd.f32 %v7342_v57, %v7101_v60 }
 0x52a   :  { %v7391_v21 = vmax.f32 %v7375_v46, 0.0  ;;  %v6665_v46 = vpop.f32.mrf.mxu0 }
 0x52c   :  { %v8101_v19 = vadd.f32 %v8100_v48, %v7391_v21  ;;  %v7404_v17 = vpack.c.bf16 %v7391_v21, %v7390_v31  ;;  %v7104_v31 = vadd.f32 %v7076_v25, %v6686_v33  ;;  %v6493_v48 = vadd.f32 %v6468_v63, %v13692_v28 }
 0x52d   :  { %v6220_v21 = vadd.f32 %v13698_v36, %v5802_v61  ;;  %v5332_v36 = vadd.f32 %v13509_v37, %v13515_v27 }
 0x52e   :  { %7524 = vmatmul.bf16.gmra.mxu3 %v7404_v17  ;;  %7573 = vmatmul.bf16.gmra.mxu0 %v7404_v17  ;;  %v6688_v3 = vadd.f32 %v6663_v14, %v6493_v48 }
 0x52f   :  { %v7345_v54 = vpop.f32.mrf.mxu2  ;;  %v6494_v28 = vadd.f32 %v6470_v62, %v6220_v21  ;;  %v5610_v30 = vadd.f32 %v13513_v13, %v5332_v36 }
 0x530   :  { %v7376_v58 = vadd.f32 %v7345_v54, %v7102_v53  ;;  %v7083_v53 = vpop.f32.mrf.mxu1  ;;  %v7106_v25 = vadd.f32 %v7081_v47, %v6688_v3  ;;  %v6473_v54 = vpop.f32.mrf.mxu3 }
 0x531   :  { %v6689_v35 = vadd.f32 %v6665_v46, %v6494_v28  ;;  %v5804_v26 = vadd.f32 %v13672_v6, %v5610_v30  ;;  %v10765_v28 = vld [vmem:[%s14321_s5 + $0x18] sm:$0xff] }
 0x532   :  { %v7392_v22 = vmax.f32 %v7376_v58, 0.0 }
 0x533   :  { %v7107_v16 = vadd.f32 %v7083_v53, %v6689_v35  ;;  %v6222_v10 = vadd.f32 %v13716_v8, %v5804_v26 }
 0x534   :  { %v8102_v40 = vadd.f32 %v8101_v19, %v7392_v22 }
 0x537   :  { %v7347_v11 = vpop.f32.mrf.mxu2 }
 0x538   :  { %v7377_v44 = vadd.f32 %v7347_v11, %v7103_v51  ;;  %v7086_v51 = vpop.f32.mrf.mxu1  ;;  %v6475_v20 = vpop.f32.mrf.mxu3 }
 0x53a   :  { %v7393_v23 = vmax.f32 %v7377_v44, 0.0 }
 0x53c   :  { %v13738_v43 = vadd.f32 %v8102_v40, %v7393_v23  ;;  %v7405_v38 = vpack.c.bf16 %v7393_v23, %v7392_v22  ;;  %v6668_v22 = vpop.f32.mrf.mxu0  ;;  %v6495_v40 = vadd.f32 %v6473_v54, %v13714_v7  ;;  %v5337_v7 = vadd.f32 %v13686_v1, %v13539_v24 }
 0x53d   :  { %v10833_v1 = vmov 64.0  }
 0x53e   :  { %7529 = vmatmul.bf16.gmra.mxu3 %v7405_v38  ;;  %7578 = vmatmul.bf16.gmra.mxu0 %v7405_v38  ;;  %v6690_v37 = vadd.f32 %v6668_v22, %v6495_v40  ;;  %v6496_v38 = vadd.f32 %v6475_v20, %v6222_v10  ;;  %v5612_v8 = vadd.f32 %v13694_v39, %v5337_v7  ;;  %10781 = vrcp.f32 %v10833_v1  ;;  %v10762_v20 = vld [vmem:[%s14321_s5] sm:$0xff]  ;;  %v10752_v1 = vld [vmem:[%s14322_s6 + $0x30] sm:$0xff] }
 0x53f   :  { %v7350_v34 = vpop.f32.mrf.mxu2 }
 0x540   :  { %v7378_v45 = vadd.f32 %v7350_v34, %v7104_v31  ;;  %v7108_v13 = vadd.f32 %v7086_v51, %v6690_v37  ;;  %v7088_v14 = vpop.f32.mrf.mxu1  ;;  %v6478_v52 = vpop.f32.mrf.mxu3  ;;  %v5806_v9 = vadd.f32 %v13696_v18, %v5612_v8  ;;  %v10767_v18 = vld [vmem:[%s14321_s5 + $0x28] sm:$0xff] }
 0x541   :  { %v6497_v33 = vadd.f32 %v6478_v52, %v13720_v4  ;;  %8208 = vmatpush.bf16.msrb.mxu3 %v10767_v18 }
 0x542   :  { %v7394_v29 = vmax.f32 %v7378_v45, 0.0  ;;  %v6224_v62 = vadd.f32 %v13722_v49, %v5806_v9 }
 0x544   :  { %v6670_v42 = vpop.f32.mrf.mxu0  ;;  %v10782_v49 = vpop.eup %10781 }
 0x545   :  { %v6691_v34 = vadd.f32 %v6670_v42, %v6496_v38  ;;  %v8124_v15 = vmul.f32 64.0, %v10782_v49  ;;  %vm8128_vm12 = vweird.f32 %v10782_v49 }
 0x547   :  { %v7352_v60 = vpop.f32.mrf.mxu2  ;;  %v7109_v12 = vadd.f32 %v7088_v14, %v6691_v34 }
 0x548   :  { %v7379_v57 = vadd.f32 %v7352_v60, %v7105_v2  ;;  %v7091_v45 = vpop.f32.mrf.mxu1  ;;  %v6480_v61 = vpop.f32.mrf.mxu3 }
 0x549   :  { %v6498_v39 = vadd.f32 %v6480_v61, %v6224_v62  ;;  %v10760_v62 = vld [vmem:[%s14322_s6 + $0x70] sm:$0xff] }
 0x54a   :  { %v7395_v41 = vmax.f32 %v7379_v57, 0.0  ;;  %v8104_v57 = vrot.slane %v13738_v43, 4 }
 0x54c   :  { %v7406_v19 = vpack.c.bf16 %v7395_v41, %v7394_v29  ;;  %v8110_v17 = vadd.f32 %v7395_v41, %v7394_v29  ;;  %v6673_v47 = vpop.f32.mrf.mxu0  ;;  %v10766_v29 = vld [vmem:[%s14321_s5 + $0x20] sm:$0xff]  ;;  %v8105_v3 = vadd.f32 %v8104_v57, %v13738_v43  ;;  %v10764_v43 = vld [vmem:[%s14321_s5 + $0x10] sm:$0xff]  ;;  %v10751_v57 = vld [vmem:[%s14322_s6 + $0x28] sm:$0xff] }
 0x54d   :  { %v6692_v24 = vadd.f32 %v6673_v47, %v6497_v33  ;;  %8209 = vmatpush.bf16.msrb.mxu3 %v10766_v29  ;;  %v10761_v33 = vld [vmem:[%s14322_s6 + $0x78] sm:$0xff]  ;;  %v10750_v29 = vld [vmem:[%s14322_s6 + $0x20] sm:$0xff] }
 0x54e   :  { %7534 = vmatmul.bf16.gmra.mxu3 %v7406_v19  ;;  %7583 = vmatmul.bf16.gmra.mxu0 %v7406_v19  ;;  %v8106_v54 = vrot.slane %v8105_v3, 2 }
 0x54f   :  { %v7355_v5 = vpop.f32.mrf.mxu2  ;;  %v7110_v4 = vadd.f32 %v7091_v45, %v6692_v24  ;;  %8048 = vmatpush.bf16.msrb.mxu2 %v10761_v33 }
 0x550   :  { %v7380_v59 = vadd.f32 %v7355_v5, %v7106_v25  ;;  %v7093_v25 = vpop.f32.mrf.mxu1  ;;  %v8107_v35 = vadd.f32 %v8106_v54, %v8105_v3 }
 0x551   :  { %8210 = vmatpush.bf16.msrb.mxu3 %v10765_v28 }
 0x552   :  { %v7396_v58 = vmax.f32 %v7380_v59, 0.0  ;;  %v8125_v59 = vsub.f32 1.0, %v8124_v15  ;;  %v8108_v51 = vrot.slane %v8107_v35, 1 }
 0x553   :  { %8049 = vmatpush.bf16.msrb.mxu2 %v10760_v62  ;;  %v10834_v62 = vmov 128.0  }
 0x554   :  { %v8111_v0 = vadd.f32 %v8110_v17, %v7396_v58  ;;  %v6675_v41 = vpop.f32.mrf.mxu0  ;;  %v8126_v30 = vmul.f32 %v10782_v49, %v8125_v59  ;;  %v8109_v10 = vadd.f32 %v8108_v51, %v8107_v35  ;;  %10783 = vrcp.f32 %v10834_v62 }
 0x555   :  { %v6693_v17 = vadd.f32 %v6675_v41, %v6498_v39  ;;  %8211 = vmatpush.bf16.msrb.mxu3 %v10764_v43 }
 0x556   :  { %v8127_v26 = vadd.f32 %v10782_v49, %v8126_v30 }
 0x557   :  { %v7357_v11 = vpop.f32.mrf.mxu2  ;;  %v7111_v5 = vadd.f32 %v7093_v25, %v6693_v17 }
 0x558   :  { %v7381_v44 = vadd.f32 %v7357_v11, %v7107_v16  ;;  %v10763_v16 = vld [vmem:[%s14321_s5 + $0x8] sm:$0xff]  ;;  %v8129_v37 = vsel %vm8128_vm12, %v10782_v49, %v8127_v26 }
 0x559   :  { %8212 = vmatpush.bf16.msrb.mxu3 %v10763_v16  ;;  %v8130_v42 = vmul.f32 %v8129_v37, %v8109_v10 }
 0x55a   :  { %v7397_v23 = vmax.f32 %v7381_v44, 0.0 }
 0x55c   :  { %v7407_v27 = vpack.c.bf16 %v7397_v23, %v7396_v58  ;;  %v8112_v63 = vadd.f32 %v8111_v0, %v7397_v23 }
 0x55d   :  { %8213 = vmatpush.bf16.msrb.mxu3 %v10762_v20 }
 0x55e   :  { %7539 = vmatmul.bf16.gmra.mxu3 %v7407_v27  ;;  %7588 = vmatmul.bf16.gmra.mxu0 %v7407_v27 }
 0x55f   :  { %v7360_v56 = vpop.f32.mrf.mxu2 }
 0x560   :  { %v7382_v50 = vadd.f32 %v7360_v56, %v7108_v13  ;;  %v8132_v56 = vpack.c.bf16 %v8130_v42, %v8130_v42 }
 0x562   :  { %v7398_v6 = vmax.f32 %v7382_v50, 0.0  ;;  %v8152_v14 = vunpack.c.l.b16 %v8132_v56 }
 0x564   :  { %v8113_v32 = vadd.f32 %v8112_v63, %v7398_v6 }
 0x567   :  { %v7362_v55 = vpop.f32.mrf.mxu2 }
 0x568   :  { %v7383_v31 = vadd.f32 %v7362_v55, %v7109_v12  ;;  %v10753_v55 = vld [vmem:[%s14322_s6 + $0x38] sm:$0xff] }
 0x569   :  { %7999 = vmatpush.bf16.msrb.mxu1 %v10753_v55 }
 0x56a   :  { %v7399_v48 = vmax.f32 %v7383_v31, 0.0 }
 0x56c   :  { %v7408_v2 = vpack.c.bf16 %v7399_v48, %v7398_v6  ;;  %v8114_v60 = vadd.f32 %v8113_v32, %v7399_v48 }
 0x56d   :  { %8000 = vmatpush.bf16.msrb.mxu1 %v10752_v1 }
 0x56e   :  { %7544 = vmatmul.bf16.gmra.mxu3 %v7408_v2  ;;  %7593 = vmatmul.bf16.gmra.mxu0 %v7408_v2 }
 0x56f   :  { %v7365_v46 = vpop.f32.mrf.mxu2 }
 0x570   :  { %v7384_v21 = vadd.f32 %v7365_v46, %v7110_v4  ;;  %v10758_v46 = vld [vmem:[%s14322_s6 + $0x60] sm:$0xff] }
 0x571   :  { %8001 = vmatpush.bf16.msrb.mxu1 %v10751_v57 }
 0x572   :  { %v7400_v19 = vmax.f32 %v7384_v21, 0.0 }
 0x574   :  { %v8115_v53 = vadd.f32 %v8114_v60, %v7400_v19  ;;  %v10759_v60 = vld [vmem:[%s14322_s6 + $0x68] sm:$0xff] }
 0x575   :  { %8050 = vmatpush.bf16.msrb.mxu2 %v10759_v60  ;;  %8002 = vmatpush.bf16.msrb.mxu1 %v10750_v29 }
 0x577   :  { %v7367_v36 = vpop.f32.mrf.mxu2 }
 0x578   :  { %v7385_v58 = vadd.f32 %v7367_v36, %v7111_v5 }
 0x579   :  { %8051 = vmatpush.bf16.msrb.mxu2 %v10758_v46 }
 0x57a   :  { %v7401_v22 = vmax.f32 %v7385_v58, 0.0 }
 0x57c   :  { %v7409_v0 = vpack.c.bf16 %v7401_v22, %v7400_v19  ;;  %v8116_v40 = vadd.f32 %v8115_v53, %v7401_v22  ;;  %v10757_v19 = vld [vmem:[%s14322_s6 + $0x58] sm:$0xff] }
 0x57d   :  { %8052 = vmatpush.bf16.msrb.mxu2 %v10757_v19  ;;  %v10749_v53 = vld [vmem:[%s14322_s6 + $0x18] sm:$0xff] }
 0x57e   :  { %v8117_v11 = vrot.slane %v8116_v40, 4  ;;  %7549 = vmatmul.bf16.gmra.mxu3 %v7409_v0  ;;  %7598 = vmatmul.bf16.gmra.mxu0 %v7409_v0 }
 0x57f   :  { %8003 = vmatpush.bf16.msrb.mxu1 %v10749_v53 }
 0x580   :  { %v8118_v44 = vadd.f32 %v8117_v11, %v8116_v40 }
 0x582   :  { %v8119_v23 = vrot.slane %v8118_v44, 2 }
 0x584   :  { %v8120_v27 = vadd.f32 %v8119_v23, %v8118_v44 }
 0x586   :  { %v8121_v63 = vrot.slane %v8120_v27, 1 }
 0x588   :  { %v8122_v38 = vadd.f32 %v8121_v63, %v8120_v27 }
 0x58a   :  { %v8131_v13 = vmul.f32 %v8129_v37, %v8122_v38 }
 0x58b   :  { %v13784_v7 = vpop.f32.mrf.mxu0 }
 0x58c   :  { %v8133_v50 = vpack.c.bf16 %v8131_v13, %v8131_v13  ;;  %v7647_v5 = vmul.f32 %v13784_v7, %v13784_v7 }
 0x58e   :  { %v8153_v6 = vunpack.c.l.b16 %v8133_v50 }
 0x590   :  { %v8155_v34 = vsel %vm8154_vm13, %v8153_v6, %v8152_v14 }
 0x591   :  { %v13786_v52 = vpop.f32.mrf.mxu3  ;;  %v8156_v8 = vpack.c.b16 %v8155_v34, %v8155_v34 }
 0x592   :  { %v7646_v14 = vmul.f32 %v13786_v52, %v13786_v52 }
 0x593   :  { %v13788_v32 = vpop.f32.mrf.mxu0  ;;  %8214 = vmatmul.bf16.vlgmr.msrb.gmra.mxu3 %v8156_v8 }
 0x594   :  { %v7649_v54 = vmul.f32 %v13788_v32, %v13788_v32  ;;  %v7625_v36 = vadd.f32 %v13788_v32, %v13784_v7 }
 0x596   :  { %v7699_v43 = vadd.f32 %v7649_v54, %v7647_v5 }
 0x599   :  { %v13793_v12 = vpop.f32.mrf.mxu3 }
 0x59a   :  { %v7648_v42 = vmul.f32 %v13793_v12, %v13793_v12  ;;  %v7604_v6 = vadd.f32 %v13793_v12, %v13786_v52 }
 0x59b   :  { %v13795_v47 = vpop.f32.mrf.mxu0 }
 0x59c   :  { %v7651_v59 = vmul.f32 %v13795_v47, %v13795_v47  ;;  %v7626_v35 = vadd.f32 %v7625_v36, %v13795_v47  ;;  %v7678_v1 = vadd.f32 %v7648_v42, %v7646_v14 }
 0x59e   :  { %v7700_v0 = vadd.f32 %v7699_v43, %v7651_v59 }
 0x5a1   :  { %v13800_v9 = vpop.f32.mrf.mxu3 }
 0x5a2   :  { %v7650_v34 = vmul.f32 %v13800_v9, %v13800_v9  ;;  %v7605_v60 = vadd.f32 %v7604_v6, %v13800_v9 }
 0x5a3   :  { %v13802_v31 = vpop.f32.mrf.mxu0 }
 0x5a4   :  { %v7653_v22 = vmul.f32 %v13802_v31, %v13802_v31  ;;  %v7627_v40 = vadd.f32 %v7626_v35, %v13802_v31  ;;  %v7679_v53 = vadd.f32 %v7678_v1, %v7650_v34 }
 0x5a6   :  { %v7701_v51 = vadd.f32 %v7700_v0, %v7653_v22 }
 0x5a9   :  { %v13807_v48 = vpop.f32.mrf.mxu3 }
 0x5aa   :  { %v7652_v57 = vmul.f32 %v13807_v48, %v13807_v48  ;;  %v7606_v54 = vadd.f32 %v7605_v60, %v13807_v48 }
 0x5ab   :  { %v13809_v24 = vpop.f32.mrf.mxu0 }
 0x5ac   :  { %v7655_v16 = vmul.f32 %v13809_v24, %v13809_v24  ;;  %v7628_v11 = vadd.f32 %v7627_v40, %v13809_v24  ;;  %v7680_v35 = vadd.f32 %v7679_v53, %v7652_v57 }
 0x5ae   :  { %v7702_v44 = vadd.f32 %v7701_v51, %v7655_v16  ;;  %v13922_v16 = vpop.eup %10783 }
 0x5af   :  { %v7721_v14 = vmul.f32 128.0, %v13922_v16  ;;  %vm7725_vm14 = vweird.f32 %v13922_v16 }
 0x5b1   :  { %v13814_v45 = vpop.f32.mrf.mxu3  ;;  %v7722_v53 = vsub.f32 1.0, %v7721_v14 }
 0x5b2   :  { %v7654_v5 = vmul.f32 %v13814_v45, %v13814_v45  ;;  %v7607_v22 = vadd.f32 %v7606_v54, %v13814_v45 }
 0x5b3   :  { %v13816_v2 = vpop.f32.mrf.mxu0 }
 0x5b4   :  { %v7657_v26 = vmul.f32 %v13816_v2, %v13816_v2  ;;  %v7629_v20 = vadd.f32 %v7628_v11, %v13816_v2 }
 0x5b6   :  { %v7703_v23 = vadd.f32 %v7702_v44, %v7657_v26 }
 0x5b9   :  { %v13821_v61 = vpop.f32.mrf.mxu3 }
 0x5ba   :  { %v7656_v0 = vmul.f32 %v13821_v61, %v13821_v61 }
 0x5bb   :  { %v13823_v39 = vpop.f32.mrf.mxu0 }
 0x5bc   :  { %v7659_v10 = vmul.f32 %v13823_v39, %v13823_v39  ;;  %v7630_v37 = vadd.f32 %v7629_v20, %v13823_v39  ;;  %v7681_v20 = vadd.f32 %v7680_v35, %v7654_v5 }
 0x5be   :  { %v7704_v13 = vadd.f32 %v7703_v23, %v7659_v10  ;;  %v7608_v10 = vadd.f32 %v7607_v22, %v13821_v61 }
 0x5c1   :  { %v13828_v4 = vpop.f32.mrf.mxu3 }
 0x5c2   :  { %v7658_v23 = vmul.f32 %v13828_v4, %v13828_v4 }
 0x5c3   :  { %v13830_v18 = vpop.f32.mrf.mxu0 }
 0x5c4   :  { %v7661_v27 = vmul.f32 %v13830_v18, %v13830_v18  ;;  %v7631_v56 = vadd.f32 %v7630_v37, %v13830_v18 }
 0x5c6   :  { %v7705_v8 = vadd.f32 %v7704_v13, %v7661_v27  ;;  %v7682_v13 = vadd.f32 %v7681_v20, %v7656_v0 }
 0x5c9   :  { %v13835_v49 = vpop.f32.mrf.mxu3 }
 0x5cb   :  { %v13837_v21 = vpop.f32.mrf.mxu0 }
 0x5cc   :  { %v7663_v50 = vmul.f32 %v13837_v21, %v13837_v21  ;;  %v7632_v33 = vadd.f32 %v7631_v56, %v13837_v21  ;;  %v7609_v56 = vadd.f32 %v7608_v10, %v13828_v4  ;;  %v7723_v10 = vmul.f32 %v13922_v16, %v7722_v53 }
 0x5ce   :  { %v7706_v46 = vadd.f32 %v7705_v8, %v7663_v50  ;;  %v7660_v50 = vmul.f32 %v13835_v49, %v13835_v49 }
 0x5d1   :  { %v13842_v41 = vpop.f32.mrf.mxu3 }
 0x5d2   :  { %v7662_v62 = vmul.f32 %v13842_v41, %v13842_v41 }
 0x5d3   :  { %v13844_v3 = vpop.f32.mrf.mxu0 }
 0x5d4   :  { %v7665_v55 = vmul.f32 %v13844_v3, %v13844_v3  ;;  %v7633_v29 = vadd.f32 %v7632_v33, %v13844_v3  ;;  %v7683_v33 = vadd.f32 %v7682_v13, %v7658_v23 }
 0x5d6   :  { %v7707_v36 = vadd.f32 %v7706_v46, %v7665_v55  ;;  %v7610_v55 = vadd.f32 %v7609_v56, %v13835_v49  ;;  %v7684_v57 = vadd.f32 %v7683_v33, %v7660_v50 }
 0x5d8   :  { %v7611_v46 = vadd.f32 %v7610_v55, %v13842_v41 }
 0x5d9   :  { %v13849_v17 = vpop.f32.mrf.mxu3 }
 0x5db   :  { %v13851_v15 = vpop.f32.mrf.mxu0 }
 0x5dc   :  { %v7667_v19 = vmul.f32 %v13851_v15, %v13851_v15  ;;  %v7634_v59 = vadd.f32 %v7633_v29, %v13851_v15  ;;  %v7664_v29 = vmul.f32 %v13849_v17, %v13849_v17 }
 0x5de   :  { %v7708_v51 = vadd.f32 %v7707_v36, %v7667_v19 }
 0x5e1   :  { %v13856_v28 = vpop.f32.mrf.mxu3 }
 0x5e2   :  { %v7666_v35 = vmul.f32 %v13856_v28, %v13856_v28 }
 0x5e3   :  { %v13858_v25 = vpop.f32.mrf.mxu0 }
 0x5e4   :  { %v7669_v43 = vmul.f32 %v13858_v25, %v13858_v25  ;;  %v7635_v11 = vadd.f32 %v7634_v59, %v13858_v25  ;;  %v7685_v59 = vadd.f32 %v7684_v57, %v7662_v62 }
 0x5e6   :  { %v7709_v37 = vadd.f32 %v7708_v51, %v7669_v43  ;;  %v7612_v43 = vadd.f32 %v7611_v46, %v13849_v17 }
 0x5e9   :  { %v13868_v58 = vpop.f32.mrf.mxu3 }
 0x5ea   :  { %v7668_v20 = vmul.f32 %v13868_v58, %v13868_v58 }
 0x5eb   :  { %v13873_v30 = vpop.f32.mrf.mxu0 }
 0x5ec   :  { %v7671_v26 = vmul.f32 %v13873_v30, %v13873_v30  ;;  %v7636_v27 = vadd.f32 %v7635_v11, %v13873_v30  ;;  %v7686_v11 = vadd.f32 %v7685_v59, %v7664_v29  ;;  %v10756_v59 = vld [vmem:[%s14322_s6 + $0x50] sm:$0xff] }
 0x5ed   :  { %8053 = vmatpush.bf16.msrb.mxu2 %v10756_v59 }
 0x5ee   :  { %v7710_v6 = vadd.f32 %v7709_v37, %v7671_v26  ;;  %v7613_v26 = vadd.f32 %v7612_v43, %v13856_v28 }
 0x5f1   :  { %v13887_v63 = vpop.f32.mrf.mxu3 }
 0x5f2   :  { %v7670_v13 = vmul.f32 %v13887_v63, %v13887_v63 }
 0x5f3   :  { %v13891_v38 = vpop.f32.mrf.mxu0 }
 0x5f4   :  { %v7673_v42 = vmul.f32 %v13891_v38, %v13891_v38  ;;  %v7637_v34 = vadd.f32 %v7636_v27, %v13891_v38  ;;  %v7687_v27 = vadd.f32 %v7686_v11, %v7666_v35 }
 0x5f6   :  { %v7711_v1 = vadd.f32 %v7710_v6, %v7673_v42  ;;  %v7614_v42 = vadd.f32 %v7613_v26, %v13868_v58  ;;  %v7688_v14 = vadd.f32 %v7687_v27, %v7668_v20 }
 0x5f8   :  { %v7615_v6 = vadd.f32 %v7614_v42, %v13887_v63  ;;  %v7689_v62 = vadd.f32 %v7688_v14, %v7670_v13 }
 0x5f9   :  { %v13927_v44 = vpop.f32.mrf.mxu3 }
 0x5fb   :  { %v13920_v40 = vpop.f32.mrf.mxu0 }
 0x5fc   :  { %v7675_v8 = vmul.f32 %v13920_v40, %v13920_v40  ;;  %v7638_v60 = vadd.f32 %v7637_v34, %v13920_v40  ;;  %v7672_v34 = vmul.f32 %v13927_v44, %v13927_v44 }
 0x5fe   :  { %v7712_v54 = vadd.f32 %v7711_v1, %v7675_v8  ;;  %v7724_v8 = vadd.f32 %v13922_v16, %v7723_v10  ;;  %v7616_v1 = vadd.f32 %v7615_v6, %v13927_v44  ;;  %v7690_v29 = vadd.f32 %v7689_v62, %v7672_v34  ;;  %v10755_v62 = vld [vmem:[%s14322_s6 + $0x48] sm:$0xff] }
 0x5ff   :  { %8054 = vmatpush.bf16.msrb.mxu2 %v10755_v62 }
 0x601   :  { %v13957_v22 = vpop.f32.mrf.mxu3 }
 0x602   :  { %v7617_v53 = vadd.f32 %v7616_v1, %v13957_v22 }
 0x603   :  { %v13949_v19 = vpop.f32.mrf.mxu0 }
 0x604   :  { %v7639_v5 = vadd.f32 %v7638_v60, %v13949_v19  ;;  %v7677_v36 = vmul.f32 %v13949_v19, %v13949_v19  ;;  %v7674_v60 = vmul.f32 %v13957_v22, %v13957_v22 }
 0x606   :  { %v7640_v0 = vrot.slane %v7639_v5, 4  ;;  %v7713_v51 = vadd.f32 %v7712_v54, %v7677_v36  ;;  %v13976_v54 = vsel %vm7725_vm14, %v13922_v16, %v7724_v8  ;;  %v7691_v35 = vadd.f32 %v7690_v29, %v7674_v60 }
 0x608   :  { %v7641_v23 = vadd.f32 %v7640_v0, %v7639_v5  ;;  %v7714_v37 = vrot.slane %v7713_v51, 4 }
 0x609   :  { %v13981_v43 = vpop.f32.mrf.mxu3 }
 0x60a   :  { %v7642_v56 = vrot.slane %v7641_v23, 2  ;;  %v7715_v50 = vadd.f32 %v7714_v37, %v7713_v51  ;;  %v7618_v0 = vadd.f32 %v7617_v53, %v13981_v43  ;;  %v7676_v51 = vmul.f32 %v13981_v43, %v13981_v43 }
 0x60c   :  { %v7643_v33 = vadd.f32 %v7642_v56, %v7641_v23  ;;  %v7716_v55 = vrot.slane %v7715_v50, 2  ;;  %v7619_v16 = vrot.slane %v7618_v0, 4  ;;  %v7692_v20 = vadd.f32 %v7691_v35, %v7676_v51 }
 0x60e   :  { %v7644_v57 = vrot.slane %v7643_v33, 1  ;;  %v7717_v46 = vadd.f32 %v7716_v55, %v7715_v50  ;;  %v7620_v37 = vadd.f32 %v7619_v16, %v7618_v0  ;;  %v7693_v27 = vrot.slane %v7692_v20, 4  ;;  %v10748_v55 = vld [vmem:[%s14322_s6 + $0x10] sm:$0xff] }
 0x60f   :  { %8004 = vmatpush.bf16.msrb.mxu1 %v10748_v55 }
 0x610   :  { %v7645_v5 = vadd.f32 %v7644_v57, %v7643_v33  ;;  %v7718_v36 = vrot.slane %v7717_v46, 1  ;;  %v7621_v13 = vrot.slane %v7620_v37, 2  ;;  %v7694_v56 = vadd.f32 %v7693_v27, %v7692_v20 }
 0x612   :  { %v7719_v11 = vadd.f32 %v7718_v36, %v7717_v46  ;;  %v13987_v26 = vmul.f32 %v13976_v54, %v7645_v5  ;;  %v7622_v14 = vadd.f32 %v7621_v13, %v7620_v37  ;;  %v7695_v6 = vrot.slane %v7694_v56, 2 }
 0x613   :  { %v10835_v5 = vmov 2.0  }
 0x614   :  { %v7730_v10 = vmul.f32 %v13976_v54, %v7719_v11  ;;  %v7732_v23 = vmul.f32 %v13987_v26, %v13987_v26  ;;  %v7623_v8 = vrot.slane %v7622_v14, 1  ;;  %v7696_v33 = vadd.f32 %v7695_v6, %v7694_v56 }
 0x616   :  { %v7734_v42 = vsub.f32 %v7730_v10, %v7732_v23  ;;  %v13998_v1 = vpop.f32.mrf.mxu3  ;;  %v7624_v46 = vadd.f32 %v7623_v8, %v7622_v14  ;;  %v7697_v29 = vrot.slane %v7696_v33, 1 }
 0x617   :  { %v8220_v60 = vsel %vm8219_vm15, %v13998_v1, 0.0  ;;  %v8227_v57 = vmul.f32 %v13998_v1, %v13998_v1 }
 0x618   :  { %v7736_v50 = vmax.f32 %v7734_v42, 0.0  ;;  %v8221_v53 = vrot.slane %v8220_v60, 4  ;;  %v7698_v59 = vadd.f32 %v7697_v29, %v7696_v33  ;;  %v14004_v35 = vmul.f32 %v13976_v54, %v7624_v46 }
 0x619   :  { %v8228_v36 = vsel %vm8219_vm15, %v8227_v57, 0.0 }
 0x61a   :  { %v7770_v34 = vadd.f32 1e-05, %v7736_v50  ;;  %v8222_v0 = vadd.f32 %v8221_v53, %v8220_v60  ;;  %v8229_v51 = vrot.slane %v8228_v36, 4  ;;  %v7729_v11 = vmul.f32 %v13976_v54, %v7698_v59 }
 0x61b   :  { %v7731_v16 = vmul.f32 %v14004_v35, %v14004_v35 }
 0x61c   :  { %10785 = vrsqrt.f32 %v7770_v34  ;;  %v8223_v20 = vrot.slane %v8222_v0, 2  ;;  %v8230_v23 = vadd.f32 %v8229_v51, %v8228_v36  ;;  %vm7787_vm2 = vweird.f32 %v7770_v34 }
 0x61d   :  { %10787 = vrcp.f32 %v10835_v5  ;;  %v7733_v42 = vsub.f32 %v7729_v11, %v7731_v16 }
 0x61e   :  { %v8224_v13 = vadd.f32 %v8223_v20, %v8222_v0  ;;  %v8217_v56 = vpop.f32.mrf.mxu3  ;;  %v8231_v50 = vrot.slane %v8230_v23, 2 }
 0x61f   :  { %v7735_v8 = vmax.f32 %v7733_v42, 0.0  ;;  %v7738_v42 = vsub.f32 %v13784_v7, %v13987_v26  ;;  %v10746_v56 = vld [vmem:[%s14322_s6] sm:$0xff] }
 0x620   :  { %v8225_v33 = vrot.slane %v8224_v13, 1  ;;  %v8232_v55 = vadd.f32 %v8231_v50, %v8230_v23  ;;  %v10747_v23 = vld [vmem:[%s14322_s6 + $0x8] sm:$0xff] }
 0x621   :  { %v7769_v57 = vadd.f32 1e-05, %v7735_v8  ;;  %8005 = vmatpush.bf16.msrb.mxu1 %v10747_v23  ;;  %v7742_v23 = vsub.f32 %v13795_v47, %v13987_v26 }
 0x622   :  { %v10786_v10 = vpop.eup %10785  ;;  %v8233_v46 = vrot.slane %v8232_v55, 1  ;;  %v8226_v5 = vadd.f32 %v8225_v33, %v8224_v13 }
 0x623   :  { %v10788_v37 = vpop.eup %10787  ;;  %v7782_v27 = vmul.f32 %v10786_v10, %v7770_v34  ;;  %vm7788_vm0 = vweird.f32 %v10786_v10  ;;  %10789 = vrsqrt.f32 %v7769_v57  ;;  %v7740_v34 = vsub.f32 %v13788_v32, %v13987_v26  ;;  %v10772_v32 = vld [vmem:[%s14323_s7 + $0x10] sm:$0xff] }
 0x624   :  { %v8236_v14 = vmul.f32 2.0, %v10788_v37  ;;  %vm8240_vm1 = vweird.f32 %v10788_v37  ;;  %v8234_v36 = vadd.f32 %v8233_v46, %v8232_v55  ;;  %vm7789_vm3 = vmor %vm7787_vm2, %vm7788_vm0  ;;  %vm7777_vm5 = vweird.f32 %v7769_v57 }
 0x625   :  { %v7783_v6 = vmul.f32 %v10786_v10, %v7782_v27  ;;  %v10754_v27 = vld [vmem:[%s14322_s6 + $0x40] sm:$0xff]  ;;  %8006 = vmatpush.bf16.msrb.mxu1 %v10746_v56 }
 0x626   :  { %v8237_v62 = vsub.f32 1.0, %v8236_v14  ;;  %8055 = vmatpush.bf16.msrb.mxu2 %v10754_v27 }
 0x627   :  { %v7784_v60 = vmul.f32 0.5, %v7783_v6 }
 0x628   :  { %v8238_v29 = vmul.f32 %v10788_v37, %v8237_v62 }
 0x629   :  { %v7785_v53 = vsub.f32 1.5, %v7784_v60 }
 0x62a   :  { %v8239_v59 = vadd.f32 %v10788_v37, %v8238_v29  ;;  %v10771_v29 = vld [vmem:[%s14323_s7 + $0x8] sm:$0xff] }
 0x62b   :  { %v7786_v0 = vmul.f32 %v10786_v10, %v7785_v53 }
 0x62c   :  { %v8241_v51 = vsel %vm8240_vm1, %v10788_v37, %v8239_v59  ;;  %v10790_v37 = vpop.eup %10789  ;;  %v10770_v59 = vld [vmem:[%s14323_s7] sm:$0xff] }
 0x62d   :  { %v14009_v11 = vsel %vm7789_vm3, %v10786_v10, %v7786_v0  ;;  %v14011_v16 = vmul.f32 %v8241_v51, %v8226_v5  ;;  %v8243_v20 = vmul.f32 %v8241_v51, %v8234_v36  ;;  %v10773_v10 = vld [vmem:[%s14323_s7 + $0x18] sm:$0xff]  ;;  %v7772_v7 = vmul.f32 %v10790_v37, %v7769_v57  ;;  %s10836_s7 = smov [#allocation4]  }
 0x62e   :  { %v7792_v50 = vmul.f32 %v14009_v11, %v7738_v42  ;;  %v7794_v14 = vmul.f32 %v14009_v11, %v7740_v34  ;;  %8302 = vmatpush.bf16.msra.mxu3 %v10773_v10  ;;  %vm7778_vm4 = vweird.f32 %v10790_v37  ;;  %v7737_v0 = vsub.f32 %v13786_v52, %v14004_v35  ;;  %s8507_s20 = sshll.u32 %s10836_s7, 4  ;;  %s8508_s20 = int_to_ptr.vmem [resolvable:$true] %s8507_s20 }
 0x62f   :  { %v8244_v13 = vmul.f32 %v14011_v16, %v14011_v16  ;;  %v7773_v33 = vmul.f32 %v10790_v37, %v7772_v7  ;;  %vm7779_vm6 = vmor %vm7777_vm5, %vm7778_vm4  ;;  %v7739_v51 = vsub.f32 %v13793_v12, %v14004_v35  ;;  %v7744_v57 = vsub.f32 %v13802_v31, %v13987_v26 }
 0x630   :  { %v7824_v8 = vmax.f32 %v7792_v50, 0.0  ;;  %v7826_v55 = vmax.f32 %v7794_v14, 0.0  ;;  %v7796_v34 = vmul.f32 %v14009_v11, %v7742_v23 }
 0x631   :  { %v8245_v6 = vsub.f32 %v8243_v20, %v8244_v13  ;;  %v7774_v60 = vmul.f32 0.5, %v7773_v33  ;;  %v7798_v52 = vmul.f32 %v14009_v11, %v7744_v57 }
 0x632   :  { %v7856_v46 = vpack.c.bf16 %v7826_v55, %v7824_v8  ;;  %8303 = vmatpush.bf16.msra.mxu3 %v10772_v32  ;;  %v7828_v7 = vmax.f32 %v7796_v34, 0.0  ;;  %v7743_v8 = vsub.f32 %v13807_v48, %v14004_v35  ;;  %v8247_v55 = vsub.f32 %v13998_v1, %v14011_v16 }
 0x633   :  { %v8246_v62 = vmax.f32 %v8245_v6, 0.0  ;;  %v7775_v5 = vsub.f32 1.5, %v7774_v60  ;;  %v7830_v47 = vmax.f32 %v7798_v52, 0.0  ;;  %v7741_v6 = vsub.f32 %v13800_v9, %v14004_v35 }
 0x634   :  { %8056 = vmatmul.bf16.vlgmr.msrb.gmra.mxu2 %v7856_v46  ;;  %v7748_v9 = vsub.f32 %v13816_v2, %v13987_v26  ;;  %v7747_v2 = vsub.f32 %v13821_v61, %v14004_v35  ;;  %v7750_v34 = vsub.f32 %v13823_v39, %v13987_v26  ;;  %v7752_v52 = vsub.f32 %v13830_v18, %v13987_v26 }
 0x635   :  { %v8248_v53 = vadd.f32 1e-05, %v8246_v62  ;;  %v7776_v36 = vmul.f32 %v10790_v37, %v7775_v5  ;;  %v7858_v32 = vpack.c.bf16 %v7830_v47, %v7828_v7  ;;  %v7746_v5 = vsub.f32 %v13809_v24, %v13987_v26 }
 0x636   :  { %8304 = vmatpush.bf16.msra.mxu3 %v10771_v29  ;;  %v7802_v1 = vmul.f32 %v14009_v11, %v7748_v9  ;;  %v7745_v24 = vsub.f32 %v13814_v45, %v14004_v35  ;;  %v7806_v45 = vmul.f32 %v14009_v11, %v7752_v52  ;;  %v7749_v7 = vsub.f32 %v13828_v4, %v14004_v35 }
 0x637   :  { %10791 = vrsqrt.f32 %v8248_v53  ;;  %v14046_v20 = vsel %vm7779_vm6, %v10790_v37, %v7776_v36  ;;  %vm8255_vm8 = vweird.f32 %v8248_v53  ;;  %v7751_v39 = vsub.f32 %v13835_v49, %v14004_v35 }
 0x638   :  { %v7791_v27 = vmul.f32 %v14046_v20, %v7737_v0  ;;  %v7793_v42 = vmul.f32 %v14046_v20, %v7739_v51  ;;  %v7795_v62 = vmul.f32 %v14046_v20, %v7741_v6  ;;  %v7797_v60 = vmul.f32 %v14046_v20, %v7743_v8 }
 0x639   :  { %v7834_v23 = vmax.f32 %v7802_v1, 0.0  ;;  %v7838_v61 = vmax.f32 %v7806_v45, 0.0  ;;  %v7803_v18 = vmul.f32 %v14046_v20, %v7749_v7  ;;  %v7805_v47 = vmul.f32 %v14046_v20, %v7751_v39 }
 0x63a   :  { %8305 = vmatpush.bf16.msra.mxu3 %v10770_v59  ;;  %v7823_v13 = vmax.f32 %v7791_v27, 0.0  ;;  %v7825_v12 = vmax.f32 %v7793_v42, 0.0  ;;  %v7827_v36 = vmax.f32 %v7795_v62, 0.0  ;;  %v7800_v59 = vmul.f32 %v14009_v11, %v7746_v5 }
 0x63b   :  { %v7799_v27 = vmul.f32 %v14046_v20, %v7745_v24  ;;  %v7801_v42 = vmul.f32 %v14046_v20, %v7747_v2  ;;  %v7837_v6 = vmax.f32 %v7805_v47, 0.0  ;;  %v7760_v5 = vsub.f32 %v13858_v25, %v13987_v26 }
 0x63c   :  { %v7855_v56 = vpack.c.bf16 %v7825_v12, %v7823_v13  ;;  %v7832_v51 = vmax.f32 %v7800_v59, 0.0  ;;  %v7804_v12 = vmul.f32 %v14009_v11, %v7750_v34  ;;  %v7761_v52 = vsub.f32 %v13887_v63, %v14004_v35 }
 0x63d   :  { %v10792_v10 = vpop.eup %10791  ;;  %v7833_v13 = vmax.f32 %v7801_v42, 0.0  ;;  %v7767_v39 = vsub.f32 %v13981_v43, %v14004_v35 }
 0x63e   :  { %v8250_v37 = vmul.f32 %v10792_v10, %v8248_v53  ;;  %8007 = vmatmul.bf16.vlgmr.msrb.gmra.mxu1 %v7855_v56  ;;  %vm8256_vm7 = vweird.f32 %v10792_v10  ;;  %v7829_v53 = vmax.f32 %v7797_v60, 0.0  ;;  %v7860_v57 = vpack.c.bf16 %v7834_v23, %v7832_v51 }
 0x63f   :  { %vm8257_vm9 = vmor %vm8255_vm8, %vm8256_vm7  ;;  %v7836_v56 = vmax.f32 %v7804_v12, 0.0  ;;  %v7753_v60 = vsub.f32 %v13842_v41, %v14004_v35  ;;  %v7814_v41 = vmul.f32 %v14009_v11, %v7760_v5  ;;  %v7762_v51 = vsub.f32 %v13873_v30, %v13987_v26 }
 0x640   :  { %v8251_v50 = vmul.f32 %v10792_v10, %v8250_v37  ;;  %v7857_v0 = vpack.c.bf16 %v7829_v53, %v7827_v36  ;;  %v7764_v23 = vsub.f32 %v13891_v38, %v13987_v26  ;;  %v7763_v30 = vsub.f32 %v13927_v44, %v14004_v35 }
 0x641   :  { %v7816_v2 = vmul.f32 %v14009_v11, %v7762_v51  ;;  %v7815_v38 = vmul.f32 %v14046_v20, %v7761_v52  ;;  %v7766_v12 = vsub.f32 %v13920_v40, %v13987_v26  ;;  %v7821_v40 = vmul.f32 %v14046_v20, %v7767_v39 }
 0x642   :  { %v8252_v14 = vmul.f32 0.5, %v8251_v50  ;;  %v7862_v50 = vpack.c.bf16 %v7838_v61, %v7836_v56 }
 0x643   :  { %v7848_v42 = vmax.f32 %v7816_v2, 0.0  ;;  %v7847_v45 = vmax.f32 %v7815_v38, 0.0  ;;  %v7820_v63 = vmul.f32 %v14009_v11, %v7766_v12  ;;  %v7853_v47 = vmax.f32 %v7821_v40, 0.0 }
 0x644   :  { %v8253_v31 = vsub.f32 1.5, %v8252_v14  ;;  %8061 = vmatmul.bf16.gmra.mxu2 %v7858_v32  ;;  %v7754_v14 = vsub.f32 %v13837_v21, %v13987_v26  ;;  %v7835_v32 = vmax.f32 %v7803_v18, 0.0  ;;  %v7755_v21 = vsub.f32 %v13849_v17, %v14004_v35 }
 0x645   :  { %v7846_v17 = vmax.f32 %v7814_v41, 0.0  ;;  %v7852_v44 = vmax.f32 %v7820_v63, 0.0 }
 0x646   :  { %v8254_v33 = vmul.f32 %v10792_v10, %v8253_v31  ;;  %v7756_v31 = vsub.f32 %v13844_v3, %v13987_v26  ;;  %v7808_v8 = vmul.f32 %v14009_v11, %v7754_v14  ;;  %v7807_v3 = vmul.f32 %v14046_v20, %v7753_v60 }
 0x648   :  { %v8258_v46 = vsel %vm8257_vm9, %v10792_v10, %v8254_v33  ;;  %v7831_v10 = vmax.f32 %v7799_v27, 0.0  ;;  %v7810_v4 = vmul.f32 %v14009_v11, %v7756_v31  ;;  %v7861_v33 = vpack.c.bf16 %v7837_v6, %v7835_v32 }
 0x649   :  { %v8259_v29 = vmul.f32 %v8258_v46, %v8247_v55  ;;  %v7840_v55 = vmax.f32 %v7808_v8, 0.0  ;;  %v7809_v46 = vmul.f32 %v14046_v20, %v7755_v21  ;;  %v7839_v9 = vmax.f32 %v7807_v3, 0.0 }
 0x64a   :  { %v7859_v37 = vpack.c.bf16 %v7833_v13, %v7831_v10  ;;  %v7842_v49 = vmax.f32 %v7810_v4, 0.0  ;;  %v7817_v10 = vmul.f32 %v14046_v20, %v7763_v30  ;;  %v7768_v13 = vsub.f32 %v13949_v19, %v13987_v26 }
 0x64b   :  { %v8260_v48 = vmax.f32 %v8259_v29, 0.0  ;;  %v7758_v29 = vsub.f32 %v13851_v15, %v13987_v26  ;;  %v7759_v15 = vsub.f32 %v13868_v58, %v14004_v35  ;;  %v7765_v19 = vsub.f32 %v13957_v22, %v14004_v35 }
 0x64c   :  { %v7864_v62 = vpack.c.bf16 %v7842_v49, %v7840_v55  ;;  %v7822_v56 = vmul.f32 %v14009_v11, %v7768_v13 }
 0x64d   :  { %v8261_v16 = vpack.c.bf16 %v8260_v48, %v8260_v48  ;;  %v7841_v48 = vmax.f32 %v7809_v46, 0.0  ;;  %v7812_v36 = vmul.f32 %v14009_v11, %v7758_v29  ;;  %v7819_v26 = vmul.f32 %v14046_v20, %v7765_v19 }
 0x64e   :  { %8012 = vmatmul.bf16.gmra.mxu1 %v7857_v0  ;;  %v7813_v0 = vmul.f32 %v14046_v20, %v7759_v15 }
 0x64f   :  { %10393 = vmatmul.msk.bf16.vlgmr.msra.gmra.mxu3 %vm8294_vm10, %v8261_v16  ;;  %v7863_v53 = vpack.c.bf16 %v7841_v48, %v7839_v9  ;;  %v7844_v59 = vmax.f32 %v7812_v36, 0.0  ;;  %v7757_v16 = vsub.f32 %v13856_v28, %v14004_v35  ;;  %v7818_v28 = vmul.f32 %v14009_v11, %v7764_v23 }
 0x650   :  { %v7845_v24 = vmax.f32 %v7813_v0, 0.0  ;;  %v7851_v18 = vmax.f32 %v7819_v26, 0.0 }
 0x651   :  { %v7866_v1 = vpack.c.bf16 %v7846_v17, %v7844_v59  ;;  %v7811_v25 = vmul.f32 %v14046_v20, %v7757_v16  ;;  %v7850_v58 = vmax.f32 %v7818_v28, 0.0 }
 0x652   :  { %v7869_v14 = vpack.c.bf16 %v7853_v47, %v7851_v18 }
 0x653   :  { %v7868_v34 = vpack.c.bf16 %v7850_v58, %v7848_v42 }
 0x654   :  { %8066 = vmatmul.bf16.gmra.mxu2 %v7860_v57  ;;  %v7843_v57 = vmax.f32 %v7811_v25, 0.0 }
 0x656   :  { %v7865_v27 = vpack.c.bf16 %v7845_v24, %v7843_v57 }
 0x65e   :  { %8017 = vmatmul.bf16.gmra.mxu1 %v7859_v37  ;;  %v7849_v37 = vmax.f32 %v7817_v10, 0.0 }
 0x660   :  { %v7867_v61 = vpack.c.bf16 %v7849_v37, %v7847_v45 }
 0x664   :  { %8071 = vmatmul.bf16.gmra.mxu2 %v7862_v50  ;;  %v7854_v50 = vmax.f32 %v7822_v56, 0.0 }
 0x666   :  { %v7870_v7 = vpack.c.bf16 %v7854_v50, %v7852_v44 }
 0x66e   :  { %8022 = vmatmul.bf16.gmra.mxu1 %v7861_v33 }
 0x674   :  { %8076 = vmatmul.bf16.gmra.mxu2 %v7864_v62 }
 0x67e   :  { %8027 = vmatmul.bf16.gmra.mxu1 %v7863_v53 }
 0x684   :  { %8081 = vmatmul.bf16.gmra.mxu2 %v7866_v1 }
 0x68e   :  { %8032 = vmatmul.bf16.gmra.mxu1 %v7865_v27 }
 0x694   :  { %8086 = vmatmul.bf16.gmra.mxu2 %v7868_v34 }
 0x69e   :  { %8037 = vmatmul.bf16.gmra.mxu1 %v7867_v61 }
 0x6a4   :  { %8091 = vmatmul.bf16.gmra.mxu2 %v7870_v7 }
 0x6ae   :  { %8042 = vmatmul.bf16.gmra.mxu1 %v7869_v14 }
 0x6b7   :  { %v8057_v11 = vpop.f32.mrf.mxu2 }
 0x6bb   :  { %v8008_v31 = vpop.f32.mrf.mxu1 }
 0x6bc   :  { %v8058_v32 = vadd.f32 %v8057_v11, %v8008_v31 }
 0x6bf   :  { %v8059_v6 = vpop.f32.mrf.mxu2 }
 0x6c3   :  { %v8010_v8 = vpop.f32.mrf.mxu1 }
 0x6c4   :  { %v8060_v4 = vadd.f32 %v8059_v6, %v8010_v8 }
 0x6c7   :  { %v8062_v33 = vpop.f32.mrf.mxu2 }
 0x6cb   :  { %v8013_v43 = vpop.f32.mrf.mxu1 }
 0x6cc   :  { %v8063_v55 = vadd.f32 %v8062_v33, %v8013_v43 }
 0x6cf   :  { %v8064_v49 = vpop.f32.mrf.mxu2 }
 0x6d2   :  { %v8307_v22 = vpop.f32.mrf.mxu3 }
 0x6d3   :  { %v8313_v35 = vperm.slane %v8307_v22, 0  ;;  %v8015_v21 = vpop.f32.mrf.mxu1  ;;  %v8312_v13 = vrot.slane %v8307_v22, 1 }
 0x6d4   :  { %v8065_v3 = vadd.f32 %v8064_v49, %v8015_v21 }
 0x6d5   :  { %v14137_v62 = vadd.f32 %v8313_v35, %v8058_v32  ;;  %v14139_v60 = vadd.f32 %v8313_v35, %v8060_v4  ;;  %v14141_v20 = vadd.f32 %v8313_v35, %v8063_v55  ;;  %v14171_v18 = vperm.slane %v8312_v13, 0 }
 0x6d6   :  { %v14143_v46 = vadd.f32 %v8313_v35, %v8065_v3 }
 0x6d7   :  { %v8067_v29 = vpop.f32.mrf.mxu2  ;;  %v8370_v28 = vmul.f32 %v14137_v62, %v14137_v62  ;;  %v8371_v27 = vmul.f32 %v14139_v60, %v14139_v60  ;;  %v8333_v58 = vsel %vm8294_vm10, %v14137_v62, 0.0  ;;  %v8334_v34 = vsel %vm8294_vm10, %v14139_v60, 0.0 }
 0x6d8   :  { %v8335_v12 = vadd.f32 %v8334_v34, %v8333_v58  ;;  %v8372_v45 = vmul.f32 %v14141_v20, %v14141_v20  ;;  %v8373_v56 = vmul.f32 %v14143_v46, %v14143_v46  ;;  %v8336_v7 = vsel %vm8294_vm10, %v14141_v20, 0.0 }
 0x6d9   :  { %v8386_v38 = vsel %vm8294_vm10, %v8370_v28, 0.0  ;;  %v8387_v10 = vsel %vm8294_vm10, %v8371_v27, 0.0  ;;  %v8338_v39 = vsel %vm8294_vm10, %v14143_v46, 0.0 }
 0x6da   :  { %v8309_v5 = vpop.f32.mrf.mxu3  ;;  %v8388_v50 = vadd.f32 %v8387_v10, %v8386_v38  ;;  %v8337_v47 = vadd.f32 %v8336_v7, %v8335_v12  ;;  %v8389_v14 = vsel %vm8294_vm10, %v8372_v45, 0.0  ;;  %v8391_v31 = vsel %vm8294_vm10, %v8373_v56, 0.0 }
 0x6db   :  { %v8018_v9 = vpop.f32.mrf.mxu1 }
 0x6dc   :  { %v8068_v48 = vadd.f32 %v8067_v29, %v8018_v9  ;;  %v8339_v4 = vadd.f32 %v8338_v39, %v8337_v47  ;;  %v8390_v33 = vadd.f32 %v8389_v14, %v8388_v50 }
 0x6de   :  { %v14145_v36 = vadd.f32 %v8313_v35, %v8068_v48  ;;  %v8392_v3 = vadd.f32 %v8391_v31, %v8390_v33 }
 0x6df   :  { %v8069_v41 = vpop.f32.mrf.mxu2 }
 0x6e0   :  { %v8374_v19 = vmul.f32 %v14145_v36, %v14145_v36  ;;  %v8340_v32 = vsel %vm8294_vm10, %v14145_v36, 0.0 }
 0x6e1   :  { %v8341_v29 = vadd.f32 %v8340_v32, %v8339_v4 }
 0x6e2   :  { %v8393_v55 = vsel %vm8294_vm10, %v8374_v19, 0.0 }
 0x6e3   :  { %v8020_v53 = vpop.f32.mrf.mxu1 }
 0x6e4   :  { %v8070_v52 = vadd.f32 %v8069_v41, %v8020_v53 }
 0x6e6   :  { %v14161_v63 = vadd.f32 %v8313_v35, %v8070_v52 }
 0x6e7   :  { %v8072_v59 = vpop.f32.mrf.mxu2 }
 0x6e8   :  { %v8375_v6 = vmul.f32 %v14161_v63, %v14161_v63  ;;  %v8342_v49 = vsel %vm8294_vm10, %v14161_v63, 0.0 }
 0x6ea   :  { %v8395_v9 = vsel %vm8294_vm10, %v8375_v6, 0.0 }
 0x6eb   :  { %v8023_v17 = vpop.f32.mrf.mxu1 }
 0x6ec   :  { %v8073_v30 = vadd.f32 %v8072_v59, %v8023_v17  ;;  %v8394_v59 = vadd.f32 %v8393_v55, %v8392_v3  ;;  %v8343_v17 = vadd.f32 %v8342_v49, %v8341_v29 }
 0x6ee   :  { %v14163_v44 = vadd.f32 %v8313_v35, %v8073_v30 }
 0x6ef   :  { %v8074_v1 = vpop.f32.mrf.mxu2 }
 0x6f0   :  { %v8376_v43 = vmul.f32 %v14163_v44, %v14163_v44  ;;  %v8344_v48 = vsel %vm8294_vm10, %v14163_v44, 0.0 }
 0x6f3   :  { %v8025_v16 = vpop.f32.mrf.mxu1 }
 0x6f4   :  { %v8075_v61 = vadd.f32 %v8074_v1, %v8025_v16  ;;  %v8397_v1 = vsel %vm8294_vm10, %v8376_v43, 0.0 }
 0x6f6   :  { %v14179_v8 = vadd.f32 %v8313_v35, %v8075_v61 }
 0x6f7   :  { %v8077_v15 = vpop.f32.mrf.mxu2 }
 0x6f8   :  { %v8377_v41 = vmul.f32 %v14179_v8, %v14179_v8  ;;  %v8346_v16 = vsel %vm8294_vm10, %v14179_v8, 0.0 }
 0x6fb   :  { %v8028_v25 = vpop.f32.mrf.mxu1 }
 0x6fc   :  { %v8078_v40 = vadd.f32 %v8077_v15, %v8028_v25 }
 0x6fe   :  { %v14187_v22 = vadd.f32 %v14171_v18, %v8078_v40 }
 0x6ff   :  { %v8079_v0 = vpop.f32.mrf.mxu2 }
 0x700   :  { %v8378_v15 = vmul.f32 %v14187_v22, %v14187_v22  ;;  %v8348_v28 = vsel %vm8294_vm10, %v14187_v22, 0.0 }
 0x702   :  { %v8401_v30 = vsel %vm8294_vm10, %v8378_v15, 0.0 }
 0x703   :  { %v8030_v51 = vpop.f32.mrf.mxu1 }
 0x704   :  { %v8080_v11 = vadd.f32 %v8079_v0, %v8030_v51  ;;  %v8396_v51 = vadd.f32 %v8395_v9, %v8394_v59 }
 0x706   :  { %v14190_v5 = vadd.f32 %v14171_v18, %v8080_v11  ;;  %v8398_v34 = vadd.f32 %v8397_v1, %v8396_v51 }
 0x707   :  { %v8082_v23 = vpop.f32.mrf.mxu2 }
 0x70b   :  { %v8033_v57 = vpop.f32.mrf.mxu1 }
 0x70c   :  { %v8083_v21 = vadd.f32 %v8082_v23, %v8033_v57  ;;  %v8345_v23 = vadd.f32 %v8344_v48, %v8343_v17  ;;  %v8379_v57 = vmul.f32 %v14190_v5, %v14190_v5 }
 0x70e   :  { %v14203_v25 = vadd.f32 %v14171_v18, %v8083_v21  ;;  %v8347_v52 = vadd.f32 %v8346_v16, %v8345_v23  ;;  %v8403_v45 = vsel %vm8294_vm10, %v8379_v57, 0.0 }
 0x70f   :  { %v8084_v24 = vpop.f32.mrf.mxu2 }
 0x710   :  { %v8380_v38 = vmul.f32 %v14203_v25, %v14203_v25  ;;  %v8349_v12 = vadd.f32 %v8348_v28, %v8347_v52  ;;  %v8352_v56 = vsel %vm8294_vm10, %v14203_v25, 0.0 }
 0x712   :  { %v8405_v40 = vsel %vm8294_vm10, %v8380_v38, 0.0 }
 0x713   :  { %v8035_v2 = vpop.f32.mrf.mxu1 }
 0x714   :  { %v8085_v53 = vadd.f32 %v8084_v24, %v8035_v2  ;;  %v8399_v2 = vsel %vm8294_vm10, %v8377_v41, 0.0 }
 0x715   :  { %v8400_v13 = vadd.f32 %v8399_v2, %v8398_v34 }
 0x716   :  { %v14211_v27 = vadd.f32 %v14171_v18, %v8085_v53 }
 0x717   :  { %v8087_v42 = vpop.f32.mrf.mxu2  ;;  %v8402_v39 = vadd.f32 %v8401_v30, %v8400_v13 }
 0x718   :  { %v8381_v61 = vmul.f32 %v14211_v27, %v14211_v27 }
 0x719   :  { %v8404_v11 = vadd.f32 %v8403_v45, %v8402_v39 }
 0x71a   :  { %v8407_v32 = vsel %vm8294_vm10, %v8381_v61, 0.0 }
 0x71b   :  { %v8038_v37 = vpop.f32.mrf.mxu1  ;;  %v8406_v33 = vadd.f32 %v8405_v40, %v8404_v11 }
 0x71c   :  { %v8088_v0 = vadd.f32 %v8087_v42, %v8038_v37  ;;  %v8350_v42 = vsel %vm8294_vm10, %v14190_v5, 0.0 }
 0x71d   :  { %v8351_v19 = vadd.f32 %v8350_v42, %v8349_v12  ;;  %v8408_v29 = vadd.f32 %v8407_v32, %v8406_v33 }
 0x71e   :  { %v14219_v10 = vadd.f32 %v14171_v18, %v8088_v0 }
 0x71f   :  { %v8089_v26 = vpop.f32.mrf.mxu2  ;;  %v8353_v31 = vadd.f32 %v8352_v56, %v8351_v19 }
 0x720   :  { %v8382_v47 = vmul.f32 %v14219_v10, %v14219_v10  ;;  %v8356_v6 = vsel %vm8294_vm10, %v14219_v10, 0.0 }
 0x722   :  { %v8409_v49 = vsel %vm8294_vm10, %v8382_v47, 0.0 }
 0x723   :  { %v8040_v35 = vpop.f32.mrf.mxu1  ;;  %v8410_v59 = vadd.f32 %v8409_v49, %v8408_v29 }
 0x724   :  { %v8090_v58 = vadd.f32 %v8089_v26, %v8040_v35  ;;  %v8354_v26 = vsel %vm8294_vm10, %v14211_v27, 0.0 }
 0x725   :  { %v8355_v43 = vadd.f32 %v8354_v26, %v8353_v31 }
 0x726   :  { %v14227_v50 = vadd.f32 %v14171_v18, %v8090_v58 }
 0x727   :  { %v8092_v24 = vpop.f32.mrf.mxu2  ;;  %v8357_v35 = vadd.f32 %v8356_v6, %v8355_v43 }
 0x728   :  { %v8383_v4 = vmul.f32 %v14227_v50, %v14227_v50  ;;  %v8358_v21 = vsel %vm8294_vm10, %v14227_v50, 0.0 }
 0x729   :  { %v8359_v17 = vadd.f32 %v8358_v21, %v8357_v35 }
 0x72a   :  { %v8411_v48 = vsel %vm8294_vm10, %v8383_v4, 0.0 }
 0x72b   :  { %v8043_v37 = vpop.f32.mrf.mxu1  ;;  %v8412_v15 = vadd.f32 %v8411_v48, %v8410_v59 }
 0x72c   :  { %v8093_v7 = vadd.f32 %v8092_v24, %v8043_v37 }
 0x72e   :  { %v14235_v14 = vadd.f32 %v14171_v18, %v8093_v7 }
 0x72f   :  { %v8094_v55 = vpop.f32.mrf.mxu2 }
 0x730   :  { %v8384_v3 = vmul.f32 %v14235_v14, %v14235_v14  ;;  %v8360_v41 = vsel %vm8294_vm10, %v14235_v14, 0.0 }
 0x731   :  { %v8361_v0 = vadd.f32 %v8360_v41, %v8359_v17 }
 0x732   :  { %v8413_v1 = vsel %vm8294_vm10, %v8384_v3, 0.0 }
 0x733   :  { %v8045_v9 = vpop.f32.mrf.mxu1  ;;  %v8414_v57 = vadd.f32 %v8413_v1, %v8412_v15 }
 0x734   :  { %v8095_v53 = vadd.f32 %v8094_v55, %v8045_v9 }
 0x736   :  { %v14252_v16 = vadd.f32 %v14171_v18, %v8095_v53 }
 0x738   :  { %v8362_v51 = vsel %vm8294_vm10, %v14252_v16, 0.0  ;;  %v8385_v23 = vmul.f32 %v14252_v16, %v14252_v16 }
 0x739   :  { %v8363_v24 = vadd.f32 %v8362_v51, %v8361_v0 }
 0x73a   :  { %v8415_v2 = vsel %vm8294_vm10, %v8385_v23, 0.0 }
 0x73b   :  { %v8364_v28 = vrot.slane %v8363_v24, 4  ;;  %v8416_v58 = vadd.f32 %v8415_v2, %v8414_v57 }
 0x73d   :  { %v8365_v34 = vadd.f32 %v8364_v28, %v8363_v24  ;;  %v8417_v52 = vrot.slane %v8416_v58, 4 }
 0x73f   :  { %v8366_v30 = vrot.slane %v8365_v34, 2  ;;  %v8418_v42 = vadd.f32 %v8417_v52, %v8416_v58 }
 0x741   :  { %v8367_v18 = vadd.f32 %v8366_v30, %v8365_v34  ;;  %v8419_v38 = vrot.slane %v8418_v42, 2 }
 0x743   :  { %v8368_v13 = vrot.slane %v8367_v18, 1  ;;  %v8420_v12 = vadd.f32 %v8419_v38, %v8418_v42 }
 0x745   :  { %v8369_v45 = vadd.f32 %v8368_v13, %v8367_v18  ;;  %v8421_v37 = vrot.slane %v8420_v12, 1 }
 0x747   :  { %v8422_v56 = vadd.f32 %v8421_v37, %v8420_v12  ;;  %v14260_v61 = vmul.f32 %v8369_v45, %v13976_v54 }
 0x749   :  { %v8424_v7 = vmul.f32 %v8422_v56, %v13976_v54  ;;  %v8425_v39 = vmul.f32 %v14260_v61, %v14260_v61  ;;  %v8435_v40 = vsub.f32 %v14179_v8, %v14260_v61  ;;  %v8436_v26 = vsub.f32 %v14187_v22, %v14260_v61 }
 0x74a   :  { %v8428_v43 = vsub.f32 %v14137_v62, %v14260_v61  ;;  %v8429_v8 = vsub.f32 %v14139_v60, %v14260_v61  ;;  %v8430_v22 = vsub.f32 %v14141_v20, %v14260_v61  ;;  %v8431_v55 = vsub.f32 %v14143_v46, %v14260_v61 }
 0x74b   :  { %v8426_v19 = vsub.f32 %v8424_v7, %v8425_v39  ;;  %v8432_v21 = vsub.f32 %v14145_v36, %v14260_v61  ;;  %v8433_v62 = vsub.f32 %v14161_v63, %v14260_v61  ;;  %v8434_v60 = vsub.f32 %v14163_v44, %v14260_v61 }
 0x74c   :  { %v8437_v36 = vsub.f32 %v14190_v5, %v14260_v61  ;;  %v8438_v0 = vsub.f32 %v14203_v25, %v14260_v61  ;;  %v8439_v44 = vsub.f32 %v14211_v27, %v14260_v61  ;;  %v8440_v57 = vsub.f32 %v14219_v10, %v14260_v61 }
 0x74d   :  { %v8427_v47 = vmax.f32 %v8426_v19, 0.0  ;;  %v8441_v5 = vsub.f32 %v14227_v50, %v14260_v61  ;;  %v8442_v27 = vsub.f32 %v14235_v14, %v14260_v61  ;;  %v8443_v10 = vsub.f32 %v14252_v16, %v14260_v61 }
 0x74f   :  { %v8444_v11 = vadd.f32 1e-05, %v8427_v47 }
 0x751   :  { %10793 = vrsqrt.f32 %v8444_v11  ;;  %vm8451_vm12 = vweird.f32 %v8444_v11 }
 0x757   :  { %v10794_v31 = vpop.eup %10793 }
 0x758   :  { %v8446_v32 = vmul.f32 %v10794_v31, %v8444_v11  ;;  %vm8452_vm11 = vweird.f32 %v10794_v31 }
 0x759   :  { %vm8453_vm13 = vmor %vm8451_vm12, %vm8452_vm11 }
 0x75a   :  { %v8447_v6 = vmul.f32 %v10794_v31, %v8446_v32 }
 0x75c   :  { %v8448_v4 = vmul.f32 0.5, %v8447_v6 }
 0x75e   :  { %v8449_v33 = vsub.f32 1.5, %v8448_v4 }
 0x760   :  { %v8450_v54 = vmul.f32 %v10794_v31, %v8449_v33 }
 0x762   :  { %v8454_v49 = vsel %vm8453_vm13, %v10794_v31, %v8450_v54 }
 0x763   :  { %v8455_v3 = vmul.f32 %v8454_v49, %v8428_v43  ;;  %v8456_v29 = vmul.f32 %v8454_v49, %v8429_v8  ;;  %v8457_v35 = vmul.f32 %v8454_v49, %v8430_v22  ;;  %v8458_v9 = vmul.f32 %v8454_v49, %v8431_v55 }
 0x764   :  { %v8462_v48 = vmul.f32 %v8454_v49, %v8435_v40  ;;  %v8459_v20 = vmul.f32 %v8454_v49, %v8432_v21  ;;  %v8463_v41 = vmul.f32 %v8454_v49, %v8436_v26  ;;  %v8460_v53 = vmul.f32 %v8454_v49, %v8433_v62 }
 0x765   :  { %v8461_v59 = vmul.f32 %v8454_v49, %v8434_v60  ;;  %v8471_v46 = vmax.f32 %v8455_v3, 0.0  ;;  %v8472_v17 = vmax.f32 %v8456_v29, 0.0  ;;  %v8473_v1 = vmax.f32 %v8457_v35, 0.0 }
 0x766   :  { %v8474_v15 = vmax.f32 %v8458_v9, 0.0  ;;  %v8475_v63 = vmax.f32 %v8459_v20, 0.0  ;;  %v8464_v51 = vmul.f32 %v8454_v49, %v8437_v36  ;;  %v8476_v23 = vmax.f32 %v8460_v53, 0.0 }
 0x767   :  { %8487 = vst.msk [vmem:[#allocation4] sm:$0xff] %vm8294_vm10, %v8471_v46  ;;  %v8465_v24 = vmul.f32 %v8454_v49, %v8438_v0  ;;  %v8477_v2 = vmax.f32 %v8461_v59, 0.0  ;;  %v8466_v25 = vmul.f32 %v8454_v49, %v8439_v44  ;;  %v8478_v28 = vmax.f32 %v8462_v48, 0.0 }
 0x768   :  { %8488 = vst.msk [vmem:[#allocation4 + $0x8] sm:$0xff] %vm8294_vm10, %v8472_v17  ;;  %v8467_v58 = vmul.f32 %v8454_v49, %v8440_v57  ;;  %v8479_v34 = vmax.f32 %v8463_v41, 0.0  ;;  %v8468_v52 = vmul.f32 %v8454_v49, %v8441_v5  ;;  %v8480_v30 = vmax.f32 %v8464_v51, 0.0 }
 0x769   :  { %8489 = vst.msk [vmem:[#allocation4 + $0x10] sm:$0xff] %vm8294_vm10, %v8473_v1  ;;  %v8469_v42 = vmul.f32 %v8454_v49, %v8442_v27  ;;  %v8481_v50 = vmax.f32 %v8465_v24, 0.0  ;;  %v8470_v18 = vmul.f32 %v8454_v49, %v8443_v10  ;;  %v8482_v38 = vmax.f32 %v8466_v25, 0.0 }
 0x76a   :  { %8490 = vst.msk [vmem:[#allocation4 + $0x18] sm:$0xff] %vm8294_vm10, %v8474_v15  ;;  %v8483_v14 = vmax.f32 %v8467_v58, 0.0  ;;  %v8484_v13 = vmax.f32 %v8468_v52, 0.0 }
 0x76b   :  { %8491 = vst.msk [vmem:[#allocation4 + $0x20] sm:$0xff] %vm8294_vm10, %v8475_v63  ;;  %v8485_v16 = vmax.f32 %v8469_v42, 0.0  ;;  %v8486_v12 = vmax.f32 %v8470_v18, 0.0 }
 0x76c   :  { %8492 = vst.msk [vmem:[#allocation4 + $0x28] sm:$0xff] %vm8294_vm10, %v8476_v23 }
 0x76d   :  { %8493 = vst.msk [vmem:[#allocation4 + $0x30] sm:$0xff] %vm8294_vm10, %v8477_v2 }
 0x76e   :  { %8494 = vst.msk [vmem:[#allocation4 + $0x38] sm:$0xff] %vm8294_vm10, %v8478_v28 }
 0x76f   :  { %8495 = vst.msk [vmem:[#allocation4 + $0x40] sm:$0xff] %vm8294_vm10, %v8479_v34 }
 0x770   :  { %8496 = vst.msk [vmem:[#allocation4 + $0x48] sm:$0xff] %vm8294_vm10, %v8480_v30 }
 0x771   :  { %8497 = vst.msk [vmem:[#allocation4 + $0x50] sm:$0xff] %vm8294_vm10, %v8481_v50 }
 0x772   :  { %8498 = vst.msk [vmem:[#allocation4 + $0x58] sm:$0xff] %vm8294_vm10, %v8482_v38 }
 0x773   :  { %8499 = vst.msk [vmem:[#allocation4 + $0x60] sm:$0xff] %vm8294_vm10, %v8483_v14 }
 0x774   :  { %8500 = vst.msk [vmem:[#allocation4 + $0x68] sm:$0xff] %vm8294_vm10, %v8484_v13 }
 0x775   :  { %8501 = vst.msk [vmem:[#allocation4 + $0x70] sm:$0xff] %vm8294_vm10, %v8485_v16 }
 0x776   :  { %8502 = vst.msk [vmem:[#allocation4 + $0x78] sm:$0xff] %vm8294_vm10, %v8486_v12 }
 0x777   :  { %8515 = dma.vmem_to_hbm [thread:$0]  %s8508_s20, 2048, %s8510_s22, [#allocation5], %s10837_s0, %s10837_s0, %s10838_s23  }
 0x778   :  { %10830 = dma.done.wait [#allocation5], 2048  }
 0x779   :  { %10831 = vsyncadd [#allocation5], 4294965248 }
 0x77a   :  { %8520 = vsyncpa [#allocation5], 1 }

</bundles_post_ra>
